<compile_context>
chip_gen: v7x
topology: tpu7x:2x2x1
jax: 0.10.0
libtpu: 0.0.40
codegen_flags: <defaults>
</compile_context>

<pallas_src>
import math

import jax
import jax.numpy as jnp
from jax import lax
from jax.experimental import pallas as pl
from jax.experimental.pallas import tpu as pltpu

BEGIN_TOKEN = 500.0
INPUT_DIM = 3
MODEL_DIM = 128
NUM_HEADS = 4
HEAD_DIM = MODEL_DIM // NUM_HEADS
NUM_ENC_LAYERS = 4
NUM_DEC_LAYERS = 6          # nn.Transformer default
FFN_DIM = 2048              # nn.Transformer default dim_feedforward
OUTPUT_DIM = 1
LN_EPS = 1e-5
D = MODEL_DIM


# --------------------------------------------------------------------------- in-kernel helpers
def _layer_norm(x, g, b):
    # f32 LayerNorm (biased variance, eps=1e-5)
    mu = jnp.mean(x, axis=-1, keepdims=True)
    var = jnp.mean(jnp.square(x - mu), axis=-1, keepdims=True)
    return (x - mu) * lax.rsqrt(var + LN_EPS) * g + b


def _softmax_rows(s):
    # Row softmax in f32; divide goes to the EUP via approx reciprocal.
    s = s - jnp.max(s, axis=-1, keepdims=True)
    p = jnp.exp(s)
    return p * pl.reciprocal(jnp.sum(p, axis=-1, keepdims=True), approx=True)


def _mm(x_f32, w_bf16, b_f32):
    # bf16 MXU matmul with f32 accumulation; bias add in f32.
    return jnp.dot(x_f32.astype(jnp.bfloat16), w_bf16,
                   preferred_element_type=jnp.float32) + b_f32


# --------------------------------------------------------------------------- encoder stack
def _make_encoder_call(batch, seq):
    bs = batch * seq
    scale = 1.0 / math.sqrt(HEAD_DIM)

    def kernel(src_ref, esw_ref, esb_ref,
               wqkv_ref, bqkv_ref, wo_ref, bo_ref,
               ln1g_ref, ln1b_ref,
               w1_ref, b1_ref, w2_ref, b2_ref,
               ln2g_ref, ln2b_ref,
               fng_ref, fnb_ref,
               mem_ref,
               x_sc, attn_sc):
        l = pl.program_id(0)

        @pl.when(l == 0)
        def _():
            # embeddingSrc folded into the first layer step: (BS, 3) @ (3, D) + b
            x_sc[...] = (jnp.dot(src_ref[...], esw_ref[...],
                                 preferred_element_type=jnp.float32) + esb_ref[...])

        x = x_sc[...]                                                 # (BS, D) f32 resident

        # ---- self-attention (fused QKV projection; batched einsum over batch per head) ----
        qkv = _mm(x, wqkv_ref[...], bqkv_ref[...])                    # (BS, 3D) f32
        qkv3 = qkv.reshape(batch, seq, 3 * D)
        for h in range(NUM_HEADS):
            cq = slice(h * HEAD_DIM, (h + 1) * HEAD_DIM)
            ck = slice(D + h * HEAD_DIM, D + (h + 1) * HEAD_DIM)
            cv = slice(2 * D + h * HEAD_DIM, 2 * D + (h + 1) * HEAD_DIM)
            qh = qkv3[:, :, cq] * scale                               # (B, S, hd)
            kh = qkv3[:, :, ck]
            vh = qkv3[:, :, cv]
            s = jnp.einsum('bqd,bkd->bqk', qh, kh,
                           preferred_element_type=jnp.float32)        # (B, S, S)
            p = _softmax_rows(s)
            oh = jnp.einsum('bqk,bkd->bqd', p, vh,
                            preferred_element_type=jnp.float32)       # (B, S, hd)
            attn_sc[:, cq] = oh.reshape(bs, HEAD_DIM)
        sa = _mm(attn_sc[...], wo_ref[...], bo_ref[...])
        x = _layer_norm(x + sa, ln1g_ref[...], ln1b_ref[...])

        # ---- FFN ----
        h1 = jnp.maximum(_mm(x, w1_ref[...], b1_ref[...]), 0.0)
        f = _mm(h1, w2_ref[...], b2_ref[...])
        x = _layer_norm(x + f, ln2g_ref[...], ln2b_ref[...])

        x_sc[...] = x

        @pl.when(l == pl.num_programs(0) - 1)
        def _():
            # final encoder norm folded into the last grid step; single HBM writeback
            mem_ref[...] = _layer_norm(x, fng_ref[...], fnb_ref[...])

    def full(shape):
        return pl.BlockSpec(shape, lambda l: (0,) * len(shape))

    def per_layer(shape):
        return pl.BlockSpec((None,) + shape, lambda l: (l,) + (0,) * len(shape))

    return pl.pallas_call(
        kernel,
        out_shape=jax.ShapeDtypeStruct((bs, D), jnp.float32),
        grid=(NUM_ENC_LAYERS,),
        in_specs=[
            full((bs, INPUT_DIM)), full((INPUT_DIM, D)), full((1, D)),
            per_layer((D, 3 * D)), per_layer((1, 3 * D)),
            per_layer((D, D)), per_layer((1, D)),
            per_layer((1, D)), per_layer((1, D)),
            per_layer((D, FFN_DIM)), per_layer((1, FFN_DIM)),
            per_layer((FFN_DIM, D)), per_layer((1, D)),
            per_layer((1, D)), per_layer((1, D)),
            full((1, D)), full((1, D)),
        ],
        out_specs=full((bs, D)),
        scratch_shapes=[pltpu.VMEM((bs, D), jnp.float32),
                        pltpu.VMEM((bs, D), jnp.float32)],
        compiler_params=pltpu.CompilerParams(dimension_semantics=("arbitrary",)),
    )


# --------------------------------------------------------------------------- decoder stack (+fc)
def _make_decoder_call(batch, seq):
    bs = batch * seq
    scale = 1.0 / math.sqrt(HEAD_DIM)

    def kernel(mem_ref, etw_ref, etb_ref,
               sawv_ref, sabv_ref, sawo_ref, sabo_ref,
               cawq_ref, cabq_ref, cawkv_ref, cabkv_ref, cawo_ref, cabo_ref,
               ln1g_ref, ln1b_ref, ln2g_ref, ln2b_ref, ln3g_ref, ln3b_ref,
               w1_ref, b1_ref, w2_ref, b2_ref,
               fng_ref, fnb_ref, fcw_ref, fcb_ref,
               out_ref,
               t_sc, ca_sc):
        l = pl.program_id(0)

        @pl.when(l == 0)
        def _():
            # embeddingTgt of the constant begin token (reproduces the original code's intent):
            # tgt = 500.0 * W_tgt + b_tgt, broadcast to every batch row.
            t_sc[...] = jnp.zeros((batch, D), jnp.float32) + (
                BEGIN_TOKEN * etw_ref[...] + etb_ref[...])

        t = t_sc[...]                                                 # (B, D) f32 resident

        # ---- decoder self-attention: Lq = Lkv = 1 -> softmax identity -> Wo·(Wv·t + bv) + bo ----
        v = _mm(t, sawv_ref[...], sabv_ref[...])
        sa = _mm(v, sawo_ref[...], sabo_ref[...])
        t = _layer_norm(t + sa, ln1g_ref[...], ln1b_ref[...])

        # ---- cross-attention over encoder memory (fused K|V projection, batched einsum) ----
        mem = mem_ref[...]                                            # (BS, D) f32
        q = _mm(t, cawq_ref[...], cabq_ref[...])                      # (B, D)
        kv = _mm(mem, cawkv_ref[...], cabkv_ref[...])                 # (BS, 2D)
        q3 = q.reshape(batch, 1, D)
        kv3 = kv.reshape(batch, seq, 2 * D)
        for h in range(NUM_HEADS):
            ck = slice(h * HEAD_DIM, (h + 1) * HEAD_DIM)
            cv = slice(D + h * HEAD_DIM, D + (h + 1) * HEAD_DIM)
            qh = q3[:, :, ck] * scale                                 # (B, 1, hd)
            kh = kv3[:, :, ck]                                        # (B, S, hd)
            vh = kv3[:, :, cv]
            s = jnp.einsum('bqd,bkd->bqk', qh, kh,
                           preferred_element_type=jnp.float32)        # (B, 1, S)
            p = _softmax_rows(s)
            oh = jnp.einsum('bqk,bkd->bqd', p, vh,
                            preferred_element_type=jnp.float32)       # (B, 1, hd)
            ca_sc[:, ck] = oh.reshape(batch, HEAD_DIM)
        ca = _mm(ca_sc[...], cawo_ref[...], cabo_ref[...])
        t = _layer_norm(t + ca, ln2g_ref[...], ln2b_ref[...])

        # ---- FFN ----
        h1 = jnp.maximum(_mm(t, w1_ref[...], b1_ref[...]), 0.0)
        f = _mm(h1, w2_ref[...], b2_ref[...])
        t = _layer_norm(t + f, ln3g_ref[...], ln3b_ref[...])

        t_sc[...] = t

        @pl.when(l == pl.num_programs(0) - 1)
        def _():
            # final decoder norm + torch.squeeze + fc, folded into the last grid step
            tn = _layer_norm(t, fng_ref[...], fnb_ref[...])
            out_ref[...] = (jnp.dot(tn, fcw_ref[...],
                                    preferred_element_type=jnp.float32) + fcb_ref[...])

    def full(shape):
        return pl.BlockSpec(shape, lambda l: (0,) * len(shape))

    def per_layer(shape):
        return pl.BlockSpec((None,) + shape, lambda l: (l,) + (0,) * len(shape))

    return pl.pallas_call(
        kernel,
        out_shape=jax.ShapeDtypeStruct((batch, OUTPUT_DIM), jnp.float32),
        grid=(NUM_DEC_LAYERS,),
        in_specs=[
            full((bs, D)), full((1, D)), full((1, D)),
            per_layer((D, D)), per_layer((1, D)), per_layer((D, D)), per_layer((1, D)),
            per_layer((D, D)), per_layer((1, D)),
            per_layer((D, 2 * D)), per_layer((1, 2 * D)),
            per_layer((D, D)), per_layer((1, D)),
            per_layer((1, D)), per_layer((1, D)),
            per_layer((1, D)), per_layer((1, D)),
            per_layer((1, D)), per_layer((1, D)),
            per_layer((D, FFN_DIM)), per_layer((1, FFN_DIM)),
            per_layer((FFN_DIM, D)), per_layer((1, D)),
            full((1, D)), full((1, D)), full((D, OUTPUT_DIM)), full((1, OUTPUT_DIM)),
        ],
        out_specs=full((batch, OUTPUT_DIM)),
        scratch_shapes=[pltpu.VMEM((batch, D), jnp.float32),
                        pltpu.VMEM((batch, D), jnp.float32)],
        compiler_params=pltpu.CompilerParams(dimension_semantics=("arbitrary",)),
    )


# --------------------------------------------------------------------------- forward
def midi_transformer_forward(params, src):
    B, S, _ = src.shape

    # TODO(synk): dropout(p=0.1) omitted — identity in eval/inference mode.

    e = params["enc"]
    memory = _make_encoder_call(B, S)(
        src.reshape(B * S, INPUT_DIM), params["emb_src_w"], params["emb_src_b"],
        e["wqkv"], e["bqkv"], e["wo"], e["bo"],
        e["ln1_g"], e["ln1_b"],
        e["w1"], e["b1"], e["w2"], e["b2"],
        e["ln2_g"], e["ln2_b"],
        params["enc_norm_g"], params["enc_norm_b"])

    d = params["dec"]
    out = _make_decoder_call(B, S)(
        memory, params["emb_tgt_w"], params["emb_tgt_b"],
        d["sa_wv"], d["sa_bv"], d["sa_wo"], d["sa_bo"],
        d["ca_wq"], d["ca_bq"], d["ca_wkv"], d["ca_bkv"], d["ca_wo"], d["ca_bo"],
        d["ln1_g"], d["ln1_b"], d["ln2_g"], d["ln2_b"], d["ln3_g"], d["ln3_b"],
        d["w1"], d["b1"], d["w2"], d["b2"],
        params["dec_norm_g"], params["dec_norm_b"], params["fc_w"], params["fc_b"])
    return out


# --------------------------------------------------------------------------- params
def init_params(key):
    kit = iter(jax.random.split(key, 256))
    bf = jnp.bfloat16
    Le, Ld, F = NUM_ENC_LAYERS, NUM_DEC_LAYERS, FFN_DIM

    def rnd(shape, scale=0.02, dtype=jnp.float32):
        return (scale * jax.random.normal(next(kit), shape, dtype=jnp.float32)).astype(dtype)

    def ones(shape):
        return jnp.ones(shape, jnp.float32)

    def zeros(shape):
        return jnp.zeros(shape, jnp.float32)

    enc = dict(
        wqkv=rnd((Le, D, 3 * D), dtype=bf), bqkv=rnd((Le, 1, 3 * D)),
        wo=rnd((Le, D, D), dtype=bf), bo=rnd((Le, 1, D)),
        ln1_g=ones((Le, 1, D)), ln1_b=zeros((Le, 1, D)),
        w1=rnd((Le, D, F), dtype=bf), b1=rnd((Le, 1, F)),
        w2=rnd((Le, F, D), dtype=bf), b2=rnd((Le, 1, D)),
        ln2_g=ones((Le, 1, D)), ln2_b=zeros((Le, 1, D)),
    )
    dec = dict(
        sa_wv=rnd((Ld, D, D), dtype=bf), sa_bv=rnd((Ld, 1, D)),
        sa_wo=rnd((Ld, D, D), dtype=bf), sa_bo=rnd((Ld, 1, D)),
        ca_wq=rnd((Ld, D, D), dtype=bf), ca_bq=rnd((Ld, 1, D)),
        ca_wkv=rnd((Ld, D, 2 * D), dtype=bf), ca_bkv=rnd((Ld, 1, 2 * D)),
        ca_wo=rnd((Ld, D, D), dtype=bf), ca_bo=rnd((Ld, 1, D)),
        ln1_g=ones((Ld, 1, D)), ln1_b=zeros((Ld, 1, D)),
        ln2_g=ones((Ld, 1, D)), ln2_b=zeros((Ld, 1, D)),
        ln3_g=ones((Ld, 1, D)), ln3_b=zeros((Ld, 1, D)),
        w1=rnd((Ld, D, F), dtype=bf), b1=rnd((Ld, 1, F)),
        w2=rnd((Ld, F, D), dtype=bf), b2=rnd((Ld, 1, D)),
    )
    return dict(
        emb_src_w=rnd((INPUT_DIM, D)), emb_src_b=rnd((1, D)),
        emb_tgt_w=rnd((OUTPUT_DIM, D)), emb_tgt_b=rnd((1, D)),
        fc_w=rnd((D, OUTPUT_DIM)), fc_b=rnd((1, OUTPUT_DIM)),
        enc_norm_g=ones((1, D)), enc_norm_b=zeros((1, D)),
        dec_norm_g=ones((1, D)), dec_norm_b=zeros((1, D)),
        enc=enc, dec=dec,
    )


# --------------------------------------------------------------------------- main
if __name__ == "__main__":
    key = jax.random.PRNGKey(0)
    pkey, skey = jax.random.split(key)
    params = init_params(pkey)

    B, S = 2, 8
    src = jax.random.normal(skey, (B, S, INPUT_DIM), dtype=jnp.float32)

    fwd = jax.jit(midi_transformer_forward)
    out = jax.block_until_ready(fwd(params, src))

    assert out.shape == (B, OUTPUT_DIM), out.shape
    assert out.dtype == jnp.float32
    assert bool(jnp.all(jnp.isfinite(out)))
    print("KERNEL_OK")
</pallas_src>

<mosaic_0001>
module attributes {stable_mosaic.version = 11 : i64} {
  func.func @kernel(%arg0: i32, %arg1: memref<16x128xf32, #tpu.memory_space<vmem>>, %arg2: memref<1x128xf32, #tpu.memory_space<vmem>>, %arg3: memref<1x128xf32, #tpu.memory_space<vmem>>, %arg4: memref<1x128x128xbf16, #tpu.memory_space<vmem>>, %arg5: memref<1x1x128xf32, #tpu.memory_space<vmem>>, %arg6: memref<1x128x128xbf16, #tpu.memory_space<vmem>>, %arg7: memref<1x1x128xf32, #tpu.memory_space<vmem>>, %arg8: memref<1x128x128xbf16, #tpu.memory_space<vmem>>, %arg9: memref<1x1x128xf32, #tpu.memory_space<vmem>>, %arg10: memref<1x128x256xbf16, #tpu.memory_space<vmem>>, %arg11: memref<1x1x256xf32, #tpu.memory_space<vmem>>, %arg12: memref<1x128x128xbf16, #tpu.memory_space<vmem>>, %arg13: memref<1x1x128xf32, #tpu.memory_space<vmem>>, %arg14: memref<1x1x128xf32, #tpu.memory_space<vmem>>, %arg15: memref<1x1x128xf32, #tpu.memory_space<vmem>>, %arg16: memref<1x1x128xf32, #tpu.memory_space<vmem>>, %arg17: memref<1x1x128xf32, #tpu.memory_space<vmem>>, %arg18: memref<1x1x128xf32, #tpu.memory_space<vmem>>, %arg19: memref<1x1x128xf32, #tpu.memory_space<vmem>>, %arg20: memref<1x128x2048xbf16, #tpu.memory_space<vmem>>, %arg21: memref<1x1x2048xf32, #tpu.memory_space<vmem>>, %arg22: memref<1x2048x128xbf16, #tpu.memory_space<vmem>>, %arg23: memref<1x1x128xf32, #tpu.memory_space<vmem>>, %arg24: memref<1x128xf32, #tpu.memory_space<vmem>>, %arg25: memref<1x128xf32, #tpu.memory_space<vmem>>, %arg26: memref<128x1xf32, #tpu.memory_space<vmem>>, %arg27: memref<1x1xf32, #tpu.memory_space<vmem>>, %arg28: memref<2x1xf32, #tpu.memory_space<vmem>>, %arg29: memref<2x128xf32, #tpu.memory_space<vmem>>, %arg30: memref<2x128xf32, #tpu.memory_space<vmem>>) attributes {dimension_semantics = [#tpu.dimension_semantics<arbitrary>], iteration_bounds = array<i64: 6>, scalar_prefetch = 0 : i64, scratch_operands = 2 : i64, tpu.core_type = #tpu.core_type<tc>, window_params = [{pipeline_mode = #tpu.pipeline_mode<synchronous>, transform_indices = @transform_0, window_bounds = array<i64: 16, 128>}, {pipeline_mode = #tpu.pipeline_mode<synchronous>, transform_indices = @transform_1, window_bounds = array<i64: 1, 128>}, {pipeline_mode = #tpu.pipeline_mode<synchronous>, transform_indices = @transform_2, window_bounds = array<i64: 1, 128>}, {transform_indices = @transform_3, window_bounds = array<i64: 1, 128, 128>}, {transform_indices = @transform_4, window_bounds = array<i64: 1, 1, 128>}, {transform_indices = @transform_5, window_bounds = array<i64: 1, 128, 128>}, {transform_indices = @transform_6, window_bounds = array<i64: 1, 1, 128>}, {transform_indices = @transform_7, window_bounds = array<i64: 1, 128, 128>}, {transform_indices = @transform_8, window_bounds = array<i64: 1, 1, 128>}, {transform_indices = @transform_9, window_bounds = array<i64: 1, 128, 256>}, {transform_indices = @transform_10, window_bounds = array<i64: 1, 1, 256>}, {transform_indices = @transform_11, window_bounds = array<i64: 1, 128, 128>}, {transform_indices = @transform_12, window_bounds = array<i64: 1, 1, 128>}, {transform_indices = @transform_13, window_bounds = array<i64: 1, 1, 128>}, {transform_indices = @transform_14, window_bounds = array<i64: 1, 1, 128>}, {transform_indices = @transform_15, window_bounds = array<i64: 1, 1, 128>}, {transform_indices = @transform_16, window_bounds = array<i64: 1, 1, 128>}, {transform_indices = @transform_17, window_bounds = array<i64: 1, 1, 128>}, {transform_indices = @transform_18, window_bounds = array<i64: 1, 1, 128>}, {transform_indices = @transform_19, window_bounds = array<i64: 1, 128, 2048>}, {transform_indices = @transform_20, window_bounds = array<i64: 1, 1, 2048>}, {transform_indices = @transform_21, window_bounds = array<i64: 1, 2048, 128>}, {transform_indices = @transform_22, window_bounds = array<i64: 1, 1, 128>}, {pipeline_mode = #tpu.pipeline_mode<synchronous>, transform_indices = @transform_23, window_bounds = array<i64: 1, 128>}, {pipeline_mode = #tpu.pipeline_mode<synchronous>, transform_indices = @transform_24, window_bounds = array<i64: 1, 128>}, {pipeline_mode = #tpu.pipeline_mode<synchronous>, transform_indices = @transform_25, window_bounds = array<i64: 128, 1>}, {pipeline_mode = #tpu.pipeline_mode<synchronous>, transform_indices = @transform_26, window_bounds = array<i64: 1, 1>}, {pipeline_mode = #tpu.pipeline_mode<synchronous>, transform_indices = @transform_27, window_bounds = array<i64: 2, 1>}]} {
    %c0_i32 = arith.constant 0 : i32
    %0 = arith.cmpi eq, %arg0, %c0_i32 : i32
    %1 = arith.extui %0 : i1 to i32
    %c0_i32_0 = arith.constant 0 : i32
    %2 = arith.cmpi ne, %1, %c0_i32_0 : i32
    scf.if %2 {
      %cst_116 = arith.constant 0.000000e+00 : f32
      %227 = vector.broadcast %cst_116 : f32 to vector<2x128xf32>
      %c0_117 = arith.constant 0 : index
      %c0_118 = arith.constant 0 : index
      %228 = vector.load %arg2[%c0_117, %c0_118] : memref<1x128xf32, #tpu.memory_space<vmem>>, vector<1x128xf32>
      %cst_119 = arith.constant 5.000000e+02 : f32
      %229 = vector.broadcast %cst_119 : f32 to vector<1x128xf32>
      %230 = arith.mulf %229, %228 : vector<1x128xf32>
      %c0_120 = arith.constant 0 : index
      %c0_121 = arith.constant 0 : index
      %231 = vector.load %arg3[%c0_120, %c0_121] : memref<1x128xf32, #tpu.memory_space<vmem>>, vector<1x128xf32>
      %232 = arith.addf %230, %231 : vector<1x128xf32>
      %233 = vector.broadcast %232 : vector<1x128xf32> to vector<2x128xf32>
      %234 = arith.addf %227, %233 : vector<2x128xf32>
      %c0_122 = arith.constant 0 : index
      %c0_123 = arith.constant 0 : index
      %235 = vector.load %arg29[%c0_122, %c0_123] : memref<2x128xf32, #tpu.memory_space<vmem>>, vector<2x128xf32>
      tpu.vector_store %arg29[%c0_122, %c0_123], %234 {strides = array<i32>} : memref<2x128xf32, #tpu.memory_space<vmem>>, vector<2x128xf32>,
    } else {
    }
    %c0 = arith.constant 0 : index
    %c0_1 = arith.constant 0 : index
    %3 = vector.load %arg29[%c0, %c0_1] : memref<2x128xf32, #tpu.memory_space<vmem>>, vector<2x128xf32>
    %c0_2 = arith.constant 0 : index
    %c0_3 = arith.constant 0 : index
    %c0_4 = arith.constant 0 : index
    %4 = vector.load %arg4[%c0_2, %c0_3, %c0_4] : memref<1x128x128xbf16, #tpu.memory_space<vmem>>, vector<1x128x128xbf16>
    %5 = vector.shape_cast %4 : vector<1x128x128xbf16> to vector<128x128xbf16>
    %c0_5 = arith.constant 0 : index
    %c0_6 = arith.constant 0 : index
    %c0_7 = arith.constant 0 : index
    %6 = vector.load %arg5[%c0_5, %c0_6, %c0_7] : memref<1x1x128xf32, #tpu.memory_space<vmem>>, vector<1x1x128xf32>
    %7 = vector.shape_cast %6 : vector<1x1x128xf32> to vector<1x128xf32>
    %8 = arith.truncf %3 : vector<2x128xf32> to vector<2x128xbf16>
    %cst = arith.constant dense<0.000000e+00> : vector<2x128xf32>
    %9 = tpu.matmul %8, %5, %cst {dimension_numbers = #tpu.dot_dimension_numbers<[1], [0], [0], [1], [0, 0, 1, 1], [], []>} : vector<2x128xbf16>, vector<128x128xbf16>, vector<2x128xf32> -> vector<2x128xf32>
    %10 = vector.broadcast %7 : vector<1x128xf32> to vector<2x128xf32>
    %11 = arith.addf %9, %10 : vector<2x128xf32>
    %c0_8 = arith.constant 0 : index
    %c0_9 = arith.constant 0 : index
    %c0_10 = arith.constant 0 : index
    %12 = vector.load %arg6[%c0_8, %c0_9, %c0_10] : memref<1x128x128xbf16, #tpu.memory_space<vmem>>, vector<1x128x128xbf16>
    %13 = vector.shape_cast %12 : vector<1x128x128xbf16> to vector<128x128xbf16>
    %c0_11 = arith.constant 0 : index
    %c0_12 = arith.constant 0 : index
    %c0_13 = arith.constant 0 : index
    %14 = vector.load %arg7[%c0_11, %c0_12, %c0_13] : memref<1x1x128xf32, #tpu.memory_space<vmem>>, vector<1x1x128xf32>
    %15 = vector.shape_cast %14 : vector<1x1x128xf32> to vector<1x128xf32>
    %16 = arith.truncf %11 : vector<2x128xf32> to vector<2x128xbf16>
    %cst_14 = arith.constant dense<0.000000e+00> : vector<2x128xf32>
    %17 = tpu.matmul %16, %13, %cst_14 {dimension_numbers = #tpu.dot_dimension_numbers<[1], [0], [0], [1], [0, 0, 1, 1], [], []>} : vector<2x128xbf16>, vector<128x128xbf16>, vector<2x128xf32> -> vector<2x128xf32>
    %18 = vector.broadcast %15 : vector<1x128xf32> to vector<2x128xf32>
    %19 = arith.addf %17, %18 : vector<2x128xf32>
    %20 = arith.addf %3, %19 : vector<2x128xf32>
    %c0_15 = arith.constant 0 : index
    %c0_16 = arith.constant 0 : index
    %c0_17 = arith.constant 0 : index
    %21 = vector.load %arg14[%c0_15, %c0_16, %c0_17] : memref<1x1x128xf32, #tpu.memory_space<vmem>>, vector<1x1x128xf32>
    %22 = vector.shape_cast %21 : vector<1x1x128xf32> to vector<1x128xf32>
    %c0_18 = arith.constant 0 : index
    %c0_19 = arith.constant 0 : index
    %c0_20 = arith.constant 0 : index
    %23 = vector.load %arg15[%c0_18, %c0_19, %c0_20] : memref<1x1x128xf32, #tpu.memory_space<vmem>>, vector<1x1x128xf32>
    %24 = vector.shape_cast %23 : vector<1x1x128xf32> to vector<1x128xf32>
    %cst_21 = arith.constant dense<0.000000e+00> : vector<2xf32>
    %25 = vector.multi_reduction <add>, %20, %cst_21 [1] : vector<2x128xf32> to vector<2xf32>
    %26 = vector.shape_cast %25 : vector<2xf32> to vector<2x1xf32>
    %cst_22 = arith.constant 1.280000e+02 : f32
    %27 = vector.broadcast %cst_22 : f32 to vector<2x1xf32>
    %28 = arith.divf %26, %27 : vector<2x1xf32>
    %29 = vector.broadcast %28 : vector<2x1xf32> to vector<2x128xf32>
    %30 = arith.subf %20, %29 : vector<2x128xf32>
    %31 = arith.mulf %30, %30 : vector<2x128xf32>
    %cst_23 = arith.constant dense<0.000000e+00> : vector<2xf32>
    %32 = vector.multi_reduction <add>, %31, %cst_23 [1] : vector<2x128xf32> to vector<2xf32>
    %33 = vector.shape_cast %32 : vector<2xf32> to vector<2x1xf32>
    %cst_24 = arith.constant 1.280000e+02 : f32
    %34 = vector.broadcast %cst_24 : f32 to vector<2x1xf32>
    %35 = arith.divf %33, %34 : vector<2x1xf32>
    %36 = vector.broadcast %28 : vector<2x1xf32> to vector<2x128xf32>
    %37 = arith.subf %20, %36 : vector<2x128xf32>
    %cst_25 = arith.constant 9.99999974E-6 : f32
    %38 = vector.broadcast %cst_25 : f32 to vector<2x1xf32>
    %39 = arith.addf %35, %38 : vector<2x1xf32>
    %40 = math.rsqrt %39 : vector<2x1xf32>
    %41 = vector.broadcast %40 : vector<2x1xf32> to vector<2x128xf32>
    %42 = arith.mulf %37, %41 : vector<2x128xf32>
    %43 = vector.broadcast %22 : vector<1x128xf32> to vector<2x128xf32>
    %44 = arith.mulf %42, %43 : vector<2x128xf32>
    %45 = vector.broadcast %24 : vector<1x128xf32> to vector<2x128xf32>
    %46 = arith.addf %44, %45 : vector<2x128xf32>
    %c0_26 = arith.constant 0 : index
    %c0_27 = arith.constant 0 : index
    %47 = vector.load %arg1[%c0_26, %c0_27] : memref<16x128xf32, #tpu.memory_space<vmem>>, vector<16x128xf32>
    %c0_28 = arith.constant 0 : index
    %c0_29 = arith.constant 0 : index
    %c0_30 = arith.constant 0 : index
    %48 = vector.load %arg8[%c0_28, %c0_29, %c0_30] : memref<1x128x128xbf16, #tpu.memory_space<vmem>>, vector<1x128x128xbf16>
    %49 = vector.shape_cast %48 : vector<1x128x128xbf16> to vector<128x128xbf16>
    %c0_31 = arith.constant 0 : index
    %c0_32 = arith.constant 0 : index
    %c0_33 = arith.constant 0 : index
    %50 = vector.load %arg9[%c0_31, %c0_32, %c0_33] : memref<1x1x128xf32, #tpu.memory_space<vmem>>, vector<1x1x128xf32>
    %51 = vector.shape_cast %50 : vector<1x1x128xf32> to vector<1x128xf32>
    %52 = arith.truncf %46 : vector<2x128xf32> to vector<2x128xbf16>
    %cst_34 = arith.constant dense<0.000000e+00> : vector<2x128xf32>
    %53 = tpu.matmul %52, %49, %cst_34 {dimension_numbers = #tpu.dot_dimension_numbers<[1], [0], [0], [1], [0, 0, 1, 1], [], []>} : vector<2x128xbf16>, vector<128x128xbf16>, vector<2x128xf32> -> vector<2x128xf32>
    %54 = vector.broadcast %51 : vector<1x128xf32> to vector<2x128xf32>
    %55 = arith.addf %53, %54 : vector<2x128xf32>
    %c0_35 = arith.constant 0 : index
    %c0_36 = arith.constant 0 : index
    %c0_37 = arith.constant 0 : index
    %56 = vector.load %arg10[%c0_35, %c0_36, %c0_37] : memref<1x128x256xbf16, #tpu.memory_space<vmem>>, vector<1x128x256xbf16>
    %57 = vector.shape_cast %56 : vector<1x128x256xbf16> to vector<128x256xbf16>
    %c0_38 = arith.constant 0 : index
    %c0_39 = arith.constant 0 : index
    %c0_40 = arith.constant 0 : index
    %58 = vector.load %arg11[%c0_38, %c0_39, %c0_40] : memref<1x1x256xf32, #tpu.memory_space<vmem>>, vector<1x1x256xf32>
    %59 = vector.shape_cast %58 : vector<1x1x256xf32> to vector<1x256xf32>
    %60 = arith.truncf %47 : vector<16x128xf32> to vector<16x128xbf16>
    %cst_41 = arith.constant dense<0.000000e+00> : vector<16x256xf32>
    %61 = tpu.matmul %60, %57, %cst_41 {dimension_numbers = #tpu.dot_dimension_numbers<[1], [0], [0], [1], [0, 0, 1, 1], [], []>} : vector<16x128xbf16>, vector<128x256xbf16>, vector<16x256xf32> -> vector<16x256xf32>
    %62 = vector.broadcast %59 : vector<1x256xf32> to vector<16x256xf32>
    %63 = arith.addf %61, %62 : vector<16x256xf32>
    %64 = vector.shape_cast %55 : vector<2x128xf32> to vector<2x1x128xf32>
    %65 = vector.shape_cast %63 : vector<16x256xf32> to vector<2x8x256xf32>
    %66 = vector.extract_strided_slice %64 {offsets = [0, 0, 0], sizes = [2, 1, 32], strides = [1, 1, 1]} : vector<2x1x128xf32> to vector<2x1x32xf32>
    %cst_42 = arith.constant 0.176776692 : f32
    %67 = vector.broadcast %cst_42 : f32 to vector<2x1x32xf32>
    %68 = arith.mulf %66, %67 : vector<2x1x32xf32>
    %69 = vector.extract_strided_slice %65 {offsets = [0, 0, 0], sizes = [2, 8, 32], strides = [1, 1, 1]} : vector<2x8x256xf32> to vector<2x8x32xf32>
    %70 = vector.extract_strided_slice %65 {offsets = [0, 0, 128], sizes = [2, 8, 32], strides = [1, 1, 1]} : vector<2x8x256xf32> to vector<2x8x32xf32>
    "tpu.trace_start"() <{level = 10 : i32, message = "bqd,bkd->bqk"}> : () -> ()
    %cst_43 = arith.constant dense<0.000000e+00> : vector<2x1x8xf32>
    %71 = tpu.matmul %68, %69, %cst_43 {dimension_numbers = #tpu.dot_dimension_numbers<[2], [2], [1], [1], [0, 0, 0, 1, 1, 1], [0], [0]>} : vector<2x1x32xf32>, vector<2x8x32xf32>, vector<2x1x8xf32> -> vector<2x1x8xf32>
    "tpu.trace_stop"() : () -> ()
    %cst_44 = arith.constant dense<0xFF800000> : vector<2x1xf32>
    %72 = vector.multi_reduction <maximumf>, %71, %cst_44 [2] : vector<2x1x8xf32> to vector<2x1xf32>
    %73 = vector.shape_cast %72 : vector<2x1xf32> to vector<2x1x1xf32>
    %74 = vector.broadcast %73 : vector<2x1x1xf32> to vector<2x1x8xf32>
    %75 = arith.subf %71, %74 : vector<2x1x8xf32>
    %76 = math.exp %75 : vector<2x1x8xf32>
    %cst_45 = arith.constant dense<0.000000e+00> : vector<2x1xf32>
    %77 = vector.multi_reduction <add>, %76, %cst_45 [2] : vector<2x1x8xf32> to vector<2x1xf32>
    %78 = vector.shape_cast %77 : vector<2x1xf32> to vector<2x1x1xf32>
    %79 = tpu.reciprocal %78 {approx = true} : vector<2x1x1xf32> -> vector<2x1x1xf32>
    %80 = vector.broadcast %79 : vector<2x1x1xf32> to vector<2x1x8xf32>
    %81 = arith.mulf %76, %80 : vector<2x1x8xf32>
    "tpu.trace_start"() <{level = 10 : i32, message = "bqk,bkd->bqd"}> : () -> ()
    %cst_46 = arith.constant dense<0.000000e+00> : vector<2x1x32xf32>
    %82 = tpu.matmul %81, %70, %cst_46 {dimension_numbers = #tpu.dot_dimension_numbers<[2], [1], [1], [2], [0, 0, 0, 1, 1, 2], [0], [0]>} : vector<2x1x8xf32>, vector<2x8x32xf32>, vector<2x1x32xf32> -> vector<2x1x32xf32>
    "tpu.trace_stop"() : () -> ()
    %83 = vector.shape_cast %82 : vector<2x1x32xf32> to vector<2x32xf32>
    %c0_47 = arith.constant 0 : index
    %c0_48 = arith.constant 0 : index
    %84 = vector.load %arg30[%c0_47, %c0_48] : memref<2x128xf32, #tpu.memory_space<vmem>>, vector<2x32xf32>
    tpu.vector_store %arg30[%c0_47, %c0_48], %83 {strides = array<i32>} : memref<2x128xf32, #tpu.memory_space<vmem>>, vector<2x32xf32>,
    %85 = vector.extract_strided_slice %64 {offsets = [0, 0, 32], sizes = [2, 1, 32], strides = [1, 1, 1]} : vector<2x1x128xf32> to vector<2x1x32xf32>
    %cst_49 = arith.constant 0.176776692 : f32
    %86 = vector.broadcast %cst_49 : f32 to vector<2x1x32xf32>
    %87 = arith.mulf %85, %86 : vector<2x1x32xf32>
    %88 = vector.extract_strided_slice %65 {offsets = [0, 0, 32], sizes = [2, 8, 32], strides = [1, 1, 1]} : vector<2x8x256xf32> to vector<2x8x32xf32>
    %89 = vector.extract_strided_slice %65 {offsets = [0, 0, 160], sizes = [2, 8, 32], strides = [1, 1, 1]} : vector<2x8x256xf32> to vector<2x8x32xf32>
    "tpu.trace_start"() <{level = 10 : i32, message = "bqd,bkd->bqk"}> : () -> ()
    %cst_50 = arith.constant dense<0.000000e+00> : vector<2x1x8xf32>
    %90 = tpu.matmul %87, %88, %cst_50 {dimension_numbers = #tpu.dot_dimension_numbers<[2], [2], [1], [1], [0, 0, 0, 1, 1, 1], [0], [0]>} : vector<2x1x32xf32>, vector<2x8x32xf32>, vector<2x1x8xf32> -> vector<2x1x8xf32>
    "tpu.trace_stop"() : () -> ()
    %cst_51 = arith.constant dense<0xFF800000> : vector<2x1xf32>
    %91 = vector.multi_reduction <maximumf>, %90, %cst_51 [2] : vector<2x1x8xf32> to vector<2x1xf32>
    %92 = vector.shape_cast %91 : vector<2x1xf32> to vector<2x1x1xf32>
    %93 = vector.broadcast %92 : vector<2x1x1xf32> to vector<2x1x8xf32>
    %94 = arith.subf %90, %93 : vector<2x1x8xf32>
    %95 = math.exp %94 : vector<2x1x8xf32>
    %cst_52 = arith.constant dense<0.000000e+00> : vector<2x1xf32>
    %96 = vector.multi_reduction <add>, %95, %cst_52 [2] : vector<2x1x8xf32> to vector<2x1xf32>
    %97 = vector.shape_cast %96 : vector<2x1xf32> to vector<2x1x1xf32>
    %98 = tpu.reciprocal %97 {approx = true} : vector<2x1x1xf32> -> vector<2x1x1xf32>
    %99 = vector.broadcast %98 : vector<2x1x1xf32> to vector<2x1x8xf32>
    %100 = arith.mulf %95, %99 : vector<2x1x8xf32>
    "tpu.trace_start"() <{level = 10 : i32, message = "bqk,bkd->bqd"}> : () -> ()
    %cst_53 = arith.constant dense<0.000000e+00> : vector<2x1x32xf32>
    %101 = tpu.matmul %100, %89, %cst_53 {dimension_numbers = #tpu.dot_dimension_numbers<[2], [1], [1], [2], [0, 0, 0, 1, 1, 2], [0], [0]>} : vector<2x1x8xf32>, vector<2x8x32xf32>, vector<2x1x32xf32> -> vector<2x1x32xf32>
    "tpu.trace_stop"() : () -> ()
    %102 = vector.shape_cast %101 : vector<2x1x32xf32> to vector<2x32xf32>
    %c0_54 = arith.constant 0 : index
    %c32 = arith.constant 32 : index
    %103 = vector.load %arg30[%c0_54, %c32] : memref<2x128xf32, #tpu.memory_space<vmem>>, vector<2x32xf32>
    tpu.vector_store %arg30[%c0_54, %c32], %102 {strides = array<i32>} : memref<2x128xf32, #tpu.memory_space<vmem>>, vector<2x32xf32>,
    %104 = vector.extract_strided_slice %64 {offsets = [0, 0, 64], sizes = [2, 1, 32], strides = [1, 1, 1]} : vector<2x1x128xf32> to vector<2x1x32xf32>
    %cst_55 = arith.constant 0.176776692 : f32
    %105 = vector.broadcast %cst_55 : f32 to vector<2x1x32xf32>
    %106 = arith.mulf %104, %105 : vector<2x1x32xf32>
    %107 = vector.extract_strided_slice %65 {offsets = [0, 0, 64], sizes = [2, 8, 32], strides = [1, 1, 1]} : vector<2x8x256xf32> to vector<2x8x32xf32>
    %108 = vector.extract_strided_slice %65 {offsets = [0, 0, 192], sizes = [2, 8, 32], strides = [1, 1, 1]} : vector<2x8x256xf32> to vector<2x8x32xf32>
    "tpu.trace_start"() <{level = 10 : i32, message = "bqd,bkd->bqk"}> : () -> ()
    %cst_56 = arith.constant dense<0.000000e+00> : vector<2x1x8xf32>
    %109 = tpu.matmul %106, %107, %cst_56 {dimension_numbers = #tpu.dot_dimension_numbers<[2], [2], [1], [1], [0, 0, 0, 1, 1, 1], [0], [0]>} : vector<2x1x32xf32>, vector<2x8x32xf32>, vector<2x1x8xf32> -> vector<2x1x8xf32>
    "tpu.trace_stop"() : () -> ()
    %cst_57 = arith.constant dense<0xFF800000> : vector<2x1xf32>
    %110 = vector.multi_reduction <maximumf>, %109, %cst_57 [2] : vector<2x1x8xf32> to vector<2x1xf32>
    %111 = vector.shape_cast %110 : vector<2x1xf32> to vector<2x1x1xf32>
    %112 = vector.broadcast %111 : vector<2x1x1xf32> to vector<2x1x8xf32>
    %113 = arith.subf %109, %112 : vector<2x1x8xf32>
    %114 = math.exp %113 : vector<2x1x8xf32>
    %cst_58 = arith.constant dense<0.000000e+00> : vector<2x1xf32>
    %115 = vector.multi_reduction <add>, %114, %cst_58 [2] : vector<2x1x8xf32> to vector<2x1xf32>
    %116 = vector.shape_cast %115 : vector<2x1xf32> to vector<2x1x1xf32>
    %117 = tpu.reciprocal %116 {approx = true} : vector<2x1x1xf32> -> vector<2x1x1xf32>
    %118 = vector.broadcast %117 : vector<2x1x1xf32> to vector<2x1x8xf32>
    %119 = arith.mulf %114, %118 : vector<2x1x8xf32>
    "tpu.trace_start"() <{level = 10 : i32, message = "bqk,bkd->bqd"}> : () -> ()
    %cst_59 = arith.constant dense<0.000000e+00> : vector<2x1x32xf32>
    %120 = tpu.matmul %119, %108, %cst_59 {dimension_numbers = #tpu.dot_dimension_numbers<[2], [1], [1], [2], [0, 0, 0, 1, 1, 2], [0], [0]>} : vector<2x1x8xf32>, vector<2x8x32xf32>, vector<2x1x32xf32> -> vector<2x1x32xf32>
    "tpu.trace_stop"() : () -> ()
    %121 = vector.shape_cast %120 : vector<2x1x32xf32> to vector<2x32xf32>
    %c0_60 = arith.constant 0 : index
    %c64 = arith.constant 64 : index
    %122 = vector.load %arg30[%c0_60, %c64] : memref<2x128xf32, #tpu.memory_space<vmem>>, vector<2x32xf32>
    tpu.vector_store %arg30[%c0_60, %c64], %121 {strides = array<i32>} : memref<2x128xf32, #tpu.memory_space<vmem>>, vector<2x32xf32>,
    %123 = vector.extract_strided_slice %64 {offsets = [0, 0, 96], sizes = [2, 1, 32], strides = [1, 1, 1]} : vector<2x1x128xf32> to vector<2x1x32xf32>
    %cst_61 = arith.constant 0.176776692 : f32
    %124 = vector.broadcast %cst_61 : f32 to vector<2x1x32xf32>
    %125 = arith.mulf %123, %124 : vector<2x1x32xf32>
    %126 = vector.extract_strided_slice %65 {offsets = [0, 0, 96], sizes = [2, 8, 32], strides = [1, 1, 1]} : vector<2x8x256xf32> to vector<2x8x32xf32>
    %127 = vector.extract_strided_slice %65 {offsets = [0, 0, 224], sizes = [2, 8, 32], strides = [1, 1, 1]} : vector<2x8x256xf32> to vector<2x8x32xf32>
    "tpu.trace_start"() <{level = 10 : i32, message = "bqd,bkd->bqk"}> : () -> ()
    %cst_62 = arith.constant dense<0.000000e+00> : vector<2x1x8xf32>
    %128 = tpu.matmul %125, %126, %cst_62 {dimension_numbers = #tpu.dot_dimension_numbers<[2], [2], [1], [1], [0, 0, 0, 1, 1, 1], [0], [0]>} : vector<2x1x32xf32>, vector<2x8x32xf32>, vector<2x1x8xf32> -> vector<2x1x8xf32>
    "tpu.trace_stop"() : () -> ()
    %cst_63 = arith.constant dense<0xFF800000> : vector<2x1xf32>
    %129 = vector.multi_reduction <maximumf>, %128, %cst_63 [2] : vector<2x1x8xf32> to vector<2x1xf32>
    %130 = vector.shape_cast %129 : vector<2x1xf32> to vector<2x1x1xf32>
    %131 = vector.broadcast %130 : vector<2x1x1xf32> to vector<2x1x8xf32>
    %132 = arith.subf %128, %131 : vector<2x1x8xf32>
    %133 = math.exp %132 : vector<2x1x8xf32>
    %cst_64 = arith.constant dense<0.000000e+00> : vector<2x1xf32>
    %134 = vector.multi_reduction <add>, %133, %cst_64 [2] : vector<2x1x8xf32> to vector<2x1xf32>
    %135 = vector.shape_cast %134 : vector<2x1xf32> to vector<2x1x1xf32>
    %136 = tpu.reciprocal %135 {approx = true} : vector<2x1x1xf32> -> vector<2x1x1xf32>
    %137 = vector.broadcast %136 : vector<2x1x1xf32> to vector<2x1x8xf32>
    %138 = arith.mulf %133, %137 : vector<2x1x8xf32>
    "tpu.trace_start"() <{level = 10 : i32, message = "bqk,bkd->bqd"}> : () -> ()
    %cst_65 = arith.constant dense<0.000000e+00> : vector<2x1x32xf32>
    %139 = tpu.matmul %138, %127, %cst_65 {dimension_numbers = #tpu.dot_dimension_numbers<[2], [1], [1], [2], [0, 0, 0, 1, 1, 2], [0], [0]>} : vector<2x1x8xf32>, vector<2x8x32xf32>, vector<2x1x32xf32> -> vector<2x1x32xf32>
    "tpu.trace_stop"() : () -> ()
    %140 = vector.shape_cast %139 : vector<2x1x32xf32> to vector<2x32xf32>
    %c0_66 = arith.constant 0 : index
    %c96 = arith.constant 96 : index
    %141 = vector.load %arg30[%c0_66, %c96] : memref<2x128xf32, #tpu.memory_space<vmem>>, vector<2x32xf32>
    tpu.vector_store %arg30[%c0_66, %c96], %140 {strides = array<i32>} : memref<2x128xf32, #tpu.memory_space<vmem>>, vector<2x32xf32>,
    %c0_67 = arith.constant 0 : index
    %c0_68 = arith.constant 0 : index
    %142 = vector.load %arg30[%c0_67, %c0_68] : memref<2x128xf32, #tpu.memory_space<vmem>>, vector<2x128xf32>
    %c0_69 = arith.constant 0 : index
    %c0_70 = arith.constant 0 : index
    %c0_71 = arith.constant 0 : index
    %143 = vector.load %arg12[%c0_69, %c0_70, %c0_71] : memref<1x128x128xbf16, #tpu.memory_space<vmem>>, vector<1x128x128xbf16>
    %144 = vector.shape_cast %143 : vector<1x128x128xbf16> to vector<128x128xbf16>
    %c0_72 = arith.constant 0 : index
    %c0_73 = arith.constant 0 : index
    %c0_74 = arith.constant 0 : index
    %145 = vector.load %arg13[%c0_72, %c0_73, %c0_74] : memref<1x1x128xf32, #tpu.memory_space<vmem>>, vector<1x1x128xf32>
    %146 = vector.shape_cast %145 : vector<1x1x128xf32> to vector<1x128xf32>
    %147 = arith.truncf %142 : vector<2x128xf32> to vector<2x128xbf16>
    %cst_75 = arith.constant dense<0.000000e+00> : vector<2x128xf32>
    %148 = tpu.matmul %147, %144, %cst_75 {dimension_numbers = #tpu.dot_dimension_numbers<[1], [0], [0], [1], [0, 0, 1, 1], [], []>} : vector<2x128xbf16>, vector<128x128xbf16>, vector<2x128xf32> -> vector<2x128xf32>
    %149 = vector.broadcast %146 : vector<1x128xf32> to vector<2x128xf32>
    %150 = arith.addf %148, %149 : vector<2x128xf32>
    %151 = arith.addf %46, %150 : vector<2x128xf32>
    %c0_76 = arith.constant 0 : index
    %c0_77 = arith.constant 0 : index
    %c0_78 = arith.constant 0 : index
    %152 = vector.load %arg16[%c0_76, %c0_77, %c0_78] : memref<1x1x128xf32, #tpu.memory_space<vmem>>, vector<1x1x128xf32>
    %153 = vector.shape_cast %152 : vector<1x1x128xf32> to vector<1x128xf32>
    %c0_79 = arith.constant 0 : index
    %c0_80 = arith.constant 0 : index
    %c0_81 = arith.constant 0 : index
    %154 = vector.load %arg17[%c0_79, %c0_80, %c0_81] : memref<1x1x128xf32, #tpu.memory_space<vmem>>, vector<1x1x128xf32>
    %155 = vector.shape_cast %154 : vector<1x1x128xf32> to vector<1x128xf32>
    %cst_82 = arith.constant dense<0.000000e+00> : vector<2xf32>
    %156 = vector.multi_reduction <add>, %151, %cst_82 [1] : vector<2x128xf32> to vector<2xf32>
    %157 = vector.shape_cast %156 : vector<2xf32> to vector<2x1xf32>
    %cst_83 = arith.constant 1.280000e+02 : f32
    %158 = vector.broadcast %cst_83 : f32 to vector<2x1xf32>
    %159 = arith.divf %157, %158 : vector<2x1xf32>
    %160 = vector.broadcast %159 : vector<2x1xf32> to vector<2x128xf32>
    %161 = arith.subf %151, %160 : vector<2x128xf32>
    %162 = arith.mulf %161, %161 : vector<2x128xf32>
    %cst_84 = arith.constant dense<0.000000e+00> : vector<2xf32>
    %163 = vector.multi_reduction <add>, %162, %cst_84 [1] : vector<2x128xf32> to vector<2xf32>
    %164 = vector.shape_cast %163 : vector<2xf32> to vector<2x1xf32>
    %cst_85 = arith.constant 1.280000e+02 : f32
    %165 = vector.broadcast %cst_85 : f32 to vector<2x1xf32>
    %166 = arith.divf %164, %165 : vector<2x1xf32>
    %167 = vector.broadcast %159 : vector<2x1xf32> to vector<2x128xf32>
    %168 = arith.subf %151, %167 : vector<2x128xf32>
    %cst_86 = arith.constant 9.99999974E-6 : f32
    %169 = vector.broadcast %cst_86 : f32 to vector<2x1xf32>
    %170 = arith.addf %166, %169 : vector<2x1xf32>
    %171 = math.rsqrt %170 : vector<2x1xf32>
    %172 = vector.broadcast %171 : vector<2x1xf32> to vector<2x128xf32>
    %173 = arith.mulf %168, %172 : vector<2x128xf32>
    %174 = vector.broadcast %153 : vector<1x128xf32> to vector<2x128xf32>
    %175 = arith.mulf %173, %174 : vector<2x128xf32>
    %176 = vector.broadcast %155 : vector<1x128xf32> to vector<2x128xf32>
    %177 = arith.addf %175, %176 : vector<2x128xf32>
    %c0_87 = arith.constant 0 : index
    %c0_88 = arith.constant 0 : index
    %c0_89 = arith.constant 0 : index
    %178 = vector.load %arg20[%c0_87, %c0_88, %c0_89] : memref<1x128x2048xbf16, #tpu.memory_space<vmem>>, vector<1x128x2048xbf16>
    %179 = vector.shape_cast %178 : vector<1x128x2048xbf16> to vector<128x2048xbf16>
    %c0_90 = arith.constant 0 : index
    %c0_91 = arith.constant 0 : index
    %c0_92 = arith.constant 0 : index
    %180 = vector.load %arg21[%c0_90, %c0_91, %c0_92] : memref<1x1x2048xf32, #tpu.memory_space<vmem>>, vector<1x1x2048xf32>
    %181 = vector.shape_cast %180 : vector<1x1x2048xf32> to vector<1x2048xf32>
    %182 = arith.truncf %177 : vector<2x128xf32> to vector<2x128xbf16>
    %cst_93 = arith.constant dense<0.000000e+00> : vector<2x2048xf32>
    %183 = tpu.matmul %182, %179, %cst_93 {dimension_numbers = #tpu.dot_dimension_numbers<[1], [0], [0], [1], [0, 0, 1, 1], [], []>} : vector<2x128xbf16>, vector<128x2048xbf16>, vector<2x2048xf32> -> vector<2x2048xf32>
    %184 = vector.broadcast %181 : vector<1x2048xf32> to vector<2x2048xf32>
    %185 = arith.addf %183, %184 : vector<2x2048xf32>
    %cst_94 = arith.constant 0.000000e+00 : f32
    %186 = vector.broadcast %cst_94 : f32 to vector<2x2048xf32>
    %187 = arith.maximumf %185, %186 : vector<2x2048xf32>
    %c0_95 = arith.constant 0 : index
    %c0_96 = arith.constant 0 : index
    %c0_97 = arith.constant 0 : index
    %188 = vector.load %arg22[%c0_95, %c0_96, %c0_97] : memref<1x2048x128xbf16, #tpu.memory_space<vmem>>, vector<1x2048x128xbf16>
    %189 = vector.shape_cast %188 : vector<1x2048x128xbf16> to vector<2048x128xbf16>
    %c0_98 = arith.constant 0 : index
    %c0_99 = arith.constant 0 : index
    %c0_100 = arith.constant 0 : index
    %190 = vector.load %arg23[%c0_98, %c0_99, %c0_100] : memref<1x1x128xf32, #tpu.memory_space<vmem>>, vector<1x1x128xf32>
    %191 = vector.shape_cast %190 : vector<1x1x128xf32> to vector<1x128xf32>
    %192 = arith.truncf %187 : vector<2x2048xf32> to vector<2x2048xbf16>
    %cst_101 = arith.constant dense<0.000000e+00> : vector<2x128xf32>
    %193 = tpu.matmul %192, %189, %cst_101 {dimension_numbers = #tpu.dot_dimension_numbers<[1], [0], [0], [1], [0, 0, 1, 1], [], []>} : vector<2x2048xbf16>, vector<2048x128xbf16>, vector<2x128xf32> -> vector<2x128xf32>
    %194 = vector.broadcast %191 : vector<1x128xf32> to vector<2x128xf32>
    %195 = arith.addf %193, %194 : vector<2x128xf32>
    %196 = arith.addf %177, %195 : vector<2x128xf32>
    %c0_102 = arith.constant 0 : index
    %c0_103 = arith.constant 0 : index
    %c0_104 = arith.constant 0 : index
    %197 = vector.load %arg18[%c0_102, %c0_103, %c0_104] : memref<1x1x128xf32, #tpu.memory_space<vmem>>, vector<1x1x128xf32>
    %198 = vector.shape_cast %197 : vector<1x1x128xf32> to vector<1x128xf32>
    %c0_105 = arith.constant 0 : index
    %c0_106 = arith.constant 0 : index
    %c0_107 = arith.constant 0 : index
    %199 = vector.load %arg19[%c0_105, %c0_106, %c0_107] : memref<1x1x128xf32, #tpu.memory_space<vmem>>, vector<1x1x128xf32>
    %200 = vector.shape_cast %199 : vector<1x1x128xf32> to vector<1x128xf32>
    %cst_108 = arith.constant dense<0.000000e+00> : vector<2xf32>
    %201 = vector.multi_reduction <add>, %196, %cst_108 [1] : vector<2x128xf32> to vector<2xf32>
    %202 = vector.shape_cast %201 : vector<2xf32> to vector<2x1xf32>
    %cst_109 = arith.constant 1.280000e+02 : f32
    %203 = vector.broadcast %cst_109 : f32 to vector<2x1xf32>
    %204 = arith.divf %202, %203 : vector<2x1xf32>
    %205 = vector.broadcast %204 : vector<2x1xf32> to vector<2x128xf32>
    %206 = arith.subf %196, %205 : vector<2x128xf32>
    %207 = arith.mulf %206, %206 : vector<2x128xf32>
    %cst_110 = arith.constant dense<0.000000e+00> : vector<2xf32>
    %208 = vector.multi_reduction <add>, %207, %cst_110 [1] : vector<2x128xf32> to vector<2xf32>
    %209 = vector.shape_cast %208 : vector<2xf32> to vector<2x1xf32>
    %cst_111 = arith.constant 1.280000e+02 : f32
    %210 = vector.broadcast %cst_111 : f32 to vector<2x1xf32>
    %211 = arith.divf %209, %210 : vector<2x1xf32>
    %212 = vector.broadcast %204 : vector<2x1xf32> to vector<2x128xf32>
    %213 = arith.subf %196, %212 : vector<2x128xf32>
    %cst_112 = arith.constant 9.99999974E-6 : f32
    %214 = vector.broadcast %cst_112 : f32 to vector<2x1xf32>
    %215 = arith.addf %211, %214 : vector<2x1xf32>
    %216 = math.rsqrt %215 : vector<2x1xf32>
    %217 = vector.broadcast %216 : vector<2x1xf32> to vector<2x128xf32>
    %218 = arith.mulf %213, %217 : vector<2x128xf32>
    %219 = vector.broadcast %198 : vector<1x128xf32> to vector<2x128xf32>
    %220 = arith.mulf %218, %219 : vector<2x128xf32>
    %221 = vector.broadcast %200 : vector<1x128xf32> to vector<2x128xf32>
    %222 = arith.addf %220, %221 : vector<2x128xf32>
    %c0_113 = arith.constant 0 : index
    %c0_114 = arith.constant 0 : index
    %223 = vector.load %arg29[%c0_113, %c0_114] : memref<2x128xf32, #tpu.memory_space<vmem>>, vector<2x128xf32>
    tpu.vector_store %arg29[%c0_113, %c0_114], %222 {strides = array<i32>} : memref<2x128xf32, #tpu.memory_space<vmem>>, vector<2x128xf32>,
    %c5_i32 = arith.constant 5 : i32
    %224 = arith.cmpi eq, %arg0, %c5_i32 : i32
    %225 = arith.extui %224 : i1 to i32
    %c0_i32_115 = arith.constant 0 : i32
    %226 = arith.cmpi ne, %225, %c0_i32_115 : i32
    scf.if %226 {
      %c0_116 = arith.constant 0 : index
      %c0_117 = arith.constant 0 : index
      %227 = vector.load %arg24[%c0_116, %c0_117] : memref<1x128xf32, #tpu.memory_space<vmem>>, vector<1x128xf32>
      %c0_118 = arith.constant 0 : index
      %c0_119 = arith.constant 0 : index
      %228 = vector.load %arg25[%c0_118, %c0_119] : memref<1x128xf32, #tpu.memory_space<vmem>>, vector<1x128xf32>
      %cst_120 = arith.constant dense<0.000000e+00> : vector<2xf32>
      %229 = vector.multi_reduction <add>, %222, %cst_120 [1] : vector<2x128xf32> to vector<2xf32>
      %230 = vector.shape_cast %229 : vector<2xf32> to vector<2x1xf32>
      %cst_121 = arith.constant 1.280000e+02 : f32
      %231 = vector.broadcast %cst_121 : f32 to vector<2x1xf32>
      %232 = arith.divf %230, %231 : vector<2x1xf32>
      %233 = vector.broadcast %232 : vector<2x1xf32> to vector<2x128xf32>
      %234 = arith.subf %222, %233 : vector<2x128xf32>
      %235 = arith.mulf %234, %234 : vector<2x128xf32>
      %cst_122 = arith.constant dense<0.000000e+00> : vector<2xf32>
      %236 = vector.multi_reduction <add>, %235, %cst_122 [1] : vector<2x128xf32> to vector<2xf32>
      %237 = vector.shape_cast %236 : vector<2xf32> to vector<2x1xf32>
      %cst_123 = arith.constant 1.280000e+02 : f32
      %238 = vector.broadcast %cst_123 : f32 to vector<2x1xf32>
      %239 = arith.divf %237, %238 : vector<2x1xf32>
      %240 = vector.broadcast %232 : vector<2x1xf32> to vector<2x128xf32>
      %241 = arith.subf %222, %240 : vector<2x128xf32>
      %cst_124 = arith.constant 9.99999974E-6 : f32
      %242 = vector.broadcast %cst_124 : f32 to vector<2x1xf32>
      %243 = arith.addf %239, %242 : vector<2x1xf32>
      %244 = math.rsqrt %243 : vector<2x1xf32>
      %245 = vector.broadcast %244 : vector<2x1xf32> to vector<2x128xf32>
      %246 = arith.mulf %241, %245 : vector<2x128xf32>
      %247 = vector.broadcast %227 : vector<1x128xf32> to vector<2x128xf32>
      %248 = arith.mulf %246, %247 : vector<2x128xf32>
      %249 = vector.broadcast %228 : vector<1x128xf32> to vector<2x128xf32>
      %250 = arith.addf %248, %249 : vector<2x128xf32>
      %c0_125 = arith.constant 0 : index
      %c0_126 = arith.constant 0 : index
      %251 = vector.load %arg26[%c0_125, %c0_126] : memref<128x1xf32, #tpu.memory_space<vmem>>, vector<128x1xf32>
      %cst_127 = arith.constant dense<0.000000e+00> : vector<2x1xf32>
      %252 = tpu.matmul %250, %251, %cst_127 {dimension_numbers = #tpu.dot_dimension_numbers<[1], [0], [0], [1], [0, 0, 1, 1], [], []>} : vector<2x128xf32>, vector<128x1xf32>, vector<2x1xf32> -> vector<2x1xf32>
      %c0_128 = arith.constant 0 : index
      %c0_129 = arith.constant 0 : index
      %253 = vector.load %arg27[%c0_128, %c0_129] : memref<1x1xf32, #tpu.memory_space<vmem>>, vector<1x1xf32>
      %254 = vector.broadcast %253 : vector<1x1xf32> to vector<2x1xf32>
      %255 = arith.addf %252, %254 : vector<2x1xf32>
      %c0_130 = arith.constant 0 : index
      %c0_131 = arith.constant 0 : index
      %256 = vector.load %arg28[%c0_130, %c0_131] : memref<2x1xf32, #tpu.memory_space<vmem>>, vector<2x1xf32>
      tpu.vector_store %arg28[%c0_130, %c0_131], %255 {strides = array<i32>} : memref<2x1xf32, #tpu.memory_space<vmem>>, vector<2x1xf32>,
    } else {
    }
    return
  }
  func.func @transform_0(%arg0: i32) -> (i32, i32) {
    %c0_i32 = arith.constant 0 : i32
    %c0_i32_0 = arith.constant 0 : i32
    %c0_i32_1 = arith.constant 0 : i32
    return %c0_i32, %c0_i32_0 : i32, i32
  }
  func.func @transform_1(%arg0: i32) -> (i32, i32) {
    %c0_i32 = arith.constant 0 : i32
    %c0_i32_0 = arith.constant 0 : i32
    %c0_i32_1 = arith.constant 0 : i32
    return %c0_i32, %c0_i32_0 : i32, i32
  }
  func.func @transform_2(%arg0: i32) -> (i32, i32) {
    %c0_i32 = arith.constant 0 : i32
    %c0_i32_0 = arith.constant 0 : i32
    %c0_i32_1 = arith.constant 0 : i32
    return %c0_i32, %c0_i32_0 : i32, i32
  }
  func.func @transform_3(%arg0: i32) -> (i32, i32, i32) {
    %c0_i32 = arith.constant 0 : i32
    %c0_i32_0 = arith.constant 0 : i32
    %c0_i32_1 = arith.constant 0 : i32
    return %arg0, %c0_i32, %c0_i32_0 : i32, i32, i32
  }
  func.func @transform_4(%arg0: i32) -> (i32, i32, i32) {
    %c0_i32 = arith.constant 0 : i32
    %c0_i32_0 = arith.constant 0 : i32
    %c0_i32_1 = arith.constant 0 : i32
    return %arg0, %c0_i32, %c0_i32_0 : i32, i32, i32
  }
  func.func @transform_5(%arg0: i32) -> (i32, i32, i32) {
    %c0_i32 = arith.constant 0 : i32
    %c0_i32_0 = arith.constant 0 : i32
    %c0_i32_1 = arith.constant 0 : i32
    return %arg0, %c0_i32, %c0_i32_0 : i32, i32, i32
  }
  func.func @transform_6(%arg0: i32) -> (i32, i32, i32) {
    %c0_i32 = arith.constant 0 : i32
    %c0_i32_0 = arith.constant 0 : i32
    %c0_i32_1 = arith.constant 0 : i32
    return %arg0, %c0_i32, %c0_i32_0 : i32, i32, i32
  }
  func.func @transform_7(%arg0: i32) -> (i32, i32, i32) {
    %c0_i32 = arith.constant 0 : i32
    %c0_i32_0 = arith.constant 0 : i32
    %c0_i32_1 = arith.constant 0 : i32
    return %arg0, %c0_i32, %c0_i32_0 : i32, i32, i32
  }
  func.func @transform_8(%arg0: i32) -> (i32, i32, i32) {
    %c0_i32 = arith.constant 0 : i32
    %c0_i32_0 = arith.constant 0 : i32
    %c0_i32_1 = arith.constant 0 : i32
    return %arg0, %c0_i32, %c0_i32_0 : i32, i32, i32
  }
  func.func @transform_9(%arg0: i32) -> (i32, i32, i32) {
    %c0_i32 = arith.constant 0 : i32
    %c0_i32_0 = arith.constant 0 : i32
    %c0_i32_1 = arith.constant 0 : i32
    return %arg0, %c0_i32, %c0_i32_0 : i32, i32, i32
  }
  func.func @transform_10(%arg0: i32) -> (i32, i32, i32) {
    %c0_i32 = arith.constant 0 : i32
    %c0_i32_0 = arith.constant 0 : i32
    %c0_i32_1 = arith.constant 0 : i32
    return %arg0, %c0_i32, %c0_i32_0 : i32, i32, i32
  }
  func.func @transform_11(%arg0: i32) -> (i32, i32, i32) {
    %c0_i32 = arith.constant 0 : i32
    %c0_i32_0 = arith.constant 0 : i32
    %c0_i32_1 = arith.constant 0 : i32
    return %arg0, %c0_i32, %c0_i32_0 : i32, i32, i32
  }
  func.func @transform_12(%arg0: i32) -> (i32, i32, i32) {
    %c0_i32 = arith.constant 0 : i32
    %c0_i32_0 = arith.constant 0 : i32
    %c0_i32_1 = arith.constant 0 : i32
    return %arg0, %c0_i32, %c0_i32_0 : i32, i32, i32
  }
  func.func @transform_13(%arg0: i32) -> (i32, i32, i32) {
    %c0_i32 = arith.constant 0 : i32
    %c0_i32_0 = arith.constant 0 : i32
    %c0_i32_1 = arith.constant 0 : i32
    return %arg0, %c0_i32, %c0_i32_0 : i32, i32, i32
  }
  func.func @transform_14(%arg0: i32) -> (i32, i32, i32) {
    %c0_i32 = arith.constant 0 : i32
    %c0_i32_0 = arith.constant 0 : i32
    %c0_i32_1 = arith.constant 0 : i32
    return %arg0, %c0_i32, %c0_i32_0 : i32, i32, i32
  }
  func.func @transform_15(%arg0: i32) -> (i32, i32, i32) {
    %c0_i32 = arith.constant 0 : i32
    %c0_i32_0 = arith.constant 0 : i32
    %c0_i32_1 = arith.constant 0 : i32
    return %arg0, %c0_i32, %c0_i32_0 : i32, i32, i32
  }
  func.func @transform_16(%arg0: i32) -> (i32, i32, i32) {
    %c0_i32 = arith.constant 0 : i32
    %c0_i32_0 = arith.constant 0 : i32
    %c0_i32_1 = arith.constant 0 : i32
    return %arg0, %c0_i32, %c0_i32_0 : i32, i32, i32
  }
  func.func @transform_17(%arg0: i32) -> (i32, i32, i32) {
    %c0_i32 = arith.constant 0 : i32
    %c0_i32_0 = arith.constant 0 : i32
    %c0_i32_1 = arith.constant 0 : i32
    return %arg0, %c0_i32, %c0_i32_0 : i32, i32, i32
  }
  func.func @transform_18(%arg0: i32) -> (i32, i32, i32) {
    %c0_i32 = arith.constant 0 : i32
    %c0_i32_0 = arith.constant 0 : i32
    %c0_i32_1 = arith.constant 0 : i32
    return %arg0, %c0_i32, %c0_i32_0 : i32, i32, i32
  }
  func.func @transform_19(%arg0: i32) -> (i32, i32, i32) {
    %c0_i32 = arith.constant 0 : i32
    %c0_i32_0 = arith.constant 0 : i32
    %c0_i32_1 = arith.constant 0 : i32
    return %arg0, %c0_i32, %c0_i32_0 : i32, i32, i32
  }
  func.func @transform_20(%arg0: i32) -> (i32, i32, i32) {
    %c0_i32 = arith.constant 0 : i32
    %c0_i32_0 = arith.constant 0 : i32
    %c0_i32_1 = arith.constant 0 : i32
    return %arg0, %c0_i32, %c0_i32_0 : i32, i32, i32
  }
  func.func @transform_21(%arg0: i32) -> (i32, i32, i32) {
    %c0_i32 = arith.constant 0 : i32
    %c0_i32_0 = arith.constant 0 : i32
    %c0_i32_1 = arith.constant 0 : i32
    return %arg0, %c0_i32, %c0_i32_0 : i32, i32, i32
  }
  func.func @transform_22(%arg0: i32) -> (i32, i32, i32) {
    %c0_i32 = arith.constant 0 : i32
    %c0_i32_0 = arith.constant 0 : i32
    %c0_i32_1 = arith.constant 0 : i32
    return %arg0, %c0_i32, %c0_i32_0 : i32, i32, i32
  }
  func.func @transform_23(%arg0: i32) -> (i32, i32) {
    %c0_i32 = arith.constant 0 : i32
    %c0_i32_0 = arith.constant 0 : i32
    %c0_i32_1 = arith.constant 0 : i32
    return %c0_i32, %c0_i32_0 : i32, i32
  }
  func.func @transform_24(%arg0: i32) -> (i32, i32) {
    %c0_i32 = arith.constant 0 : i32
    %c0_i32_0 = arith.constant 0 : i32
    %c0_i32_1 = arith.constant 0 : i32
    return %c0_i32, %c0_i32_0 : i32, i32
  }
  func.func @transform_25(%arg0: i32) -> (i32, i32) {
    %c0_i32 = arith.constant 0 : i32
    %c0_i32_0 = arith.constant 0 : i32
    %c0_i32_1 = arith.constant 0 : i32
    return %c0_i32, %c0_i32_0 : i32, i32
  }
  func.func @transform_26(%arg0: i32) -> (i32, i32) {
    %c0_i32 = arith.constant 0 : i32
    %c0_i32_0 = arith.constant 0 : i32
    %c0_i32_1 = arith.constant 0 : i32
    return %c0_i32, %c0_i32_0 : i32, i32
  }
  func.func @transform_27(%arg0: i32) -> (i32, i32) {
    %c0_i32 = arith.constant 0 : i32
    %c0_i32_0 = arith.constant 0 : i32
    %c0_i32_1 = arith.constant 0 : i32
    return %c0_i32, %c0_i32_0 : i32, i32
  }
}

module attributes {stable_mosaic.version = 11 : i64} {
  func.func @kernel(%arg0: i32, %arg1: memref<16x3xf32, #tpu.memory_space<vmem>>, %arg2: memref<3x128xf32, #tpu.memory_space<vmem>>, %arg3: memref<1x128xf32, #tpu.memory_space<vmem>>, %arg4: memref<1x128x384xbf16, #tpu.memory_space<vmem>>, %arg5: memref<1x1x384xf32, #tpu.memory_space<vmem>>, %arg6: memref<1x128x128xbf16, #tpu.memory_space<vmem>>, %arg7: memref<1x1x128xf32, #tpu.memory_space<vmem>>, %arg8: memref<1x1x128xf32, #tpu.memory_space<vmem>>, %arg9: memref<1x1x128xf32, #tpu.memory_space<vmem>>, %arg10: memref<1x128x2048xbf16, #tpu.memory_space<vmem>>, %arg11: memref<1x1x2048xf32, #tpu.memory_space<vmem>>, %arg12: memref<1x2048x128xbf16, #tpu.memory_space<vmem>>, %arg13: memref<1x1x128xf32, #tpu.memory_space<vmem>>, %arg14: memref<1x1x128xf32, #tpu.memory_space<vmem>>, %arg15: memref<1x1x128xf32, #tpu.memory_space<vmem>>, %arg16: memref<1x128xf32, #tpu.memory_space<vmem>>, %arg17: memref<1x128xf32, #tpu.memory_space<vmem>>, %arg18: memref<16x128xf32, #tpu.memory_space<vmem>>, %arg19: memref<16x128xf32, #tpu.memory_space<vmem>>, %arg20: memref<16x128xf32, #tpu.memory_space<vmem>>) attributes {dimension_semantics = [#tpu.dimension_semantics<arbitrary>], iteration_bounds = array<i64: 4>, scalar_prefetch = 0 : i64, scratch_operands = 2 : i64, tpu.core_type = #tpu.core_type<tc>, window_params = [{pipeline_mode = #tpu.pipeline_mode<synchronous>, transform_indices = @transform_0, window_bounds = array<i64: 16, 3>}, {pipeline_mode = #tpu.pipeline_mode<synchronous>, transform_indices = @transform_1, window_bounds = array<i64: 3, 128>}, {pipeline_mode = #tpu.pipeline_mode<synchronous>, transform_indices = @transform_2, window_bounds = array<i64: 1, 128>}, {transform_indices = @transform_3, window_bounds = array<i64: 1, 128, 384>}, {transform_indices = @transform_4, window_bounds = array<i64: 1, 1, 384>}, {transform_indices = @transform_5, window_bounds = array<i64: 1, 128, 128>}, {transform_indices = @transform_6, window_bounds = array<i64: 1, 1, 128>}, {transform_indices = @transform_7, window_bounds = array<i64: 1, 1, 128>}, {transform_indices = @transform_8, window_bounds = array<i64: 1, 1, 128>}, {transform_indices = @transform_9, window_bounds = array<i64: 1, 128, 2048>}, {transform_indices = @transform_10, window_bounds = array<i64: 1, 1, 2048>}, {transform_indices = @transform_11, window_bounds = array<i64: 1, 2048, 128>}, {transform_indices = @transform_12, window_bounds = array<i64: 1, 1, 128>}, {transform_indices = @transform_13, window_bounds = array<i64: 1, 1, 128>}, {transform_indices = @transform_14, window_bounds = array<i64: 1, 1, 128>}, {pipeline_mode = #tpu.pipeline_mode<synchronous>, transform_indices = @transform_15, window_bounds = array<i64: 1, 128>}, {pipeline_mode = #tpu.pipeline_mode<synchronous>, transform_indices = @transform_16, window_bounds = array<i64: 1, 128>}, {pipeline_mode = #tpu.pipeline_mode<synchronous>, transform_indices = @transform_17, window_bounds = array<i64: 16, 128>}]} {
    %c0_i32 = arith.constant 0 : i32
    %0 = arith.cmpi eq, %arg0, %c0_i32 : i32
    %1 = arith.extui %0 : i1 to i32
    %c0_i32_0 = arith.constant 0 : i32
    %2 = arith.cmpi ne, %1, %c0_i32_0 : i32
    scf.if %2 {
      %c0_82 = arith.constant 0 : index
      %c0_83 = arith.constant 0 : index
      %174 = vector.load %arg1[%c0_82, %c0_83] : memref<16x3xf32, #tpu.memory_space<vmem>>, vector<16x3xf32>
      %c0_84 = arith.constant 0 : index
      %c0_85 = arith.constant 0 : index
      %175 = vector.load %arg2[%c0_84, %c0_85] : memref<3x128xf32, #tpu.memory_space<vmem>>, vector<3x128xf32>
      %cst_86 = arith.constant dense<0.000000e+00> : vector<16x128xf32>
      %176 = tpu.matmul %174, %175, %cst_86 {dimension_numbers = #tpu.dot_dimension_numbers<[1], [0], [0], [1], [0, 0, 1, 1], [], []>} : vector<16x3xf32>, vector<3x128xf32>, vector<16x128xf32> -> vector<16x128xf32>
      %c0_87 = arith.constant 0 : index
      %c0_88 = arith.constant 0 : index
      %177 = vector.load %arg3[%c0_87, %c0_88] : memref<1x128xf32, #tpu.memory_space<vmem>>, vector<1x128xf32>
      %178 = vector.broadcast %177 : vector<1x128xf32> to vector<16x128xf32>
      %179 = arith.addf %176, %178 : vector<16x128xf32>
      %c0_89 = arith.constant 0 : index
      %c0_90 = arith.constant 0 : index
      %180 = vector.load %arg19[%c0_89, %c0_90] : memref<16x128xf32, #tpu.memory_space<vmem>>, vector<16x128xf32>
      tpu.vector_store %arg19[%c0_89, %c0_90], %179 {strides = array<i32>} : memref<16x128xf32, #tpu.memory_space<vmem>>, vector<16x128xf32>,
    } else {
    }
    %c0 = arith.constant 0 : index
    %c0_1 = arith.constant 0 : index
    %3 = vector.load %arg19[%c0, %c0_1] : memref<16x128xf32, #tpu.memory_space<vmem>>, vector<16x128xf32>
    %c0_2 = arith.constant 0 : index
    %c0_3 = arith.constant 0 : index
    %c0_4 = arith.constant 0 : index
    %4 = vector.load %arg4[%c0_2, %c0_3, %c0_4] : memref<1x128x384xbf16, #tpu.memory_space<vmem>>, vector<1x128x384xbf16>
    %5 = vector.shape_cast %4 : vector<1x128x384xbf16> to vector<128x384xbf16>
    %c0_5 = arith.constant 0 : index
    %c0_6 = arith.constant 0 : index
    %c0_7 = arith.constant 0 : index
    %6 = vector.load %arg5[%c0_5, %c0_6, %c0_7] : memref<1x1x384xf32, #tpu.memory_space<vmem>>, vector<1x1x384xf32>
    %7 = vector.shape_cast %6 : vector<1x1x384xf32> to vector<1x384xf32>
    %8 = arith.truncf %3 : vector<16x128xf32> to vector<16x128xbf16>
    %cst = arith.constant dense<0.000000e+00> : vector<16x384xf32>
    %9 = tpu.matmul %8, %5, %cst {dimension_numbers = #tpu.dot_dimension_numbers<[1], [0], [0], [1], [0, 0, 1, 1], [], []>} : vector<16x128xbf16>, vector<128x384xbf16>, vector<16x384xf32> -> vector<16x384xf32>
    %10 = vector.broadcast %7 : vector<1x384xf32> to vector<16x384xf32>
    %11 = arith.addf %9, %10 : vector<16x384xf32>
    %12 = vector.shape_cast %11 : vector<16x384xf32> to vector<2x8x384xf32>
    %13 = vector.extract_strided_slice %12 {offsets = [0, 0, 0], sizes = [2, 8, 32], strides = [1, 1, 1]} : vector<2x8x384xf32> to vector<2x8x32xf32>
    %cst_8 = arith.constant 0.176776692 : f32
    %14 = vector.broadcast %cst_8 : f32 to vector<2x8x32xf32>
    %15 = arith.mulf %13, %14 : vector<2x8x32xf32>
    %16 = vector.extract_strided_slice %12 {offsets = [0, 0, 128], sizes = [2, 8, 32], strides = [1, 1, 1]} : vector<2x8x384xf32> to vector<2x8x32xf32>
    %17 = vector.extract_strided_slice %12 {offsets = [0, 0, 256], sizes = [2, 8, 32], strides = [1, 1, 1]} : vector<2x8x384xf32> to vector<2x8x32xf32>
    "tpu.trace_start"() <{level = 10 : i32, message = "bqd,bkd->bqk"}> : () -> ()
    %cst_9 = arith.constant dense<0.000000e+00> : vector<2x8x8xf32>
    %18 = tpu.matmul %15, %16, %cst_9 {dimension_numbers = #tpu.dot_dimension_numbers<[2], [2], [1], [1], [0, 0, 0, 1, 1, 1], [0], [0]>} : vector<2x8x32xf32>, vector<2x8x32xf32>, vector<2x8x8xf32> -> vector<2x8x8xf32>
    "tpu.trace_stop"() : () -> ()
    %cst_10 = arith.constant dense<0xFF800000> : vector<2x8xf32>
    %19 = vector.multi_reduction <maximumf>, %18, %cst_10 [2] : vector<2x8x8xf32> to vector<2x8xf32>
    %20 = vector.shape_cast %19 : vector<2x8xf32> to vector<2x8x1xf32>
    %21 = vector.broadcast %20 : vector<2x8x1xf32> to vector<2x8x8xf32>
    %22 = arith.subf %18, %21 : vector<2x8x8xf32>
    %23 = math.exp %22 : vector<2x8x8xf32>
    %cst_11 = arith.constant dense<0.000000e+00> : vector<2x8xf32>
    %24 = vector.multi_reduction <add>, %23, %cst_11 [2] : vector<2x8x8xf32> to vector<2x8xf32>
    %25 = vector.shape_cast %24 : vector<2x8xf32> to vector<2x8x1xf32>
    %26 = tpu.reciprocal %25 {approx = true} : vector<2x8x1xf32> -> vector<2x8x1xf32>
    %27 = vector.broadcast %26 : vector<2x8x1xf32> to vector<2x8x8xf32>
    %28 = arith.mulf %23, %27 : vector<2x8x8xf32>
    "tpu.trace_start"() <{level = 10 : i32, message = "bqk,bkd->bqd"}> : () -> ()
    %cst_12 = arith.constant dense<0.000000e+00> : vector<2x8x32xf32>
    %29 = tpu.matmul %28, %17, %cst_12 {dimension_numbers = #tpu.dot_dimension_numbers<[2], [1], [1], [2], [0, 0, 0, 1, 1, 2], [0], [0]>} : vector<2x8x8xf32>, vector<2x8x32xf32>, vector<2x8x32xf32> -> vector<2x8x32xf32>
    "tpu.trace_stop"() : () -> ()
    %30 = vector.shape_cast %29 : vector<2x8x32xf32> to vector<16x32xf32>
    %c0_13 = arith.constant 0 : index
    %c0_14 = arith.constant 0 : index
    %31 = vector.load %arg20[%c0_13, %c0_14] : memref<16x128xf32, #tpu.memory_space<vmem>>, vector<16x32xf32>
    tpu.vector_store %arg20[%c0_13, %c0_14], %30 {strides = array<i32>} : memref<16x128xf32, #tpu.memory_space<vmem>>, vector<16x32xf32>,
    %32 = vector.extract_strided_slice %12 {offsets = [0, 0, 32], sizes = [2, 8, 32], strides = [1, 1, 1]} : vector<2x8x384xf32> to vector<2x8x32xf32>
    %cst_15 = arith.constant 0.176776692 : f32
    %33 = vector.broadcast %cst_15 : f32 to vector<2x8x32xf32>
    %34 = arith.mulf %32, %33 : vector<2x8x32xf32>
    %35 = vector.extract_strided_slice %12 {offsets = [0, 0, 160], sizes = [2, 8, 32], strides = [1, 1, 1]} : vector<2x8x384xf32> to vector<2x8x32xf32>
    %36 = vector.extract_strided_slice %12 {offsets = [0, 0, 288], sizes = [2, 8, 32], strides = [1, 1, 1]} : vector<2x8x384xf32> to vector<2x8x32xf32>
    "tpu.trace_start"() <{level = 10 : i32, message = "bqd,bkd->bqk"}> : () -> ()
    %cst_16 = arith.constant dense<0.000000e+00> : vector<2x8x8xf32>
    %37 = tpu.matmul %34, %35, %cst_16 {dimension_numbers = #tpu.dot_dimension_numbers<[2], [2], [1], [1], [0, 0, 0, 1, 1, 1], [0], [0]>} : vector<2x8x32xf32>, vector<2x8x32xf32>, vector<2x8x8xf32> -> vector<2x8x8xf32>
    "tpu.trace_stop"() : () -> ()
    %cst_17 = arith.constant dense<0xFF800000> : vector<2x8xf32>
    %38 = vector.multi_reduction <maximumf>, %37, %cst_17 [2] : vector<2x8x8xf32> to vector<2x8xf32>
    %39 = vector.shape_cast %38 : vector<2x8xf32> to vector<2x8x1xf32>
    %40 = vector.broadcast %39 : vector<2x8x1xf32> to vector<2x8x8xf32>
    %41 = arith.subf %37, %40 : vector<2x8x8xf32>
    %42 = math.exp %41 : vector<2x8x8xf32>
    %cst_18 = arith.constant dense<0.000000e+00> : vector<2x8xf32>
    %43 = vector.multi_reduction <add>, %42, %cst_18 [2] : vector<2x8x8xf32> to vector<2x8xf32>
    %44 = vector.shape_cast %43 : vector<2x8xf32> to vector<2x8x1xf32>
    %45 = tpu.reciprocal %44 {approx = true} : vector<2x8x1xf32> -> vector<2x8x1xf32>
    %46 = vector.broadcast %45 : vector<2x8x1xf32> to vector<2x8x8xf32>
    %47 = arith.mulf %42, %46 : vector<2x8x8xf32>
    "tpu.trace_start"() <{level = 10 : i32, message = "bqk,bkd->bqd"}> : () -> ()
    %cst_19 = arith.constant dense<0.000000e+00> : vector<2x8x32xf32>
    %48 = tpu.matmul %47, %36, %cst_19 {dimension_numbers = #tpu.dot_dimension_numbers<[2], [1], [1], [2], [0, 0, 0, 1, 1, 2], [0], [0]>} : vector<2x8x8xf32>, vector<2x8x32xf32>, vector<2x8x32xf32> -> vector<2x8x32xf32>
    "tpu.trace_stop"() : () -> ()
    %49 = vector.shape_cast %48 : vector<2x8x32xf32> to vector<16x32xf32>
    %c0_20 = arith.constant 0 : index
    %c32 = arith.constant 32 : index
    %50 = vector.load %arg20[%c0_20, %c32] : memref<16x128xf32, #tpu.memory_space<vmem>>, vector<16x32xf32>
    tpu.vector_store %arg20[%c0_20, %c32], %49 {strides = array<i32>} : memref<16x128xf32, #tpu.memory_space<vmem>>, vector<16x32xf32>,
    %51 = vector.extract_strided_slice %12 {offsets = [0, 0, 64], sizes = [2, 8, 32], strides = [1, 1, 1]} : vector<2x8x384xf32> to vector<2x8x32xf32>
    %cst_21 = arith.constant 0.176776692 : f32
    %52 = vector.broadcast %cst_21 : f32 to vector<2x8x32xf32>
    %53 = arith.mulf %51, %52 : vector<2x8x32xf32>
    %54 = vector.extract_strided_slice %12 {offsets = [0, 0, 192], sizes = [2, 8, 32], strides = [1, 1, 1]} : vector<2x8x384xf32> to vector<2x8x32xf32>
    %55 = vector.extract_strided_slice %12 {offsets = [0, 0, 320], sizes = [2, 8, 32], strides = [1, 1, 1]} : vector<2x8x384xf32> to vector<2x8x32xf32>
    "tpu.trace_start"() <{level = 10 : i32, message = "bqd,bkd->bqk"}> : () -> ()
    %cst_22 = arith.constant dense<0.000000e+00> : vector<2x8x8xf32>
    %56 = tpu.matmul %53, %54, %cst_22 {dimension_numbers = #tpu.dot_dimension_numbers<[2], [2], [1], [1], [0, 0, 0, 1, 1, 1], [0], [0]>} : vector<2x8x32xf32>, vector<2x8x32xf32>, vector<2x8x8xf32> -> vector<2x8x8xf32>
    "tpu.trace_stop"() : () -> ()
    %cst_23 = arith.constant dense<0xFF800000> : vector<2x8xf32>
    %57 = vector.multi_reduction <maximumf>, %56, %cst_23 [2] : vector<2x8x8xf32> to vector<2x8xf32>
    %58 = vector.shape_cast %57 : vector<2x8xf32> to vector<2x8x1xf32>
    %59 = vector.broadcast %58 : vector<2x8x1xf32> to vector<2x8x8xf32>
    %60 = arith.subf %56, %59 : vector<2x8x8xf32>
    %61 = math.exp %60 : vector<2x8x8xf32>
    %cst_24 = arith.constant dense<0.000000e+00> : vector<2x8xf32>
    %62 = vector.multi_reduction <add>, %61, %cst_24 [2] : vector<2x8x8xf32> to vector<2x8xf32>
    %63 = vector.shape_cast %62 : vector<2x8xf32> to vector<2x8x1xf32>
    %64 = tpu.reciprocal %63 {approx = true} : vector<2x8x1xf32> -> vector<2x8x1xf32>
    %65 = vector.broadcast %64 : vector<2x8x1xf32> to vector<2x8x8xf32>
    %66 = arith.mulf %61, %65 : vector<2x8x8xf32>
    "tpu.trace_start"() <{level = 10 : i32, message = "bqk,bkd->bqd"}> : () -> ()
    %cst_25 = arith.constant dense<0.000000e+00> : vector<2x8x32xf32>
    %67 = tpu.matmul %66, %55, %cst_25 {dimension_numbers = #tpu.dot_dimension_numbers<[2], [1], [1], [2], [0, 0, 0, 1, 1, 2], [0], [0]>} : vector<2x8x8xf32>, vector<2x8x32xf32>, vector<2x8x32xf32> -> vector<2x8x32xf32>
    "tpu.trace_stop"() : () -> ()
    %68 = vector.shape_cast %67 : vector<2x8x32xf32> to vector<16x32xf32>
    %c0_26 = arith.constant 0 : index
    %c64 = arith.constant 64 : index
    %69 = vector.load %arg20[%c0_26, %c64] : memref<16x128xf32, #tpu.memory_space<vmem>>, vector<16x32xf32>
    tpu.vector_store %arg20[%c0_26, %c64], %68 {strides = array<i32>} : memref<16x128xf32, #tpu.memory_space<vmem>>, vector<16x32xf32>,
    %70 = vector.extract_strided_slice %12 {offsets = [0, 0, 96], sizes = [2, 8, 32], strides = [1, 1, 1]} : vector<2x8x384xf32> to vector<2x8x32xf32>
    %cst_27 = arith.constant 0.176776692 : f32
    %71 = vector.broadcast %cst_27 : f32 to vector<2x8x32xf32>
    %72 = arith.mulf %70, %71 : vector<2x8x32xf32>
    %73 = vector.extract_strided_slice %12 {offsets = [0, 0, 224], sizes = [2, 8, 32], strides = [1, 1, 1]} : vector<2x8x384xf32> to vector<2x8x32xf32>
    %74 = vector.extract_strided_slice %12 {offsets = [0, 0, 352], sizes = [2, 8, 32], strides = [1, 1, 1]} : vector<2x8x384xf32> to vector<2x8x32xf32>
    "tpu.trace_start"() <{level = 10 : i32, message = "bqd,bkd->bqk"}> : () -> ()
    %cst_28 = arith.constant dense<0.000000e+00> : vector<2x8x8xf32>
    %75 = tpu.matmul %72, %73, %cst_28 {dimension_numbers = #tpu.dot_dimension_numbers<[2], [2], [1], [1], [0, 0, 0, 1, 1, 1], [0], [0]>} : vector<2x8x32xf32>, vector<2x8x32xf32>, vector<2x8x8xf32> -> vector<2x8x8xf32>
    "tpu.trace_stop"() : () -> ()
    %cst_29 = arith.constant dense<0xFF800000> : vector<2x8xf32>
    %76 = vector.multi_reduction <maximumf>, %75, %cst_29 [2] : vector<2x8x8xf32> to vector<2x8xf32>
    %77 = vector.shape_cast %76 : vector<2x8xf32> to vector<2x8x1xf32>
    %78 = vector.broadcast %77 : vector<2x8x1xf32> to vector<2x8x8xf32>
    %79 = arith.subf %75, %78 : vector<2x8x8xf32>
    %80 = math.exp %79 : vector<2x8x8xf32>
    %cst_30 = arith.constant dense<0.000000e+00> : vector<2x8xf32>
    %81 = vector.multi_reduction <add>, %80, %cst_30 [2] : vector<2x8x8xf32> to vector<2x8xf32>
    %82 = vector.shape_cast %81 : vector<2x8xf32> to vector<2x8x1xf32>
    %83 = tpu.reciprocal %82 {approx = true} : vector<2x8x1xf32> -> vector<2x8x1xf32>
    %84 = vector.broadcast %83 : vector<2x8x1xf32> to vector<2x8x8xf32>
    %85 = arith.mulf %80, %84 : vector<2x8x8xf32>
    "tpu.trace_start"() <{level = 10 : i32, message = "bqk,bkd->bqd"}> : () -> ()
    %cst_31 = arith.constant dense<0.000000e+00> : vector<2x8x32xf32>
    %86 = tpu.matmul %85, %74, %cst_31 {dimension_numbers = #tpu.dot_dimension_numbers<[2], [1], [1], [2], [0, 0, 0, 1, 1, 2], [0], [0]>} : vector<2x8x8xf32>, vector<2x8x32xf32>, vector<2x8x32xf32> -> vector<2x8x32xf32>
    "tpu.trace_stop"() : () -> ()
    %87 = vector.shape_cast %86 : vector<2x8x32xf32> to vector<16x32xf32>
    %c0_32 = arith.constant 0 : index
    %c96 = arith.constant 96 : index
    %88 = vector.load %arg20[%c0_32, %c96] : memref<16x128xf32, #tpu.memory_space<vmem>>, vector<16x32xf32>
    tpu.vector_store %arg20[%c0_32, %c96], %87 {strides = array<i32>} : memref<16x128xf32, #tpu.memory_space<vmem>>, vector<16x32xf32>,
    %c0_33 = arith.constant 0 : index
    %c0_34 = arith.constant 0 : index
    %89 = vector.load %arg20[%c0_33, %c0_34] : memref<16x128xf32, #tpu.memory_space<vmem>>, vector<16x128xf32>
    %c0_35 = arith.constant 0 : index
    %c0_36 = arith.constant 0 : index
    %c0_37 = arith.constant 0 : index
    %90 = vector.load %arg6[%c0_35, %c0_36, %c0_37] : memref<1x128x128xbf16, #tpu.memory_space<vmem>>, vector<1x128x128xbf16>
    %91 = vector.shape_cast %90 : vector<1x128x128xbf16> to vector<128x128xbf16>
    %c0_38 = arith.constant 0 : index
    %c0_39 = arith.constant 0 : index
    %c0_40 = arith.constant 0 : index
    %92 = vector.load %arg7[%c0_38, %c0_39, %c0_40] : memref<1x1x128xf32, #tpu.memory_space<vmem>>, vector<1x1x128xf32>
    %93 = vector.shape_cast %92 : vector<1x1x128xf32> to vector<1x128xf32>
    %94 = arith.truncf %89 : vector<16x128xf32> to vector<16x128xbf16>
    %cst_41 = arith.constant dense<0.000000e+00> : vector<16x128xf32>
    %95 = tpu.matmul %94, %91, %cst_41 {dimension_numbers = #tpu.dot_dimension_numbers<[1], [0], [0], [1], [0, 0, 1, 1], [], []>} : vector<16x128xbf16>, vector<128x128xbf16>, vector<16x128xf32> -> vector<16x128xf32>
    %96 = vector.broadcast %93 : vector<1x128xf32> to vector<16x128xf32>
    %97 = arith.addf %95, %96 : vector<16x128xf32>
    %98 = arith.addf %3, %97 : vector<16x128xf32>
    %c0_42 = arith.constant 0 : index
    %c0_43 = arith.constant 0 : index
    %c0_44 = arith.constant 0 : index
    %99 = vector.load %arg8[%c0_42, %c0_43, %c0_44] : memref<1x1x128xf32, #tpu.memory_space<vmem>>, vector<1x1x128xf32>
    %100 = vector.shape_cast %99 : vector<1x1x128xf32> to vector<1x128xf32>
    %c0_45 = arith.constant 0 : index
    %c0_46 = arith.constant 0 : index
    %c0_47 = arith.constant 0 : index
    %101 = vector.load %arg9[%c0_45, %c0_46, %c0_47] : memref<1x1x128xf32, #tpu.memory_space<vmem>>, vector<1x1x128xf32>
    %102 = vector.shape_cast %101 : vector<1x1x128xf32> to vector<1x128xf32>
    %cst_48 = arith.constant dense<0.000000e+00> : vector<16xf32>
    %103 = vector.multi_reduction <add>, %98, %cst_48 [1] : vector<16x128xf32> to vector<16xf32>
    %104 = vector.shape_cast %103 : vector<16xf32> to vector<16x1xf32>
    %cst_49 = arith.constant 1.280000e+02 : f32
    %105 = vector.broadcast %cst_49 : f32 to vector<16x1xf32>
    %106 = arith.divf %104, %105 : vector<16x1xf32>
    %107 = vector.broadcast %106 : vector<16x1xf32> to vector<16x128xf32>
    %108 = arith.subf %98, %107 : vector<16x128xf32>
    %109 = arith.mulf %108, %108 : vector<16x128xf32>
    %cst_50 = arith.constant dense<0.000000e+00> : vector<16xf32>
    %110 = vector.multi_reduction <add>, %109, %cst_50 [1] : vector<16x128xf32> to vector<16xf32>
    %111 = vector.shape_cast %110 : vector<16xf32> to vector<16x1xf32>
    %cst_51 = arith.constant 1.280000e+02 : f32
    %112 = vector.broadcast %cst_51 : f32 to vector<16x1xf32>
    %113 = arith.divf %111, %112 : vector<16x1xf32>
    %114 = vector.broadcast %106 : vector<16x1xf32> to vector<16x128xf32>
    %115 = arith.subf %98, %114 : vector<16x128xf32>
    %cst_52 = arith.constant 9.99999974E-6 : f32
    %116 = vector.broadcast %cst_52 : f32 to vector<16x1xf32>
    %117 = arith.addf %113, %116 : vector<16x1xf32>
    %118 = math.rsqrt %117 : vector<16x1xf32>
    %119 = vector.broadcast %118 : vector<16x1xf32> to vector<16x128xf32>
    %120 = arith.mulf %115, %119 : vector<16x128xf32>
    %121 = vector.broadcast %100 : vector<1x128xf32> to vector<16x128xf32>
    %122 = arith.mulf %120, %121 : vector<16x128xf32>
    %123 = vector.broadcast %102 : vector<1x128xf32> to vector<16x128xf32>
    %124 = arith.addf %122, %123 : vector<16x128xf32>
    %c0_53 = arith.constant 0 : index
    %c0_54 = arith.constant 0 : index
    %c0_55 = arith.constant 0 : index
    %125 = vector.load %arg10[%c0_53, %c0_54, %c0_55] : memref<1x128x2048xbf16, #tpu.memory_space<vmem>>, vector<1x128x2048xbf16>
    %126 = vector.shape_cast %125 : vector<1x128x2048xbf16> to vector<128x2048xbf16>
    %c0_56 = arith.constant 0 : index
    %c0_57 = arith.constant 0 : index
    %c0_58 = arith.constant 0 : index
    %127 = vector.load %arg11[%c0_56, %c0_57, %c0_58] : memref<1x1x2048xf32, #tpu.memory_space<vmem>>, vector<1x1x2048xf32>
    %128 = vector.shape_cast %127 : vector<1x1x2048xf32> to vector<1x2048xf32>
    %129 = arith.truncf %124 : vector<16x128xf32> to vector<16x128xbf16>
    %cst_59 = arith.constant dense<0.000000e+00> : vector<16x2048xf32>
    %130 = tpu.matmul %129, %126, %cst_59 {dimension_numbers = #tpu.dot_dimension_numbers<[1], [0], [0], [1], [0, 0, 1, 1], [], []>} : vector<16x128xbf16>, vector<128x2048xbf16>, vector<16x2048xf32> -> vector<16x2048xf32>
    %131 = vector.broadcast %128 : vector<1x2048xf32> to vector<16x2048xf32>
    %132 = arith.addf %130, %131 : vector<16x2048xf32>
    %cst_60 = arith.constant 0.000000e+00 : f32
    %133 = vector.broadcast %cst_60 : f32 to vector<16x2048xf32>
    %134 = arith.maximumf %132, %133 : vector<16x2048xf32>
    %c0_61 = arith.constant 0 : index
    %c0_62 = arith.constant 0 : index
    %c0_63 = arith.constant 0 : index
    %135 = vector.load %arg12[%c0_61, %c0_62, %c0_63] : memref<1x2048x128xbf16, #tpu.memory_space<vmem>>, vector<1x2048x128xbf16>
    %136 = vector.shape_cast %135 : vector<1x2048x128xbf16> to vector<2048x128xbf16>
    %c0_64 = arith.constant 0 : index
    %c0_65 = arith.constant 0 : index
    %c0_66 = arith.constant 0 : index
    %137 = vector.load %arg13[%c0_64, %c0_65, %c0_66] : memref<1x1x128xf32, #tpu.memory_space<vmem>>, vector<1x1x128xf32>
    %138 = vector.shape_cast %137 : vector<1x1x128xf32> to vector<1x128xf32>
    %139 = arith.truncf %134 : vector<16x2048xf32> to vector<16x2048xbf16>
    %cst_67 = arith.constant dense<0.000000e+00> : vector<16x128xf32>
    %140 = tpu.matmul %139, %136, %cst_67 {dimension_numbers = #tpu.dot_dimension_numbers<[1], [0], [0], [1], [0, 0, 1, 1], [], []>} : vector<16x2048xbf16>, vector<2048x128xbf16>, vector<16x128xf32> -> vector<16x128xf32>
    %141 = vector.broadcast %138 : vector<1x128xf32> to vector<16x128xf32>
    %142 = arith.addf %140, %141 : vector<16x128xf32>
    %143 = arith.addf %124, %142 : vector<16x128xf32>
    %c0_68 = arith.constant 0 : index
    %c0_69 = arith.constant 0 : index
    %c0_70 = arith.constant 0 : index
    %144 = vector.load %arg14[%c0_68, %c0_69, %c0_70] : memref<1x1x128xf32, #tpu.memory_space<vmem>>, vector<1x1x128xf32>
    %145 = vector.shape_cast %144 : vector<1x1x128xf32> to vector<1x128xf32>
    %c0_71 = arith.constant 0 : index
    %c0_72 = arith.constant 0 : index
    %c0_73 = arith.constant 0 : index
    %146 = vector.load %arg15[%c0_71, %c0_72, %c0_73] : memref<1x1x128xf32, #tpu.memory_space<vmem>>, vector<1x1x128xf32>
    %147 = vector.shape_cast %146 : vector<1x1x128xf32> to vector<1x128xf32>
    %cst_74 = arith.constant dense<0.000000e+00> : vector<16xf32>
    %148 = vector.multi_reduction <add>, %143, %cst_74 [1] : vector<16x128xf32> to vector<16xf32>
    %149 = vector.shape_cast %148 : vector<16xf32> to vector<16x1xf32>
    %cst_75 = arith.constant 1.280000e+02 : f32
    %150 = vector.broadcast %cst_75 : f32 to vector<16x1xf32>
    %151 = arith.divf %149, %150 : vector<16x1xf32>
    %152 = vector.broadcast %151 : vector<16x1xf32> to vector<16x128xf32>
    %153 = arith.subf %143, %152 : vector<16x128xf32>
    %154 = arith.mulf %153, %153 : vector<16x128xf32>
    %cst_76 = arith.constant dense<0.000000e+00> : vector<16xf32>
    %155 = vector.multi_reduction <add>, %154, %cst_76 [1] : vector<16x128xf32> to vector<16xf32>
    %156 = vector.shape_cast %155 : vector<16xf32> to vector<16x1xf32>
    %cst_77 = arith.constant 1.280000e+02 : f32
    %157 = vector.broadcast %cst_77 : f32 to vector<16x1xf32>
    %158 = arith.divf %156, %157 : vector<16x1xf32>
    %159 = vector.broadcast %151 : vector<16x1xf32> to vector<16x128xf32>
    %160 = arith.subf %143, %159 : vector<16x128xf32>
    %cst_78 = arith.constant 9.99999974E-6 : f32
    %161 = vector.broadcast %cst_78 : f32 to vector<16x1xf32>
    %162 = arith.addf %158, %161 : vector<16x1xf32>
    %163 = math.rsqrt %162 : vector<16x1xf32>
    %164 = vector.broadcast %163 : vector<16x1xf32> to vector<16x128xf32>
    %165 = arith.mulf %160, %164 : vector<16x128xf32>
    %166 = vector.broadcast %145 : vector<1x128xf32> to vector<16x128xf32>
    %167 = arith.mulf %165, %166 : vector<16x128xf32>
    %168 = vector.broadcast %147 : vector<1x128xf32> to vector<16x128xf32>
    %169 = arith.addf %167, %168 : vector<16x128xf32>
    %c0_79 = arith.constant 0 : index
    %c0_80 = arith.constant 0 : index
    %170 = vector.load %arg19[%c0_79, %c0_80] : memref<16x128xf32, #tpu.memory_space<vmem>>, vector<16x128xf32>
    tpu.vector_store %arg19[%c0_79, %c0_80], %169 {strides = array<i32>} : memref<16x128xf32, #tpu.memory_space<vmem>>, vector<16x128xf32>,
    %c3_i32 = arith.constant 3 : i32
    %171 = arith.cmpi eq, %arg0, %c3_i32 : i32
    %172 = arith.extui %171 : i1 to i32
    %c0_i32_81 = arith.constant 0 : i32
    %173 = arith.cmpi ne, %172, %c0_i32_81 : i32
    scf.if %173 {
      %c0_82 = arith.constant 0 : index
      %c0_83 = arith.constant 0 : index
      %174 = vector.load %arg16[%c0_82, %c0_83] : memref<1x128xf32, #tpu.memory_space<vmem>>, vector<1x128xf32>
      %c0_84 = arith.constant 0 : index
      %c0_85 = arith.constant 0 : index
      %175 = vector.load %arg17[%c0_84, %c0_85] : memref<1x128xf32, #tpu.memory_space<vmem>>, vector<1x128xf32>
      %cst_86 = arith.constant dense<0.000000e+00> : vector<16xf32>
      %176 = vector.multi_reduction <add>, %169, %cst_86 [1] : vector<16x128xf32> to vector<16xf32>
      %177 = vector.shape_cast %176 : vector<16xf32> to vector<16x1xf32>
      %cst_87 = arith.constant 1.280000e+02 : f32
      %178 = vector.broadcast %cst_87 : f32 to vector<16x1xf32>
      %179 = arith.divf %177, %178 : vector<16x1xf32>
      %180 = vector.broadcast %179 : vector<16x1xf32> to vector<16x128xf32>
      %181 = arith.subf %169, %180 : vector<16x128xf32>
      %182 = arith.mulf %181, %181 : vector<16x128xf32>
      %cst_88 = arith.constant dense<0.000000e+00> : vector<16xf32>
      %183 = vector.multi_reduction <add>, %182, %cst_88 [1] : vector<16x128xf32> to vector<16xf32>
      %184 = vector.shape_cast %183 : vector<16xf32> to vector<16x1xf32>
      %cst_89 = arith.constant 1.280000e+02 : f32
      %185 = vector.broadcast %cst_89 : f32 to vector<16x1xf32>
      %186 = arith.divf %184, %185 : vector<16x1xf32>
      %187 = vector.broadcast %179 : vector<16x1xf32> to vector<16x128xf32>
      %188 = arith.subf %169, %187 : vector<16x128xf32>
      %cst_90 = arith.constant 9.99999974E-6 : f32
      %189 = vector.broadcast %cst_90 : f32 to vector<16x1xf32>
      %190 = arith.addf %186, %189 : vector<16x1xf32>
      %191 = math.rsqrt %190 : vector<16x1xf32>
      %192 = vector.broadcast %191 : vector<16x1xf32> to vector<16x128xf32>
      %193 = arith.mulf %188, %192 : vector<16x128xf32>
      %194 = vector.broadcast %174 : vector<1x128xf32> to vector<16x128xf32>
      %195 = arith.mulf %193, %194 : vector<16x128xf32>
      %196 = vector.broadcast %175 : vector<1x128xf32> to vector<16x128xf32>
      %197 = arith.addf %195, %196 : vector<16x128xf32>
      %c0_91 = arith.constant 0 : index
      %c0_92 = arith.constant 0 : index
      %198 = vector.load %arg18[%c0_91, %c0_92] : memref<16x128xf32, #tpu.memory_space<vmem>>, vector<16x128xf32>
      tpu.vector_store %arg18[%c0_91, %c0_92], %197 {strides = array<i32>} : memref<16x128xf32, #tpu.memory_space<vmem>>, vector<16x128xf32>,
    } else {
    }
    return
  }
  func.func @transform_0(%arg0: i32) -> (i32, i32) {
    %c0_i32 = arith.constant 0 : i32
    %c0_i32_0 = arith.constant 0 : i32
    %c0_i32_1 = arith.constant 0 : i32
    return %c0_i32, %c0_i32_0 : i32, i32
  }
  func.func @transform_1(%arg0: i32) -> (i32, i32) {
    %c0_i32 = arith.constant 0 : i32
    %c0_i32_0 = arith.constant 0 : i32
    %c0_i32_1 = arith.constant 0 : i32
    return %c0_i32, %c0_i32_0 : i32, i32
  }
  func.func @transform_2(%arg0: i32) -> (i32, i32) {
    %c0_i32 = arith.constant 0 : i32
    %c0_i32_0 = arith.constant 0 : i32
    %c0_i32_1 = arith.constant 0 : i32
    return %c0_i32, %c0_i32_0 : i32, i32
  }
  func.func @transform_3(%arg0: i32) -> (i32, i32, i32) {
    %c0_i32 = arith.constant 0 : i32
    %c0_i32_0 = arith.constant 0 : i32
    %c0_i32_1 = arith.constant 0 : i32
    return %arg0, %c0_i32, %c0_i32_0 : i32, i32, i32
  }
  func.func @transform_4(%arg0: i32) -> (i32, i32, i32) {
    %c0_i32 = arith.constant 0 : i32
    %c0_i32_0 = arith.constant 0 : i32
    %c0_i32_1 = arith.constant 0 : i32
    return %arg0, %c0_i32, %c0_i32_0 : i32, i32, i32
  }
  func.func @transform_5(%arg0: i32) -> (i32, i32, i32) {
    %c0_i32 = arith.constant 0 : i32
    %c0_i32_0 = arith.constant 0 : i32
    %c0_i32_1 = arith.constant 0 : i32
    return %arg0, %c0_i32, %c0_i32_0 : i32, i32, i32
  }
  func.func @transform_6(%arg0: i32) -> (i32, i32, i32) {
    %c0_i32 = arith.constant 0 : i32
    %c0_i32_0 = arith.constant 0 : i32
    %c0_i32_1 = arith.constant 0 : i32
    return %arg0, %c0_i32, %c0_i32_0 : i32, i32, i32
  }
  func.func @transform_7(%arg0: i32) -> (i32, i32, i32) {
    %c0_i32 = arith.constant 0 : i32
    %c0_i32_0 = arith.constant 0 : i32
    %c0_i32_1 = arith.constant 0 : i32
    return %arg0, %c0_i32, %c0_i32_0 : i32, i32, i32
  }
  func.func @transform_8(%arg0: i32) -> (i32, i32, i32) {
    %c0_i32 = arith.constant 0 : i32
    %c0_i32_0 = arith.constant 0 : i32
    %c0_i32_1 = arith.constant 0 : i32
    return %arg0, %c0_i32, %c0_i32_0 : i32, i32, i32
  }
  func.func @transform_9(%arg0: i32) -> (i32, i32, i32) {
    %c0_i32 = arith.constant 0 : i32
    %c0_i32_0 = arith.constant 0 : i32
    %c0_i32_1 = arith.constant 0 : i32
    return %arg0, %c0_i32, %c0_i32_0 : i32, i32, i32
  }
  func.func @transform_10(%arg0: i32) -> (i32, i32, i32) {
    %c0_i32 = arith.constant 0 : i32
    %c0_i32_0 = arith.constant 0 : i32
    %c0_i32_1 = arith.constant 0 : i32
    return %arg0, %c0_i32, %c0_i32_0 : i32, i32, i32
  }
  func.func @transform_11(%arg0: i32) -> (i32, i32, i32) {
    %c0_i32 = arith.constant 0 : i32
    %c0_i32_0 = arith.constant 0 : i32
    %c0_i32_1 = arith.constant 0 : i32
    return %arg0, %c0_i32, %c0_i32_0 : i32, i32, i32
  }
  func.func @transform_12(%arg0: i32) -> (i32, i32, i32) {
    %c0_i32 = arith.constant 0 : i32
    %c0_i32_0 = arith.constant 0 : i32
    %c0_i32_1 = arith.constant 0 : i32
    return %arg0, %c0_i32, %c0_i32_0 : i32, i32, i32
  }
  func.func @transform_13(%arg0: i32) -> (i32, i32, i32) {
    %c0_i32 = arith.constant 0 : i32
    %c0_i32_0 = arith.constant 0 : i32
    %c0_i32_1 = arith.constant 0 : i32
    return %arg0, %c0_i32, %c0_i32_0 : i32, i32, i32
  }
  func.func @transform_14(%arg0: i32) -> (i32, i32, i32) {
    %c0_i32 = arith.constant 0 : i32
    %c0_i32_0 = arith.constant 0 : i32
    %c0_i32_1 = arith.constant 0 : i32
    return %arg0, %c0_i32, %c0_i32_0 : i32, i32, i32
  }
  func.func @transform_15(%arg0: i32) -> (i32, i32) {
    %c0_i32 = arith.constant 0 : i32
    %c0_i32_0 = arith.constant 0 : i32
    %c0_i32_1 = arith.constant 0 : i32
    return %c0_i32, %c0_i32_0 : i32, i32
  }
  func.func @transform_16(%arg0: i32) -> (i32, i32) {
    %c0_i32 = arith.constant 0 : i32
    %c0_i32_0 = arith.constant 0 : i32
    %c0_i32_1 = arith.constant 0 : i32
    return %c0_i32, %c0_i32_0 : i32, i32
  }
  func.func @transform_17(%arg0: i32) -> (i32, i32) {
    %c0_i32 = arith.constant 0 : i32
    %c0_i32_0 = arith.constant 0 : i32
    %c0_i32_1 = arith.constant 0 : i32
    return %c0_i32, %c0_i32_0 : i32, i32
  }
}

</mosaic_0001>

<bundles_post_ra>
// kernel: midi_transformer_forward.3
= control target key start
LH: loop header
LB: loop body
LE: loop exit
PB: predicated region body
PF: predicated region fallthrough
CT: control target
= control target key end

     0   :  { %s8438_s0 = inlined_call_operand.vmem [shape: f32[16,128], index: 0, kind: input, shape index: {}]   ;;  %s8439_s1 = inlined_call_operand.vmem [shape: f32[1,128], index: 1, kind: input, shape index: {}]   ;;  %s8440_s2 = inlined_call_operand.vmem [shape: f32[1,128], index: 2, kind: input, shape index: {}]   ;;  %s8441_s3 = inlined_call_operand.vmem [shape: bf16[6,128,128], index: 3, kind: input, shape index: {}]   ;;  %s8442_s4 = inlined_call_operand.vmem [shape: f32[6,1,128], index: 4, kind: input, shape index: {}]   ;;  %s8443_s5 = inlined_call_operand.vmem [shape: bf16[6,128,128], index: 5, kind: input, shape index: {}]   ;;  %s8444_s6 = inlined_call_operand.vmem [shape: f32[6,1,128], index: 6, kind: input, shape index: {}]   ;;  %s8445_s7 = inlined_call_operand.vmem [shape: bf16[6,128,128], index: 7, kind: input, shape index: {}]   ;;  %s8446_s8 = inlined_call_operand.vmem [shape: f32[6,1,128], index: 8, kind: input, shape index: {}]   ;;  %s8447_s9 = inlined_call_operand.vmem [shape: bf16[6,128,256], index: 9, kind: input, shape index: {}]   ;;  %s8448_s10 = inlined_call_operand.vmem [shape: f32[6,1,256], index: 10, kind: input, shape index: {}]   ;;  %s8449_s11 = inlined_call_operand.vmem [shape: bf16[6,128,128], index: 11, kind: input, shape index: {}]   ;;  %s8450_s12 = inlined_call_operand.vmem [shape: f32[6,1,128], index: 12, kind: input, shape index: {}]   ;;  %s8451_s13 = inlined_call_operand.vmem [shape: f32[6,1,128], index: 13, kind: input, shape index: {}]   ;;  %s8452_s14 = inlined_call_operand.vmem [shape: f32[6,1,128], index: 14, kind: input, shape index: {}]   ;;  %s8453_s15 = inlined_call_operand.vmem [shape: f32[6,1,128], index: 15, kind: input, shape index: {}]   ;;  %s8454_s16 = inlined_call_operand.vmem [shape: f32[6,1,128], index: 16, kind: input, shape index: {}]   ;;  %s8455_s17 = inlined_call_operand.vmem [shape: f32[6,1,128], index: 17, kind: input, shape index: {}]   ;;  %s8456_s18 = inlined_call_operand.vmem [shape: f32[6,1,128], index: 18, kind: input, shape index: {}]   ;;  %s8457_s19 = inlined_call_operand.vmem [shape: bf16[6,128,2048], index: 19, kind: input, shape index: {}]   ;;  %s8458_s20 = inlined_call_operand.vmem [shape: f32[6,1,2048], index: 20, kind: input, shape index: {}]   ;;  %s8459_s21 = inlined_call_operand.hbm [shape: bf16[6,2048,128], index: 21, kind: input, shape index: {}]   ;;  %s8460_s22 = inlined_call_operand.vmem [shape: f32[6,1,128], index: 22, kind: input, shape index: {}]   ;;  %s8461_s23 = inlined_call_operand.vmem [shape: f32[1,128], index: 23, kind: input, shape index: {}]   ;;  %s8462_s24 = inlined_call_operand.vmem [shape: f32[1,128], index: 24, kind: input, shape index: {}]   ;;  %s8463_s25 = inlined_call_operand.vmem [shape: f32[128,1], index: 25, kind: input, shape index: {}]   ;;  %s8464_s26 = inlined_call_operand.<no memory space> [shape: f32[1,1], index: 26, kind: input, shape index: {}]   ;;  %s8465_s27 = inlined_call_operand.vmem [shape: f32[2,1], index: 27, kind: output, shape index: {}]  }
   0x1   :  { %8477 = sst [smem:[#allocation17_spill]] %s8438_s0  ;;  %v32_v0 = vstv %s8464_s26 }
   0x2   :  { %8478 = sst [smem:[#allocation18_spill]] %s8439_s1  ;;  %33 = vst [vmem:[#allocation4] sm:$0x1] %v32_v0 }
   0x3   :  { %8479 = sst [smem:[#allocation19_spill]] %s8440_s2 }
   0x4   :  { %8480 = sst [smem:[#allocation20_spill]] %s8441_s3 }
   0x5   :  { %8481 = sst [smem:[#allocation21_spill]] %s8442_s4 }
   0x6   :  { %8482 = sst [smem:[#allocation22_spill]] %s8443_s5 }
   0x7   :  { %8483 = sst [smem:[#allocation23_spill]] %s8444_s6 }
   0x8   :  { %8484 = sst [smem:[#allocation24_spill]] %s8445_s7 }
   0x9   :  { %8485 = sst [smem:[#allocation25_spill]] %s8446_s8 }
   0xa   :  { %8486 = sst [smem:[#allocation26_spill]] %s8447_s9 }
   0xb   :  { %8487 = sst [smem:[#allocation27_spill]] %s8448_s10 }
   0xc   :  { %8488 = sst [smem:[#allocation28_spill]] %s8449_s11 }
   0xd   :  { %8489 = sst [smem:[#allocation29_spill]] %s8459_s21 }
   0xe   :  { %8490 = sst [smem:[#allocation30_spill]] %s8461_s23 }
   0xf   :  { %8491 = sst [smem:[#allocation31_spill]] %s8462_s24 }
  0x10   :  { %8492 = sst [smem:[#allocation32_spill]] %s8463_s25 }
  0x11   :  { %8493 = sst [smem:[#allocation33_spill]] %s8465_s27 }
  0x12   :  { %34 = vsyncpa [#allocation6], 0 }
  0x13   :  { %36 = vsyncpa [#allocation6 + $0x1], 0  ;;  %s7511_s8 = smov 0   ;;  %s7513_s30 = smov 0  }
  0x14   :  { %s7515_s9 = smov 0   ;;  %s7517_s5 = smov 0  }
  0x15 LB: > { %8494 = sst [smem:[#allocation8_spill]] %s7345_s30  ;;  %s7530_s26 = sadd.s32 4294967295, %s7353_s5   ;;  %s7353_s5 = sphi %s7517_s5, %s8538_s5   ;;  %s7349_s9 = sphi %s7515_s9, %s8541_s9   ;;  %s7345_s30 = sphi %s7513_s30, %s8540_s30   ;;  %s7341_s8 = sphi %s7511_s8, %s8539_s8  }
  0x16   : > { %8495 = sst [smem:[#allocation9_spill]] %s7349_s9  ;;  %s7533_s28 = sadd.s32 1, %s7353_s5  }
  0x17   : > { %8496 = sst [smem:[#allocation10_spill]] %s7533_s28  ;;  %s577_s0 = ssub.s32 %s7353_s5, %s7533_s28 }
  0x18   : > { %s580_s10 = sadd.s32 1, %s7349_s9  ;;  %p578_p0 = scmp.eq.s32.totalorder %s577_s0, 0 }
  0x19   : > { %p587_p1 = scmp.ne.s32.totalorder %s7349_s9, %s7345_s30  ;;  %p588_p2 = scmp.eq.s32.totalorder %s7353_s5, 0 }
  0x1a   : > { %p593_p3 = scmp.ne.s32.totalorder %s7345_s30, %s7341_s8  ;;  %p594_p5 = scmp.eq.s32.totalorder %s7530_s26, 0 }
  0x1b   : > { %s7543_s29 = scalar_select %p578_p0, %s7349_s9, %s580_s10  }
  0x1c   : > { %p589_p4 = por %p588_p2, %p587_p1  ;;  %p7020_p6 = scmp.lt.s32.totalorder %s7353_s5, 6 }
  0x1d   : > { %8497 = sst [smem:[#allocation11_spill]] %s7543_s29  ;;  %p7547_p7 = por %p594_p5, %p593_p3 }
  0x1e   : > { %s891_s6 = sand.u32 1, %s7349_s9   ;;  %s6527_s2 = sshll.u32 %s7353_s5, 14 }
  0x1f   : > { %s6162_s11 = sshll.u32 %s891_s6, 10  ;;  %s8499_s21 = sld [smem:[#allocation29_spill]] }
  0x20   : > { %s895_s8 = scalar_lea.vmem [#allocation5], %s6162_s11  ;;  %p7560_p8 = pnand %p7020_p6, %p589_p4 }
  0x21   : > { %s902_s0 = sshll.u32 %s895_s8, 4  ;;  %s7565_s29 = scalar_lea.sflag [#allocation6], %s891_s6  ;;  %s7558_s0 = int_to_ptr.vmem [resolvable:$true] %s902_s0 }
  0x22   : > { %p7291_p11 = pneg %p7560_p8 }
  0x25   : > { %s7556_s4 = scalar_lea.hbm %s8499_s21, %s6527_s2  ;;  %s7294_s7 = scalar_lea.hbm %s8499_s21, 98304 }
  0x26   : > { %s7289_s3 = scalar_lea.hbm %s7556_s4, 16384  ;;  %p7295_p0 = scmp.lt.u32.totalorder %s7556_s4, %s8499_s21 }
  0x27   : > { %p7290_p10 = scmp.ne.s32.totalorder %s7556_s4, %s7289_s3  ;;  %p7296_p1 = scmp.lt.u32.totalorder %s7294_s7, %s7289_s3 }
  0x28   : > { %p7298_p3 = scmp.lt.u32.totalorder %s7289_s3, %s7556_s4 }
  0x29   : > { %p7292_p12 = pnand %p7291_p11, %p7290_p10  ;;  %p7297_p2 = por %p7296_p1, %p7295_p0 }
  0x2b   : > { %p7293_p13 = pneg %p7292_p12  ;;  %p7299_p4 = por %p7298_p3, %p7297_p2 }
  0x2d   : > { %p7300_p5 = pnand %p7299_p4, %p7293_p13 }
  0x2f   : > { %7303 = shalt.err (!%p7300_p5)
}
  0x30   : > { %s7304_s6 = scalar_lea.vmem %s7558_s0, 16384  ;;  %s7355_s11 = smov [#allocation5]  }
  0x31   : > { %p7305_p6 = scmp.ne.s32.totalorder %s7558_s0, %s7304_s6  ;;  %s7309_s2 = sshll.u32 %s7355_s11, 4  ;;  %s7310_s2 = int_to_ptr.vmem [resolvable:$false] %s7309_s2 }
  0x32   : > { %s7311_s9 = scalar_lea.vmem %s7310_s2, 32768  ;;  %p7312_p9 = scmp.lt.s32.totalorder %s7558_s0, %s7310_s2 }
  0x33   : > { %p7307_p10 = pnand %p7305_p6, %p7291_p11  ;;  %p7313_p0 = scmp.lt.s32.totalorder %s7311_s9, %s7304_s6 }
  0x35   : > { %p7308_p12 = pneg %p7307_p10  ;;  %p7314_p1 = por %p7313_p0, %p7312_p9 }
  0x37   : > { %p7315_p2 = pnand %p7314_p1, %p7308_p12 }
  0x39   : > { %7318 = shalt.err (!%p7315_p2)
}
  0x3a   : > { %s7356_s3 = smov 64   ;;  %s7357_s7 = smov 4  }
  0x3b   : > { %7019 = dma.hbm_to_vmem [thread:$0]  (!%p7560_p8), %s7556_s4, 16384, %s7558_s0, %s7565_s29, %s7356_s3, %s7356_s3, %s7357_s7  }
  0x3c   : > { %p916_p11 = scmp.lt.s32.totalorder %s7353_s5, 7  ;;  %p8501_p13 = scmp.ge.s32.totalorder %s7353_s5, 1 }
  0x3e   : > { %p917_p3 = pnand %p8501_p13, %p916_p11 }
  0x40   : > { %920 = sbr.rel (%p917_p3) target bundleno = 5533 (0x159d), region = 128 }
  0x47   : > { %s922_s8 = sand.u32 1, %s7345_s30  }
  0x48   : > { %s6166_s6 = sshll.u32 %s922_s8, 10  ;;  %s923_s11 = scalar_lea.sflag [#allocation6], %s922_s8 }
  0x49   : > { %s7597_s2 = scalar_lea.vmem [#allocation5], %s6166_s6 }
  0x4a   : > { %8502 = sst [smem:[#allocation12_spill]] %s7597_s2 }
  0x4b   : > { %7336 = dma.done.wait (%p7547_p7), %s923_s11, 16384  }
  0x4c   : > { %7338 = vsyncadd (%p7547_p7), %s923_s11, 4294950912  ;;  %p1063_p9 = scmp.lt.s32.totalorder %s7530_s26, 5  ;;  %s8504_s7 = sld [smem:[#allocation20_spill]] }
  0x4d   : > { %s8506_s21 = sld [smem:[#allocation22_spill]]  ;;  %s8509_s1 = sld [smem:[#allocation24_spill]] }
  0x4e   : > { %s7605_s29 = scalar_select %p1063_p9, %s7530_s26, 5 }
  0x4f   : > { %s8514_s23 = sld [smem:[#allocation27_spill]]  ;;  %p6181_p7 = scmp.ne.s32.totalorder %s7530_s26, 0 }
  0x50   : > { %s6528_s5 = sshll.u32 %s7605_s29, 6  ;;  %s6531_s2 = sshll.u32 %s7605_s29, 7  ;;  %v1144_v3 = vlaneseq (!%p6181_p7) }
  0x51   : > { %s6175_s27 = sshll.u32 %s7605_s29, 1  ;;  %s1118_s9 = scalar_lea.vmem %s8455_s17, %s7605_s29 }
  0x52   : > { %s7615_s8 = scalar_lea.vmem %s8504_s7, %s6528_s5  ;;  %s1121_s25 = scalar_lea.vmem %s8456_s18, %s7605_s29  ;;  %v1145_v5 = vshrl.u32 (!%p6181_p7), %v1144_v3, 7 }
  0x53   : > { %8505 = sst [smem:[#allocation13_spill]] %s7615_s8  ;;  %s7620_s30 = scalar_lea.vmem %s8506_s21, %s6528_s5 }
  0x54   : > { %8507 = sst [smem:[#allocation14_spill]] %s7620_s30  ;;  %s7629_s10 = scalar_lea.vmem %s8509_s1, %s6528_s5  ;;  %v1146_v7 = vsub.s32 (!%p6181_p7), 0, %v1145_v5 }
  0x55   : > { %8510 = sst [smem:[#allocation15_spill]] %s7629_s10  ;;  %s8512_s21 = sld [smem:[#allocation26_spill]] }
  0x56   : > { %s7645_s8 = scalar_lea.vmem %s8514_s23, %s6175_s27  ;;  %s8515_s1 = sld [smem:[#allocation28_spill]] }
  0x57   : > { %s6533_s6 = sshll.u32 %s7605_s29, 10  ;;  %s6180_s28 = sshll.u32 %s7605_s29, 4 }
  0x58   : > { %s7690_s24 = scalar_lea.vmem %s8458_s20, %s6180_s28  ;;  %s1133_s0 = scalar_lea.vmem %s8460_s22, %s7605_s29 }
  0x59   : > { %1138 = sbr.rel (%p6181_p7) target bundleno = 103 (0x67), region = 136  ;;  %s8516_s3 = sld [smem:[#allocation18_spill]] (!%p6181_p7) }
  0x5a   : > { %s8517_s11 = sld [smem:[#allocation19_spill]] (!%p6181_p7) }
  0x5b   : > { %s7639_s30 = scalar_lea.vmem %s8512_s21, %s6531_s2  ;;  %s7684_s21 = scalar_lea.vmem %s8457_s19, %s6533_s6 }
  0x5c   : > { %8513 = sst [smem:[#allocation16_spill]] %s7639_s30  ;;  %s7650_s10 = scalar_lea.vmem %s8515_s1, %s6528_s5 }
  0x5d   : > { %s1109_s30 = scalar_lea.vmem %s8452_s14, %s7605_s29 }
  0x5f   : > { %v1139_v1 = vld [vmem:[%s8516_s3] sm:$0x1] (!%p6181_p7) }
  0x60   : > { %v1141_v2 = vld [vmem:[%s8517_s11] sm:$0x1]  ;;  %v1140_v4 = vmul.f32 500.0, %v1139_v1 }
  0x62   : > { %v1142_v6 = vadd.f32 %v1141_v2, %v1140_v4 }
  0x64   : > { %v1147_v8 = vrot.slane %v1142_v6, %v1146_v7 }
  0x66   : > { %1150 = vst [vmem:[#allocation2] sm:$0x3] %v1147_v8 }
  0x67 PF: > { %s8518_s27 = sld [smem:[#allocation13_spill]]  ;;  %s8519_s5 = sld [smem:[#allocation14_spill]]  ;;  %v7358_v10 = vmov 0.0   ;;  %vm7359_vm0 = vmmov 0   ;;  %vm1379_vm1 = vcmask 1041408   ;;  %vm1701_vm2 = vcmask 261120  }
  0x68   : > { %6795 = vmatprep.subr.bf16.mxu0 %v7358_v10  ;;  %6815 = vmatprep.subr.bf16.mxu1 %v7358_v10  ;;  %s8520_s4 = sld [smem:[#allocation21_spill]]  ;;  %s8522_s1 = sld [smem:[#allocation16_spill]]  ;;  %vm1854_vm3 = vcmask 57344   ;;  %vm1877_vm4 = vcmask 64512   ;;  %vm2027_vm5 = vcmask 1041409   ;;  %vm2030_vm6 = vcmask 254976  }
  0x69   : > { %6811 = vmatprep.mubr.msk.bf16.mxu0 %vm7359_vm0, %v7358_v10  ;;  %6831 = vmatprep.mubr.msk.bf16.mxu1 %vm7359_vm0, %v7358_v10  ;;  %s8523_s3 = sld [smem:[#allocation15_spill]]  ;;  %s8524_s11 = sld [smem:[#allocation23_spill]]  ;;  %vm2379_vm7 = vcmask 517376   ;;  %vm2718_vm8 = vcmask 779776   ;;  %vm3057_vm9 = vcmask 1042176  }
  0x6a   : > { %s8526_s23 = sld [smem:[#allocation17_spill]]  ;;  %s8527_s2 = scalar_lea.vmem %s8451_s13, %s7605_s29 }
  0x6b   : > { %s7362_s28 = smov 96   ;;  %p6521_p8 = scmp.ne.s32.totalorder %s7530_s26, 5 }
  0x6c   : > { %vm7366_vm10 = vmmov (!%p6521_p8), 0   ;;  %vm5923_vm11 = vcmask (!%p6521_p8), 1024  }
  0x6d   : > { %v7065_v9 = vld [vmem:[%s8518_s27] sm:$0xff]   ;;  %v7066_v11 = vld [vmem:[%s8518_s27 + $0x8] sm:$0xff]   ;;  %v7067_v12 = vld [vmem:[%s8518_s27 + $0x10] sm:$0xff]  }
  0x6e   : > { %6796 = vmatpush3.bf16.msra.mxu0 %v7065_v9  ;;  %v7073_v13 = vld [vmem:[%s8519_s5] sm:$0xff]   ;;  %v7068_v14 = vld [vmem:[%s8518_s27 + $0x18] sm:$0xff]   ;;  %v7074_v15 = vld [vmem:[%s8519_s5 + $0x8] sm:$0xff]   ;;  %s8521_s7 = scalar_lea.vmem %s8520_s4, %s7605_s29  ;;  %s7363_s4 = smov 64  }
  0x6f   : > { %6797 = vmatprep.subr.bf16.mxu0 %v7358_v10  ;;  %6816 = vmatpush3.bf16.msra.mxu1 %v7073_v13  ;;  %v7069_v16 = vld [vmem:[%s8518_s27 + $0x20] sm:$0xff]   ;;  %v7075_v17 = vld [vmem:[%s8519_s5 + $0x10] sm:$0xff]   ;;  %v7070_v18 = vld [vmem:[%s8518_s27 + $0x28] sm:$0xff]  }
  0x70   : > { %6817 = vmatprep.subr.bf16.mxu1 %v7358_v10  ;;  %v7076_v19 = vld [vmem:[%s8519_s5 + $0x18] sm:$0xff]   ;;  %v7071_v20 = vld [vmem:[%s8518_s27 + $0x30] sm:$0xff]   ;;  %v7077_v21 = vld [vmem:[%s8519_s5 + $0x20] sm:$0xff]  }
  0x71   : > { %v7072_v22 = vld [vmem:[%s8518_s27 + $0x38] sm:$0xff]   ;;  %v1151_v23 = vld [vmem:[#allocation2] sm:$0x3]  ;;  %v7078_v24 = vld [vmem:[%s8519_s5 + $0x28] sm:$0xff]   ;;  %s8525_s27 = scalar_lea.vmem %s8524_s11, %s7605_s29  ;;  %s8531_s11 = scalar_lea.vmem %s8453_s15, %s7605_s29 }
  0x72   : > { %6798 = vmatpush3.bf16.msra.mxu0 %v7066_v11  ;;  %v1169_v25 = vpack.c.bf16 %v1151_v23, %v1151_v23  ;;  %v7079_v26 = vld [vmem:[%s8519_s5 + $0x30] sm:$0xff]   ;;  %v7080_v27 = vld [vmem:[%s8519_s5 + $0x38] sm:$0xff]   ;;  %v6182_v28 = vld [vmem:[%s8521_s7] ss:$0 sm:$0xff]  ;;  %v7360_v11 = vmov 0   ;;  %s7364_s7 = smov 32  }
  0x73   : > { %6799 = vmatprep.subr.bf16.mxu0 %v7358_v10  ;;  %6818 = vmatpush3.bf16.msra.mxu1 %v7074_v15  ;;  %v6191_v35 = vld [vmem:[%s8525_s27] ss:$0 sm:$0xff]  ;;  %v7083_v44 = vld [vmem:[%s8522_s1 + $0x4] ss:$8 sps:$4 sm:$0xff]   ;;  %v7086_v45 = vld [vmem:[%s8522_s1 + $0x14] ss:$8 sps:$4 sm:$0xff]  }
  0x74   : > { %6819 = vmatprep.subr.bf16.mxu1 %v7358_v10  ;;  %v7081_v43 = vld [vmem:[%s8522_s1] ss:$8 sps:$4 sm:$0xff]   ;;  %v7084_v47 = vld [vmem:[%s8522_s1 + $0x10] ss:$8 sps:$4 sm:$0xff]   ;;  %v7090_v49 = vld [vmem:[%s8522_s1 + $0x24] ss:$8 sps:$4 sm:$0xff]  }
  0x75   : > { %v7087_v46 = vld [vmem:[%s8523_s3] sm:$0xff]   ;;  %v7091_v48 = vld [vmem:[%s8523_s3 + $0x8] sm:$0xff]   ;;  %v7094_v51 = vld [vmem:[%s8522_s1 + $0x34] ss:$8 sps:$4 sm:$0xff]   ;;  %s8528_s27 = sld [smem:[#allocation25_spill]] }
  0x76   : > { %6800 = vmatpush3.bf16.msra.mxu0 %v7067_v12  ;;  %v7088_v50 = vld [vmem:[%s8522_s1 + $0x20] ss:$8 sps:$4 sm:$0xff]   ;;  %v7092_v52 = vld [vmem:[%s8522_s1 + $0x30] ss:$8 sps:$4 sm:$0xff]   ;;  %v7098_v60 = vld [vmem:[%s8522_s1 + $0x44] ss:$8 sps:$4 sm:$0xff]  }
  0x77   : > { %6801 = vmatprep.subr.bf16.mxu0 %v7358_v10  ;;  %6820 = vmatpush3.bf16.msra.mxu1 %v7075_v17  ;;  %v7095_v58 = vld [vmem:[%s8523_s3 + $0x10] sm:$0xff]   ;;  %v7099_v59 = vld [vmem:[%s8523_s3 + $0x18] sm:$0xff]   ;;  %v7096_v61 = vld [vmem:[%s8522_s1 + $0x40] ss:$8 sps:$4 sm:$0xff]  }
  0x78   : > { %6821 = vmatprep.subr.bf16.mxu1 %v7358_v10  ;;  %v7103_v62 = vld [vmem:[%s8523_s3 + $0x20] sm:$0xff]   ;;  %v7102_v63 = vld [vmem:[%s8522_s1 + $0x54] ss:$8 sps:$4 sm:$0xff]   ;;  %v7100_v0 = vld [vmem:[%s8522_s1 + $0x50] ss:$8 sps:$4 sm:$0xff]  }
  0x79   : > { %v7107_v1 = vld [vmem:[%s8523_s3 + $0x28] sm:$0xff]   ;;  %v7111_v4 = vld [vmem:[%s8523_s3 + $0x30] sm:$0xff]   ;;  %v1408_v7 = vld [vmem:[%s8526_s23] sm:$0xff] }
  0x7a   : > { %6802 = vmatpush3.bf16.msra.mxu0 %v7068_v14  ;;  %v7106_v2 = vld [vmem:[%s8522_s1 + $0x64] ss:$8 sps:$4 sm:$0xff]   ;;  %v7104_v3 = vld [vmem:[%s8522_s1 + $0x60] ss:$8 sps:$4 sm:$0xff]   ;;  %v7108_v5 = vld [vmem:[%s8522_s1 + $0x70] ss:$8 sps:$4 sm:$0xff]  }
  0x7b   : > { %6803 = vmatprep.subr.bf16.mxu0 %v7358_v10  ;;  %6822 = vmatpush3.bf16.msra.mxu1 %v7076_v19  ;;  %v7110_v6 = vld [vmem:[%s8522_s1 + $0x74] ss:$8 sps:$4 sm:$0xff]   ;;  %v1409_v8 = vld [vmem:[%s8526_s23 + $0x8] sm:$0xff]  ;;  %v6200_v17 = vld [vmem:[%s8527_s2] ss:$0 sm:$0xff]  ;;  %s8529_s5 = scalar_lea.vmem %s8528_s27, %s7605_s29  ;;  %s8532_s27 = scalar_lea.vmem %s8454_s16, %s7605_s29 }
  0x7c   : > { %6823 = vmatprep.subr.bf16.mxu1 %v7358_v10  ;;  %v7112_v9 = vld [vmem:[%s8523_s3 + $0x38] sm:$0xff]   ;;  %v1539_v12 = vpack.c.bf16 %v1409_v8, %v1408_v7  ;;  %v6201_v19 = vld [vmem:[%s1109_s30] ss:$0 sm:$0xff]  ;;  %s8530_s3 = scalar_lea.vmem %s8450_s12, %s7605_s29 }
  0x7e   : > { %6804 = vmatpush3.bf16.msra.mxu0 %v7069_v16 }
  0x7f   : > { %6805 = vmatprep.subr.bf16.mxu0 %v7358_v10  ;;  %6824 = vmatpush3.bf16.msra.mxu1 %v7077_v21 }
  0x80   : > { %6825 = vmatprep.subr.bf16.mxu1 %v7358_v10 }
  0x82   : > { %6806 = vmatpush3.bf16.msra.mxu0 %v7070_v18 }
  0x83   : > { %6807 = vmatprep.subr.bf16.mxu0 %v7358_v10  ;;  %6826 = vmatpush3.bf16.msra.mxu1 %v7078_v24 }
  0x84   : > { %6827 = vmatprep.subr.bf16.mxu1 %v7358_v10 }
  0x86   : > { %6808 = vmatpush3.bf16.msra.mxu0 %v7071_v20 }
  0x87   : > { %6809 = vmatprep.subr.bf16.mxu0 %v7358_v10  ;;  %6828 = vmatpush3.bf16.msra.mxu1 %v7079_v26  ;;  %v1538_v26 = vld [vmem:[%s7645_s8] sm:$0x3] }
  0x88   : > { %6829 = vmatprep.subr.bf16.mxu1 %v7358_v10 }
  0x8a   : > { %6810 = vmatpush3.bf16.msra.mxu0 %v7072_v22 }
  0x8b   : > { %6835 = vmatprep.subr.bf16.mxu0 %v7358_v10  ;;  %6830 = vmatpush3.bf16.msra.mxu1 %v7080_v27 }
  0x8c   : > { %1631 = vmatprep.subr.bf16.mxu1 %v7083_v44 }
  0x8d   : > { %6812 = vmatmul.mubr.bf16.vlgmr.msra.gmra.mrb[0].mxu0 %v1169_v25 }
  0x8e   : > { %6851 = vmatprep.mubr.msk.bf16.mxu0 %vm7359_vm0, %v7358_v10  ;;  %6836 = vmatpush3.bf16.msra.mxu0 %v7087_v46 }
  0x8f   : > { %6837 = vmatprep.subr.bf16.mxu0 %v7358_v10 }
  0x92   : > { %6838 = vmatpush3.bf16.msra.mxu0 %v7091_v48 }
  0x93   : > { %6839 = vmatprep.subr.bf16.mxu0 %v7358_v10 }
  0x96   : > { %6840 = vmatpush3.bf16.msra.mxu0 %v7095_v58 }
  0x97   : > { %6841 = vmatprep.subr.bf16.mxu0 %v7358_v10 }
  0x9a   : > { %6842 = vmatpush3.bf16.msra.mxu0 %v7099_v59 }
  0x9b   : > { %6843 = vmatprep.subr.bf16.mxu0 %v7358_v10 }
  0x9e   : > { %6844 = vmatpush3.bf16.msra.mxu0 %v7103_v62 }
  0x9f   : > { %6845 = vmatprep.subr.bf16.mxu0 %v7358_v10 }
  0xa2   : > { %6846 = vmatpush3.bf16.msra.mxu0 %v7107_v1 }
  0xa3   : > { %6847 = vmatprep.subr.bf16.mxu0 %v7358_v10 }
  0xa6   : > { %6848 = vmatpush3.bf16.msra.mxu0 %v7111_v4 }
  0xa7   : > { %6849 = vmatprep.subr.bf16.mxu0 %v7358_v10 }
  0xaa   : > { %6850 = vmatpush3.bf16.msra.mxu0 %v7112_v9 }
  0xab   : > { %6895 = vmatprep.subr.mxu0 %v7358_v10 }
 0x160   : > { %v1258_v29 = vpop.f32.mrb[0].mxu0 }
 0x161   : > { %v1259_v30 = vadd.f32 %v6182_v28, %v1258_v29  ;;  %v6813_v31 = vpop.f32.mrb[1].mxu0 }
 0x162   : > { %v1261_v32 = vpop.f32.mrb[2].mxu0 }
 0x163   : > { %v1281_v33 = vpack.c.bf16 %v1259_v30, %v1259_v30  ;;  %v6814_v34 = vpop.f32.mrb[3].mxu0 }
 0x165   : > { %6832 = vmatmul.mubr.bf16.vlgmr.msra.gmra.mrb[0].mxu1 %v1281_v33 }
 0x166   : > { %1632 = vmatpush1.bf16.msra.mxu1 %v7081_v43  ;;  %1663 = vmatprep.mubr.bf16.mxu1 %v7360_v11 }
 0x167   : > { %1633 = vmatprep.subr.bf16.mxu1 %v7086_v45 }
 0x16a   : > { %1634 = vmatpush1.bf16.msra.mxu1 %v7084_v47 }
 0x16b   : > { %1635 = vmatprep.subr.bf16.mxu1 %v7090_v49 }
 0x16e   : > { %1636 = vmatpush1.bf16.msra.mxu1 %v7088_v50 }
 0x16f   : > { %1637 = vmatprep.subr.bf16.mxu1 %v7094_v51 }
 0x172   : > { %1638 = vmatpush1.bf16.msra.mxu1 %v7092_v52 }
 0x173   : > { %1639 = vmatprep.subr.bf16.mxu1 %v7098_v60 }
 0x176   : > { %1640 = vmatpush1.bf16.msra.mxu1 %v7096_v61 }
 0x177   : > { %1641 = vmatprep.subr.bf16.mxu1 %v7102_v63 }
 0x17a   : > { %1642 = vmatpush1.bf16.msra.mxu1 %v7100_v0 }
 0x17b   : > { %1643 = vmatprep.subr.bf16.mxu1 %v7106_v2 }
 0x17e   : > { %1644 = vmatpush1.bf16.msra.mxu1 %v7104_v3 }
 0x17f   : > { %1645 = vmatprep.subr.bf16.mxu1 %v7110_v6 }
 0x182   : > { %1646 = vmatpush1.bf16.msra.mxu1 %v7108_v5 }
 0x183   : > { %6855 = vmatprep.subr.mxu1 %v7358_v10 }
 0x185   : > { %1664 = vmatmul.mubr.bf16.vlgmr.msra.gmra.mrb[4].mxu1 %v1539_v12 }
 0x186   : > { %6857 = vmatprep.mubr.msk.f32.mxu1 %vm7359_vm0, %v7358_v10 }
 0x238   : > { %v1370_v36 = vpop.f32.mrb[0].mxu1 }
 0x239   : > { %v1371_v37 = vadd.f32 %v6191_v35, %v1370_v36  ;;  %v6833_v38 = vpop.f32.mrb[1].mxu1 }
 0x23a   : > { %v1373_v39 = vpop.f32.mrb[2].mxu1 }
 0x23b   : > { %v6834_v40 = vpop.f32.mrb[3].mxu1  ;;  %v1376_v41 = vadd.f32 %v1371_v37, %v1151_v23  ;;  %v1541_v23 = vlaneseq  ;;  %v7361_v37 = vmov 1966171168  }
 0x23c   : > { %v1676_v38 = vunpack.c.l.s4 %v7361_v37  ;;  %v6202_v40 = vld [vmem:[%s8529_s5] ss:$0 sm:$0xff]  ;;  %s8533_s5 = sld [smem:[#allocation12_spill]] }
 0x23d   : > { %v1380_v42 = vsel %vm1379_vm1, %v1376_v41, 0.0  ;;  %v7812_v24 = vshrl.u32 %v1541_v23, 7 }
 0x23e   : > { %1381 = vadd.xlane.f32.xlu0 %v1380_v42  ;;  %v1677_v39 = vunpack.c.0.s8 %v1676_v38 }
 0x23f   : > { %v7815_v25 = vsub.s32 0, %v7812_v24  ;;  %v7819_v27 = vsub.s32 1, %v7812_v24 }
 0x241   : > { %v1544_v28 = vrot.slane %v1538_v26, %v7815_v25  ;;  %v1548_v30 = vrot.slane %v1538_v26, %v7819_v27 }
 0x258   : > { %v1665_v29 = vpop.f32.mrb[4].mxu1 }
 0x259   : > { %v7823_v31 = vadd.f32 %v1665_v29, %v1544_v28  ;;  %v1667_v32 = vpop.f32.mrb[5].mxu1 }
 0x25a   : > { %v1669_v33 = vpop.f32.mrb[6].mxu1 }
 0x25b   : > { %v7825_v34 = vadd.f32 %v1669_v33, %v1544_v28  ;;  %v1671_v35 = vpop.f32.mrb[7].mxu1  ;;  %6856 = vmatpush3.xpose.msk.msra.mxu1 %vm1701_vm2, %v7823_v31 }
 0x25c   : > { %v7827_v36 = vadd.f32 %v1671_v35, %v1548_v30  ;;  %6860 = vmatprep.subr.mxu1 %v7358_v10 }
 0x2cb   : > { %v1382_v53 = vpop.xlane.xlu0 %1381 }
 0x2cc   : > { %v1384_v54 = vmul.f32 0.0078125, %v1382_v53  ;;  %v7844_v53 = vadd.f32 %v1667_v32, %v1548_v30 }
 0x2ce   : > { %v1385_v55 = vsub.f32 %v1376_v41, %v1384_v54  ;;  %v1680_v41 = vsub.s32 %v1677_v39, %v7812_v24 }
 0x2d0   : > { %v1386_v56 = vmul.f32 %v1385_v55, %v1385_v55 }
 0x2d2   : > { %v1387_v57 = vsel %vm1379_vm1, %v1386_v56, 0.0 }
 0x2d3   : > { %1388 = vadd.xlane.f32.xlu0 %v1387_v57 }
 0x360   : > { %v1389_v13 = vpop.xlane.xlu0 %1388 }
 0x361   : > { %v1390_v14 = vmul.f32 0.0078125, %v1389_v13 }
 0x363   : > { %v1391_v15 = vadd.f32 1e-05, %v1390_v14 }
 0x365   : > { %7249 = vrsqrt.f32 %v1391_v15 }
 0x36f   : > { %v7250_v16 = vpop.eup %7249 }
 0x370   : > { %v1393_v18 = vmul.f32 %v7250_v16, %v1385_v55 }
 0x372   : > { %v1400_v20 = vmul.f32 %v6200_v17, %v1393_v18 }
 0x374   : > { %v7806_v21 = vadd.f32 %v6201_v19, %v1400_v20 }
 0x376   : > { %v1427_v22 = vpack.c.bf16 %v7806_v21, %v7806_v21 }
 0x378   : > { %6852 = vmatmul.mubr.bf16.vlgmr.msra.gmra.mrb[4].mxu0 %v1427_v22 }
 0x379   : > { %6897 = vmatprep.mubr.msk.f32.mxu0 %vm7359_vm0, %v7358_v10 }
 0x44b   : > { %v1516_v42 = vpop.f32.mrb[4].mxu0 }
 0x44c   : > { %v1517_v43 = vadd.f32 %v6202_v40, %v1516_v42  ;;  %v6853_v44 = vpop.f32.mrb[5].mxu0 }
 0x44d   : > { %v1519_v45 = vpop.f32.mrb[6].mxu0 }
 0x44e   : > { %v1681_v46 = vrot.slane %v1517_v43, %v1680_v41  ;;  %v6854_v47 = vpop.f32.mrb[7].mxu0 }
 0x450   : > { %v1682_v48 = vcombine.high %v1681_v46, %v1681_v46  ;;  %v1689_v49 = vrot.slane %v1681_v46, %v1680_v41 }
 0x452   : > { %v1696_v50 = vrot.slane %v1682_v48, %v1680_v41  ;;  %v1699_v51 = vmul.f32 0.17677669, %v1689_v49 }
 0x454   : > { %6858 = vmatmul.mubr.msk.f32.vlgmr.msra.gmra.mrb[8].mxu1 %vm1701_vm2, %v1699_v51  ;;  %v1700_v52 = vmul.f32 0.17677669, %v1696_v50  ;;  %v7854_v60 = vrot.slane %v1699_v51, %v7815_v25 }
 0x455   : > { %6861 = vmatpush3.xpose.msk.msra.mxu1 %vm1701_vm2, %v7825_v34  ;;  %6862 = vmatprep.mubr.msk.f32.mxu1 %vm7359_vm0, %v7358_v10 }
 0x456   : > { %6865 = vmatprep.subr.mxu1 %v7358_v10  ;;  %v7865_v7 = vrot.slane %v1700_v52, %v7815_v25 }
 0x458   : > { %6863 = vmatmul.mubr.msk.f32.vlgmr.msra.gmra.mrb[10].mxu1 %vm1701_vm2, %v1700_v52 }
 0x459   : > { %6866 = vmatpush3.msra.mxu1 %v7844_v53  ;;  %6867 = vmatprep.mubr.msk.f32.mxu1 %vm7359_vm0, %v7358_v10 }
 0x45a   : > { %6870 = vmatprep.subr.mxu1 %v7358_v10 }
 0x527   : > { %v1774_v54 = vpop.f32.mrb[8].mxu1 }
 0x528   : > { %v6859_v55 = vpop.f32.mrb[9].mxu1  ;;  %v1855_v56 = vsel %vm1854_vm3, %v1774_v54, -inf }
 0x529   : > { %1856 = vmax.xlane.f32.xlu1 %v1855_v56 }
 0x52b   : > { %v1850_v57 = vpop.f32.mrb[10].mxu1 }
 0x52c   : > { %v6864_v58 = vpop.f32.mrb[11].mxu1  ;;  %v1858_v59 = vsel %vm1854_vm3, %v1850_v57, -inf }
 0x52d   : > { %1859 = vmax.xlane.f32.xlu1 %v1858_v59 }
 0x53e   : > { %2036 = vrot.lane.b32.xlu1 %v7854_v60, %s7362_s28 }
 0x5b6   : > { %v1857_v61 = vpop.xlane.xlu1 %1856 }
 0x5b7   : > { %v1861_v62 = vsub.f32 %v1774_v54, %v1857_v61 }
 0x5b9   : > { %v1863_v63 = vmul.f32 1.442695, %v1861_v62 }
 0x5ba   : > { %v1860_v0 = vpop.xlane.xlu1 %1859 }
 0x5bb   : > { %7251 = vpow2.f32 %v1863_v63  ;;  %v1862_v1 = vsub.f32 %v1850_v57, %v1860_v0 }
 0x5bd   : > { %v1865_v2 = vmul.f32 1.442695, %v1862_v1 }
 0x5be   : > { %v2037_v8 = vpop.permute.xlu1 %2036 }
 0x5bf   : > { %7253 = vpow2.f32 %v1865_v2 }
 0x5c5   : > { %v7252_v3 = vpop.eup %7251 }
 0x5c6   : > { %v1867_v4 = vsel %vm1854_vm3, %v7252_v3, 0.0 }
 0x5c7   : > { %1868 = vadd.xlane.f32.xlu0 %v1867_v4 }
 0x5c9   : > { %v7254_v5 = vpop.eup %7253 }
 0x5ca   : > { %v1870_v6 = vsel %vm1854_vm3, %v7254_v5, 0.0 }
 0x5cb   : > { %1871 = vadd.xlane.f32.xlu1 %v1870_v6 }
 0x5dc   : > { %2120 = vrot.lane.b32.xlu1 %v7825_v34, %s7362_s28 }
 0x5dd   : > { %2038 = vrot.lane.b32.xlu0 %v7823_v31, %s7362_s28 }
 0x5e0   : > { %2118 = vrot.lane.b32.xlu1 %v7865_v7, %s7362_s28 }
 0x654   : > { %v1869_v9 = vpop.xlane.xlu0 %1868 }
 0x655   : > { %7255 = vrcp.f32 %v1869_v9 }
 0x658   : > { %v1872_v12 = vpop.xlane.xlu1 %1871  ;;  %v2039_v17 = vpop.permute.xlu0 %2038 }
 0x659   : > { %7257 = vrcp.f32 %v1872_v12 }
 0x65c   : > { %v2121_v18 = vpop.permute.xlu1 %2120 }
 0x65f   : > { %v7256_v13 = vpop.eup %7255 }
 0x660   : > { %v1875_v14 = vmul.f32 %v7256_v13, %v7252_v3  ;;  %v2119_v19 = vpop.permute.xlu1 %2118 }
 0x662   : > { %6868 = vmatmul.mubr.msk.f32.vlgmr.msra.gmra.mrb[12].mxu1 %vm1877_vm4, %v1875_v14 }
 0x663   : > { %v7258_v15 = vpop.eup %7257  ;;  %6871 = vmatpush3.msra.mxu1 %v7827_v36  ;;  %6872 = vmatprep.mubr.msk.f32.mxu1 %vm7359_vm0, %v7358_v10 }
 0x664   : > { %v1876_v16 = vmul.f32 %v7258_v15, %v7254_v5  ;;  %6875 = vmatprep.subr.mxu1 %v7358_v10 }
 0x666   : > { %6873 = vmatmul.mubr.msk.f32.vlgmr.msra.gmra.mrb[14].mxu1 %vm1877_vm4, %v1876_v16 }
 0x667   : > { %6877 = vmatprep.mubr.msk.f32.mxu1 %vm7359_vm0, %v7358_v10 }
 0x66a   : > { %6876 = vmatpush3.xpose.msk.msra.mxu1 %vm1701_vm2, %v2039_v17 }
 0x66b   : > { %6880 = vmatprep.subr.mxu1 %v7358_v10 }
 0x66d   : > { %6878 = vmatmul.mubr.msk.f32.vlgmr.msra.gmra.mrb[16].mxu1 %vm1701_vm2, %v2037_v8 }
 0x66e   : > { %6881 = vmatpush3.xpose.msk.msra.mxu1 %vm1701_vm2, %v2121_v18  ;;  %6882 = vmatprep.mubr.msk.f32.mxu1 %vm7359_vm0, %v7358_v10 }
 0x66f   : > { %6885 = vmatprep.subr.mxu1 %v7358_v10 }
 0x671   : > { %6883 = vmatmul.mubr.msk.f32.vlgmr.msra.gmra.mrb[18].mxu1 %vm1701_vm2, %v2119_v19 }
 0x672   : > { %6887 = vmatprep.mubr.msk.f32.mxu1 %vm7359_vm0, %v7358_v10 }
 0x735   : > { %v1947_v20 = vpop.f32.mrb[12].mxu1 }
 0x736   : > { %v6869_v22 = vpop.f32.mrb[13].mxu1 }
 0x739   : > { %v2020_v23 = vpop.f32.mrb[14].mxu1 }
 0x73a   : > { %v2026_v26 = vrot.slane %v2020_v23, 7  ;;  %v6874_v28 = vpop.f32.mrb[15].mxu1 }
 0x73c   : > { %v2028_v29 = vsel %vm2027_vm5, %v2026_v26, %v1947_v20 }
 0x73d   : > { %2031 = vst.msk [vmem:[#allocation3] sm:$0x3] %vm2030_vm6, %v2028_v29 }
 0x740   : > { %v2110_v30 = vpop.f32.mrb[16].mxu1 }
 0x741   : > { %v6879_v32 = vpop.f32.mrb[17].mxu1  ;;  %v2196_v33 = vsel %vm1854_vm3, %v2110_v30, -inf }
 0x742   : > { %2197 = vmax.xlane.f32.xlu0 %v2196_v33 }
 0x744   : > { %v2192_v35 = vpop.f32.mrb[18].mxu1 }
 0x745   : > { %v6884_v37 = vpop.f32.mrb[19].mxu1  ;;  %v2199_v38 = vsel %vm1854_vm3, %v2192_v35, -inf }
 0x746   : > { %2200 = vmax.xlane.f32.xlu1 %v2199_v38 }
 0x757   : > { %2296 = vrot.lane.b32.xlu1 %v7827_v36, %s7362_s28 }
 0x75b   : > { %2461 = vrot.lane.b32.xlu1 %v7825_v34, %s7363_s4 }
 0x75f   : > { %2383 = vrot.lane.b32.xlu1 %v7823_v31, %s7363_s4 }
 0x763   : > { %2381 = vrot.lane.b32.xlu1 %v7854_v60, %s7363_s4 }
 0x7cf   : > { %v2198_v39 = vpop.xlane.xlu0 %2197 }
 0x7d0   : > { %v2202_v40 = vsub.f32 %v2110_v30, %v2198_v39 }
 0x7d2   : > { %v2204_v41 = vmul.f32 1.442695, %v2202_v40 }
 0x7d3   : > { %v2201_v42 = vpop.xlane.xlu1 %2200 }
 0x7d4   : > { %7259 = vpow2.f32 %v2204_v41  ;;  %v2203_v49 = vsub.f32 %v2192_v35, %v2201_v42 }
 0x7d6   : > { %v2206_v50 = vmul.f32 1.442695, %v2203_v49 }
 0x7d7   : > { %v2297_v43 = vpop.permute.xlu1 %2296 }
 0x7d8   : > { %7261 = vpow2.f32 %v2206_v50 }
 0x7db   : > { %v2462_v44 = vpop.permute.xlu1 %2461 }
 0x7de   : > { %v7260_v45 = vpop.eup %7259 }
 0x7df   : > { %v2384_v46 = vpop.permute.xlu1 %2383  ;;  %v2208_v47 = vsel %vm1854_vm3, %v7260_v45, 0.0 }
 0x7e0   : > { %2209 = vadd.xlane.f32.xlu0 %v2208_v47  ;;  %6896 = vmatpush3.xpose.msk.msra.mxu0 %vm1701_vm2, %v2384_v46 }
 0x7e1   : > { %6905 = vmatprep.subr.mxu0 %v7358_v10 }
 0x7e2   : > { %v7262_v51 = vpop.eup %7261 }
 0x7e3   : > { %v2382_v48 = vpop.permute.xlu1 %2381  ;;  %v2211_v52 = vsel %vm1854_vm3, %v7262_v51, 0.0 }
 0x7e4   : > { %6898 = vmatmul.mubr.msk.f32.vlgmr.msra.gmra.mrb[8].mxu0 %vm1701_vm2, %v2382_v48 }
 0x7e5   : > { %6907 = vmatprep.mubr.msk.f32.mxu0 %vm7359_vm0, %v7358_v10 }
 0x7f6   : > { %2219 = vrot.lane.b32.xlu0 %v7844_v53, %s7362_s28 }
 0x815   : > { %2212 = vadd.xlane.f32.xlu0 %v2211_v52 }
 0x82b   : > { %2459 = vrot.lane.b32.xlu0 %v7865_v7, %s7363_s4 }
 0x86d   : > { %v2210_v54 = vpop.xlane.xlu0 %2209 }
 0x86e   : > { %7263 = vrcp.f32 %v2210_v54 }
 0x871   : > { %v2220_v55 = vpop.permute.xlu0 %2219 }
 0x872   : > { %6886 = vmatpush3.msra.mxu1 %v2220_v55 }
 0x873   : > { %6890 = vmatprep.subr.mxu1 %v7358_v10 }
 0x878   : > { %v7264_v56 = vpop.eup %7263 }
 0x879   : > { %v2216_v57 = vmul.f32 %v7264_v56, %v7260_v45 }
 0x87b   : > { %6888 = vmatmul.mubr.msk.f32.vlgmr.msra.gmra.mrb[20].mxu1 %vm1877_vm4, %v2216_v57 }
 0x87c   : > { %6891 = vmatpush3.msra.mxu1 %v2297_v43  ;;  %6892 = vmatprep.mubr.msk.f32.mxu1 %vm7359_vm0, %v7358_v10 }
 0x87d   : > { %6900 = vmatprep.subr.mxu1 %v7358_v10 }
 0x8a2   : > { %v2213_v58 = vpop.xlane.xlu0 %2212 }
 0x8a3   : > { %7265 = vrcp.f32 %v2213_v58 }
 0x8a6   : > { %v2460_v62 = vpop.permute.xlu0 %2459 }
 0x8ad   : > { %v7266_v59 = vpop.eup %7265 }
 0x8ae   : > { %v2217_v61 = vmul.f32 %v7266_v59, %v7262_v51 }
 0x8b0   : > { %6893 = vmatmul.mubr.msk.f32.vlgmr.msra.gmra.mrb[22].mxu1 %vm1877_vm4, %v2217_v61 }
 0x8b1   : > { %6901 = vmatpush3.xpose.msk.msra.mxu1 %vm1701_vm2, %v2462_v44  ;;  %6902 = vmatprep.mubr.msk.f32.mxu1 %vm7359_vm0, %v7358_v10 }
 0x8b2   : > { %6910 = vmatprep.subr.mxu1 %v7358_v10 }
 0x8b4   : > { %6903 = vmatmul.mubr.msk.f32.vlgmr.msra.gmra.mrb[24].mxu1 %vm1701_vm2, %v2460_v62 }
 0x8b5   : > { %6912 = vmatprep.mubr.msk.f32.mxu1 %vm7359_vm0, %v7358_v10 }
 0x8b7   : > { %v2455_v63 = vpop.f32.mrb[8].mxu0 }
 0x8b8   : > { %v6899_v0 = vpop.f32.mrb[9].mxu0  ;;  %v2537_v1 = vsel %vm1854_vm3, %v2455_v63, -inf }
 0x8b9   : > { %2538 = vmax.xlane.f32.xlu1 %v2537_v1 }
 0x8ca   : > { %2559 = vrot.lane.b32.xlu1 %v7844_v53, %s7363_s4 }
 0x8ce   : > { %2800 = vrot.lane.b32.xlu1 %v7825_v34, %s7364_s7 }
 0x8d2   : > { %2722 = vrot.lane.b32.xlu1 %v7823_v31, %s7364_s7 }
 0x8d6   : > { %2720 = vrot.lane.b32.xlu1 %v7854_v60, %s7364_s7 }
 0x946   : > { %v2539_v2 = vpop.xlane.xlu1 %2538 }
 0x947   : > { %v2543_v6 = vsub.f32 %v2455_v63, %v2539_v2 }
 0x949   : > { %v2545_v8 = vmul.f32 1.442695, %v2543_v6 }
 0x94a   : > { %v2560_v3 = vpop.permute.xlu1 %2559 }
 0x94b   : > { %6906 = vmatpush3.msra.mxu0 %v2560_v3  ;;  %7267 = vpow2.f32 %v2545_v8 }
 0x94c   : > { %6915 = vmatprep.subr.mxu0 %v7358_v10 }
 0x94e   : > { %v2291_v4 = vpop.f32.mrb[20].mxu1  ;;  %v2801_v23 = vpop.permute.xlu1 %2800 }
 0x94f   : > { %v6889_v5 = vpop.f32.mrb[21].mxu1 }
 0x952   : > { %v2723_v29 = vpop.permute.xlu1 %2722 }
 0x955   : > { %v7268_v60 = vpop.eup %7267 }
 0x956   : > { %v2549_v16 = vsel %vm1854_vm3, %v7268_v60, 0.0  ;;  %v2721_v33 = vpop.permute.xlu1 %2720 }
 0x983   : > { %v2368_v9 = vpop.f32.mrb[22].mxu1 }
 0x984   : > { %v2374_v12 = vrot.slane %v2368_v9, 7  ;;  %v6894_v13 = vpop.f32.mrb[23].mxu1 }
 0x985   : > { %v7113_v13 = vld [vmem:[%s7650_s10] sm:$0xff]  }
 0x986   : > { %v2375_v34 = vsel %vm2027_vm5, %v2374_v12, %v2291_v4 }
 0x987   : > { %v2533_v14 = vpop.f32.mrb[24].mxu1 }
 0x988   : > { %v6904_v31 = vpop.f32.mrb[25].mxu1  ;;  %v2540_v15 = vsel %vm1854_vm3, %v2533_v14, -inf }
 0x989   : > { %2541 = vmax.xlane.f32.xlu0 %v2540_v15  ;;  %v7117_v31 = vld [vmem:[%s7650_s10 + $0x20] sm:$0xff]   ;;  %v7118_v15 = vld [vmem:[%s7650_s10 + $0x28] sm:$0xff]  }
 0x98d   : > { %2550 = vadd.xlane.f32.xlu0 %v2549_v16  ;;  %v7120_v16 = vld [vmem:[%s7650_s10 + $0x38] sm:$0xff]  }
 0x9a3   : > { %2635 = vrot.lane.b32.xlu0 %v7827_v36, %s7363_s4 }
 0xa16   : > { %v2542_v17 = vpop.xlane.xlu0 %2541 }
 0xa17   : > { %v2544_v18 = vsub.f32 %v2533_v14, %v2542_v17  ;;  %v7116_v14 = vld [vmem:[%s7650_s10 + $0x18] sm:$0xff]  }
 0xa19   : > { %v2547_v19 = vmul.f32 1.442695, %v2544_v18 }
 0xa1a   : > { %v2551_v20 = vpop.xlane.xlu0 %2550 }
 0xa1b   : > { %7269 = vpow2.f32 %v2547_v19 }
 0xa1c   : > { %7271 = vrcp.f32 %v2551_v20 }
 0xa1e   : > { %v2636_v22 = vpop.permute.xlu0 %2635 }
 0xa1f   : > { %6911 = vmatpush3.msra.mxu1 %v2636_v22 }
 0xa20   : > { %6920 = vmatprep.subr.mxu1 %v7358_v10 }
 0xa25   : > { %v7270_v26 = vpop.eup %7269 }
 0xa26   : > { %v7272_v28 = vpop.eup %7271  ;;  %v2552_v30 = vsel %vm1854_vm3, %v7270_v26, 0.0 }
 0xa27   : > { %v2557_v32 = vmul.f32 %v7272_v28, %v7268_v60  ;;  %2553 = vadd.xlane.f32.xlu0 %v2552_v30  ;;  %v7119_v60 = vld [vmem:[%s7650_s10 + $0x30] sm:$0xff]  }
 0xa29   : > { %6908 = vmatmul.mubr.msk.f32.vlgmr.msra.gmra.mrb[10].mxu0 %vm1877_vm4, %v2557_v32 }
 0xa2a   : > { %6916 = vmatpush3.xpose.msk.msra.mxu0 %vm1701_vm2, %v2723_v29  ;;  %6917 = vmatprep.mubr.msk.f32.mxu0 %vm7359_vm0, %v7358_v10 }
 0xa2b   : > { %6925 = vmatprep.subr.mxu0 %v7358_v10 }
 0xa2d   : > { %6918 = vmatmul.mubr.msk.f32.vlgmr.msra.gmra.mrb[12].mxu0 %vm1701_vm2, %v2721_v33 }
 0xa2e   : > { %6927 = vmatprep.mubr.msk.f32.mxu0 %vm7359_vm0, %v7358_v10 }
 0xa3d   : > { %2798 = vrot.lane.b32.xlu0 %v7865_v7, %s7364_s7 }
 0xab4   : > { %v2554_v35 = vpop.xlane.xlu0 %2553 }
 0xab5   : > { %7273 = vrcp.f32 %v2554_v35 }
 0xab8   : > { %v2799_v39 = vpop.permute.xlu0 %2798 }
 0xabf   : > { %v7274_v37 = vpop.eup %7273 }
 0xac0   : > { %v2558_v38 = vmul.f32 %v7274_v37, %v7270_v26 }
 0xac2   : > { %6913 = vmatmul.mubr.msk.f32.vlgmr.msra.gmra.mrb[26].mxu1 %vm1877_vm4, %v2558_v38  ;;  %v3202_v38 = vld [vmem:[%s7684_s21] sm:$0xff] }
 0xac3   : > { %6921 = vmatpush3.xpose.msk.msra.mxu1 %vm1701_vm2, %v2801_v23  ;;  %6922 = vmatprep.mubr.msk.f32.mxu1 %vm7359_vm0, %v7358_v10 }
 0xac4   : > { %6930 = vmatprep.subr.mxu1 %v7358_v10 }
 0xac6   : > { %6923 = vmatmul.mubr.msk.f32.vlgmr.msra.gmra.mrb[28].mxu1 %vm1701_vm2, %v2799_v39  ;;  %v3210_v39 = vld [vmem:[%s7684_s21 + $0x40] sm:$0xff] }
 0xac7   : > { %6932 = vmatprep.mubr.msk.f32.mxu1 %vm7359_vm0, %v7358_v10 }
 0xafc   : > { %v2631_v7 = vpop.f32.mrb[10].mxu0 }
 0xafd   : > { %v6909_v40 = vpop.f32.mrb[11].mxu0 }
 0xafe   : > { %v6262_v40 = vcombine.low %v3202_v38, %v3210_v39 }
 0xb00   : > { %v2794_v41 = vpop.f32.mrb[12].mxu0 }
 0xb01   : > { %v6919_v42 = vpop.f32.mrb[13].mxu0  ;;  %v2876_v43 = vsel %vm1854_vm3, %v2794_v41, -inf }
 0xb02   : > { %2877 = vmax.xlane.f32.xlu1 %v2876_v43  ;;  %v3211_v42 = vld [vmem:[%s7684_s21 + $0x48] sm:$0xff]  ;;  %v3218_v43 = vld [vmem:[%s7684_s21 + $0x80] sm:$0xff] }
 0xb13   : > { %2898 = vrot.lane.b32.xlu1 %v7844_v53, %s7364_s7 }
 0xb17   : > { %2376 = vrot.lane.b32.xlu1 %v2375_v34, %s7364_s7  ;;  %v7114_v34 = vld [vmem:[%s7650_s10 + $0x8] sm:$0xff]  }
 0xb8f   : > { %v2878_v44 = vpop.xlane.xlu1 %2877 }
 0xb90   : > { %v2882_v45 = vsub.f32 %v2794_v41, %v2878_v44  ;;  %v6263_v41 = vcombine.high %v3202_v38, %v3210_v39  ;;  %v3226_v44 = vld [vmem:[%s7684_s21 + $0xc0] sm:$0xff] }
 0xb91   : > { %v3314_v39 = vld [vmem:[%s7684_s21 + $0x380] sm:$0xff] }
 0xb92   : > { %v2884_v46 = vmul.f32 1.442695, %v2882_v45 }
 0xb93   : > { %v2899_v47 = vpop.permute.xlu1 %2898 }
 0xb94   : > { %7275 = vpow2.f32 %v2884_v46  ;;  %6926 = vmatpush3.msra.mxu0 %v2899_v47  ;;  %v6279_v47 = vcombine.high %v3218_v43, %v3226_v44 }
 0xb95   : > { %v2707_v48 = vpop.f32.mrb[26].mxu1  ;;  %6935 = vmatprep.subr.bf16.mxu0 %v7358_v10 }
 0xb96   : > { %v2713_v49 = vrot.slane %v2707_v48, 7  ;;  %v6914_v50 = vpop.f32.mrb[27].mxu1  ;;  %v3219_v48 = vld [vmem:[%s7684_s21 + $0x88] sm:$0xff] }
 0xb97   : > { %v2377_v51 = vpop.permute.xlu1 %2376 }
 0xb98   : > { %2380 = vst.msk [vmem:[#allocation3] sm:$0x3] %vm2379_vm7, %v2377_v51  ;;  %v2714_v52 = vsel %vm2027_vm5, %v2713_v49, %v2631_v7  ;;  %v3203_v7 = vld [vmem:[%s7684_s21 + $0x8] sm:$0xff]  ;;  %v3234_v49 = vld [vmem:[%s7684_s21 + $0x100] sm:$0xff] }
 0xb99   : > { %v2872_v54 = vpop.f32.mrb[28].mxu1  ;;  %2715 = vrot.lane.b32.xlu1 %v2714_v52, %s7363_s4  ;;  %v6264_v45 = vcombine.low %v3203_v7, %v3211_v42  ;;  %v6265_v46 = vcombine.high %v3203_v7, %v3211_v42  ;;  %v3242_v51 = vld [vmem:[%s7684_s21 + $0x140] sm:$0xff]  ;;  %v3235_v52 = vld [vmem:[%s7684_s21 + $0x108] sm:$0xff] }
 0xb9a   : > { %v6924_v53 = vpop.f32.mrb[29].mxu1  ;;  %v2879_v55 = vsel %vm1854_vm3, %v2872_v54, -inf  ;;  %v3322_v7 = vld [vmem:[%s7684_s21 + $0x3c0] sm:$0xff]  ;;  %v3323_v42 = vld [vmem:[%s7684_s21 + $0x3c8] sm:$0xff] }
 0xb9b   : > { %2880 = vmax.xlane.f32.xlu0 %v2879_v55  ;;  %v6278_v53 = vcombine.low %v3218_v43, %v3226_v44  ;;  %v6374_v43 = vcombine.low %v3314_v39, %v3322_v7 }
 0xb9e   : > { %v7276_v56 = vpop.eup %7275 }
 0xb9f   : > { %v2888_v57 = vsel %vm1854_vm3, %v7276_v56, 0.0 }
 0xba0   : > { %2889 = vadd.xlane.f32.xlu0 %v2888_v57 }
 0xc0b   : > { %v2716_v58 = vpop.permute.xlu1 %2715 }
 0xc0c   : > { %2719 = vst.msk [vmem:[#allocation3] sm:$0x3] %vm2718_vm8, %v2716_v58  ;;  %v6294_v58 = vcombine.low %v3234_v49, %v3242_v51 }
 0xc28   : > { %v2881_v59 = vpop.xlane.xlu0 %2880 }
 0xc29   : > { %v2883_v61 = vsub.f32 %v2872_v54, %v2881_v59  ;;  %v3243_v54 = vld [vmem:[%s7684_s21 + $0x148] sm:$0xff] }
 0xc2a   : > { %v6297_v57 = vcombine.high %v3235_v52, %v3243_v54  ;;  %v6296_v59 = vcombine.low %v3235_v52, %v3243_v54 }
 0xc2b   : > { %v2886_v62 = vmul.f32 1.442695, %v2883_v61 }
 0xc2d   : > { %7277 = vpow2.f32 %v2886_v62  ;;  %v2890_v63 = vpop.xlane.xlu0 %2889 }
 0xc2e   : > { %7279 = vrcp.f32 %v2890_v63 }
 0xc37   : > { %v7278_v0 = vpop.eup %7277 }
 0xc38   : > { %v7280_v1 = vpop.eup %7279  ;;  %v2891_v2 = vsel %vm1854_vm3, %v7278_v0, 0.0 }
 0xc39   : > { %v2896_v3 = vmul.f32 %v7280_v1, %v7276_v56  ;;  %2892 = vadd.xlane.f32.xlu0 %v2891_v2  ;;  %v6295_v56 = vcombine.high %v3234_v49, %v3242_v51  ;;  %v3250_v2 = vld [vmem:[%s7684_s21 + $0x180] sm:$0xff] }
 0xc3b   : > { %6928 = vmatmul.mubr.msk.f32.vlgmr.msra.gmra.mrb[14].mxu0 %vm1877_vm4, %v2896_v3  ;;  %v3258_v3 = vld [vmem:[%s7684_s21 + $0x1c0] sm:$0xff] }
 0xc3c   : > { %6951 = vmatprep.mubr.msk.bf16.mxu0 %vm7359_vm0, %v7358_v10  ;;  %6936 = vmatpush3.bf16.msra.mxu0 %v7113_v13  ;;  %v3266_v13 = vld [vmem:[%s7684_s21 + $0x200] sm:$0xff] }
 0xc3d   : > { %6937 = vmatprep.subr.bf16.mxu0 %v7358_v10 }
 0xc40   : > { %6938 = vmatpush3.bf16.msra.mxu0 %v7114_v34  ;;  %v3274_v34 = vld [vmem:[%s7684_s21 + $0x240] sm:$0xff] }
 0xc41   : > { %6939 = vmatprep.subr.bf16.mxu0 %v7358_v10 }
 0xc4f   : > { %2974 = vrot.lane.b32.xlu0 %v7827_v36, %s7364_s7  ;;  %v7115_v36 = vld [vmem:[%s7650_s10 + $0x10] sm:$0xff]   ;;  %s8536_s7 = sld [smem:[#allocation31_spill]] (!%p6521_p8) }
 0xc50   : > { %6940 = vmatpush3.bf16.msra.mxu0 %v7115_v36  ;;  %v3267_v36 = vld [vmem:[%s7684_s21 + $0x208] sm:$0xff] }
 0xc51   : > { %6941 = vmatprep.subr.bf16.mxu0 %v7358_v10 }
 0xc54   : > { %6942 = vmatpush3.bf16.msra.mxu0 %v7116_v14  ;;  %v6327_v14 = vcombine.high %v3266_v13, %v3274_v34 }
 0xc55   : > { %6943 = vmatprep.subr.bf16.mxu0 %v7358_v10 }
 0xc58   : > { %6944 = vmatpush3.bf16.msra.mxu0 %v7117_v31  ;;  %v3275_v31 = vld [vmem:[%s7684_s21 + $0x248] sm:$0xff] }
 0xc59   : > { %6945 = vmatprep.subr.bf16.mxu0 %v7358_v10 }
 0xc5c   : > { %6946 = vmatpush3.bf16.msra.mxu0 %v7118_v15  ;;  %v6326_v15 = vcombine.low %v3266_v13, %v3274_v34 }
 0xc5d   : > { %6947 = vmatprep.subr.bf16.mxu0 %v7358_v10 }
 0xc60   : > { %6948 = vmatpush3.bf16.msra.mxu0 %v7119_v60  ;;  %v6328_v60 = vcombine.low %v3267_v36, %v3275_v31 }
 0xc61   : > { %6949 = vmatprep.subr.bf16.mxu0 %v7358_v10  ;;  %v6251_v10 = vld [vmem:[%s8530_s3] ss:$0 sm:$0xff]  ;;  %s8534_s3 = sld [smem:[#allocation32_spill]] (!%p6521_p8) }
 0xc64   : > { %6950 = vmatpush3.bf16.msra.mxu0 %v7120_v16  ;;  %v6329_v16 = vcombine.high %v3267_v36, %v3275_v31  ;;  %v3252_v31 = vld [vmem:[%s7684_s21 + $0x190] sm:$0xff] }
 0xc65   : > { %4096 = vmatprep.subr.bf16.mxu0 %v6265_v46  ;;  %v3204_v46 = vld [vmem:[%s7684_s21 + $0x10] sm:$0xff] }
 0xcc6   : > { %v2893_v4 = vpop.xlane.xlu0 %2892 }
 0xcc7   : > { %7281 = vrcp.f32 %v2893_v4  ;;  %v3251_v4 = vld [vmem:[%s7684_s21 + $0x188] sm:$0xff] }
 0xcca   : > { %v2975_v5 = vpop.permute.xlu0 %2974 }
 0xccb   : > { %6931 = vmatpush3.msra.mxu1 %v2975_v5  ;;  %v6311_v5 = vcombine.high %v3250_v2, %v3258_v3 }
 0xccc   : > { %4055 = vmatprep.subr.bf16.mxu1 %v6263_v41  ;;  %v6375_v41 = vcombine.high %v3314_v39, %v3322_v7 }
 0xcd1   : > { %v7282_v6 = vpop.eup %7281 }
 0xcd2   : > { %v2897_v8 = vmul.f32 %v7282_v6, %v7278_v0  ;;  %v3259_v6 = vld [vmem:[%s7684_s21 + $0x1c8] sm:$0xff] }
 0xcd4   : > { %6933 = vmatmul.mubr.msk.f32.vlgmr.msra.gmra.mrb[30].mxu1 %vm1877_vm4, %v2897_v8  ;;  %v6310_v8 = vcombine.low %v3250_v2, %v3258_v3  ;;  %v3229_v2 = vld [vmem:[%s7684_s21 + $0xd8] sm:$0xff] }
 0xcd5   : > { %4087 = vmatprep.mubr.bf16.mxu1 %v7360_v11  ;;  %4056 = vmatpush1.bf16.msra.mxu1 %v6262_v40  ;;  %v3315_v40 = vld [vmem:[%s7684_s21 + $0x388] sm:$0xff] }
 0xcd6   : > { %4057 = vmatprep.subr.bf16.mxu1 %v6279_v47  ;;  %v6376_v44 = vcombine.low %v3315_v40, %v3323_v42  ;;  %v3212_v47 = vld [vmem:[%s7684_s21 + $0x50] sm:$0xff] }
 0xcd7   : > { %v6267_v49 = vcombine.high %v3204_v46, %v3212_v47 }
 0xcd9   : > { %4058 = vmatpush1.bf16.msra.mxu1 %v6278_v53 }
 0xcda   : > { %4059 = vmatprep.subr.bf16.mxu1 %v6295_v56 }
 0xcdd   : > { %4060 = vmatpush1.bf16.msra.mxu1 %v6294_v58 }
 0xcde   : > { %4061 = vmatprep.subr.bf16.mxu1 %v6311_v5 }
 0xce1   : > { %4062 = vmatpush1.bf16.msra.mxu1 %v6310_v8  ;;  %v3244_v8 = vld [vmem:[%s7684_s21 + $0x150] sm:$0xff] }
 0xce2   : > { %4063 = vmatprep.subr.bf16.mxu1 %v6327_v14 }
 0xce5   : > { %4064 = vmatpush1.bf16.msra.mxu1 %v6326_v15  ;;  %v3260_v15 = vld [vmem:[%s7684_s21 + $0x1d0] sm:$0xff] }
 0xd0e   : > { %v2970_v9 = vpop.f32.mrb[14].mxu0 }
 0xd0f   : > { %v6929_v12 = vpop.f32.mrb[15].mxu0 }
 0xd10   : > { %v6313_v12 = vcombine.high %v3251_v4, %v3259_v6 }
 0xda7   : > { %v3046_v17 = vpop.f32.mrb[30].mxu1 }
 0xda8   : > { %v3052_v18 = vrot.slane %v3046_v17, 7  ;;  %v6934_v19 = vpop.f32.mrb[31].mxu1  ;;  %v3282_v17 = vld [vmem:[%s7684_s21 + $0x280] sm:$0xff] }
 0xda9   : > { %v3283_v19 = vld [vmem:[%s7684_s21 + $0x288] sm:$0xff] }
 0xdaa   : > { %v3053_v20 = vsel %vm2027_vm5, %v3052_v18, %v2970_v9  ;;  %v6312_v9 = vcombine.low %v3251_v4, %v3259_v6  ;;  %v3290_v18 = vld [vmem:[%s7684_s21 + $0x2c0] sm:$0xff] }
 0xdab   : > { %3054 = vrot.lane.b32.xlu0 %v3053_v20, %s7362_s28  ;;  %v6343_v20 = vcombine.high %v3282_v17, %v3290_v18 }
 0xdad   : > { %4065 = vmatprep.subr.bf16.mxu1 %v6343_v20 }
 0xe1d   : > { %v3055_v22 = vpop.permute.xlu0 %3054 }
 0xe1e   : > { %3058 = vst.msk [vmem:[#allocation3] sm:$0x3] %vm3057_vm9, %v3055_v22  ;;  %v3291_v22 = vld [vmem:[%s7684_s21 + $0x2c8] sm:$0xff] }
 0xe25   : > { %v3059_v23 = vld [vmem:[#allocation3] sm:$0x3] }
 0xe26   : > { %v3077_v26 = vpack.c.bf16 %v3059_v23, %v3059_v23  ;;  %v6342_v23 = vcombine.low %v3282_v17, %v3290_v18 }
 0xe28   : > { %6952 = vmatmul.mubr.bf16.vlgmr.msra.gmra.mrb[16].mxu0 %v3077_v26  ;;  %v6344_v26 = vcombine.low %v3283_v19, %v3291_v22  ;;  %4066 = vmatpush1.bf16.msra.mxu1 %v6342_v23  ;;  %v3276_v23 = vld [vmem:[%s7684_s21 + $0x250] sm:$0xff] }
 0xe29   : > { %4128 = vmatprep.mubr.bf16.mxu0 %v7360_v11  ;;  %4097 = vmatpush1.bf16.msra.mxu0 %v6264_v45  ;;  %v6377_v45 = vcombine.high %v3315_v40, %v3323_v42  ;;  %v3300_v42 = vld [vmem:[%s7684_s21 + $0x310] sm:$0xff] }
 0xefb   : > { %v3166_v28 = vpop.f32.mrb[16].mxu0 }
 0xefc   : > { %v3167_v29 = vadd.f32 %v6251_v10, %v3166_v28  ;;  %v6953_v30 = vpop.f32.mrb[17].mxu0  ;;  %v6345_v10 = vcombine.high %v3283_v19, %v3291_v22  ;;  %v3298_v28 = vld [vmem:[%s7684_s21 + $0x300] sm:$0xff]  ;;  %v6315_v19 = vcombine.high %v3252_v31, %v3260_v15  ;;  %v3268_v22 = vld [vmem:[%s7684_s21 + $0x210] sm:$0xff] }
 0xefd   : > { %v3169_v32 = vpop.f32.mrb[18].mxu0  ;;  %v3299_v30 = vld [vmem:[%s7684_s21 + $0x308] sm:$0xff]  ;;  %v6330_v39 = vcombine.low %v3268_v22, %v3276_v23 }
 0xefe   : > { %v6954_v33 = vpop.f32.mrb[19].mxu0  ;;  %v3172_v35 = vadd.f32 %v3167_v29, %v7806_v21  ;;  %v3227_v21 = vld [vmem:[%s7684_s21 + $0xc8] sm:$0xff]  ;;  %v3306_v29 = vld [vmem:[%s7684_s21 + $0x340] sm:$0xff] }
 0xeff   : > { %v6281_v50 = vcombine.high %v3219_v48, %v3227_v21  ;;  %v6280_v55 = vcombine.low %v3219_v48, %v3227_v21  ;;  %v6359_v32 = vcombine.high %v3298_v28, %v3306_v29  ;;  %v3307_v33 = vld [vmem:[%s7684_s21 + $0x348] sm:$0xff]  ;;  %v3205_v48 = vld [vmem:[%s7684_s21 + $0x18] sm:$0xff]  ;;  %v6266_v21 = vcombine.low %v3204_v46, %v3212_v47 }
 0xf00   : > { %v3175_v37 = vsel %vm1379_vm1, %v3172_v35, 0.0  ;;  %v6361_v38 = vcombine.high %v3299_v30, %v3307_v33 }
 0xf01   : > { %3176 = vadd.xlane.f32.xlu1 %v3175_v37  ;;  %4098 = vmatprep.subr.bf16.mxu0 %v6281_v50  ;;  %v6360_v37 = vcombine.low %v3299_v30, %v3307_v33  ;;  %v3213_v50 = vld [vmem:[%s7684_s21 + $0x58] sm:$0xff]  ;;  %v6331_v30 = vcombine.high %v3268_v22, %v3276_v23  ;;  %v3284_v33 = vld [vmem:[%s7684_s21 + $0x290] sm:$0xff]  ;;  %v3255_v22 = vld [vmem:[%s7684_s21 + $0x1a8] sm:$0xff] }
 0xf02   : > { %4099 = vmatpush1.bf16.msra.mxu0 %v6280_v55  ;;  %4067 = vmatprep.subr.bf16.mxu1 %v6359_v32  ;;  %v6268_v51 = vcombine.low %v3205_v48, %v3213_v50  ;;  %v6269_v52 = vcombine.high %v3205_v48, %v3213_v50  ;;  %v3324_v50 = vld [vmem:[%s7684_s21 + $0x3d0] sm:$0xff]  ;;  %v3263_v23 = vld [vmem:[%s7684_s21 + $0x1e8] sm:$0xff] }
 0xf03   : > { %4100 = vmatprep.subr.bf16.mxu0 %v6297_v57  ;;  %v6260_v57 = vld [vmem:[%s8531_s11] ss:$0 sm:$0xff] }
 0xf06   : > { %4101 = vmatpush1.bf16.msra.mxu0 %v6296_v59  ;;  %v6261_v59 = vld [vmem:[%s8532_s27] ss:$0 sm:$0xff] }
 0xf07   : > { %4102 = vmatprep.subr.bf16.mxu0 %v6313_v12  ;;  %v3245_v12 = vld [vmem:[%s7684_s21 + $0x158] sm:$0xff] }
 0xf0a   : > { %4103 = vmatpush1.bf16.msra.mxu0 %v6312_v9  ;;  %v3237_v9 = vld [vmem:[%s7684_s21 + $0x118] sm:$0xff] }
 0xf0b   : > { %4104 = vmatprep.subr.bf16.mxu0 %v6329_v16  ;;  %v6301_v14 = vcombine.high %v3237_v9, %v3245_v12  ;;  %v3261_v16 = vld [vmem:[%s7684_s21 + $0x1d8] sm:$0xff]  ;;  %v6300_v18 = vcombine.low %v3237_v9, %v3245_v12 }
 0xf0e   : > { %4105 = vmatpush1.bf16.msra.mxu0 %v6328_v60  ;;  %v3253_v60 = vld [vmem:[%s7684_s21 + $0x198] sm:$0xff] }
 0xf0f   : > { %4106 = vmatprep.subr.bf16.mxu0 %v6345_v10  ;;  %v6317_v20 = vcombine.high %v3253_v60, %v3261_v16  ;;  %v3277_v10 = vld [vmem:[%s7684_s21 + $0x258] sm:$0xff] }
 0xf12   : > { %4107 = vmatpush1.bf16.msra.mxu0 %v6344_v26  ;;  %v3269_v26 = vld [vmem:[%s7684_s21 + $0x218] sm:$0xff] }
 0xf13   : > { %4108 = vmatprep.subr.bf16.mxu0 %v6361_v38  ;;  %v6333_v32 = vcombine.high %v3269_v26, %v3277_v10  ;;  %v3293_v38 = vld [vmem:[%s7684_s21 + $0x2d8] sm:$0xff]  ;;  %v6332_v7 = vcombine.low %v3269_v26, %v3277_v10 }
 0xf16   : > { %4109 = vmatpush1.bf16.msra.mxu0 %v6360_v37  ;;  %v3285_v37 = vld [vmem:[%s7684_s21 + $0x298] sm:$0xff] }
 0xf17   : > { %4110 = vmatprep.subr.bf16.mxu0 %v6377_v45  ;;  %v3309_v45 = vld [vmem:[%s7684_s21 + $0x358] sm:$0xff]  ;;  %v6348_v47 = vcombine.low %v3285_v37, %v3293_v38 }
 0xf1a   : > { %4111 = vmatpush1.bf16.msra.mxu0 %v6376_v44  ;;  %v3301_v44 = vld [vmem:[%s7684_s21 + $0x318] sm:$0xff] }
 0xf1b   : > { %4178 = vmatprep.subr.bf16.mxu0 %v6269_v52  ;;  %v3325_v52 = vld [vmem:[%s7684_s21 + $0x3d8] sm:$0xff] }
 0xf8e   : > { %v3177_v61 = vpop.xlane.xlu1 %3176 }
 0xf8f   : > { %v3178_v62 = vmul.f32 0.0078125, %v3177_v61 }
 0xf91   : > { %v8011_v63 = vsub.f32 %v3172_v35, %v3178_v62  ;;  %v6358_v35 = vcombine.low %v3298_v28, %v3306_v29  ;;  %v3220_v62 = vld [vmem:[%s7684_s21 + $0x90] sm:$0xff]  ;;  %v6314_v28 = vcombine.low %v3252_v31, %v3260_v15  ;;  %v6316_v29 = vcombine.low %v3253_v60, %v3261_v16  ;;  %v3239_v31 = vld [vmem:[%s7684_s21 + $0x128] sm:$0xff] }
 0xf92   : > { %v3247_v15 = vld [vmem:[%s7684_s21 + $0x168] sm:$0xff] }
 0xf93   : > { %v3180_v0 = vmul.f32 %v8011_v63, %v8011_v63  ;;  %4068 = vmatpush1.bf16.msra.mxu1 %v6358_v35  ;;  %v3292_v35 = vld [vmem:[%s7684_s21 + $0x2d0] sm:$0xff]  ;;  %v6304_v10 = vcombine.low %v3239_v31, %v3247_v15 }
 0xf94   : > { %4069 = vmatprep.subr.bf16.mxu1 %v6375_v41  ;;  %v6347_v40 = vcombine.high %v3284_v33, %v3292_v35  ;;  %v6349_v41 = vcombine.high %v3285_v37, %v3293_v38  ;;  %v6346_v46 = vcombine.low %v3284_v33, %v3292_v35  ;;  %v3271_v33 = vld [vmem:[%s7684_s21 + $0x228] sm:$0xff]  ;;  %v6320_v38 = vcombine.low %v3255_v22, %v3263_v23 }
 0xf95   : > { %v3181_v1 = vsel %vm1379_vm1, %v3180_v0, 0.0  ;;  %v3228_v0 = vld [vmem:[%s7684_s21 + $0xd0] sm:$0xff]  ;;  %v3279_v35 = vld [vmem:[%s7684_s21 + $0x268] sm:$0xff] }
 0xf96   : > { %3182 = vadd.xlane.f32.xlu0 %v3181_v1  ;;  %v3221_v1 = vld [vmem:[%s7684_s21 + $0x98] sm:$0xff]  ;;  %v6283_v5 = vcombine.high %v3220_v62, %v3228_v0  ;;  %v6282_v13 = vcombine.low %v3220_v62, %v3228_v0 }
 0xf97   : > { %4070 = vmatpush1.bf16.msra.mxu1 %v6374_v43  ;;  %v6285_v6 = vcombine.high %v3221_v1, %v3229_v2  ;;  %v6284_v34 = vcombine.low %v3221_v1, %v3229_v2  ;;  %v3308_v43 = vld [vmem:[%s7684_s21 + $0x350] sm:$0xff] }
 0xf98   : > { %4137 = vmatprep.subr.bf16.mxu1 %v6267_v49  ;;  %v6363_v48 = vcombine.high %v3300_v42, %v3308_v43  ;;  %v3316_v49 = vld [vmem:[%s7684_s21 + $0x390] sm:$0xff] }
 0xf99   : > { %v6378_v62 = vcombine.low %v3316_v49, %v3324_v50 }
0x1023   : > { %v3183_v54 = vpop.xlane.xlu0 %3182 }
0x1024   : > { %v3184_v53 = vmul.f32 0.0078125, %v3183_v54  ;;  %v6362_v54 = vcombine.low %v3300_v42, %v3308_v43  ;;  %v3287_v42 = vld [vmem:[%s7684_s21 + $0x2a8] sm:$0xff] }
0x1025   : > { %v3295_v43 = vld [vmem:[%s7684_s21 + $0x2e8] sm:$0xff] }
0x1026   : > { %v3185_v55 = vadd.f32 1e-05, %v3184_v53  ;;  %v6364_v53 = vcombine.low %v3301_v44, %v3309_v45 }
0x1028   : > { %7283 = vrsqrt.f32 %v3185_v55  ;;  %v6379_v55 = vcombine.high %v3316_v49, %v3324_v50  ;;  %v3303_v49 = vld [vmem:[%s7684_s21 + $0x328] sm:$0xff] }
0x1029   : > { %v3311_v50 = vld [vmem:[%s7684_s21 + $0x368] sm:$0xff] }
0x1032   : > { %v7284_v56 = vpop.eup %7283 }
0x1033   : > { %v3187_v58 = vmul.f32 %v7284_v56, %v8011_v63  ;;  %v3236_v63 = vld [vmem:[%s7684_s21 + $0x110] sm:$0xff] }
0x1034   : > { %v6299_v36 = vcombine.high %v3236_v63, %v3244_v8  ;;  %v6298_v17 = vcombine.low %v3236_v63, %v3244_v8  ;;  %v3223_v63 = vld [vmem:[%s7684_s21 + $0xa8] sm:$0xff] }
0x1035   : > { %v3194_v61 = vmul.f32 %v6260_v57, %v3187_v58  ;;  %v3206_v57 = vld [vmem:[%s7684_s21 + $0x20] sm:$0xff]  ;;  %v3231_v8 = vld [vmem:[%s7684_s21 + $0xe8] sm:$0xff] }
0x1036   : > { %v3214_v58 = vld [vmem:[%s7684_s21 + $0x60] sm:$0xff]  ;;  %v6288_v16 = vcombine.low %v3223_v63, %v3231_v8 }
0x1037   : > { %v8055_v3 = vadd.f32 %v6261_v59, %v3194_v61  ;;  %v3207_v59 = vld [vmem:[%s7684_s21 + $0x28] sm:$0xff]  ;;  %v6271_v1 = vcombine.high %v3206_v57, %v3214_v58  ;;  %v6270_v9 = vcombine.low %v3206_v57, %v3214_v58 }
0x1038   : > { %v3215_v61 = vld [vmem:[%s7684_s21 + $0x68] sm:$0xff] }
0x1039   : > { %v8059_v4 = vpack.c.bf16 %v8055_v3, %v8055_v3  ;;  %v6273_v2 = vcombine.high %v3207_v59, %v3215_v61  ;;  %v6272_v12 = vcombine.low %v3207_v59, %v3215_v61  ;;  %v3319_v57 = vld [vmem:[%s7684_s21 + $0x3a8] sm:$0xff]  ;;  %v6368_v61 = vcombine.low %v3303_v49, %v3311_v50 }
0x103a   : > { %v3327_v58 = vld [vmem:[%s7684_s21 + $0x3e8] sm:$0xff] }
0x103b   : > { %4088 = vmatmul.mubr.bf16.vlgmr.msra.gmra.mrb[32].mxu1 %v8059_v4  ;;  %4129 = vmatmul.mubr.bf16.vlgmr.msra.gmra.mrb[20].mxu0 %v8059_v4 }
0x103c   : > { %4138 = vmatpush1.bf16.msra.mxu1 %v6266_v21  ;;  %4179 = vmatpush1.bf16.msra.mxu0 %v6268_v51  ;;  %v6365_v21 = vcombine.high %v3301_v44, %v3309_v45  ;;  %v3317_v51 = vld [vmem:[%s7684_s21 + $0x398] sm:$0xff]  ;;  %v6336_v45 = vcombine.low %v3271_v33, %v3279_v35 }
0x103d   : > { %4139 = vmatprep.subr.bf16.mxu1 %v6283_v5  ;;  %4180 = vmatprep.subr.bf16.mxu0 %v6285_v6  ;;  %v6381_v56 = vcombine.high %v3317_v51, %v3325_v52  ;;  %v6380_v0 = vcombine.low %v3317_v51, %v3325_v52  ;;  %v3222_v5 = vld [vmem:[%s7684_s21 + $0xa0] sm:$0xff]  ;;  %v6352_v52 = vcombine.low %v3287_v42, %v3295_v43 }
0x103e   : > { %4169 = vmatprep.mubr.bf16.mxu1 %v7360_v11  ;;  %4210 = vmatprep.mubr.bf16.mxu0 %v7360_v11  ;;  %v3230_v6 = vld [vmem:[%s7684_s21 + $0xe0] sm:$0xff] }
0x103f   : > { %v6286_v60 = vcombine.low %v3222_v5, %v3230_v6 }
0x1040   : > { %4140 = vmatpush1.bf16.msra.mxu1 %v6282_v13  ;;  %4181 = vmatpush1.bf16.msra.mxu0 %v6284_v34  ;;  %v6287_v13 = vcombine.high %v3222_v5, %v3230_v6  ;;  %v6289_v34 = vcombine.high %v3223_v63, %v3231_v8  ;;  %v3209_v5 = vld [vmem:[%s7684_s21 + $0x38] sm:$0xff]  ;;  %v6384_v8 = vcombine.low %v3319_v57, %v3327_v58 }
0x1041   : > { %4141 = vmatprep.subr.bf16.mxu1 %v6299_v36  ;;  %4182 = vmatprep.subr.bf16.mxu0 %v6301_v14  ;;  %v3238_v36 = vld [vmem:[%s7684_s21 + $0x120] sm:$0xff]  ;;  %v3217_v6 = vld [vmem:[%s7684_s21 + $0x78] sm:$0xff] }
0x1042   : > { %v3246_v14 = vld [vmem:[%s7684_s21 + $0x160] sm:$0xff] }
0x1043   : > { %v6302_v26 = vcombine.low %v3238_v36, %v3246_v14 }
0x1044   : > { %4142 = vmatpush1.bf16.msra.mxu1 %v6298_v17  ;;  %4183 = vmatpush1.bf16.msra.mxu0 %v6300_v18  ;;  %v6303_v17 = vcombine.high %v3238_v36, %v3246_v14  ;;  %v6305_v18 = vcombine.high %v3239_v31, %v3247_v15  ;;  %v3225_v36 = vld [vmem:[%s7684_s21 + $0xb8] sm:$0xff]  ;;  %v6276_v15 = vcombine.low %v3209_v5, %v3217_v6 }
0x1045   : > { %4143 = vmatprep.subr.bf16.mxu1 %v6315_v19  ;;  %4184 = vmatprep.subr.bf16.mxu0 %v6317_v20  ;;  %v3254_v19 = vld [vmem:[%s7684_s21 + $0x1a0] sm:$0xff]  ;;  %v3233_v14 = vld [vmem:[%s7684_s21 + $0xf8] sm:$0xff] }
0x1046   : > { %v3262_v20 = vld [vmem:[%s7684_s21 + $0x1e0] sm:$0xff] }
0x1047   : > { %v6318_v37 = vcombine.low %v3254_v19, %v3262_v20 }
0x1048   : > { %4144 = vmatpush1.bf16.msra.mxu1 %v6314_v28  ;;  %4185 = vmatpush1.bf16.msra.mxu0 %v6316_v29  ;;  %v6319_v28 = vcombine.high %v3254_v19, %v3262_v20  ;;  %v6321_v29 = vcombine.high %v3255_v22, %v3263_v23  ;;  %v3241_v19 = vld [vmem:[%s7684_s21 + $0x138] sm:$0xff]  ;;  %v6292_v23 = vcombine.low %v3225_v36, %v3233_v14 }
0x1049   : > { %4145 = vmatprep.subr.bf16.mxu1 %v6331_v30  ;;  %4186 = vmatprep.subr.bf16.mxu0 %v6333_v32  ;;  %v3270_v30 = vld [vmem:[%s7684_s21 + $0x220] sm:$0xff]  ;;  %v3249_v20 = vld [vmem:[%s7684_s21 + $0x178] sm:$0xff] }
0x104a   : > { %v3278_v32 = vld [vmem:[%s7684_s21 + $0x260] sm:$0xff] }
0x104b   : > { %v6334_v44 = vcombine.low %v3270_v30, %v3278_v32 }
0x104c   : > { %4146 = vmatpush1.bf16.msra.mxu1 %v6330_v39  ;;  %4187 = vmatpush1.bf16.msra.mxu0 %v6332_v7  ;;  %v6335_v39 = vcombine.high %v3270_v30, %v3278_v32  ;;  %v6337_v7 = vcombine.high %v3271_v33, %v3279_v35  ;;  %v3257_v30 = vld [vmem:[%s7684_s21 + $0x1b8] sm:$0xff]  ;;  %v6308_v35 = vcombine.low %v3241_v19, %v3249_v20 }
0x104d   : > { %4147 = vmatprep.subr.bf16.mxu1 %v6347_v40  ;;  %4188 = vmatprep.subr.bf16.mxu0 %v6349_v41  ;;  %v3286_v40 = vld [vmem:[%s7684_s21 + $0x2a0] sm:$0xff]  ;;  %v3265_v32 = vld [vmem:[%s7684_s21 + $0x1f8] sm:$0xff] }
0x104e   : > { %v3294_v41 = vld [vmem:[%s7684_s21 + $0x2e0] sm:$0xff] }
0x104f   : > { %v6350_v51 = vcombine.low %v3286_v40, %v3294_v41 }
0x1050   : > { %4148 = vmatpush1.bf16.msra.mxu1 %v6346_v46  ;;  %4189 = vmatpush1.bf16.msra.mxu0 %v6348_v47  ;;  %v6351_v46 = vcombine.high %v3286_v40, %v3294_v41  ;;  %v6353_v47 = vcombine.high %v3287_v42, %v3295_v43  ;;  %v3273_v40 = vld [vmem:[%s7684_s21 + $0x238] sm:$0xff] }
0x1051   : > { %4149 = vmatprep.subr.bf16.mxu1 %v6363_v48  ;;  %4190 = vmatprep.subr.bf16.mxu0 %v6365_v21  ;;  %v3302_v48 = vld [vmem:[%s7684_s21 + $0x320] sm:$0xff]  ;;  %v3281_v41 = vld [vmem:[%s7684_s21 + $0x278] sm:$0xff] }
0x1052   : > { %v3310_v21 = vld [vmem:[%s7684_s21 + $0x360] sm:$0xff] }
0x1053   : > { %v6366_v59 = vcombine.low %v3302_v48, %v3310_v21 }
0x1054   : > { %4150 = vmatpush1.bf16.msra.mxu1 %v6362_v54  ;;  %4191 = vmatpush1.bf16.msra.mxu0 %v6364_v53  ;;  %v6367_v54 = vcombine.high %v3302_v48, %v3310_v21  ;;  %v6369_v53 = vcombine.high %v3303_v49, %v3311_v50  ;;  %v3297_v48 = vld [vmem:[%s7684_s21 + $0x2f8] sm:$0xff]  ;;  %v6340_v49 = vcombine.low %v3273_v40, %v3281_v41 }
0x1055   : > { %4151 = vmatprep.subr.bf16.mxu1 %v6379_v55  ;;  %4192 = vmatprep.subr.bf16.mxu0 %v6381_v56  ;;  %v3318_v55 = vld [vmem:[%s7684_s21 + $0x3a0] sm:$0xff] }
0x1056   : > { %v3326_v56 = vld [vmem:[%s7684_s21 + $0x3e0] sm:$0xff] }
0x1057   : > { %v6382_v63 = vcombine.low %v3318_v55, %v3326_v56 }
0x1058   : > { %4152 = vmatpush1.bf16.msra.mxu1 %v6378_v62  ;;  %4193 = vmatpush1.bf16.msra.mxu0 %v6380_v0  ;;  %v6383_v62 = vcombine.high %v3318_v55, %v3326_v56  ;;  %v6385_v0 = vcombine.high %v3319_v57, %v3327_v58  ;;  %v3313_v55 = vld [vmem:[%s7684_s21 + $0x378] sm:$0xff] }
0x1059   : > { %4219 = vmatprep.subr.bf16.mxu1 %v6271_v1  ;;  %4260 = vmatprep.subr.bf16.mxu0 %v6273_v2  ;;  %v3208_v1 = vld [vmem:[%s7684_s21 + $0x30] sm:$0xff] }
0x105a   : > { %v3216_v2 = vld [vmem:[%s7684_s21 + $0x70] sm:$0xff] }
0x105b   : > { %4170 = vmatmul.mubr.bf16.vlgmr.msra.gmra.mrb[36].mxu1 %v8059_v4  ;;  %4211 = vmatmul.mubr.bf16.vlgmr.msra.gmra.mrb[24].mxu0 %v8059_v4  ;;  %v6274_v31 = vcombine.low %v3208_v1, %v3216_v2 }
0x105c   : > { %4220 = vmatpush1.bf16.msra.mxu1 %v6270_v9  ;;  %4261 = vmatpush1.bf16.msra.mxu0 %v6272_v12  ;;  %v6275_v9 = vcombine.high %v3208_v1, %v3216_v2  ;;  %v6277_v12 = vcombine.high %v3209_v5, %v3217_v6  ;;  %v3329_v1 = vld [vmem:[%s7684_s21 + $0x3f8] sm:$0xff] }
0x105d   : > { %4221 = vmatprep.subr.bf16.mxu1 %v6287_v13  ;;  %4262 = vmatprep.subr.bf16.mxu0 %v6289_v34  ;;  %v3224_v13 = vld [vmem:[%s7684_s21 + $0xb0] sm:$0xff] }
0x105e   : > { %4251 = vmatprep.mubr.bf16.mxu1 %v7360_v11  ;;  %4292 = vmatprep.mubr.bf16.mxu0 %v7360_v11  ;;  %v3232_v34 = vld [vmem:[%s7684_s21 + $0xf0] sm:$0xff] }
0x105f   : > { %v6290_v22 = vcombine.low %v3224_v13, %v3232_v34 }
0x1060   : > { %4222 = vmatpush1.bf16.msra.mxu1 %v6286_v60  ;;  %4263 = vmatpush1.bf16.msra.mxu0 %v6288_v16  ;;  %v6291_v60 = vcombine.high %v3224_v13, %v3232_v34  ;;  %v6293_v16 = vcombine.high %v3225_v36, %v3233_v14  ;;  %v7122_v13 = vld [vmem:[%s8533_s5 + $0xc0] sm:$0xff]   ;;  %v7125_v14 = vld [vmem:[%s8533_s5 + $0x48] sm:$0xff]  }
0x1061   : > { %4223 = vmatprep.subr.bf16.mxu1 %v6303_v17  ;;  %4264 = vmatprep.subr.bf16.mxu0 %v6305_v18  ;;  %v3240_v17 = vld [vmem:[%s7684_s21 + $0x130] sm:$0xff]  ;;  %v7123_v34 = vld [vmem:[%s8533_s5] sm:$0xff]  }
0x1062   : > { %v3248_v18 = vld [vmem:[%s7684_s21 + $0x170] sm:$0xff]  ;;  %v7124_v36 = vld [vmem:[%s8533_s5 + $0x80] sm:$0xff]  }
0x1063   : > { %v6306_v33 = vcombine.low %v3240_v17, %v3248_v18 }
0x1064   : > { %4224 = vmatpush1.bf16.msra.mxu1 %v6302_v26  ;;  %4265 = vmatpush1.bf16.msra.mxu0 %v6304_v10  ;;  %v6307_v26 = vcombine.high %v3240_v17, %v3248_v18  ;;  %v6309_v10 = vcombine.high %v3241_v19, %v3249_v20  ;;  %v7130_v17 = vld [vmem:[%s8533_s5 + $0xd0] sm:$0xff]   ;;  %v7134_v20 = vld [vmem:[%s8533_s5 + $0xd8] sm:$0xff]  }
0x1065   : > { %4225 = vmatprep.subr.bf16.mxu1 %v6319_v28  ;;  %4266 = vmatprep.subr.bf16.mxu0 %v6321_v29  ;;  %v3256_v28 = vld [vmem:[%s7684_s21 + $0x1b0] sm:$0xff] }
0x1066   : > { %v3264_v29 = vld [vmem:[%s7684_s21 + $0x1f0] sm:$0xff] }
0x1067   : > { %v6322_v42 = vcombine.low %v3256_v28, %v3264_v29  ;;  %v7131_v18 = vld [vmem:[%s8533_s5 + $0x10] sm:$0xff]  }
0x1068   : > { %4226 = vmatpush1.bf16.msra.mxu1 %v6318_v37  ;;  %4267 = vmatpush1.bf16.msra.mxu0 %v6320_v38  ;;  %v6323_v37 = vcombine.high %v3256_v28, %v3264_v29  ;;  %v6325_v38 = vcombine.high %v3257_v30, %v3265_v32  ;;  %v7132_v19 = vld [vmem:[%s8533_s5 + $0x90] sm:$0xff]   ;;  %v7139_v28 = vld [vmem:[%s8533_s5 + $0x20] sm:$0xff]  }
0x1069   : > { %4227 = vmatprep.subr.bf16.mxu1 %v6335_v39  ;;  %4268 = vmatprep.subr.bf16.mxu0 %v6337_v7  ;;  %v3272_v39 = vld [vmem:[%s7684_s21 + $0x230] sm:$0xff]  ;;  %v7140_v29 = vld [vmem:[%s8533_s5 + $0xa0] sm:$0xff]  }
0x106a   : > { %v3280_v7 = vld [vmem:[%s7684_s21 + $0x270] sm:$0xff] }
0x106b   : > { %v6339_v43 = vcombine.high %v3272_v39, %v3280_v7  ;;  %v6338_v21 = vcombine.low %v3272_v39, %v3280_v7  ;;  %v7147_v39 = vld [vmem:[%s8533_s5 + $0x30] sm:$0xff]  }
0x106c   : > { %4228 = vmatpush1.bf16.msra.mxu1 %v6334_v44  ;;  %4269 = vmatpush1.bf16.msra.mxu0 %v6336_v45  ;;  %v6341_v44 = vcombine.high %v3273_v40, %v3281_v41  ;;  %v3288_v45 = vld [vmem:[%s7684_s21 + $0x2b0] sm:$0xff]  ;;  %v7149_v40 = vld [vmem:[%s8533_s5 + $0x78] sm:$0xff]  }
0x106d   : > { %4229 = vmatprep.subr.bf16.mxu1 %v6351_v46  ;;  %4270 = vmatprep.subr.bf16.mxu0 %v6353_v47  ;;  %v3296_v46 = vld [vmem:[%s7684_s21 + $0x2f0] sm:$0xff]  ;;  %v3289_v47 = vld [vmem:[%s7684_s21 + $0x2b8] sm:$0xff] }
0x106e   : > { %v6355_v50 = vcombine.high %v3288_v45, %v3296_v46  ;;  %v6354_v56 = vcombine.low %v3288_v45, %v3296_v46  ;;  %v6356_v57 = vcombine.low %v3289_v47, %v3297_v48  ;;  %v7148_v7 = vld [vmem:[%s8533_s5 + $0xb0] sm:$0xff]   ;;  %v7150_v41 = vld [vmem:[%s8533_s5 + $0xf8] sm:$0xff]   ;;  %v3345_v45 = vsub.s32 2, %v7812_v24  ;;  %v8199_v46 = vld [vmem:[%s7690_s24] sm:$0xff] }
0x1070   : > { %4230 = vmatpush1.bf16.msra.mxu1 %v6350_v51  ;;  %4271 = vmatpush1.bf16.msra.mxu0 %v6352_v52  ;;  %v6357_v51 = vcombine.high %v3289_v47, %v3297_v48  ;;  %v3304_v52 = vld [vmem:[%s7684_s21 + $0x330] sm:$0xff]  ;;  %v3349_v47 = vsub.s32 3, %v7812_v24  ;;  %v3338_v48 = vrot.slane %v8199_v46, %v7815_v25 }
0x1071   : > { %4231 = vmatprep.subr.bf16.mxu1 %v6367_v54  ;;  %4272 = vmatprep.subr.bf16.mxu0 %v6369_v53  ;;  %v3312_v54 = vld [vmem:[%s7684_s21 + $0x370] sm:$0xff]  ;;  %v3305_v53 = vld [vmem:[%s7684_s21 + $0x338] sm:$0xff] }
0x1072   : > { %v6371_v58 = vcombine.high %v3304_v52, %v3312_v54  ;;  %v6370_v2 = vcombine.low %v3304_v52, %v3312_v54  ;;  %v6372_v5 = vcombine.low %v3305_v53, %v3313_v55 }
0x1074   : > { %4232 = vmatpush1.bf16.msra.mxu1 %v6366_v59  ;;  %4273 = vmatpush1.bf16.msra.mxu0 %v6368_v61  ;;  %v6373_v59 = vcombine.high %v3305_v53, %v3313_v55  ;;  %v3320_v61 = vld [vmem:[%s7684_s21 + $0x3b0] sm:$0xff] }
0x1075   : > { %4233 = vmatprep.subr.bf16.mxu1 %v6383_v62  ;;  %4274 = vmatprep.subr.bf16.mxu0 %v6385_v0  ;;  %v3328_v62 = vld [vmem:[%s7684_s21 + $0x3f0] sm:$0xff]  ;;  %v3321_v0 = vld [vmem:[%s7684_s21 + $0x3b8] sm:$0xff] }
0x1076   : > { %v6387_v6 = vcombine.high %v3320_v61, %v3328_v62 }
0x1078   : > { %4234 = vmatpush1.bf16.msra.mxu1 %v6382_v63  ;;  %4275 = vmatpush1.bf16.msra.mxu0 %v6384_v8  ;;  %v6389_v63 = vcombine.high %v3321_v0, %v3329_v1  ;;  %v6386_v8 = vcombine.low %v3320_v61, %v3328_v62 }
0x1079   : > { %4301 = vmatprep.subr.bf16.mxu1 %v6275_v9  ;;  %4342 = vmatprep.subr.bf16.mxu0 %v6277_v12  ;;  %v6388_v9 = vcombine.low %v3321_v0, %v3329_v1  ;;  %v7121_v12 = vld [vmem:[%s8533_s5 + $0x40] sm:$0xff]  }
0x107b   : > { %4252 = vmatmul.mubr.bf16.vlgmr.msra.gmra.mrb[40].mxu1 %v8059_v4  ;;  %4293 = vmatmul.mubr.bf16.vlgmr.msra.gmra.mrb[28].mxu0 %v8059_v4 }
0x107c   : > { %4302 = vmatpush1.bf16.msra.mxu1 %v6274_v31  ;;  %4343 = vmatpush1.bf16.msra.mxu0 %v6276_v15  ;;  %v7126_v31 = vld [vmem:[%s8533_s5 + $0xc8] sm:$0xff]  }
0x107d   : > { %4303 = vmatprep.subr.bf16.mxu1 %v6291_v60  ;;  %4344 = vmatprep.subr.bf16.mxu0 %v6293_v16  ;;  %v7127_v15 = vld [vmem:[%s8533_s5 + $0x8] sm:$0xff]   ;;  %v7129_v16 = vld [vmem:[%s8533_s5 + $0x50] sm:$0xff]  }
0x107e   : > { %4333 = vmatprep.mubr.bf16.mxu1 %v7360_v11  ;;  %4374 = vmatprep.mubr.bf16.mxu0 %v7360_v11  ;;  %v6324_v11 = vcombine.low %v3257_v30, %v3265_v32  ;;  %v7128_v60 = vld [vmem:[%s8533_s5 + $0x88] sm:$0xff]  }
0x107f   : > { %v7141_v30 = vld [vmem:[%s8533_s5 + $0x68] sm:$0xff]  }
0x1080   : > { %4304 = vmatpush1.bf16.msra.mxu1 %v6290_v22  ;;  %4345 = vmatpush1.bf16.msra.mxu0 %v6292_v23  ;;  %v7135_v22 = vld [vmem:[%s8533_s5 + $0x18] sm:$0xff]   ;;  %v7142_v32 = vld [vmem:[%s8533_s5 + $0xe8] sm:$0xff]  }
0x1081   : > { %4305 = vmatprep.subr.bf16.mxu1 %v6307_v26  ;;  %4346 = vmatprep.subr.bf16.mxu0 %v6309_v10  ;;  %v7136_v23 = vld [vmem:[%s8533_s5 + $0x98] sm:$0xff]   ;;  %v7137_v26 = vld [vmem:[%s8533_s5 + $0x60] sm:$0xff]  }
0x1082   : > { %v7138_v10 = vld [vmem:[%s8533_s5 + $0xe0] sm:$0xff]  }
0x1084   : > { %4306 = vmatpush1.bf16.msra.mxu1 %v6306_v33  ;;  %4347 = vmatpush1.bf16.msra.mxu0 %v6308_v35  ;;  %v7143_v33 = vld [vmem:[%s8533_s5 + $0x28] sm:$0xff]  }
0x1085   : > { %4307 = vmatprep.subr.bf16.mxu1 %v6323_v37  ;;  %4348 = vmatprep.subr.bf16.mxu0 %v6325_v38  ;;  %v7144_v35 = vld [vmem:[%s8533_s5 + $0xa8] sm:$0xff]   ;;  %v7145_v37 = vld [vmem:[%s8533_s5 + $0x70] sm:$0xff]  }
0x1086   : > { %v7146_v38 = vld [vmem:[%s8533_s5 + $0xf0] sm:$0xff]  }
0x1088   : > { %4308 = vmatpush1.bf16.msra.mxu1 %v6322_v42  ;;  %4349 = vmatpush1.bf16.msra.mxu0 %v6324_v11  ;;  %v7151_v42 = vld [vmem:[%s8533_s5 + $0x38] sm:$0xff]  }
0x1089   : > { %4309 = vmatprep.subr.bf16.mxu1 %v6339_v43  ;;  %4350 = vmatprep.subr.bf16.mxu0 %v6341_v44  ;;  %v7152_v11 = vld [vmem:[%s8533_s5 + $0xb8] sm:$0xff]   ;;  %v7153_v43 = vld [vmem:[%s8533_s5 + $0x140] sm:$0xff]  }
0x108a   : > { %v7154_v44 = vld [vmem:[%s8533_s5 + $0x1c0] sm:$0xff]  }
0x108c   : > { %4310 = vmatpush1.bf16.msra.mxu1 %v6338_v21  ;;  %4351 = vmatpush1.bf16.msra.mxu0 %v6340_v49  ;;  %v3346_v21 = vrot.slane %v8199_v46, %v3345_v45  ;;  %v3342_v49 = vrot.slane %v8199_v46, %v7819_v27 }
0x108d   : > { %4311 = vmatprep.subr.bf16.mxu1 %v6355_v50  ;;  %4352 = vmatprep.subr.bf16.mxu0 %v6357_v51  ;;  %v3350_v50 = vrot.slane %v8199_v46, %v3349_v47 }
0x1090   : > { %4312 = vmatpush1.bf16.msra.mxu1 %v6354_v56  ;;  %4353 = vmatpush1.bf16.msra.mxu0 %v6356_v57 }
0x1091   : > { %4313 = vmatprep.subr.bf16.mxu1 %v6371_v58  ;;  %4354 = vmatprep.subr.bf16.mxu0 %v6373_v59 }
0x1094   : > { %4314 = vmatpush1.bf16.msra.mxu1 %v6370_v2  ;;  %4355 = vmatpush1.bf16.msra.mxu0 %v6372_v5 }
0x1095   : > { %4315 = vmatprep.subr.bf16.mxu1 %v6387_v6  ;;  %4356 = vmatprep.subr.bf16.mxu0 %v6389_v63 }
0x1098   : > { %4316 = vmatpush1.bf16.msra.mxu1 %v6386_v8  ;;  %4357 = vmatpush1.bf16.msra.mxu0 %v6388_v9  ;;  %v7155_v9 = vld [vmem:[%s8533_s5 + $0x100] sm:$0xff]  }
0x1099   : > { %6602 = vmatprep.subr.bf16.mxu1 %v7121_v12  ;;  %6624 = vmatprep.subr.bf16.mxu0 %v7122_v13  ;;  %v7156_v12 = vld [vmem:[%s8533_s5 + $0x180] sm:$0xff]  }
0x109b   : > { %4334 = vmatmul.mubr.bf16.vlgmr.msra.gmra.mrb[44].mxu1 %v8059_v4  ;;  %4375 = vmatmul.mubr.bf16.vlgmr.msra.gmra.mrb[32].mxu0 %v8059_v4  ;;  %v7133_v4 = vld [vmem:[%s8533_s5 + $0x58] sm:$0xff]  }
0x109c   : > { %6603 = vmatpush3.bf16.msra.mxu1 %v7123_v34  ;;  %6625 = vmatpush3.bf16.msra.mxu0 %v7124_v36  ;;  %v7157_v36 = vld [vmem:[%s8533_s5 + $0x148] sm:$0xff]  }
0x109d   : > { %6604 = vmatprep.subr.bf16.mxu1 %v7125_v14  ;;  %6626 = vmatprep.subr.bf16.mxu0 %v7126_v31  ;;  %v7158_v14 = vld [vmem:[%s8533_s5 + $0x1c8] sm:$0xff]  }
0x109e   : > { %v7159_v31 = vld [vmem:[%s8533_s5 + $0x108] sm:$0xff]  }
0x10a0   : > { %6605 = vmatpush3.bf16.msra.mxu1 %v7127_v15  ;;  %6627 = vmatpush3.bf16.msra.mxu0 %v7128_v60  ;;  %v7160_v15 = vld [vmem:[%s8533_s5 + $0x188] sm:$0xff]   ;;  %v7161_v60 = vld [vmem:[%s8533_s5 + $0x150] sm:$0xff]  }
0x10a1   : > { %6606 = vmatprep.subr.bf16.mxu1 %v7129_v16  ;;  %6628 = vmatprep.subr.bf16.mxu0 %v7130_v17  ;;  %v7162_v16 = vld [vmem:[%s8533_s5 + $0x1d0] sm:$0xff]  }
0x10a2   : > { %v7163_v17 = vld [vmem:[%s8533_s5 + $0x110] sm:$0xff]  }
0x10a4   : > { %6607 = vmatpush3.bf16.msra.mxu1 %v7131_v18  ;;  %6629 = vmatpush3.bf16.msra.mxu0 %v7132_v19  ;;  %v7164_v18 = vld [vmem:[%s8533_s5 + $0x190] sm:$0xff]   ;;  %v7165_v19 = vld [vmem:[%s8533_s5 + $0x158] sm:$0xff]  }
0x10a5   : > { %6608 = vmatprep.subr.bf16.mxu1 %v7133_v4  ;;  %6630 = vmatprep.subr.bf16.mxu0 %v7134_v20  ;;  %v7166_v4 = vld [vmem:[%s8533_s5 + $0x1d8] sm:$0xff]  }
0x10a6   : > { %v7167_v20 = vld [vmem:[%s8533_s5 + $0x118] sm:$0xff]  }
0x10a8   : > { %6609 = vmatpush3.bf16.msra.mxu1 %v7135_v22  ;;  %6631 = vmatpush3.bf16.msra.mxu0 %v7136_v23  ;;  %v7168_v22 = vld [vmem:[%s8533_s5 + $0x198] sm:$0xff]   ;;  %v7169_v23 = vld [vmem:[%s8533_s5 + $0x160] sm:$0xff]  }
0x10a9   : > { %6610 = vmatprep.subr.bf16.mxu1 %v7137_v26  ;;  %6632 = vmatprep.subr.bf16.mxu0 %v7138_v10  ;;  %v7170_v26 = vld [vmem:[%s8533_s5 + $0x1e0] sm:$0xff]  }
0x10aa   : > { %v7171_v10 = vld [vmem:[%s8533_s5 + $0x120] sm:$0xff]  }
0x10ac   : > { %6611 = vmatpush3.bf16.msra.mxu1 %v7139_v28  ;;  %6633 = vmatpush3.bf16.msra.mxu0 %v7140_v29  ;;  %v7172_v28 = vld [vmem:[%s8533_s5 + $0x1a0] sm:$0xff]   ;;  %v7173_v29 = vld [vmem:[%s8533_s5 + $0x168] sm:$0xff]  }
0x10ad   : > { %6612 = vmatprep.subr.bf16.mxu1 %v7141_v30  ;;  %6634 = vmatprep.subr.bf16.mxu0 %v7142_v32  ;;  %v7174_v30 = vld [vmem:[%s8533_s5 + $0x1e8] sm:$0xff]   ;;  %v3353_v32 = vsub.s32 4, %v7812_v24 }
0x10b0   : > { %6613 = vmatpush3.bf16.msra.mxu1 %v7143_v33  ;;  %6635 = vmatpush3.bf16.msra.mxu0 %v7144_v35  ;;  %v3361_v33 = vsub.s32 6, %v7812_v24  ;;  %v7175_v35 = vld [vmem:[%s8533_s5 + $0x128] sm:$0xff]  }
0x10b1   : > { %6614 = vmatprep.subr.bf16.mxu1 %v7145_v37  ;;  %6636 = vmatprep.subr.bf16.mxu0 %v7146_v38  ;;  %v7176_v37 = vld [vmem:[%s8533_s5 + $0x1a8] sm:$0xff]   ;;  %v3357_v38 = vsub.s32 5, %v7812_v24 }
0x10b4   : > { %6615 = vmatpush3.bf16.msra.mxu1 %v7147_v39  ;;  %6637 = vmatpush3.bf16.msra.mxu0 %v7148_v7  ;;  %v3365_v39 = vsub.s32 7, %v7812_v24  ;;  %v7177_v7 = vld [vmem:[%s8533_s5 + $0x170] sm:$0xff]  }
0x10b5   : > { %6616 = vmatprep.subr.bf16.mxu1 %v7149_v40  ;;  %6638 = vmatprep.subr.bf16.mxu0 %v7150_v41  ;;  %v7178_v40 = vld [vmem:[%s8533_s5 + $0x1f0] sm:$0xff]   ;;  %v3354_v41 = vrot.slane %v8199_v46, %v3353_v32 }
0x10b8   : > { %6617 = vmatpush3.bf16.msra.mxu1 %v7151_v42  ;;  %6639 = vmatpush3.bf16.msra.mxu0 %v7152_v11  ;;  %v3362_v42 = vrot.slane %v8199_v46, %v3361_v33  ;;  %v3358_v11 = vrot.slane %v8199_v46, %v3357_v38 }
0x10b9   : > { %6646 = vmatprep.subr.bf16.mxu1 %v7153_v43  ;;  %6668 = vmatprep.subr.bf16.mxu0 %v7154_v44  ;;  %v3366_v43 = vrot.slane %v8199_v46, %v3365_v39  ;;  %v7179_v44 = vld [vmem:[%s8533_s5 + $0x130] sm:$0xff]  }
0x110e   : > { %v4089_v51 = vpop.f32.mrb[32].mxu1  ;;  %v4130_v52 = vpop.f32.mrb[20].mxu0 }
0x110f   : > { %v4090_v54 = vadd.f32 %v4089_v51, %v3338_v48  ;;  %v4131_v53 = vadd.f32 %v4130_v52, %v3346_v21  ;;  %v4091_v55 = vpop.f32.mrb[33].mxu1  ;;  %v4132_v56 = vpop.f32.mrb[21].mxu0  ;;  %v7180_v48 = vld [vmem:[%s8533_s5 + $0x1b0] sm:$0xff]   ;;  %v7181_v21 = vld [vmem:[%s8533_s5 + $0x178] sm:$0xff]  }
0x1110   : > { %v4092_v57 = vadd.f32 %v4091_v55, %v3342_v49  ;;  %v4133_v58 = vadd.f32 %v4132_v56, %v3350_v50  ;;  %v4093_v59 = vpop.f32.mrb[34].mxu1  ;;  %v4134_v61 = vpop.f32.mrb[22].mxu0  ;;  %v7182_v49 = vld [vmem:[%s8533_s5 + $0x1f8] sm:$0xff]  }
0x1111   : > { %v4383_v62 = vmax.f32 %v4090_v54, 0.0  ;;  %v4385_v0 = vmax.f32 %v4131_v53, 0.0  ;;  %v4094_v1 = vpop.f32.mrb[35].mxu1  ;;  %v4135_v2 = vpop.f32.mrb[23].mxu0  ;;  %v7183_v59 = vld [vmem:[%s8533_s5 + $0x138] sm:$0xff]  }
0x1112   : > { %v4384_v5 = vmax.f32 %v4092_v57, 0.0  ;;  %v4386_v6 = vmax.f32 %v4133_v58, 0.0  ;;  %v7184_v61 = vld [vmem:[%s8533_s5 + $0x1b8] sm:$0xff]  }
0x1113   : > { %v4656_v13 = vpack.c.bf16 %v4383_v62, %v4383_v62  ;;  %v4658_v34 = vpack.c.bf16 %v4385_v0, %v4385_v0 }
0x1114   : > { %v4657_v63 = vpack.c.bf16 %v4384_v5, %v4384_v5  ;;  %v4659_v8 = vpack.c.bf16 %v4386_v6, %v4386_v6  ;;  %v7185_v5 = vld [vmem:[%s8533_s5 + $0x240] sm:$0xff]  }
0x1115   : > { %v7186_v6 = vld [vmem:[%s8533_s5 + $0x2c0] sm:$0xff]  }
0x1116   : > { %5478 = vmatprep.mubr.bf16.mxu1 %v4657_v63  ;;  %5518 = vmatprep.mubr.bf16.mxu0 %v4659_v8 }
0x1117   : > { %5479 = vmatmul.mubr.bf16.vlgmr.msra.gmra.mrb[48].mxu1 %v4656_v13  ;;  %5519 = vmatmul.mubr.bf16.vlgmr.msra.gmra.mrb[36].mxu0 %v4658_v34  ;;  %v7187_v13 = vld [vmem:[%s8533_s5 + $0x200] sm:$0xff]  }
0x1118   : > { %6647 = vmatpush3.bf16.msra.mxu1 %v7155_v9  ;;  %6669 = vmatpush3.bf16.msra.mxu0 %v7156_v12  ;;  %v7188_v34 = vld [vmem:[%s8533_s5 + $0x280] sm:$0xff]  }
0x1119   : > { %6648 = vmatprep.subr.bf16.mxu1 %v7157_v36  ;;  %6670 = vmatprep.subr.bf16.mxu0 %v7158_v14 }
0x111c   : > { %6649 = vmatpush3.bf16.msra.mxu1 %v7159_v31  ;;  %6671 = vmatpush3.bf16.msra.mxu0 %v7160_v15  ;;  %v7189_v31 = vld [vmem:[%s8533_s5 + $0x248] sm:$0xff]  }
0x111d   : > { %6650 = vmatprep.subr.bf16.mxu1 %v7161_v60  ;;  %6672 = vmatprep.subr.bf16.mxu0 %v7162_v16  ;;  %v7190_v15 = vld [vmem:[%s8533_s5 + $0x2c8] sm:$0xff]  }
0x111e   : > { %v7191_v60 = vld [vmem:[%s8533_s5 + $0x208] sm:$0xff]  }
0x111f   : > { %v7192_v16 = vld [vmem:[%s8533_s5 + $0x288] sm:$0xff]  }
0x1120   : > { %6651 = vmatpush3.bf16.msra.mxu1 %v7163_v17  ;;  %6673 = vmatpush3.bf16.msra.mxu0 %v7164_v18  ;;  %v7193_v17 = vld [vmem:[%s8533_s5 + $0x250] sm:$0xff]  }
0x1121   : > { %6652 = vmatprep.subr.bf16.mxu1 %v7165_v19  ;;  %6674 = vmatprep.subr.bf16.mxu0 %v7166_v4  ;;  %v7194_v18 = vld [vmem:[%s8533_s5 + $0x2d0] sm:$0xff]  }
0x1122   : > { %v7195_v19 = vld [vmem:[%s8533_s5 + $0x210] sm:$0xff]  }
0x1123   : > { %v7196_v4 = vld [vmem:[%s8533_s5 + $0x290] sm:$0xff]  }
0x1124   : > { %6653 = vmatpush3.bf16.msra.mxu1 %v7167_v20  ;;  %6675 = vmatpush3.bf16.msra.mxu0 %v7168_v22  ;;  %v7197_v20 = vld [vmem:[%s8533_s5 + $0x258] sm:$0xff]  }
0x1125   : > { %6654 = vmatprep.subr.bf16.mxu1 %v7169_v23  ;;  %6676 = vmatprep.subr.bf16.mxu0 %v7170_v26  ;;  %v7198_v22 = vld [vmem:[%s8533_s5 + $0x2d8] sm:$0xff]  }
0x1126   : > { %v7199_v23 = vld [vmem:[%s8533_s5 + $0x218] sm:$0xff]  }
0x1127   : > { %v7200_v26 = vld [vmem:[%s8533_s5 + $0x298] sm:$0xff]  }
0x1128   : > { %6655 = vmatpush3.bf16.msra.mxu1 %v7171_v10  ;;  %6677 = vmatpush3.bf16.msra.mxu0 %v7172_v28  ;;  %v7201_v10 = vld [vmem:[%s8533_s5 + $0x260] sm:$0xff]  }
0x1129   : > { %6656 = vmatprep.subr.bf16.mxu1 %v7173_v29  ;;  %6678 = vmatprep.subr.bf16.mxu0 %v7174_v30  ;;  %v7202_v28 = vld [vmem:[%s8533_s5 + $0x2e0] sm:$0xff]  }
0x112a   : > { %v7203_v29 = vld [vmem:[%s8533_s5 + $0x220] sm:$0xff]  }
0x112b   : > { %v7204_v30 = vld [vmem:[%s8533_s5 + $0x2a0] sm:$0xff]  }
0x112c   : > { %6657 = vmatpush3.bf16.msra.mxu1 %v7175_v35  ;;  %6679 = vmatpush3.bf16.msra.mxu0 %v7176_v37  ;;  %v7205_v35 = vld [vmem:[%s8533_s5 + $0x268] sm:$0xff]  }
0x112d   : > { %6658 = vmatprep.subr.bf16.mxu1 %v7177_v7  ;;  %6680 = vmatprep.subr.bf16.mxu0 %v7178_v40  ;;  %v7206_v37 = vld [vmem:[%s8533_s5 + $0x2e8] sm:$0xff]  }
0x112e   : > { %v4171_v50 = vpop.f32.mrb[36].mxu1  ;;  %v4212_v51 = vpop.f32.mrb[24].mxu0  ;;  %v7207_v7 = vld [vmem:[%s8533_s5 + $0x228] sm:$0xff]  }
0x112f   : > { %v4172_v52 = vadd.f32 %v4171_v50, %v3354_v41  ;;  %v4213_v54 = vadd.f32 %v4212_v51, %v3362_v42  ;;  %v4173_v53 = vpop.f32.mrb[37].mxu1  ;;  %v4214_v55 = vpop.f32.mrb[25].mxu0  ;;  %v7208_v40 = vld [vmem:[%s8533_s5 + $0x2a8] sm:$0xff]   ;;  %v7209_v42 = vld [vmem:[%s8533_s5 + $0x270] sm:$0xff]   ;;  %v7214_v51 = vld [vmem:[%s8533_s5 + $0x2f8] sm:$0xff]  }
0x1130   : > { %v4174_v56 = vadd.f32 %v4173_v53, %v3358_v11  ;;  %v4215_v57 = vadd.f32 %v4214_v55, %v3366_v43  ;;  %v4175_v58 = vpop.f32.mrb[38].mxu1  ;;  %v4216_v46 = vpop.f32.mrb[26].mxu0  ;;  %6659 = vmatpush3.bf16.msra.mxu1 %v7179_v44  ;;  %6681 = vmatpush3.bf16.msra.mxu0 %v7180_v48  ;;  %v8283_v41 = vld [vmem:[%s7690_s24 + $0x8] sm:$0xff]  ;;  %v7210_v11 = vld [vmem:[%s8533_s5 + $0x2f0] sm:$0xff]  }
0x1131   : > { %v4387_v62 = vmax.f32 %v4172_v52, 0.0  ;;  %v4389_v0 = vmax.f32 %v4213_v54, 0.0  ;;  %v4176_v1 = vpop.f32.mrb[39].mxu1  ;;  %v4217_v2 = vpop.f32.mrb[27].mxu0  ;;  %6660 = vmatprep.subr.bf16.mxu1 %v7181_v21  ;;  %6682 = vmatprep.subr.bf16.mxu0 %v7182_v49  ;;  %v3370_v43 = vrot.slane %v8283_v41, %v7815_v25  ;;  %v3378_v44 = vrot.slane %v8283_v41, %v3345_v45  ;;  %v7211_v49 = vld [vmem:[%s8533_s5 + $0x230] sm:$0xff]   ;;  %v7213_v25 = vld [vmem:[%s8533_s5 + $0x278] sm:$0xff]  }
0x1132   : > { %v4388_v63 = vmax.f32 %v4174_v56, 0.0  ;;  %v4390_v8 = vmax.f32 %v4215_v57, 0.0  ;;  %v3374_v48 = vrot.slane %v8283_v41, %v7819_v27  ;;  %v3382_v21 = vrot.slane %v8283_v41, %v3349_v47  ;;  %v7212_v50 = vld [vmem:[%s8533_s5 + $0x2b0] sm:$0xff]   ;;  %v7215_v46 = vld [vmem:[%s8533_s5 + $0x238] sm:$0xff]   ;;  %v7217_v2 = vld [vmem:[%s8533_s5 + $0x340] sm:$0xff]  }
0x1133   : > { %v4660_v36 = vpack.c.bf16 %v4387_v62, %v4387_v62  ;;  %v4662_v14 = vpack.c.bf16 %v4389_v0, %v4389_v0 }
0x1134   : > { %v4661_v9 = vpack.c.bf16 %v4388_v63, %v4388_v63  ;;  %v4663_v12 = vpack.c.bf16 %v4390_v8, %v4390_v8  ;;  %6661 = vmatpush3.bf16.msra.mxu1 %v7183_v59  ;;  %6683 = vmatpush3.bf16.msra.mxu0 %v7184_v61  ;;  %v7216_v59 = vld [vmem:[%s8533_s5 + $0x2b8] sm:$0xff]  }
0x1135   : > { %6690 = vmatprep.subr.bf16.mxu1 %v7185_v5  ;;  %6712 = vmatprep.subr.bf16.mxu0 %v7186_v6  ;;  %v7218_v5 = vld [vmem:[%s8533_s5 + $0x3c0] sm:$0xff]  }
0x1136   : > { %5558 = vmatprep.mubr.bf16.mxu1 %v4661_v9  ;;  %5598 = vmatprep.mubr.bf16.mxu0 %v4663_v12  ;;  %v7219_v12 = vld [vmem:[%s8533_s5 + $0x300] sm:$0xff]  }
0x1137   : > { %5559 = vmatmul.mubr.bf16.vlgmr.msra.gmra.mrb[52].mxu1 %v4660_v36  ;;  %5599 = vmatmul.mubr.bf16.vlgmr.msra.gmra.mrb[40].mxu0 %v4662_v14  ;;  %v7221_v14 = vld [vmem:[%s8533_s5 + $0x348] sm:$0xff]  }
0x1138   : > { %6691 = vmatpush3.bf16.msra.mxu1 %v7187_v13  ;;  %6713 = vmatpush3.bf16.msra.mxu0 %v7188_v34  ;;  %v7220_v13 = vld [vmem:[%s8533_s5 + $0x380] sm:$0xff]  }
0x1139   : > { %6692 = vmatprep.subr.bf16.mxu1 %v7189_v31  ;;  %6714 = vmatprep.subr.bf16.mxu0 %v7190_v15  ;;  %v7222_v31 = vld [vmem:[%s8533_s5 + $0x3c8] sm:$0xff]  }
0x113a   : > { %v7223_v15 = vld [vmem:[%s8533_s5 + $0x308] sm:$0xff]  }
0x113c   : > { %6693 = vmatpush3.bf16.msra.mxu1 %v7191_v60  ;;  %6715 = vmatpush3.bf16.msra.mxu0 %v7192_v16  ;;  %v7224_v60 = vld [vmem:[%s8533_s5 + $0x388] sm:$0xff]   ;;  %v7225_v16 = vld [vmem:[%s8533_s5 + $0x350] sm:$0xff]  }
0x113d   : > { %6694 = vmatprep.subr.bf16.mxu1 %v7193_v17  ;;  %6716 = vmatprep.subr.bf16.mxu0 %v7194_v18  ;;  %v7226_v17 = vld [vmem:[%s8533_s5 + $0x3d0] sm:$0xff]  }
0x113e   : > { %v7227_v18 = vld [vmem:[%s8533_s5 + $0x310] sm:$0xff]  }
0x1140   : > { %6695 = vmatpush3.bf16.msra.mxu1 %v7195_v19  ;;  %6717 = vmatpush3.bf16.msra.mxu0 %v7196_v4  ;;  %v7228_v19 = vld [vmem:[%s8533_s5 + $0x390] sm:$0xff]   ;;  %v7229_v4 = vld [vmem:[%s8533_s5 + $0x358] sm:$0xff]  }
0x1141   : > { %6696 = vmatprep.subr.bf16.mxu1 %v7197_v20  ;;  %6718 = vmatprep.subr.bf16.mxu0 %v7198_v22  ;;  %v7230_v20 = vld [vmem:[%s8533_s5 + $0x3d8] sm:$0xff]  }
0x1142   : > { %v7231_v22 = vld [vmem:[%s8533_s5 + $0x318] sm:$0xff]  }
0x1144   : > { %6697 = vmatpush3.bf16.msra.mxu1 %v7199_v23  ;;  %6719 = vmatpush3.bf16.msra.mxu0 %v7200_v26  ;;  %v7232_v23 = vld [vmem:[%s8533_s5 + $0x398] sm:$0xff]   ;;  %v7233_v26 = vld [vmem:[%s8533_s5 + $0x360] sm:$0xff]  }
0x1145   : > { %6698 = vmatprep.subr.bf16.mxu1 %v7201_v10  ;;  %6720 = vmatprep.subr.bf16.mxu0 %v7202_v28  ;;  %v7234_v10 = vld [vmem:[%s8533_s5 + $0x3e0] sm:$0xff]  }
0x1146   : > { %v7235_v28 = vld [vmem:[%s8533_s5 + $0x320] sm:$0xff]  }
0x1148   : > { %6699 = vmatpush3.bf16.msra.mxu1 %v7203_v29  ;;  %6721 = vmatpush3.bf16.msra.mxu0 %v7204_v30  ;;  %v7236_v29 = vld [vmem:[%s8533_s5 + $0x3a0] sm:$0xff]   ;;  %v7237_v30 = vld [vmem:[%s8533_s5 + $0x368] sm:$0xff]  }
0x1149   : > { %6700 = vmatprep.subr.bf16.mxu1 %v7205_v35  ;;  %6722 = vmatprep.subr.bf16.mxu0 %v7206_v37  ;;  %v7238_v35 = vld [vmem:[%s8533_s5 + $0x3e8] sm:$0xff]  }
0x114a   : > { %v7239_v37 = vld [vmem:[%s8533_s5 + $0x328] sm:$0xff]  }
0x114c   : > { %6701 = vmatpush3.bf16.msra.mxu1 %v7207_v7  ;;  %6723 = vmatpush3.bf16.msra.mxu0 %v7208_v40  ;;  %v7240_v7 = vld [vmem:[%s8533_s5 + $0x3a8] sm:$0xff]   ;;  %v7241_v40 = vld [vmem:[%s8533_s5 + $0x370] sm:$0xff]  }
0x114d   : > { %6702 = vmatprep.subr.bf16.mxu1 %v7209_v42  ;;  %6724 = vmatprep.subr.bf16.mxu0 %v7210_v11  ;;  %v7242_v42 = vld [vmem:[%s8533_s5 + $0x3f0] sm:$0xff]   ;;  %v3386_v11 = vrot.slane %v8283_v41, %v3353_v32  ;;  %v7245_v32 = vld [vmem:[%s8533_s5 + $0x378] sm:$0xff]  }
0x114e   : > { %v4253_v52 = vpop.f32.mrb[40].mxu1  ;;  %v4294_v54 = vpop.f32.mrb[28].mxu0 }
0x114f   : > { %v4254_v45 = vadd.f32 %v4253_v52, %v3370_v43  ;;  %v4295_v53 = vadd.f32 %v4294_v54, %v3378_v44  ;;  %v4255_v55 = vpop.f32.mrb[41].mxu1  ;;  %v4296_v56 = vpop.f32.mrb[29].mxu0  ;;  %v3394_v43 = vrot.slane %v8283_v41, %v3361_v33  ;;  %v3390_v44 = vrot.slane %v8283_v41, %v3357_v38 }
0x1150   : > { %v4256_v27 = vadd.f32 %v4255_v55, %v3374_v48  ;;  %v4297_v57 = vadd.f32 %v4296_v56, %v3382_v21  ;;  %v4257_v58 = vpop.f32.mrb[42].mxu1  ;;  %v4298_v47 = vpop.f32.mrb[30].mxu0  ;;  %6703 = vmatpush3.bf16.msra.mxu1 %v7211_v49  ;;  %6725 = vmatpush3.bf16.msra.mxu0 %v7212_v50  ;;  %v3398_v48 = vrot.slane %v8283_v41, %v3365_v39  ;;  %v7243_v21 = vld [vmem:[%s8533_s5 + $0x330] sm:$0xff]   ;;  %v7246_v50 = vld [vmem:[%s8533_s5 + $0x3f8] sm:$0xff]  }
0x1151   : > { %v4391_v61 = vmax.f32 %v4254_v45, 0.0  ;;  %v4393_v62 = vmax.f32 %v4295_v53, 0.0  ;;  %v4258_v0 = vpop.f32.mrb[43].mxu1  ;;  %v4299_v1 = vpop.f32.mrb[31].mxu0  ;;  %6704 = vmatprep.subr.bf16.mxu1 %v7213_v25  ;;  %6726 = vmatprep.subr.bf16.mxu0 %v7214_v51  ;;  %v7244_v49 = vld [vmem:[%s8533_s5 + $0x3b0] sm:$0xff]   ;;  %v7247_v39 = vld [vmem:[%s8533_s5 + $0x338] sm:$0xff]  }
0x1152   : > { %v4392_v6 = vmax.f32 %v4256_v27, 0.0  ;;  %v4394_v63 = vmax.f32 %v4297_v57, 0.0  ;;  %v7248_v41 = vld [vmem:[%s8533_s5 + $0x3b8] sm:$0xff]  }
0x1153   : > { %v4664_v34 = vpack.c.bf16 %v4391_v61, %v4391_v61  ;;  %v4666_v36 = vpack.c.bf16 %v4393_v62, %v4393_v62 }
0x1154   : > { %v4665_v8 = vpack.c.bf16 %v4392_v6, %v4392_v6  ;;  %v4667_v9 = vpack.c.bf16 %v4394_v63, %v4394_v63  ;;  %6705 = vmatpush3.bf16.msra.mxu1 %v7215_v46  ;;  %6727 = vmatpush3.bf16.msra.mxu0 %v7216_v59 }
0x1155   : > { %6734 = vmatprep.subr.bf16.mxu1 %v7217_v2  ;;  %6756 = vmatprep.subr.bf16.mxu0 %v7218_v5  ;;  %v6390_v5 = vld [vmem:[%s1133_s0] ss:$0 sm:$0xff]  ;;  %s8535_s0 = sld [smem:[#allocation30_spill]] (!%p6521_p8) }
0x1156   : > { %5638 = vmatprep.mubr.bf16.mxu1 %v4665_v8  ;;  %5678 = vmatprep.mubr.bf16.mxu0 %v4667_v9 }
0x1157   : > { %5639 = vmatmul.mubr.bf16.vlgmr.msra.gmra.mrb[56].mxu1 %v4664_v34  ;;  %5679 = vmatmul.mubr.bf16.vlgmr.msra.gmra.mrb[44].mxu0 %v4666_v36 }
0x1158   : > { %6735 = vmatpush3.bf16.msra.mxu1 %v7219_v12  ;;  %6757 = vmatpush3.bf16.msra.mxu0 %v7220_v13 }
0x1159   : > { %6736 = vmatprep.subr.bf16.mxu1 %v7221_v14  ;;  %6758 = vmatprep.subr.bf16.mxu0 %v7222_v31 }
0x115c   : > { %6737 = vmatpush3.bf16.msra.mxu1 %v7223_v15  ;;  %6759 = vmatpush3.bf16.msra.mxu0 %v7224_v60 }
0x115d   : > { %6738 = vmatprep.subr.bf16.mxu1 %v7225_v16  ;;  %6760 = vmatprep.subr.bf16.mxu0 %v7226_v17 }
0x1160   : > { %6739 = vmatpush3.bf16.msra.mxu1 %v7227_v18  ;;  %6761 = vmatpush3.bf16.msra.mxu0 %v7228_v19 }
0x1161   : > { %6740 = vmatprep.subr.bf16.mxu1 %v7229_v4  ;;  %6762 = vmatprep.subr.bf16.mxu0 %v7230_v20 }
0x1164   : > { %6741 = vmatpush3.bf16.msra.mxu1 %v7231_v22  ;;  %6763 = vmatpush3.bf16.msra.mxu0 %v7232_v23 }
0x1165   : > { %6742 = vmatprep.subr.bf16.mxu1 %v7233_v26  ;;  %6764 = vmatprep.subr.bf16.mxu0 %v7234_v10 }
0x1168   : > { %6743 = vmatpush3.bf16.msra.mxu1 %v7235_v28  ;;  %6765 = vmatpush3.bf16.msra.mxu0 %v7236_v29 }
0x1169   : > { %6744 = vmatprep.subr.bf16.mxu1 %v7237_v30  ;;  %6766 = vmatprep.subr.bf16.mxu0 %v7238_v35 }
0x116c   : > { %6745 = vmatpush3.bf16.msra.mxu1 %v7239_v37  ;;  %6767 = vmatpush3.bf16.msra.mxu0 %v7240_v7 }
0x116d   : > { %6746 = vmatprep.subr.bf16.mxu1 %v7241_v40  ;;  %6768 = vmatprep.subr.bf16.mxu0 %v7242_v42 }
0x116e   : > { %v4335_v25 = vpop.f32.mrb[44].mxu1  ;;  %v4376_v33 = vpop.f32.mrb[32].mxu0 }
0x116f   : > { %v4336_v51 = vadd.f32 %v4335_v25, %v3386_v11  ;;  %v4377_v52 = vadd.f32 %v4376_v33, %v3394_v43  ;;  %v4337_v54 = vpop.f32.mrb[45].mxu1  ;;  %v4378_v45 = vpop.f32.mrb[33].mxu0 }
0x1170   : > { %v4338_v53 = vadd.f32 %v4337_v54, %v3390_v44  ;;  %v4379_v38 = vadd.f32 %v4378_v45, %v3398_v48  ;;  %v4339_v55 = vpop.f32.mrb[46].mxu1  ;;  %v4380_v24 = vpop.f32.mrb[34].mxu0  ;;  %6747 = vmatpush3.bf16.msra.mxu1 %v7243_v21  ;;  %6769 = vmatpush3.bf16.msra.mxu0 %v7244_v49 }
0x1171   : > { %v4395_v56 = vmax.f32 %v4336_v51, 0.0  ;;  %v4397_v27 = vmax.f32 %v4377_v52, 0.0  ;;  %v4340_v57 = vpop.f32.mrb[47].mxu1  ;;  %v4381_v58 = vpop.f32.mrb[35].mxu0  ;;  %6748 = vmatprep.subr.bf16.mxu1 %v7245_v32  ;;  %6770 = vmatprep.subr.bf16.mxu0 %v7246_v50 }
0x1172   : > { %v4396_v47 = vmax.f32 %v4338_v53, 0.0  ;;  %v4398_v46 = vmax.f32 %v4379_v38, 0.0 }
0x1173   : > { %v4668_v62 = vpack.c.bf16 %v4395_v56, %v4395_v56  ;;  %v4670_v0 = vpack.c.bf16 %v4397_v27, %v4397_v27 }
0x1174   : > { %v4669_v59 = vpack.c.bf16 %v4396_v47, %v4396_v47  ;;  %v4671_v61 = vpack.c.bf16 %v4398_v46, %v4398_v46  ;;  %6749 = vmatpush3.bf16.msra.mxu1 %v7247_v39  ;;  %6771 = vmatpush3.bf16.msra.mxu0 %v7248_v41 }
0x1176   : > { %5718 = vmatprep.mubr.bf16.mxu1 %v4669_v59  ;;  %5758 = vmatprep.mubr.bf16.mxu0 %v4671_v61 }
0x1177   : > { %5719 = vmatmul.mubr.bf16.vlgmr.msra.gmra.mrb[60].mxu1 %v4668_v62  ;;  %5759 = vmatmul.mubr.bf16.vlgmr.msra.gmra.mrb[48].mxu0 %v4670_v0  ;;  %v6520_v62 = vld [vmem:[%s1121_s25] ss:$0 sm:$0xff] }
0x11ea   : > { %v6618_v1 = vpop.f32.mrb[48].mxu1  ;;  %v6640_v2 = vpop.f32.mrb[36].mxu0 }
0x11eb   : > { %v6619_v6 = vpop.f32.mrb[49].mxu1  ;;  %v6641_v63 = vpop.f32.mrb[37].mxu0 }
0x11ec   : > { %v6620_v8 = vadd.f32 %v6619_v6, %v6618_v1  ;;  %v6642_v9 = vadd.f32 %v6641_v63, %v6640_v2  ;;  %v6621_v12 = vpop.f32.mrb[50].mxu1  ;;  %v6643_v13 = vpop.f32.mrb[38].mxu0  ;;  %v5831_v6 = vld [vmem:[%s8534_s3 + $0x8] sm:$0xff] (!%p6521_p8)  ;;  %v5832_v63 = vld [vmem:[%s8534_s3 + $0x10] sm:$0xff] (!%p6521_p8) }
0x11ed   : > { %v6622_v34 = vpop.f32.mrb[51].mxu1  ;;  %v6644_v36 = vpop.f32.mrb[39].mxu0  ;;  %v5833_v12 = vld [vmem:[%s8534_s3 + $0x18] sm:$0xff] (!%p6521_p8) }
0x11ee   : > { %v5481_v14 = vadd.f32 %v6620_v8, %v6390_v5  ;;  %v5830_v5 = vld [vmem:[%s8534_s3] sm:$0xff] (!%p6521_p8)  ;;  %v7365_v8 = vmov (!%p6521_p8), 0.0|0.0   ;;  %v6994_v13 = vpack.c.bf16 (!%p6521_p8), %v5833_v12, %v5832_v63  ;;  %v5835_v36 = vld [vmem:[%s8534_s3 + $0x28] sm:$0xff] (!%p6521_p8) }
0x11ef   : > { %6990 = vmatprep.subr.bf16.mxu0 (!%p6521_p8), %v7365_v8  ;;  %v5834_v34 = vld [vmem:[%s8534_s3 + $0x20] sm:$0xff] (!%p6521_p8) }
0x11f0   : > { %v5521_v31 = vadd.f32 %v6642_v9, %v5481_v14  ;;  %v6991_v9 = vpack.c.bf16 (!%p6521_p8), %v5831_v6, %v5830_v5  ;;  %v6997_v14 = vpack.c.bf16 (!%p6521_p8), %v5835_v36, %v5834_v34 }
0x11f2   : > { %6992 = vmatpush3.bf16.msra.mxu0 (!%p6521_p8), %v6991_v9 }
0x11f3   : > { %6993 = vmatprep.subr.bf16.mxu0 (!%p6521_p8), %v7365_v8 }
0x11f6   : > { %6995 = vmatpush3.bf16.msra.mxu0 (!%p6521_p8), %v6994_v13 }
0x11f7   : > { %6996 = vmatprep.subr.bf16.mxu0 (!%p6521_p8), %v7365_v8 }
0x11fa   : > { %6998 = vmatpush3.bf16.msra.mxu0 (!%p6521_p8), %v6997_v14 }
0x11fb   : > { %6999 = vmatprep.subr.bf16.mxu0 (!%p6521_p8), %v7365_v8 }
0x120a   : > { %v6662_v15 = vpop.f32.mrb[52].mxu1  ;;  %v6684_v60 = vpop.f32.mrb[40].mxu0 }
0x120b   : > { %v6663_v16 = vpop.f32.mrb[53].mxu1  ;;  %v6685_v17 = vpop.f32.mrb[41].mxu0 }
0x120c   : > { %v6664_v18 = vadd.f32 %v6663_v16, %v6662_v15  ;;  %v6686_v19 = vadd.f32 %v6685_v17, %v6684_v60  ;;  %v6665_v4 = vpop.f32.mrb[54].mxu1  ;;  %v6687_v20 = vpop.f32.mrb[42].mxu0 }
0x120d   : > { %v6666_v22 = vpop.f32.mrb[55].mxu1  ;;  %v6688_v23 = vpop.f32.mrb[43].mxu0  ;;  %v5838_v20 = vld [vmem:[%s8534_s3 + $0x40] sm:$0xff] (!%p6521_p8) }
0x120e   : > { %v5561_v26 = vadd.f32 %v6664_v18, %v5521_v31  ;;  %v5836_v18 = vld [vmem:[%s8534_s3 + $0x30] sm:$0xff] (!%p6521_p8)  ;;  %v5839_v22 = vld [vmem:[%s8534_s3 + $0x48] sm:$0xff] (!%p6521_p8) }
0x120f   : > { %v7003_v23 = vpack.c.bf16 (!%p6521_p8), %v5839_v22, %v5838_v20 }
0x1210   : > { %v5601_v10 = vadd.f32 %v6686_v19, %v5561_v26  ;;  %v5837_v19 = vld [vmem:[%s8534_s3 + $0x38] sm:$0xff] (!%p6521_p8)  ;;  %v5840_v26 = vld [vmem:[%s8534_s3 + $0x50] sm:$0xff] (!%p6521_p8) }
0x1211   : > { %v7000_v4 = vpack.c.bf16 (!%p6521_p8), %v5837_v19, %v5836_v18 }
0x1213   : > { %7001 = vmatpush3.bf16.msra.mxu0 (!%p6521_p8), %v7000_v4 }
0x1214   : > { %7002 = vmatprep.subr.bf16.mxu0 (!%p6521_p8), %v7365_v8 }
0x1217   : > { %7004 = vmatpush3.bf16.msra.mxu0 (!%p6521_p8), %v7003_v23 }
0x1218   : > { %7005 = vmatprep.subr.bf16.mxu0 (!%p6521_p8), %v7365_v8 }
0x122a   : > { %v6706_v28 = vpop.f32.mrb[56].mxu1  ;;  %v6728_v29 = vpop.f32.mrb[44].mxu0 }
0x122b   : > { %v6707_v30 = vpop.f32.mrb[57].mxu1  ;;  %v6729_v35 = vpop.f32.mrb[45].mxu0 }
0x122c   : > { %v6708_v37 = vadd.f32 %v6707_v30, %v6706_v28  ;;  %v6730_v7 = vadd.f32 %v6729_v35, %v6728_v29  ;;  %v6709_v40 = vpop.f32.mrb[58].mxu1  ;;  %v6731_v42 = vpop.f32.mrb[46].mxu0  ;;  %v7367_v28 = vmov (!%p6521_p8), 0.0   ;;  %v5842_v30 = vld [vmem:[%s8534_s3 + $0x60] sm:$0xff] (!%p6521_p8)  ;;  %v5843_v35 = vld [vmem:[%s8534_s3 + $0x68] sm:$0xff] (!%p6521_p8) }
0x122d   : > { %v6710_v11 = vpop.f32.mrb[59].mxu1  ;;  %v6732_v43 = vpop.f32.mrb[47].mxu0  ;;  %6987 = vmatprep.mubr.msk.f32.mxu0 (!%p6521_p8), %vm7366_vm10, %v7367_v28  ;;  %v5845_v40 = vld [vmem:[%s8534_s3 + $0x78] sm:$0xff] (!%p6521_p8) }
0x122e   : > { %v5641_v44 = vadd.f32 %v6708_v37, %v5601_v10  ;;  %v5841_v10 = vld [vmem:[%s8534_s3 + $0x58] sm:$0xff] (!%p6521_p8)  ;;  %v7009_v37 = vpack.c.bf16 (!%p6521_p8), %v5843_v35, %v5842_v30 }
0x122f   : > { %v7006_v29 = vpack.c.bf16 (!%p6521_p8), %v5841_v10, %v5840_v26 }
0x1230   : > { %v5681_v48 = vadd.f32 %v6730_v7, %v5641_v44  ;;  %v5844_v7 = vld [vmem:[%s8534_s3 + $0x70] sm:$0xff] (!%p6521_p8) }
0x1231   : > { %7007 = vmatpush3.bf16.msra.mxu0 (!%p6521_p8), %v7006_v29  ;;  %v7012_v42 = vpack.c.bf16 (!%p6521_p8), %v5845_v40, %v5844_v7 }
0x1232   : > { %7008 = vmatprep.subr.bf16.mxu0 (!%p6521_p8), %v7365_v8 }
0x1235   : > { %7010 = vmatpush3.bf16.msra.mxu0 (!%p6521_p8), %v7009_v37 }
0x1236   : > { %7011 = vmatprep.subr.bf16.mxu0 (!%p6521_p8), %v7365_v8 }
0x1239   : > { %7013 = vmatpush3.bf16.msra.mxu0 (!%p6521_p8), %v7012_v42 }
0x124a   : > { %v6750_v21 = vpop.f32.mrb[60].mxu1  ;;  %v6772_v49 = vpop.f32.mrb[48].mxu0 }
0x124b   : > { %v6751_v32 = vpop.f32.mrb[61].mxu1  ;;  %v6773_v50 = vpop.f32.mrb[49].mxu0 }
0x124c   : > { %v6752_v25 = vadd.f32 %v6751_v32, %v6750_v21  ;;  %v6774_v33 = vadd.f32 %v6773_v50, %v6772_v49  ;;  %v6753_v51 = vpop.f32.mrb[62].mxu1  ;;  %v6775_v52 = vpop.f32.mrb[50].mxu0  ;;  %v6522_v21 = vld [vmem:[%s8535_s0] ss:$0 sm:$0xff] (!%p6521_p8) }
0x124d   : > { %v6754_v54 = vpop.f32.mrb[63].mxu1  ;;  %v6776_v45 = vpop.f32.mrb[51].mxu0  ;;  %v6523_v32 = vld [vmem:[%s8536_s7] ss:$0 sm:$0xff] (!%p6521_p8) }
0x124e   : > { %v5721_v53 = vadd.f32 %v6752_v25, %v5681_v48 }
0x1250   : > { %v5761_v38 = vadd.f32 %v6774_v33, %v5721_v53  ;;  %v6524_v33 = vld [vmem:[#allocation4] ss:$0 sm:$0xff] (!%p6521_p8) }
0x1252   : > { %v5766_v55 = vadd.f32 %v5761_v38, %v8055_v3  ;;  %v6519_v3 = vld [vmem:[%s1118_s9] ss:$0 sm:$0xff]  ;;  %s8537_s9 = sld [smem:[#allocation33_spill]] (!%p6521_p8) }
0x1254   : > { %v5769_v24 = vsel %vm1379_vm1, %v5766_v55, 0.0 }
0x1255   : > { %5770 = vadd.xlane.f32.xlu0 %v5769_v24 }
0x12e2   : > { %v5771_v39 = vpop.xlane.xlu0 %5770 }
0x12e3   : > { %v5772_v41 = vmul.f32 0.0078125, %v5771_v39 }
0x12e5   : > { %v5773_v56 = vsub.f32 %v5766_v55, %v5772_v41 }
0x12e7   : > { %v5774_v27 = vmul.f32 %v5773_v56, %v5773_v56 }
0x12e9   : > { %v5775_v57 = vsel %vm1379_vm1, %v5774_v27, 0.0 }
0x12ea   : > { %5776 = vadd.xlane.f32.xlu0 %v5775_v57 }
0x1377   : > { %v5777_v58 = vpop.xlane.xlu0 %5776 }
0x1378   : > { %v5778_v47 = vmul.f32 0.0078125, %v5777_v58 }
0x137a   : > { %v5779_v46 = vadd.f32 1e-05, %v5778_v47 }
0x137c   : > { %7285 = vrsqrt.f32 %v5779_v46 }
0x1386   : > { %v7286_v59 = vpop.eup %7285 }
0x1387   : > { %v5781_v61 = vmul.f32 %v7286_v59, %v5773_v56  ;;  %5800 = sbr.rel (%p6521_p8) target bundleno = 5533 (0x159d), region = 140 }
0x1389   : > { %v5788_v0 = vmul.f32 %v6519_v3, %v5781_v61 }
0x138b   : > { %v5795_v1 = vadd.f32 %v6520_v62, %v5788_v0 }
0x138d   : > { %5796 = vst [vmem:[#allocation2] sm:$0x3] %v5795_v1  ;;  %v5803_v2 = vsel (!%p6521_p8), %vm1379_vm1, %v5795_v1, 0.0 }
0x138e   : > { %5804 = vadd.xlane.f32.xlu0 %v5803_v2 }
0x141b   : > { %v5805_v31 = vpop.xlane.xlu0 %5804 }
0x141c   : > { %v5806_v15 = vmul.f32 0.0078125, %v5805_v31 }
0x141e   : > { %v5807_v60 = vsub.f32 %v5795_v1, %v5806_v15 }
0x1420   : > { %v5808_v16 = vmul.f32 %v5807_v60, %v5807_v60 }
0x1422   : > { %v5809_v17 = vsel %vm1379_vm1, %v5808_v16, 0.0 }
0x1423   : > { %5810 = vadd.xlane.f32.xlu0 %v5809_v17 }
0x14b0   : > { %v5811_v11 = vpop.xlane.xlu0 %5810 }
0x14b1   : > { %v5812_v43 = vmul.f32 0.0078125, %v5811_v11 }
0x14b3   : > { %v5813_v44 = vadd.f32 1e-05, %v5812_v43 }
0x14b5   : > { %7287 = vrsqrt.f32 %v5813_v44 }
0x14bf   : > { %v7288_v48 = vpop.eup %7287 }
0x14c0   : > { %v5815_v49 = vmul.f32 %v7288_v48, %v5807_v60 }
0x14c2   : > { %v5822_v50 = vmul.f32 %v6522_v21, %v5815_v49 }
0x14c4   : > { %v5829_v25 = vadd.f32 %v6523_v32, %v5822_v50 }
0x14c6   : > { %6988 = vmatmul.mubr.f32.vlgmr.msra.gmra.mrb[0].mxu0 %v5829_v25 }
0x1599   : > { %v5919_v51 = vpop.f32.mrb[0].mxu0 }
0x159a   : > { %v5920_v52 = vadd.f32 %v6524_v33, %v5919_v51  ;;  %v6989_v54 = vpop.f32.mrb[1].mxu0 }
0x159c   : > { %5924 = vst.msk [vmem:[%s8537_s9] sm:$0x3] %vm5923_vm11, %v5920_v52 }
0x159d PF: > { %s8538_s5 = sld [smem:[#allocation10_spill]]  ;;  %s8539_s8 = sld [smem:[#allocation8_spill]] }
0x159e   : > { %s8540_s30 = sld [smem:[#allocation9_spill]]  ;;  %s8541_s9 = sld [smem:[#allocation11_spill]] }
0x15a3   : > { %p39_p4 = scmp.ge.s32.totalorder %s8538_s5, 8  }
0x15a5   :  { %41 = sbr.rel (!%p39_p4) target bundleno = 21 (0x15), region = 229 }
0x15ac   :  { %5936 = vsyncpa [#allocation6], 1 }
0x15ad   :  { %5938 = vsyncpa [#allocation6 + $0x1], 1 }

// kernel: midi_transformer_forward.2
= control target key start
LH: loop header
LB: loop body
LE: loop exit
PB: predicated region body
PF: predicated region fallthrough
CT: control target
= control target key end

     0   :  { %s8712_s0 = inlined_call_operand.vmem [shape: f32[16,3], index: 0, kind: input, shape index: {}]   ;;  %s8713_s1 = inlined_call_operand.hbm [shape: f32[3,128], index: 1, kind: input, shape index: {}]   ;;  %s8714_s2 = inlined_call_operand.hbm [shape: f32[1,128], index: 2, kind: input, shape index: {}]   ;;  %s8715_s3 = inlined_call_operand.hbm [shape: bf16[4,128,384], index: 3, kind: input, shape index: {}]   ;;  %s8716_s4 = inlined_call_operand.hbm [shape: f32[4,1,384], index: 4, kind: input, shape index: {}]   ;;  %s8717_s5 = inlined_call_operand.hbm [shape: bf16[4,128,128], index: 5, kind: input, shape index: {}]   ;;  %s8718_s6 = inlined_call_operand.hbm [shape: f32[4,1,128], index: 6, kind: input, shape index: {}]   ;;  %s8719_s7 = inlined_call_operand.hbm [shape: f32[4,1,128], index: 7, kind: input, shape index: {}]   ;;  %s8720_s8 = inlined_call_operand.hbm [shape: f32[4,1,128], index: 8, kind: input, shape index: {}]   ;;  %s8721_s9 = inlined_call_operand.hbm [shape: bf16[4,128,2048], index: 9, kind: input, shape index: {}]   ;;  %s8722_s10 = inlined_call_operand.hbm [shape: f32[4,1,2048], index: 10, kind: input, shape index: {}]   ;;  %s8723_s11 = inlined_call_operand.hbm [shape: bf16[4,2048,128], index: 11, kind: input, shape index: {}]   ;;  %s8724_s12 = inlined_call_operand.hbm [shape: f32[4,1,128], index: 12, kind: input, shape index: {}]   ;;  %s8725_s13 = inlined_call_operand.hbm [shape: f32[4,1,128], index: 13, kind: input, shape index: {}]   ;;  %s8726_s14 = inlined_call_operand.hbm [shape: f32[4,1,128], index: 14, kind: input, shape index: {}]   ;;  %s8727_s15 = inlined_call_operand.hbm [shape: f32[1,128], index: 15, kind: input, shape index: {}]   ;;  %s8728_s16 = inlined_call_operand.hbm [shape: f32[1,128], index: 16, kind: input, shape index: {}]   ;;  %s8729_s17 = inlined_call_operand.vmem [shape: f32[16,128], index: 17, kind: output, shape index: {}]  }
   0x1   :  { %8766 = sst [smem:[#allocation36_spill]] %s8712_s0 }
   0x2   :  { %8767 = sst [smem:[#allocation37_spill]] %s8713_s1 }
   0x3   :  { %8768 = sst [smem:[#allocation38_spill]] %s8715_s3 }
   0x4   :  { %8769 = sst [smem:[#allocation39_spill]] %s8716_s4 }
   0x5   :  { %8770 = sst [smem:[#allocation40_spill]] %s8725_s13 }
   0x6   :  { %8771 = sst [smem:[#allocation41_spill]] %s8726_s14 }
   0x7   :  { %8772 = sst [smem:[#allocation42_spill]] %s8727_s15 }
   0x8   :  { %8773 = sst [smem:[#allocation43_spill]] %s8728_s16 }
   0x9   :  { %8774 = sst [smem:[#allocation44_spill]] %s8729_s17 }
   0xa   :  { %22 = vsyncpa [#allocation5], 0 }
   0xb   :  { %23 = vsyncpa [#allocation7], 0 }
   0xc   :  { %24 = vsyncpa [#allocation22], 0  ;;  %s7547_s24 = smov 0   ;;  %s7549_s25 = smov 0  }
   0xd   :  { %s7551_s26 = smov 0   ;;  %s7553_s27 = smov 0  }
   0xe LB: > { %8775 = sst [smem:[#allocation28_spill]] %s7420_s25  ;;  %s7566_s28 = sadd.s32 4294967295, %s7428_s27   ;;  %s7428_s27 = sphi %s7553_s27, %s8833_s27   ;;  %s7424_s26 = sphi %s7551_s26, %s8836_s26   ;;  %s7420_s25 = sphi %s7549_s25, %s8835_s25   ;;  %s7416_s24 = sphi %s7547_s24, %s8834_s24  }
   0xf   : > { %8776 = sst [smem:[#allocation29_spill]] %s7424_s26  ;;  %s7569_s29 = sadd.s32 1, %s7428_s27  }
  0x10   : > { %8777 = sst [smem:[#allocation30_spill]] %s7566_s28  ;;  %s97_s0 = ssub.s32 %s7428_s27, %s7569_s29 }
  0x11   : > { %8778 = sst [smem:[#allocation31_spill]] %s7569_s29  ;;  %s100_s30 = sadd.s32 1, %s7424_s26 }
  0x12   : > { %p98_p0 = scmp.eq.s32.totalorder %s97_s0, 0  ;;  %p107_p1 = scmp.ne.s32.totalorder %s7424_s26, %s7420_s25 }
  0x13   : > { %p108_p2 = scmp.eq.s32.totalorder %s7428_s27, 0  ;;  %p113_p3 = scmp.ne.s32.totalorder %s7420_s25, %s7416_s24 }
  0x14   : > { %s7579_s18 = scalar_select %p98_p0, %s7424_s26, %s100_s30  }
  0x15   : > { %p7581_p4 = por %p108_p2, %p107_p1  ;;  %p8742_p5 = scmp.eq.s32.totalorder %s7566_s28, 0 }
  0x16   : > { %8779 = sst [smem:[#allocation32_spill]] %s7579_s18  ;;  %p5819_p6 = scmp.ge.s32.totalorder %s7428_s27, 1 }
  0x17   : > { %p473_p7 = scmp.lt.s32.totalorder %s7428_s27, 5  ;;  %p7590_p8 = por %p8742_p5, %p113_p3 }
  0x18   : > { %s7430_s21 = smov [#allocation4]   ;;  %p6640_p12 = scmp.lt.s32.totalorder %s7428_s27, 4 }
  0x19   : > { %s8781_s1 = scalar_select %p7590_p8, 1, 0 }
  0x1a   : > { %p7595_p10 = pnand %p5819_p6, %p473_p7  ;;  %s489_s22 = sshll.u32 %s7430_s21, 4  ;;  %s490_s22 = int_to_ptr.vmem [resolvable:$true] %s489_s22 }
  0x1b   : > { %8782 = sst [smem:[#allocation33_spill]] %s8781_s1  ;;  %s7603_s23 = sand.u32 1, %s7424_s26  }
  0x1c   : > { %s8783_s20 = scalar_select %p7595_p10, 1, 0 }
  0x1d   : > { %p6586_p11 = pneg %p7595_p10  ;;  %s533_s0 = sand.u32 1, %s7428_s27  }
  0x1e   : > { %8784 = sst [smem:[#allocation34_spill]] %s8783_s20  ;;  %p7614_p0 = pnand %p6640_p12, %p7581_p4 }
  0x1f   : > { %p7607_p13 = pnand %p6586_p11, %p8742_p5  ;;  %s6540_s21 = smul.u32 192, %s7603_s23 }
  0x20   : > { %s8787_s30 = scalar_select %p7614_p0, 1, 0 }
  0x21   : > { %s8785_s24 = scalar_select %p7607_p13, 1, 0 }
  0x22   : > { %s8788_s17 = sld [smem:[#allocation37_spill]]  ;;  %p7627_p2 = pneg %p7607_p13 }
  0x23   : > { %8786 = sst [smem:[#allocation35_spill]] %s8785_s24 }
  0x24   : > { %s8789_s28 = scalar_select %p7627_p2, 1, 0 }
  0x28   : > { %s6906_s1 = scalar_lea.hbm %s8788_s17, 64 }
  0x29   : > { %p6907_p1 = scmp.ne.s32.totalorder %s8788_s17, %s6906_s1  ;;  %p6913_p6 = scmp.lt.u32.totalorder %s6906_s1, %s8788_s17 }
  0x2b   : > { %p6909_p3 = pnand %p7627_p2, %p6907_p1 }
  0x2d   : > { %p6910_p4 = pneg %p6909_p3 }
  0x2f   : > { %p6915_p7 = pnand %p6913_p6, %p6910_p4 }
  0x31   : > { %6918 = shalt.err (!%p6915_p7)
}
  0x32   : > { %s6919_s29 = scalar_lea.vmem %s490_s22, 64  ;;  %p6927_p5 = scmp.lt.s32.totalorder %s490_s22, %s490_s22 }
  0x33   : > { %p6920_p11 = scmp.ne.s32.totalorder %s490_s22, %s6919_s29  ;;  %p6928_p8 = scmp.lt.s32.totalorder %s6919_s29, %s6919_s29 }
  0x35   : > { %p6922_p12 = pnand %p6920_p11, %p7627_p2  ;;  %p6929_p10 = por %p6928_p8, %p6927_p5 }
  0x37   : > { %p6923_p9 = pneg %p6922_p12 }
  0x39   : > { %p6930_p0 = pnand %p6929_p10, %p6923_p9 }
  0x3b   : > { %6933 = shalt.err (!%p6930_p0)
}
  0x3c   : > { %6589 = dma.hbm_to_vmem [thread:$0]  (!%p7607_p13), %s8788_s17, 64, %s490_s22, [#allocation5]  }
  0x3d   : > { %s6541_s18 = smul.u32 3072, %s7428_s27  ;;  %s537_s1 = scalar_lea.vmem [#allocation8], %s6540_s21 }
  0x3e   : > { %s544_s20 = sshll.u32 %s537_s1, 4  ;;  %s8790_s3 = sld [smem:[#allocation38_spill]]  ;;  %s7644_s20 = int_to_ptr.vmem [resolvable:$true] %s544_s20 }
  0x3f   : > { %s7651_s16 = scalar_lea.sflag [#allocation5], %s533_s0  ;;  %p8791_p8 = scmp.ne.s32.totalorder %s8787_s30, 0 }
  0x41   : > { %p7657_p9 = pneg %p8791_p8 }
  0x43   : > { %s8792_s22 = scalar_select %p7657_p9, 1, 0 }
  0x44   : > { %s7649_s29 = scalar_lea.hbm %s8790_s3, %s6541_s18  ;;  %s6939_s26 = scalar_lea.hbm %s8790_s3, 12288 }
  0x45   : > { %s6934_s25 = scalar_lea.hbm %s7649_s29, 3072  ;;  %p6940_p1 = scmp.lt.u32.totalorder %s7649_s29, %s8790_s3 }
  0x46   : > { %p6935_p5 = scmp.ne.s32.totalorder %s7649_s29, %s6934_s25  ;;  %p6941_p3 = scmp.lt.u32.totalorder %s6939_s26, %s6934_s25 }
  0x47   : > { %p6943_p6 = scmp.lt.u32.totalorder %s6934_s25, %s7649_s29 }
  0x48   : > { %p6937_p10 = pnand %p7657_p9, %p6935_p5  ;;  %p6942_p4 = por %p6941_p3, %p6940_p1 }
  0x4a   : > { %p6938_p0 = pneg %p6937_p10  ;;  %p6944_p7 = por %p6943_p6, %p6942_p4 }
  0x4c   : > { %p6945_p11 = pnand %p6944_p7, %p6938_p0 }
  0x4e   : > { %6948 = shalt.err (!%p6945_p11)
}
  0x4f   : > { %s6949_s0 = scalar_lea.vmem %s7644_s20, 3072  ;;  %s7431_s19 = smov [#allocation8]  }
  0x50   : > { %p6950_p12 = scmp.ne.s32.totalorder %s7644_s20, %s6949_s0  ;;  %s6954_s14 = sshll.u32 %s7431_s19, 4  ;;  %s6955_s14 = int_to_ptr.vmem [resolvable:$false] %s6954_s14 }
  0x51   : > { %s6956_s21 = scalar_lea.vmem %s6955_s14, 6144  ;;  %p6957_p13 = scmp.lt.s32.totalorder %s7644_s20, %s6955_s14 }
  0x52   : > { %p6952_p5 = pnand %p6950_p12, %p7657_p9  ;;  %p6958_p2 = scmp.lt.s32.totalorder %s6956_s21, %s6949_s0 }
  0x54   : > { %p6953_p10 = pneg %p6952_p5  ;;  %p6959_p1 = por %p6958_p2, %p6957_p13 }
  0x56   : > { %p6960_p3 = pnand %p6959_p1, %p6953_p10 }
  0x58   : > { %6963 = shalt.err (!%p6960_p3)
}
  0x59   : > { %s7432_s25 = smov 192   ;;  %s7433_s26 = smov 12  }
  0x5a   : > { %6602 = dma.hbm_to_vmem [thread:$0]  (!%p8791_p8), %s7649_s29, 3072, %s7644_s20, %s7651_s16, %s7432_s25, %s7432_s25, %s7433_s26  }
  0x5b   : > { %s6542_s18 = smul.u32 3, %s7603_s23  ;;  %s5827_s1 = sshll.u32 %s7603_s23, 6 }
  0x5c   : > { %s6543_s19 = smul.u32 48, %s7428_s27  ;;  %s6182_s0 = sshll.u32 %s7428_s27, 10 }
  0x5d   : > { %s8793_s4 = sld [smem:[#allocation39_spill]]  ;;  %s558_s17 = scalar_lea.vmem [#allocation9], %s6542_s18 }
  0x5e   : > { %s566_s15 = sshll.u32 %s558_s17, 4  ;;  %s7693_s20 = scalar_lea.hbm %s8717_s5, %s6182_s0  ;;  %s567_s15 = int_to_ptr.vmem [resolvable:$true] %s566_s15 }
  0x63   : > { %s7688_s3 = scalar_lea.hbm %s8793_s4, %s6543_s19  ;;  %s6969_s19 = scalar_lea.hbm %s8793_s4, 192 }
  0x64   : > { %s6964_s29 = scalar_lea.hbm %s7688_s3, 48  ;;  %p6970_p4 = scmp.lt.u32.totalorder %s7688_s3, %s8793_s4 }
  0x65   : > { %p6965_p13 = scmp.ne.s32.totalorder %s7688_s3, %s6964_s29  ;;  %p6971_p6 = scmp.lt.u32.totalorder %s6969_s19, %s6964_s29 }
  0x66   : > { %p6973_p11 = scmp.lt.u32.totalorder %s6964_s29, %s7688_s3 }
  0x67   : > { %p6967_p2 = pnand %p6965_p13, %p7657_p9  ;;  %p6972_p7 = por %p6971_p6, %p6970_p4 }
  0x69   : > { %p6968_p0 = pneg %p6967_p2  ;;  %p6974_p12 = por %p6973_p11, %p6972_p7 }
  0x6b   : > { %p6975_p5 = pnand %p6974_p12, %p6968_p0 }
  0x6d   : > { %6978 = shalt.err (!%p6975_p5)
}
  0x6e   : > { %s6979_s13 = scalar_lea.vmem %s567_s15, 48  ;;  %s7434_s17 = smov [#allocation9]  }
  0x6f   : > { %p6980_p10 = scmp.ne.s32.totalorder %s567_s15, %s6979_s13  ;;  %s6984_s24 = sshll.u32 %s7434_s17, 4  ;;  %s6985_s24 = int_to_ptr.vmem [resolvable:$false] %s6984_s24 }
  0x70   : > { %s6986_s18 = scalar_lea.vmem %s6985_s24, 96  ;;  %p6987_p13 = scmp.lt.s32.totalorder %s567_s15, %s6985_s24 }
  0x71   : > { %p6982_p1 = pnand %p6980_p10, %p7657_p9  ;;  %p6988_p2 = scmp.lt.s32.totalorder %s6986_s18, %s6979_s13 }
  0x73   : > { %p6983_p3 = pneg %p6982_p1  ;;  %p6989_p8 = por %p6988_p2, %p6987_p13 }
  0x75   : > { %p6990_p4 = pnand %p6989_p8, %p6983_p3 }
  0x77   : > { %6993 = shalt.err (!%p6990_p4)
}
  0x78   : > { %p8794_p6 = scmp.ne.s32.totalorder %s8787_s30, 0  ;;  %s577_s0 = scalar_lea.vmem [#allocation10], %s5827_s1 }
  0x79   : > { %s584_s29 = sshll.u32 %s577_s0, 4  ;;  %s6994_s25 = scalar_lea.hbm %s7693_s20, 1024  ;;  %s7715_s29 = int_to_ptr.vmem [resolvable:$true] %s584_s29 }
  0x7a   : > { %6605 = dma.hbm_to_vmem [thread:$0]  (!%p8794_p6), %s7688_s3, 48, %s567_s15, %s7651_s16  }
  0x7b   : > { %p6995_p0 = scmp.ne.s32.totalorder %s7693_s20, %s6994_s25  ;;  %s6999_s14 = scalar_lea.hbm %s8717_s5, 4096 }
  0x7c   : > { %p7000_p11 = scmp.lt.u32.totalorder %s7693_s20, %s8717_s5  ;;  %p7001_p12 = scmp.lt.u32.totalorder %s6999_s14, %s6994_s25 }
  0x7d   : > { %p6997_p8 = pnand %p6995_p0, %p7657_p9  ;;  %p7003_p10 = scmp.lt.u32.totalorder %s6994_s25, %s7693_s20 }
  0x7e   : > { %p7002_p5 = por %p7001_p12, %p7000_p11 }
  0x7f   : > { %p6998_p7 = pneg %p6997_p8 }
  0x80   : > { %p7004_p1 = por %p7003_p10, %p7002_p5 }
  0x82   : > { %p7005_p3 = pnand %p7004_p1, %p6998_p7 }
  0x84   : > { %7008 = shalt.err (!%p7005_p3)
}
  0x85   : > { %s7009_s3 = scalar_lea.vmem %s7715_s29, 1024  ;;  %s7435_s15 = smov [#allocation10]  }
  0x86   : > { %p7010_p13 = scmp.ne.s32.totalorder %s7715_s29, %s7009_s3  ;;  %s7014_s1 = sshll.u32 %s7435_s15, 4  ;;  %s7015_s1 = int_to_ptr.vmem [resolvable:$false] %s7014_s1 }
  0x87   : > { %s7016_s17 = scalar_lea.vmem %s7015_s1, 2048  ;;  %p7017_p0 = scmp.lt.s32.totalorder %s7715_s29, %s7015_s1 }
  0x88   : > { %p7012_p2 = pnand %p7010_p13, %p7657_p9  ;;  %p7018_p8 = scmp.lt.s32.totalorder %s7016_s17, %s7009_s3 }
  0x8a   : > { %p7013_p4 = pneg %p7012_p2  ;;  %p7019_p11 = por %p7018_p8, %p7017_p0 }
  0x8c   : > { %p7020_p12 = pnand %p7019_p11, %p7013_p4 }
  0x8e   : > { %7023 = shalt.err (!%p7020_p12)
}
  0x8f   : > { %s7436_s24 = smov 64   ;;  %s8759_s18 = smov 4  }
  0x90   : > { %6608 = dma.hbm_to_vmem [thread:$0]  (!%p8794_p6), %s7693_s20, 1024, %s7715_s29, %s7651_s16, %s7436_s24, %s7436_s24, %s8759_s18  }
  0x91   : > { %s7743_s0 = sshll.u32 %s7428_s27, 4  ;;  %s597_s14 = scalar_lea.vmem [#allocation11], %s7603_s23 }
  0x92   : > { %s7749_s19 = scalar_lea.hbm %s8718_s6, %s7743_s0  ;;  %s604_s21 = sshll.u32 %s597_s14, 4  ;;  %s605_s21 = int_to_ptr.vmem [resolvable:$true] %s604_s21 }
  0x93   : > { %s7024_s13 = scalar_lea.hbm %s7749_s19, 16  ;;  %s7029_s3 = scalar_lea.hbm %s8718_s6, 64 }
  0x94   : > { %p7025_p7 = scmp.ne.s32.totalorder %s7749_s19, %s7024_s13  ;;  %p7030_p1 = scmp.lt.u32.totalorder %s7749_s19, %s8718_s6 }
  0x95   : > { %p7031_p3 = scmp.lt.u32.totalorder %s7029_s3, %s7024_s13  ;;  %p7033_p2 = scmp.lt.u32.totalorder %s7024_s13, %s7749_s19 }
  0x96   : > { %p7027_p5 = pnand %p7025_p7, %p7657_p9 }
  0x97   : > { %p7032_p13 = por %p7031_p3, %p7030_p1 }
  0x98   : > { %p7028_p10 = pneg %p7027_p5 }
  0x99   : > { %p7034_p4 = por %p7033_p2, %p7032_p13 }
  0x9b   : > { %p7035_p0 = pnand %p7034_p4, %p7028_p10 }
  0x9d   : > { %7038 = shalt.err (!%p7035_p0)
}
  0x9e   : > { %s7039_s17 = scalar_lea.vmem %s605_s21, 16  ;;  %s7438_s25 = smov [#allocation11]  }
  0x9f   : > { %p7040_p8 = scmp.ne.s32.totalorder %s605_s21, %s7039_s17  ;;  %s7044_s26 = sshll.u32 %s7438_s25, 4  ;;  %s7045_s26 = int_to_ptr.vmem [resolvable:$false] %s7044_s26 }
  0xa0   : > { %s7046_s14 = scalar_lea.vmem %s7045_s26, 32  ;;  %p7047_p7 = scmp.lt.s32.totalorder %s605_s21, %s7045_s26 }
  0xa1   : > { %p7042_p11 = pnand %p7040_p8, %p7657_p9  ;;  %p7048_p5 = scmp.lt.s32.totalorder %s7046_s14, %s7039_s17 }
  0xa3   : > { %p7043_p12 = pneg %p7042_p11  ;;  %p7049_p6 = por %p7048_p5, %p7047_p7 }
  0xa5   : > { %p7050_p1 = pnand %p7049_p6, %p7043_p12 }
  0xa7   : > { %7053 = shalt.err (!%p7050_p1)
}
  0xa8   : > { %p8795_p3 = scmp.ne.s32.totalorder %s8787_s30, 0  ;;  %s7774_s29 = scalar_lea.hbm %s8719_s7, %s7743_s0 }
  0xa9   : > { %s614_s3 = scalar_lea.vmem [#allocation12], %s7603_s23  ;;  %s7054_s1 = scalar_lea.hbm %s7774_s29, 16 }
  0xaa   : > { %6611 = dma.hbm_to_vmem [thread:$0]  (!%p8795_p3), %s7749_s19, 16, %s605_s21, %s7651_s16  }
  0xab   : > { %s621_s15 = sshll.u32 %s614_s3, 4  ;;  %p7055_p6 = scmp.ne.s32.totalorder %s7774_s29, %s7054_s1  ;;  %s622_s15 = int_to_ptr.vmem [resolvable:$true] %s621_s15 }
  0xac   : > { %s7059_s19 = scalar_lea.hbm %s8719_s7, 64  ;;  %p7060_p2 = scmp.lt.u32.totalorder %s7774_s29, %s8719_s7 }
  0xad   : > { %p7057_p10 = pnand %p7055_p6, %p7657_p9  ;;  %p7061_p4 = scmp.lt.u32.totalorder %s7059_s19, %s7054_s1 }
  0xae   : > { %p7063_p8 = scmp.lt.u32.totalorder %s7054_s1, %s7774_s29 }
  0xaf   : > { %p7058_p13 = pneg %p7057_p10  ;;  %p7062_p0 = por %p7061_p4, %p7060_p2 }
  0xb1   : > { %p7064_p11 = por %p7063_p8, %p7062_p0 }
  0xb3   : > { %p7065_p12 = pnand %p7064_p11, %p7058_p13 }
  0xb5   : > { %7068 = shalt.err (!%p7065_p12)
}
  0xb6   : > { %s7069_s14 = scalar_lea.vmem %s622_s15, 16  ;;  %s7439_s13 = smov [#allocation12]  }
  0xb7   : > { %p7070_p7 = scmp.ne.s32.totalorder %s622_s15, %s7069_s14  ;;  %s7074_s20 = sshll.u32 %s7439_s13, 4  ;;  %s7075_s20 = int_to_ptr.vmem [resolvable:$false] %s7074_s20 }
  0xb8   : > { %s7076_s3 = scalar_lea.vmem %s7075_s20, 32  ;;  %p7077_p6 = scmp.lt.s32.totalorder %s622_s15, %s7075_s20 }
  0xb9   : > { %p7072_p5 = pnand %p7070_p7, %p7657_p9  ;;  %p7078_p10 = scmp.lt.s32.totalorder %s7076_s3, %s7069_s14 }
  0xbb   : > { %p7073_p1 = pneg %p7072_p5  ;;  %p7079_p3 = por %p7078_p10, %p7077_p6 }
  0xbd   : > { %p7080_p2 = pnand %p7079_p3, %p7073_p1 }
  0xbf   : > { %7083 = shalt.err (!%p7080_p2)
}
  0xc0   : > { %p8796_p4 = scmp.ne.s32.totalorder %s8787_s30, 0  ;;  %s7799_s25 = scalar_lea.hbm %s8720_s8, %s7743_s0 }
  0xc1   : > { %s631_s19 = scalar_lea.vmem [#allocation13], %s7603_s23  ;;  %s8760_s26 = sshll.u32 %s7603_s23, 10 }
  0xc2   : > { %6614 = dma.hbm_to_vmem [thread:$0]  (!%p8796_p4), %s7774_s29, 16, %s622_s15, %s7651_s16  }
  0xc3   : > { %s638_s21 = sshll.u32 %s631_s19, 4  ;;  %s7084_s14 = scalar_lea.hbm %s7799_s25, 16  ;;  %s639_s21 = int_to_ptr.vmem [resolvable:$true] %s638_s21 }
  0xc4   : > { %p7085_p3 = scmp.ne.s32.totalorder %s7799_s25, %s7084_s14  ;;  %s7089_s15 = scalar_lea.hbm %s8720_s8, 64 }
  0xc5   : > { %p7090_p8 = scmp.lt.u32.totalorder %s7799_s25, %s8720_s8  ;;  %p7091_p11 = scmp.lt.u32.totalorder %s7089_s15, %s7084_s14 }
  0xc6   : > { %p7087_p13 = pnand %p7085_p3, %p7657_p9  ;;  %p7093_p7 = scmp.lt.u32.totalorder %s7084_s14, %s7799_s25 }
  0xc7   : > { %p7092_p12 = por %p7091_p11, %p7090_p8 }
  0xc8   : > { %p7088_p0 = pneg %p7087_p13 }
  0xc9   : > { %p7094_p5 = por %p7093_p7, %p7092_p12 }
  0xcb   : > { %p7095_p1 = pnand %p7094_p5, %p7088_p0 }
  0xcd   : > { %7098 = shalt.err (!%p7095_p1)
}
  0xce   : > { %s7099_s1 = scalar_lea.vmem %s639_s21, 16  ;;  %s7440_s17 = smov [#allocation13]  }
  0xcf   : > { %p7100_p6 = scmp.ne.s32.totalorder %s639_s21, %s7099_s1  ;;  %s7104_s19 = sshll.u32 %s7440_s17, 4  ;;  %s7105_s19 = int_to_ptr.vmem [resolvable:$false] %s7104_s19 }
  0xd0   : > { %s7106_s13 = scalar_lea.vmem %s7105_s19, 32  ;;  %p7107_p3 = scmp.lt.s32.totalorder %s639_s21, %s7105_s19 }
  0xd1   : > { %p7102_p10 = pnand %p7100_p6, %p7657_p9  ;;  %p7108_p13 = scmp.lt.s32.totalorder %s7106_s13, %s7099_s1 }
  0xd3   : > { %p7103_p2 = pneg %p7102_p10  ;;  %p7109_p4 = por %p7108_p13, %p7107_p3 }
  0xd5   : > { %p7110_p8 = pnand %p7109_p4, %p7103_p2 }
  0xd7   : > { %7113 = shalt.err (!%p7110_p8)
}
  0xd8   : > { %p8797_p11 = scmp.ne.s32.totalorder %s8787_s30, 0  ;;  %s6183_s14 = sshll.u32 %s7428_s27, 14 }
  0xd9   : > { %s7827_s20 = scalar_lea.hbm %s8721_s9, %s6183_s14  ;;  %s649_s3 = scalar_lea.vmem [#allocation14], %s8760_s26 }
  0xda   : > { %6617 = dma.hbm_to_vmem [thread:$0]  (!%p8797_p11), %s7799_s25, 16, %s639_s21, %s7651_s16  }
  0xdb   : > { %s656_s1 = sshll.u32 %s649_s3, 4  ;;  %s7114_s17 = scalar_lea.hbm %s7827_s20, 16384  ;;  %s7831_s1 = int_to_ptr.vmem [resolvable:$true] %s656_s1 }
  0xdc   : > { %p7115_p4 = scmp.ne.s32.totalorder %s7827_s20, %s7114_s17  ;;  %s7119_s19 = scalar_lea.hbm %s8721_s9, 65536 }
  0xdd   : > { %p7120_p7 = scmp.lt.u32.totalorder %s7827_s20, %s8721_s9  ;;  %p7121_p5 = scmp.lt.u32.totalorder %s7119_s19, %s7114_s17 }
  0xde   : > { %p7117_p0 = pnand %p7115_p4, %p7657_p9  ;;  %p7123_p6 = scmp.lt.u32.totalorder %s7114_s17, %s7827_s20 }
  0xdf   : > { %p7122_p1 = por %p7121_p5, %p7120_p7 }
  0xe0   : > { %p7118_p12 = pneg %p7117_p0 }
  0xe1   : > { %p7124_p10 = por %p7123_p6, %p7122_p1 }
  0xe3   : > { %p7125_p2 = pnand %p7124_p10, %p7118_p12 }
  0xe5   : > { %7128 = shalt.err (!%p7125_p2)
}
  0xe6   : > { %s7129_s15 = scalar_lea.vmem %s7831_s1, 16384  ;;  %s7441_s3 = smov [#allocation14]  }
  0xe7   : > { %p7130_p3 = scmp.ne.s32.totalorder %s7831_s1, %s7129_s15  ;;  %s7134_s25 = sshll.u32 %s7441_s3, 4  ;;  %s7135_s25 = int_to_ptr.vmem [resolvable:$false] %s7134_s25 }
  0xe8   : > { %s7136_s21 = scalar_lea.vmem %s7135_s25, 32768  ;;  %p7137_p4 = scmp.lt.s32.totalorder %s7831_s1, %s7135_s25 }
  0xe9   : > { %p7132_p13 = pnand %p7130_p3, %p7657_p9  ;;  %p7138_p0 = scmp.lt.s32.totalorder %s7136_s21, %s7129_s15 }
  0xeb   : > { %p7133_p8 = pneg %p7132_p13  ;;  %p7139_p7 = por %p7138_p0, %p7137_p4 }
  0xed   : > { %p7140_p5 = pnand %p7139_p7, %p7133_p8 }
  0xef   : > { %7143 = shalt.err (!%p7140_p5)
}
  0xf0   : > { %s7442_s17 = smov 1024   ;;  %s5836_s19 = sshll.u32 %s7603_s23, 4 }
  0xf1   : > { %6620 = dma.hbm_to_vmem [thread:$0]  (!%p8797_p11), %s7827_s20, 16384, %s7831_s1, %s7651_s16, %s7442_s17, %s7442_s17, %s7436_s24  }
  0xf2   : > { %s6184_s13 = sshll.u32 %s7428_s27, 8  ;;  %s670_s25 = scalar_lea.vmem [#allocation15], %s5836_s19 }
  0xf3   : > { %s7861_s15 = scalar_lea.hbm %s8722_s10, %s6184_s13  ;;  %s678_s21 = sshll.u32 %s670_s25, 4  ;;  %s679_s21 = int_to_ptr.vmem [resolvable:$true] %s678_s21 }
  0xf4   : > { %s7868_s4 = scalar_lea.hbm %s8723_s11, %s6183_s14  ;;  %s7144_s20 = scalar_lea.hbm %s7861_s15, 256 }
  0xf5   : > { %p7145_p12 = scmp.ne.s32.totalorder %s7861_s15, %s7144_s20  ;;  %s7149_s13 = scalar_lea.hbm %s8722_s10, 1024 }
  0xf6   : > { %p7150_p10 = scmp.lt.u32.totalorder %s7861_s15, %s8722_s10  ;;  %p7151_p2 = scmp.lt.u32.totalorder %s7149_s13, %s7144_s20 }
  0xf7   : > { %p7147_p1 = pnand %p7145_p12, %p7657_p9  ;;  %p7153_p13 = scmp.lt.u32.totalorder %s7144_s20, %s7861_s15 }
  0xf8   : > { %p7152_p3 = por %p7151_p2, %p7150_p10 }
  0xf9   : > { %p7148_p6 = pneg %p7147_p1 }
  0xfa   : > { %p7154_p8 = por %p7153_p13, %p7152_p3 }
  0xfc   : > { %p7155_p4 = pnand %p7154_p8, %p7148_p6 }
  0xfe   : > { %7158 = shalt.err (!%p7155_p4)
}
  0xff   : > { %s7159_s27 = scalar_lea.vmem %s679_s21, 256  ;;  %s7443_s18 = smov [#allocation15]  }
 0x100   : > { %p7160_p0 = scmp.ne.s32.totalorder %s679_s21, %s7159_s27  ;;  %s7164_s26 = sshll.u32 %s7443_s18, 4  ;;  %s7165_s26 = int_to_ptr.vmem [resolvable:$false] %s7164_s26 }
 0x101   : > { %s7166_s14 = scalar_lea.vmem %s7165_s26, 512  ;;  %p7167_p12 = scmp.lt.s32.totalorder %s679_s21, %s7165_s26 }
 0x102   : > { %p7162_p7 = pnand %p7160_p0, %p7657_p9  ;;  %p7168_p1 = scmp.lt.s32.totalorder %s7166_s14, %s7159_s27 }
 0x104   : > { %p7163_p5 = pneg %p7162_p7  ;;  %p7169_p11 = por %p7168_p1, %p7167_p12 }
 0x106   : > { %p7170_p2 = pnand %p7169_p11, %p7163_p5 }
 0x108   : > { %7173 = shalt.err (!%p7170_p2)
}
 0x109   : > { %p8798_p10 = scmp.ne.s32.totalorder %s8787_s30, 0  ;;  %s8799_s19 = sshll.u32 %s7603_s23, 10 }
 0x10a   : > { %s689_s25 = scalar_lea.vmem [#allocation16], %s8799_s19  ;;  %s7896_s13 = scalar_lea.hbm %s8724_s12, %s7743_s0 }
 0x10b   : > { %6623 = dma.hbm_to_vmem [thread:$0]  (!%p8798_p10), %s7861_s15, 256, %s679_s21, %s7651_s16  }
 0x10c   : > { %s696_s20 = sshll.u32 %s689_s25, 4  ;;  %s7174_s29 = scalar_lea.hbm %s7868_s4, 16384  ;;  %s7890_s20 = int_to_ptr.vmem [resolvable:$true] %s696_s20 }
 0x10d   : > { %p7175_p11 = scmp.ne.s32.totalorder %s7868_s4, %s7174_s29  ;;  %s7179_s18 = scalar_lea.hbm %s8723_s11, 65536 }
 0x10e   : > { %p7180_p13 = scmp.lt.u32.totalorder %s7868_s4, %s8723_s11  ;;  %p7181_p8 = scmp.lt.u32.totalorder %s7179_s18, %s7174_s29 }
 0x10f   : > { %p7177_p6 = pnand %p7175_p11, %p7657_p9  ;;  %p7183_p0 = scmp.lt.u32.totalorder %s7174_s29, %s7868_s4 }
 0x110   : > { %p7182_p4 = por %p7181_p8, %p7180_p13 }
 0x111   : > { %p7178_p3 = pneg %p7177_p6 }
 0x112   : > { %p7184_p7 = por %p7183_p0, %p7182_p4 }
 0x114   : > { %p7185_p5 = pnand %p7184_p7, %p7178_p3 }
 0x116   : > { %7188 = shalt.err (!%p7185_p5)
}
 0x117   : > { %s7189_s26 = scalar_lea.vmem %s7890_s20, 16384  ;;  %s7444_s14 = smov [#allocation16]  }
 0x118   : > { %p7190_p12 = scmp.ne.s32.totalorder %s7890_s20, %s7189_s26  ;;  %s7194_s19 = sshll.u32 %s7444_s14, 4  ;;  %s7195_s19 = int_to_ptr.vmem [resolvable:$false] %s7194_s19 }
 0x119   : > { %s7196_s25 = scalar_lea.vmem %s7195_s19, 32768  ;;  %p7197_p11 = scmp.lt.s32.totalorder %s7890_s20, %s7195_s19 }
 0x11a   : > { %p7192_p1 = pnand %p7190_p12, %p7657_p9  ;;  %p7198_p6 = scmp.lt.s32.totalorder %s7196_s25, %s7189_s26 }
 0x11c   : > { %p7193_p2 = pneg %p7192_p1  ;;  %p7199_p13 = por %p7198_p6, %p7197_p11 }
 0x11e   : > { %p7200_p8 = pnand %p7199_p13, %p7193_p2 }
 0x120   : > { %7203 = shalt.err (!%p7200_p8)
}
 0x121   : > { %s8800_s1 = smov 4   ;;  %s709_s17 = scalar_lea.vmem [#allocation17], %s7603_s23 }
 0x122   : > { %6626 = dma.hbm_to_vmem [thread:$0]  (!%p8798_p10), %s7868_s4, 16384, %s7890_s20, %s7651_s16, %s7436_s24, %s7436_s24, %s8800_s1  }
 0x123   : > { %s716_s29 = sshll.u32 %s709_s17, 4  ;;  %s7445_s3 = smov [#allocation6]   ;;  %s7924_s29 = int_to_ptr.vmem [resolvable:$true] %s716_s29 }
 0x124   : > { %s500_s27 = sshll.u32 %s7445_s3, 4  ;;  %s7204_s18 = scalar_lea.hbm %s7896_s13, 16  ;;  %s501_s27 = int_to_ptr.vmem [resolvable:$true] %s500_s27 }
 0x125   : > { %p7205_p3 = scmp.ne.s32.totalorder %s7896_s13, %s7204_s18  ;;  %s7209_s26 = scalar_lea.hbm %s8724_s12, 64 }
 0x126   : > { %p7210_p7 = scmp.lt.u32.totalorder %s7896_s13, %s8724_s12  ;;  %p7211_p5 = scmp.lt.u32.totalorder %s7209_s26, %s7204_s18 }
 0x127   : > { %p7207_p4 = pnand %p7205_p3, %p7657_p9  ;;  %p7213_p1 = scmp.lt.u32.totalorder %s7204_s18, %s7896_s13 }
 0x128   : > { %p7212_p12 = por %p7211_p5, %p7210_p7 }
 0x129   : > { %p7208_p0 = pneg %p7207_p4 }
 0x12a   : > { %p7214_p2 = por %p7213_p1, %p7212_p12 }
 0x12c   : > { %p7215_p11 = pnand %p7214_p2, %p7208_p0 }
 0x12e   : > { %7218 = shalt.err (!%p7215_p11)
}
 0x12f   : > { %s7219_s4 = scalar_lea.vmem %s7924_s29, 16  ;;  %s7446_s24 = smov [#allocation17]  }
 0x130   : > { %p7220_p6 = scmp.ne.s32.totalorder %s7924_s29, %s7219_s4  ;;  %s7224_s20 = sshll.u32 %s7446_s24, 4  ;;  %s7225_s20 = int_to_ptr.vmem [resolvable:$false] %s7224_s20 }
 0x131   : > { %s7226_s25 = scalar_lea.vmem %s7225_s20, 32  ;;  %p7227_p3 = scmp.lt.s32.totalorder %s7924_s29, %s7225_s20 }
 0x132   : > { %p7222_p13 = pnand %p7220_p6, %p7657_p9  ;;  %p7228_p4 = scmp.lt.s32.totalorder %s7226_s25, %s7219_s4 }
 0x134   : > { %p7223_p8 = pneg %p7222_p13  ;;  %p7229_p7 = por %p7228_p4, %p7227_p3 }
 0x136   : > { %p7230_p5 = pnand %p7229_p7, %p7223_p8 }
 0x138   : > { %7233 = shalt.err (!%p7230_p5)
}
 0x139   : > { %6629 = dma.hbm_to_vmem [thread:$0]  (!%p8798_p10), %s7896_s13, 16, %s7924_s29, %s7651_s16  }
 0x13a   : > { %s7234_s3 = scalar_lea.hbm %s8714_s2, 16  ;;  %p8801_p12 = scmp.ne.s32.totalorder %s8789_s28, 0 }
 0x13b   : > { %p7235_p0 = scmp.ne.s32.totalorder %s8714_s2, %s7234_s3  ;;  %p7241_p11 = scmp.lt.u32.totalorder %s7234_s3, %s8714_s2 }
 0x13d   : > { %p7237_p1 = pnand %p7235_p0, %p8801_p12 }
 0x13f   : > { %p7238_p2 = pneg %p7237_p1 }
 0x141   : > { %p7243_p6 = pnand %p7241_p11, %p7238_p2 }
 0x143   : > { %7246 = shalt.err (!%p7243_p6)
}
 0x144   : > { %s7247_s14 = scalar_lea.vmem %s501_s27, 16  ;;  %s7254_s13 = scalar_lea.vmem %s501_s27, 32 }
 0x145   : > { %p7248_p13 = scmp.ne.s32.totalorder %s501_s27, %s7247_s14  ;;  %p7255_p4 = scmp.lt.s32.totalorder %s501_s27, %s501_s27 }
 0x146   : > { %p7256_p7 = scmp.lt.s32.totalorder %s7254_s13, %s7247_s14 }
 0x147   : > { %p7250_p8 = pnand %p7248_p13, %p8801_p12 }
 0x148   : > { %p7257_p5 = por %p7256_p7, %p7255_p4 }
 0x149   : > { %p7251_p3 = pneg %p7250_p8 }
 0x14b   : > { %p7258_p10 = pnand %p7257_p5, %p7251_p3 }
 0x14d   : > { %7261 = shalt.err (!%p7258_p10)
}
 0x14e   : > { %s8802_s29 = sld [smem:[#allocation35_spill]]  ;;  %s8804_s25 = sld [smem:[#allocation40_spill]] }
 0x14f   : > { %s726_s3 = scalar_lea.vmem [#allocation18], %s7603_s23 }
 0x150   : > { %s733_s18 = sshll.u32 %s726_s3, 4  ;;  %s734_s18 = int_to_ptr.vmem [resolvable:$true] %s733_s18 }
 0x154   : > { %p8803_p0 = scmp.ne.s32.totalorder %s8802_s29, 0  ;;  %s8805_s1 = smov %s8804_s25 }
 0x155   : > { %s7970_s17 = scalar_lea.hbm %s8804_s25, %s7743_s0 }
 0x156   : > { %6592 = dma.hbm_to_vmem [thread:$0]  (!%p8803_p0), %s8714_s2, 16, %s501_s27, [#allocation7]  }
 0x157   : > { %s7262_s15 = scalar_lea.hbm %s7970_s17, 16  ;;  %s7267_s27 = scalar_lea.hbm %s8805_s1, 64 }
 0x158   : > { %p7263_p10 = scmp.ne.s32.totalorder %s7970_s17, %s7262_s15  ;;  %p7268_p11 = scmp.lt.u32.totalorder %s7970_s17, %s8805_s1 }
 0x159   : > { %p7269_p6 = scmp.lt.u32.totalorder %s7267_s27, %s7262_s15  ;;  %p7271_p8 = scmp.lt.u32.totalorder %s7262_s15, %s7970_s17 }
 0x15a   : > { %p7265_p1 = pnand %p7263_p10, %p7657_p9 }
 0x15b   : > { %p7270_p13 = por %p7269_p6, %p7268_p11 }
 0x15c   : > { %p7266_p2 = pneg %p7265_p1 }
 0x15d   : > { %p7272_p3 = por %p7271_p8, %p7270_p13 }
 0x15f   : > { %p7273_p4 = pnand %p7272_p3, %p7266_p2 }
 0x161   : > { %7276 = shalt.err (!%p7273_p4)
}
 0x162   : > { %s7277_s19 = scalar_lea.vmem %s734_s18, 16  ;;  %s7447_s4 = smov [#allocation18]  }
 0x163   : > { %p7278_p7 = scmp.ne.s32.totalorder %s734_s18, %s7277_s19  ;;  %s7282_s24 = sshll.u32 %s7447_s4, 4  ;;  %s7283_s24 = int_to_ptr.vmem [resolvable:$false] %s7282_s24 }
 0x164   : > { %s7284_s20 = scalar_lea.vmem %s7283_s24, 32  ;;  %p7285_p1 = scmp.lt.s32.totalorder %s734_s18, %s7283_s24 }
 0x165   : > { %p7280_p5 = pnand %p7278_p7, %p7657_p9  ;;  %p7286_p0 = scmp.lt.s32.totalorder %s7284_s20, %s7277_s19 }
 0x167   : > { %p7281_p10 = pneg %p7280_p5  ;;  %p7287_p12 = por %p7286_p0, %p7285_p1 }
 0x169   : > { %p7288_p6 = pnand %p7287_p12, %p7281_p10 }
 0x16b   : > { %7291 = shalt.err (!%p7288_p6)
}
 0x16c   : > { %p8806_p11 = scmp.ne.s32.totalorder %s8787_s30, 0  ;;  %s7448_s25 = smov [#allocation20]  }
 0x16d   : > { %s511_s3 = sshll.u32 %s7448_s25, 4  ;;  %s7449_s15 = smov [#allocation21]   ;;  %s512_s3 = int_to_ptr.vmem [resolvable:$true] %s511_s3 }
 0x16e   : > { %6632 = dma.hbm_to_vmem [thread:$0]  (!%p8806_p11), %s7970_s17, 16, %s734_s18, %s7651_s16  }
 0x16f   : > { %s522_s21 = sshll.u32 %s7449_s15, 4  ;;  %s8807_s14 = sld [smem:[#allocation42_spill]]  ;;  %s523_s21 = int_to_ptr.vmem [resolvable:$true] %s522_s21 }
 0x170   : > { %p8808_p0 = scmp.ne.s32.totalorder %s8789_s28, 0 }
 0x175   : > { %s7292_s13 = scalar_lea.hbm %s8807_s14, 16 }
 0x176   : > { %p7293_p12 = scmp.ne.s32.totalorder %s8807_s14, %s7292_s13  ;;  %p7299_p8 = scmp.lt.u32.totalorder %s7292_s13, %s8807_s14 }
 0x178   : > { %p7295_p2 = pnand %p7293_p12, %p8808_p0 }
 0x17a   : > { %p7296_p13 = pneg %p7295_p2 }
 0x17c   : > { %p7301_p3 = pnand %p7299_p8, %p7296_p13 }
 0x17e   : > { %7304 = shalt.err (!%p7301_p3)
}
 0x17f   : > { %s7305_s17 = scalar_lea.vmem %s512_s3, 16  ;;  %s7312_s18 = scalar_lea.vmem %s512_s3, 32 }
 0x180   : > { %p7306_p4 = scmp.ne.s32.totalorder %s512_s3, %s7305_s17  ;;  %p7313_p10 = scmp.lt.s32.totalorder %s512_s3, %s512_s3 }
 0x181   : > { %p7314_p1 = scmp.lt.s32.totalorder %s7312_s18, %s7305_s17 }
 0x182   : > { %p7308_p7 = pnand %p7306_p4, %p8808_p0 }
 0x183   : > { %p7315_p6 = por %p7314_p1, %p7313_p10 }
 0x184   : > { %p7309_p5 = pneg %p7308_p7 }
 0x186   : > { %p7316_p11 = pnand %p7315_p6, %p7309_p5 }
 0x188   : > { %7319 = shalt.err (!%p7316_p11)
}
 0x189   : > { %p8809_p12 = scmp.ne.s32.totalorder %s8802_s29, 0  ;;  %s8810_s13 = sld [smem:[#allocation43_spill]] }
 0x18b   : > { %6595 = dma.hbm_to_vmem [thread:$0]  (!%p8809_p12), %s8807_s14, 16, %s512_s3, [#allocation7]  }
 0x18f   : > { %s7320_s4 = scalar_lea.hbm %s8810_s13, 16 }
 0x190   : > { %p7321_p2 = scmp.ne.s32.totalorder %s8810_s13, %s7320_s4  ;;  %p7327_p11 = scmp.lt.u32.totalorder %s7320_s4, %s8810_s13 }
 0x192   : > { %p7323_p13 = pnand %p7321_p2, %p8808_p0 }
 0x194   : > { %p7324_p8 = pneg %p7323_p13 }
 0x196   : > { %p7329_p3 = pnand %p7327_p11, %p7324_p8 }
 0x198   : > { %7332 = shalt.err (!%p7329_p3)
}
 0x199   : > { %s7333_s18 = scalar_lea.vmem %s523_s21, 16  ;;  %s7340_s3 = scalar_lea.vmem %s523_s21, 32 }
 0x19a   : > { %p7334_p4 = scmp.ne.s32.totalorder %s523_s21, %s7333_s18  ;;  %p7341_p10 = scmp.lt.s32.totalorder %s523_s21, %s523_s21 }
 0x19b   : > { %p7342_p1 = scmp.lt.s32.totalorder %s7340_s3, %s7333_s18 }
 0x19c   : > { %p7336_p7 = pnand %p7334_p4, %p8808_p0 }
 0x19d   : > { %p7343_p6 = por %p7342_p1, %p7341_p10 }
 0x19e   : > { %p7337_p5 = pneg %p7336_p7 }
 0x1a0   : > { %p7344_p9 = pnand %p7343_p6, %p7337_p5 }
 0x1a2   : > { %7347 = shalt.err (!%p7344_p9)
}
 0x1a3   : > { %6598 = dma.hbm_to_vmem [thread:$0]  (!%p8809_p12), %s8810_s13, 16, %s523_s21, [#allocation22]  }
 0x1a4   : > { %s8811_s28 = sld [smem:[#allocation41_spill]]  ;;  %s743_s19 = scalar_lea.vmem [#allocation19], %s7603_s23 }
 0x1a5   : > { %s750_s24 = sshll.u32 %s743_s19, 4  ;;  %p8812_p0 = scmp.ne.s32.totalorder %s8792_s22, 0  ;;  %s751_s24 = int_to_ptr.vmem [resolvable:$true] %s750_s24 }
 0x1aa   : > { %s8031_s4 = scalar_lea.hbm %s8811_s28, %s7743_s0  ;;  %s7353_s21 = scalar_lea.hbm %s8811_s28, 64 }
 0x1ab   : > { %s7348_s29 = scalar_lea.hbm %s8031_s4, 16  ;;  %p7354_p12 = scmp.lt.u32.totalorder %s8031_s4, %s8811_s28 }
 0x1ac   : > { %p7349_p9 = scmp.ne.s32.totalorder %s8031_s4, %s7348_s29  ;;  %p7355_p8 = scmp.lt.u32.totalorder %s7353_s21, %s7348_s29 }
 0x1ad   : > { %p7357_p3 = scmp.lt.u32.totalorder %s7348_s29, %s8031_s4 }
 0x1ae   : > { %p7351_p2 = pnand %p7349_p9, %p8812_p0  ;;  %p7356_p11 = por %p7355_p8, %p7354_p12 }
 0x1b0   : > { %p7352_p13 = pneg %p7351_p2  ;;  %p7358_p4 = por %p7357_p3, %p7356_p11 }
 0x1b2   : > { %p7359_p7 = pnand %p7358_p4, %p7352_p13 }
 0x1b4   : > { %7362 = shalt.err (!%p7359_p7)
}
 0x1b5   : > { %s7363_s23 = scalar_lea.vmem %s751_s24, 16  ;;  %s7450_s0 = smov [#allocation19]  }
 0x1b6   : > { %p7364_p5 = scmp.ne.s32.totalorder %s751_s24, %s7363_s23  ;;  %s7368_s25 = sshll.u32 %s7450_s0, 4  ;;  %s7369_s25 = int_to_ptr.vmem [resolvable:$false] %s7368_s25 }
 0x1b7   : > { %s7370_s15 = scalar_lea.vmem %s7369_s25, 32  ;;  %p7371_p6 = scmp.lt.s32.totalorder %s751_s24, %s7369_s25 }
 0x1b8   : > { %p7366_p10 = pnand %p7364_p5, %p8812_p0  ;;  %p7372_p9 = scmp.lt.s32.totalorder %s7370_s15, %s7363_s23 }
 0x1ba   : > { %p7367_p1 = pneg %p7366_p10  ;;  %p7373_p2 = por %p7372_p9, %p7371_p6 }
 0x1bc   : > { %p7374_p8 = pnand %p7373_p2, %p7367_p1 }
 0x1be   : > { %7377 = shalt.err (!%p7374_p8)
}
 0x1bf   : > { %p8813_p12 = scmp.ne.s32.totalorder %s8787_s30, 0  ;;  %s8814_s26 = sld [smem:[#allocation34_spill]] }
 0x1c1   : > { %6635 = dma.hbm_to_vmem [thread:$0]  (!%p8813_p12), %s8031_s4, 16, %s751_s24, %s7651_s16  }
 0x1c5   : > { %p8815_p13 = scmp.ne.s32.totalorder %s8814_s26, 0 }
 0x1c6   : > { %s8816_s22 = sld [smem:[#allocation30_spill]] (!%p8815_p13) }
 0x1c7   : > { %759 = sbr.rel (%p8815_p13) target bundleno = 5219 (0x1463), region = 88 }
 0x1cc   : > { %p8817_p0 = scmp.eq.s32.totalorder (!%p8815_p13), %s8816_s22, 0 }
 0x1ce   : > { %7395 = dma.done.wait (%p8817_p0), [#allocation5], 64   ;;  %p8818_p11 = pmov %p8817_p0 }
 0x1cf   : > { %p8819_p3 = pmov %p8817_p0 }
 0x1d0   : > { %7397 = vsyncadd (%p8818_p11), [#allocation5], 4294967232 }
 0x1d1   : > { %7399 = dma.done.wait (%p8819_p3), [#allocation7], 16   ;;  %p8820_p4 = pmov %p8817_p0 }
 0x1d2   : > { %s8821_s30 = sld [smem:[#allocation28_spill]]  ;;  %s8822_s27 = sld [smem:[#allocation33_spill]] }
 0x1d3   : > { %7401 = vsyncadd (%p8820_p4), [#allocation7], 4294967280  ;;  %s769_s19 = sand.u32 1, %s8816_s22  }
 0x1d4   : > { %s770_s24 = scalar_lea.sflag [#allocation5], %s769_s19 }
 0x1d8   : > { %s8064_s16 = sand.u32 1, %s8821_s30   ;;  %p8823_p7 = scmp.ne.s32.totalorder %s8822_s27, 0 }
 0x1d9   : > { %s6544_s4 = smul.u32 192, %s8064_s16 }
 0x1db   : > { %s8067_s29 = scalar_lea.vmem [#allocation8], %s6544_s4 }
 0x1dc   : > { %7403 = dma.done.wait (%p8823_p7), %s770_s24, 37264  }
 0x1dd   : > { %7405 = vsyncadd (%p8823_p7), %s770_s24, 4294930032  ;;  %s6545_s20 = smul.u32 3, %s8064_s16  ;;  %s5848_s17 = sshll.u32 %s8064_s16, 6 }
 0x1de   : > { %s5849_s21 = sshll.u32 %s8064_s16, 10  ;;  %s5850_s18 = sshll.u32 %s8064_s16, 4 }
 0x1df   : > { %s8077_s3 = scalar_lea.vmem [#allocation9], %s6545_s20  ;;  %s8079_s23 = scalar_lea.vmem [#allocation10], %s5848_s17 }
 0x1e0   : > { %s799_s0 = scalar_lea.vmem [#allocation11], %s8064_s16  ;;  %s807_s25 = scalar_lea.vmem [#allocation12], %s8064_s16 }
 0x1e1   : > { %s815_s15 = scalar_lea.vmem [#allocation13], %s8064_s16  ;;  %s8084_s26 = scalar_lea.vmem [#allocation14], %s5849_s21 }
 0x1e2   : > { %s8086_s30 = scalar_lea.vmem [#allocation15], %s5850_s18  ;;  %s8088_s27 = scalar_lea.vmem [#allocation16], %s5849_s21 }
 0x1e3   : > { %s850_s19 = scalar_lea.vmem [#allocation17], %s8064_s16  ;;  %s858_s4 = scalar_lea.vmem [#allocation18], %s8064_s16 }
 0x1e4   : > { %p8824_p5 = pmov %p8817_p0 }
 0x1e5   : > { %p8825_p10 = pmov %p8817_p0 }
 0x1e6   : > { %7407 = dma.done.wait (%p8824_p5), [#allocation7], 16  }
 0x1e7   : > { %7409 = vsyncadd (%p8825_p10), [#allocation7], 4294967280  ;;  %p8826_p1 = pmov %p8817_p0 }
 0x1e8   : > { %p8827_p6 = pmov %p8817_p0 }
 0x1e9   : > { %7411 = dma.done.wait (%p8826_p1), [#allocation22], 16  }
 0x1ea   : > { %7413 = vsyncadd (%p8827_p6), [#allocation22], 4294967280  ;;  %p8828_p9 = scmp.ne.s32.totalorder %s8816_s22, 0 }
 0x1eb   : > { %v976_v0 = vld [vmem:[#allocation4] sm:$0x7] (!%p8828_p9)  ;;  %vm991_vm0 = vcmask (!%p8828_p9), 1042432   ;;  %s8829_s21 = sld [smem:[#allocation36_spill]] (!%p8828_p9)  ;;  %vm984_vm1 = vcmask (!%p8828_p9), 23552  }
 0x1ec   : > { %973 = sbr.rel (%p8828_p9) target bundleno = 715 (0x2cb), region = 156  ;;  %6415 = vmatprep.subr.msk.mxu0 (!%p8828_p9), %vm991_vm0, %v976_v0  ;;  %v5855_v3 = vld [vmem:[#allocation6] ss:$0 sm:$0xff] (!%p8828_p9) }
 0x1ed   : > { %6416 = vmatpush3.msk.msra.mxu0 (!%p8828_p9), %vm991_vm0, %v976_v0 }
 0x1f1   : > { %v974_v1 = vld [vmem:[%s8829_s21] sm:$0xff] (!%p8828_p9)  ;;  %v975_v2 = vld [vmem:[%s8829_s21 + $0x8] sm:$0xff] (!%p8828_p9) }
 0x1f2   : > { %6417 = vmatprep.mubr.msk.f32.mxu0 (!%p8828_p9), %vm984_vm1, %v974_v1 }
 0x1f3   : > { %6418 = vmatmul.mubr.msk.f32.vlgmr.msra.gmra.mrb[0].mxu0 %vm984_vm1, %v975_v2 }
 0x2c6   : > { %v6419_v4 = vpop.f32.mrb[0].mxu0 }
 0x2c7   : > { %v1067_v5 = vadd.f32 %v6419_v4, %v5855_v3  ;;  %v1061_v6 = vpop.f32.mrb[1].mxu0 }
 0x2c8   : > { %v1062_v7 = vadd.f32 %v5855_v3, %v1061_v6 }
 0x2c9   : > { %1071 = vst [vmem:[#allocation2 + $0x8] sm:$0xff] %v1067_v5 }
 0x2ca   : > { %1070 = vst [vmem:[#allocation2] sm:$0xff] %v1062_v7 }
 0x2cb PF: > { %v6692_v8 = vld [vmem:[%s8067_s29 + $0x4] ss:$12 sps:$4 sm:$0xff]   ;;  %v6694_v9 = vld [vmem:[%s8067_s29] ss:$12 sps:$4 sm:$0xff]   ;;  %v7451_v10 = vmov 0   ;;  %v7452_v11 = vmov 0.0   ;;  %v1109_v37 = vlaneseq }
 0x2cc   : > { %1284 = vmatprep.mubr.bf16.mxu0 %v7451_v10  ;;  %6420 = vmatprep.subr.bf16.mxu1 %v7452_v11  ;;  %v6695_v12 = vld [vmem:[%s8067_s29 + $0x1c] ss:$12 sps:$4 sm:$0xff]   ;;  %vm7453_vm2 = vmmov 0   ;;  %v6697_v13 = vld [vmem:[%s8067_s29 + $0x18] ss:$12 sps:$4 sm:$0xff]   ;;  %vm1338_vm3 = vcmask 261120  }
 0x2cd   : > { %1252 = vmatprep.subr.bf16.mxu0 %v6692_v8  ;;  %6436 = vmatprep.mubr.msk.bf16.mxu1 %vm7453_vm2, %v7452_v11  ;;  %v6698_v14 = vld [vmem:[%s8067_s29 + $0x34] ss:$12 sps:$4 sm:$0xff]   ;;  %v6700_v15 = vld [vmem:[%s8067_s29 + $0x30] ss:$12 sps:$4 sm:$0xff]   ;;  %v6701_v16 = vld [vmem:[%s8067_s29 + $0x4c] ss:$12 sps:$4 sm:$0xff]  }
 0x2ce   : > { %1253 = vmatpush1.bf16.msra.mxu0 %v6694_v9  ;;  %v6703_v17 = vld [vmem:[%s8067_s29 + $0x48] ss:$12 sps:$4 sm:$0xff]   ;;  %v6704_v18 = vld [vmem:[%s8067_s29 + $0x64] ss:$12 sps:$4 sm:$0xff]   ;;  %v6717_v20 = vld [vmem:[%s8067_s29 + $0x20] ss:$12 sps:$4 sm:$0xff]  }
 0x2cf   : > { %1254 = vmatprep.subr.bf16.mxu0 %v6695_v12  ;;  %v6716_v19 = vld [vmem:[%s8067_s29 + $0x8] ss:$12 sps:$4 sm:$0xff]   ;;  %v6706_v21 = vld [vmem:[%s8067_s29 + $0x60] ss:$12 sps:$4 sm:$0xff]   ;;  %v6718_v23 = vld [vmem:[%s8067_s29 + $0x38] ss:$12 sps:$4 sm:$0xff]  }
 0x2d0   : > { %6421 = vmatpush3.bf16.msra.mxu1 %v6716_v19  ;;  %v6707_v22 = vld [vmem:[%s8067_s29 + $0x7c] ss:$12 sps:$4 sm:$0xff]   ;;  %v6709_v24 = vld [vmem:[%s8067_s29 + $0x78] ss:$12 sps:$4 sm:$0xff]   ;;  %v6710_v25 = vld [vmem:[%s8067_s29 + $0x94] ss:$12 sps:$4 sm:$0xff]  }
 0x2d1   : > { %6422 = vmatprep.subr.bf16.mxu1 %v7452_v11  ;;  %v6719_v26 = vld [vmem:[%s8067_s29 + $0x50] ss:$12 sps:$4 sm:$0xff]   ;;  %v6713_v28 = vld [vmem:[%s8067_s29 + $0xac] ss:$12 sps:$4 sm:$0xff]   ;;  %v6720_v29 = vld [vmem:[%s8067_s29 + $0x68] ss:$12 sps:$4 sm:$0xff]  }
 0x2d2   : > { %1255 = vmatpush1.bf16.msra.mxu0 %v6697_v13  ;;  %v6712_v27 = vld [vmem:[%s8067_s29 + $0x90] ss:$12 sps:$4 sm:$0xff]   ;;  %v6715_v30 = vld [vmem:[%s8067_s29 + $0xa8] ss:$12 sps:$4 sm:$0xff]   ;;  %v6721_v33 = vld [vmem:[%s8067_s29 + $0x80] ss:$12 sps:$4 sm:$0xff]  }
 0x2d3   : > { %1256 = vmatprep.subr.bf16.mxu0 %v6698_v14  ;;  %v1072_v31 = vld [vmem:[#allocation2] sm:$0xff]  ;;  %v1073_v32 = vld [vmem:[#allocation2 + $0x8] sm:$0xff]  ;;  %v8150_v38 = vshrl.u32 %v1109_v37, 7  ;;  %s7454_s22 = smov 96   ;;  %vm1491_vm4 = vcmask 64512   ;;  %vm2002_vm5 = vcmask 523520  }
 0x2d4   : > { %6423 = vmatpush3.bf16.msra.mxu1 %v6717_v20  ;;  %v1107_v34 = vpack.c.bf16 %v1073_v32, %v1072_v31  ;;  %v6722_v35 = vld [vmem:[%s8067_s29 + $0x98] ss:$12 sps:$4 sm:$0xff]   ;;  %v6723_v36 = vld [vmem:[%s8067_s29 + $0xb0] ss:$12 sps:$4 sm:$0xff]   ;;  %s7455_s29 = smov 64   ;;  %vm2343_vm6 = vcmask 785920  }
 0x2d5   : > { %6424 = vmatprep.subr.bf16.mxu1 %v7452_v11  ;;  %v8153_v39 = vsub.s32 0, %v8150_v38  ;;  %v1106_v40 = vld [vmem:[%s8077_s3] sm:$0x7]  ;;  %v8157_v41 = vsub.s32 1, %v8150_v38  ;;  %v8168_v51 = vsub.s32 2, %v8150_v38  ;;  %s7456_s3 = smov 32  }
 0x2d6   : > { %1257 = vmatpush1.bf16.msra.mxu0 %v6700_v15  ;;  %vm2684_vm7 = vcmask 1048320  }
 0x2d7   : > { %1258 = vmatprep.subr.bf16.mxu0 %v6701_v16  ;;  %v1112_v42 = vrot.slane %v1106_v40, %v8153_v39  ;;  %v1116_v43 = vrot.slane %v1106_v40, %v8157_v41  ;;  %v1120_v54 = vrot.slane %v1106_v40, %v8168_v51 }
 0x2d8   : > { %6425 = vmatpush3.bf16.msra.mxu1 %v6718_v23 }
 0x2d9   : > { %6426 = vmatprep.subr.bf16.mxu1 %v7452_v11 }
 0x2da   : > { %1259 = vmatpush1.bf16.msra.mxu0 %v6703_v17 }
 0x2db   : > { %1260 = vmatprep.subr.bf16.mxu0 %v6704_v18 }
 0x2dc   : > { %6427 = vmatpush3.bf16.msra.mxu1 %v6719_v26 }
 0x2dd   : > { %6428 = vmatprep.subr.bf16.mxu1 %v7452_v11 }
 0x2de   : > { %1261 = vmatpush1.bf16.msra.mxu0 %v6706_v21 }
 0x2df   : > { %1262 = vmatprep.subr.bf16.mxu0 %v6707_v22 }
 0x2e0   : > { %6429 = vmatpush3.bf16.msra.mxu1 %v6720_v29 }
 0x2e1   : > { %6430 = vmatprep.subr.bf16.mxu1 %v7452_v11 }
 0x2e2   : > { %1263 = vmatpush1.bf16.msra.mxu0 %v6709_v24 }
 0x2e3   : > { %1264 = vmatprep.subr.bf16.mxu0 %v6710_v25 }
 0x2e4   : > { %6431 = vmatpush3.bf16.msra.mxu1 %v6721_v33 }
 0x2e5   : > { %6432 = vmatprep.subr.bf16.mxu1 %v7452_v11 }
 0x2e6   : > { %1265 = vmatpush1.bf16.msra.mxu0 %v6712_v27 }
 0x2e7   : > { %1266 = vmatprep.subr.bf16.mxu0 %v6713_v28 }
 0x2e8   : > { %6433 = vmatpush3.bf16.msra.mxu1 %v6722_v35 }
 0x2e9   : > { %6434 = vmatprep.subr.bf16.mxu1 %v7452_v11 }
 0x2ea   : > { %1267 = vmatpush1.bf16.msra.mxu0 %v6715_v30 }
 0x2eb   : > { %6480 = vmatprep.subr.mxu0 %v7452_v11 }
 0x2ec   : > { %6435 = vmatpush3.bf16.msra.mxu1 %v6723_v36 }
 0x2ed   : > { %1285 = vmatmul.mubr.bf16.vlgmr.msra.gmra.mrb[0].mxu0 %v1107_v34  ;;  %6440 = vmatprep.subr.mxu1 %v7452_v11 }
 0x2ee   : > { %6482 = vmatprep.mubr.msk.f32.mxu0 %vm7453_vm2, %v7452_v11 }
 0x2ef   : > { %6437 = vmatmul.mubr.bf16.vlgmr.msra.gmra.mrb[0].mxu1 %v1107_v34 }
 0x2f0   : > { %6442 = vmatprep.mubr.msk.f32.mxu1 %vm7453_vm2, %v7452_v11 }
 0x3c0   : > { %v1286_v44 = vpop.f32.mrb[0].mxu0 }
 0x3c1   : > { %v1287_v45 = vadd.f32 %v1286_v44, %v1112_v42  ;;  %v1288_v46 = vpop.f32.mrb[1].mxu0 }
 0x3c2   : > { %v8161_v47 = vadd.f32 %v1288_v46, %v1116_v43  ;;  %v1290_v48 = vpop.f32.mrb[2].mxu0  ;;  %v1329_v56 = vpop.f32.mrb[0].mxu1 }
 0x3c3   : > { %v8163_v49 = vmul.f32 0.17677669, %v1287_v45  ;;  %v1292_v50 = vpop.f32.mrb[3].mxu0  ;;  %v1291_v52 = vadd.f32 %v1290_v48, %v1112_v42  ;;  %v8187_v57 = vadd.f32 %v1329_v56, %v1120_v54  ;;  %v6438_v58 = vpop.f32.mrb[1].mxu1 }
 0x3c4   : > { %6441 = vmatpush3.xpose.msk.msra.mxu1 %vm1338_vm3, %v8161_v47  ;;  %v8173_v53 = vadd.f32 %v1292_v50, %v1116_v43  ;;  %v1332_v59 = vpop.f32.mrb[2].mxu1 }
 0x3c5   : > { %1662 = vrot.lane.b32.xlu1 %v8163_v49, %s7454_s22  ;;  %6445 = vmatprep.subr.mxu1 %v7452_v11  ;;  %v8182_v55 = vmul.f32 0.17677669, %v1291_v52  ;;  %v8191_v60 = vadd.f32 %v1332_v59, %v1120_v54  ;;  %v6439_v61 = vpop.f32.mrb[3].mxu1 }
 0x3c7   : > { %6443 = vmatmul.mubr.msk.f32.vlgmr.msra.gmra.mrb[4].mxu1 %vm1338_vm3, %v8163_v49 }
 0x3c8   : > { %6446 = vmatpush3.xpose.msk.msra.mxu1 %vm1338_vm3, %v8173_v53  ;;  %6447 = vmatprep.mubr.msk.f32.mxu1 %vm7453_vm2, %v7452_v11 }
 0x3c9   : > { %6450 = vmatprep.subr.mxu1 %v7452_v11 }
 0x3cb   : > { %6448 = vmatmul.mubr.msk.f32.vlgmr.msra.gmra.mrb[6].mxu1 %vm1338_vm3, %v8182_v55 }
 0x3cc   : > { %6452 = vmatprep.mubr.msk.f32.mxu1 %vm7453_vm2, %v7452_v11  ;;  %6451 = vmatpush3.msra.mxu1 %v8187_v57 }
 0x3cd   : > { %6455 = vmatprep.subr.mxu1 %v7452_v11 }
 0x437   : > { %v1663_v16 = vpop.permute.xlu1 %1662 }
 0x49a   : > { %v1411_v62 = vpop.f32.mrb[4].mxu1 }
 0x49b   : > { %v6444_v63 = vpop.f32.mrb[5].mxu1  ;;  %v1492_v0 = vsel %vm1491_vm4, %v1411_v62, -inf }
 0x49c   : > { %1493 = vmax.xlane.f32.xlu0 %v1492_v0 }
 0x49e   : > { %v1487_v1 = vpop.f32.mrb[6].mxu1 }
 0x49f   : > { %v6449_v2 = vpop.f32.mrb[7].mxu1  ;;  %v1495_v3 = vsel %vm1491_vm4, %v1487_v1, -inf }
 0x4a0   : > { %1496 = vmax.xlane.f32.xlu0 %v1495_v3 }
 0x4b6   : > { %1664 = vrot.lane.b32.xlu0 %v8161_v47, %s7454_s22 }
 0x529   : > { %v1494_v4 = vpop.xlane.xlu0 %1493 }
 0x52a   : > { %v1498_v5 = vsub.f32 %v1411_v62, %v1494_v4 }
 0x52c   : > { %v1500_v6 = vmul.f32 1.442695, %v1498_v5 }
 0x52d   : > { %v1497_v7 = vpop.xlane.xlu0 %1496 }
 0x52e   : > { %6860 = vpow2.f32 %v1500_v6  ;;  %v1499_v8 = vsub.f32 %v1487_v1, %v1497_v7 }
 0x530   : > { %v1502_v9 = vmul.f32 1.442695, %v1499_v8 }
 0x531   : > { %v1665_v23 = vpop.permute.xlu0 %1664 }
 0x532   : > { %6862 = vpow2.f32 %v1502_v9 }
 0x538   : > { %v6861_v12 = vpop.eup %6860 }
 0x539   : > { %v1504_v13 = vsel %vm1491_vm4, %v6861_v12, 0.0 }
 0x53a   : > { %1505 = vadd.xlane.f32.xlu1 %v1504_v13 }
 0x53c   : > { %v6863_v14 = vpop.eup %6862 }
 0x53d   : > { %v1507_v15 = vsel %vm1491_vm4, %v6863_v14, 0.0 }
 0x53e   : > { %1508 = vadd.xlane.f32.xlu1 %v1507_v15 }
 0x54f   : > { %1742 = vrot.lane.b32.xlu1 %v8173_v53, %s7454_s22 }
 0x553   : > { %1740 = vrot.lane.b32.xlu1 %v8182_v55, %s7454_s22 }
 0x5c7   : > { %v1506_v17 = vpop.xlane.xlu1 %1505 }
 0x5c8   : > { %6864 = vrcp.f32 %v1506_v17 }
 0x5cb   : > { %v1509_v18 = vpop.xlane.xlu1 %1508 }
 0x5cc   : > { %6866 = vrcp.f32 %v1509_v18 }
 0x5cf   : > { %v1743_v24 = vpop.permute.xlu1 %1742 }
 0x5d2   : > { %v6865_v19 = vpop.eup %6864 }
 0x5d3   : > { %v1512_v20 = vmul.f32 %v6865_v19, %v6861_v12  ;;  %v1741_v25 = vpop.permute.xlu1 %1740 }
 0x5d5   : > { %6453 = vmatmul.mubr.msk.f32.vlgmr.msra.gmra.mrb[8].mxu1 %vm1491_vm4, %v1512_v20 }
 0x5d6   : > { %v6867_v21 = vpop.eup %6866  ;;  %6456 = vmatpush3.msra.mxu1 %v8191_v60  ;;  %6457 = vmatprep.mubr.msk.f32.mxu1 %vm7453_vm2, %v7452_v11 }
 0x5d7   : > { %v1513_v22 = vmul.f32 %v6867_v21, %v6863_v14  ;;  %6460 = vmatprep.subr.mxu1 %v7452_v11 }
 0x5d9   : > { %6458 = vmatmul.mubr.msk.f32.vlgmr.msra.gmra.mrb[10].mxu1 %vm1491_vm4, %v1513_v22 }
 0x5da   : > { %6462 = vmatprep.mubr.msk.f32.mxu1 %vm7453_vm2, %v7452_v11 }
 0x5dd   : > { %6461 = vmatpush3.xpose.msk.msra.mxu1 %vm1338_vm3, %v1665_v23 }
 0x5de   : > { %6465 = vmatprep.subr.mxu1 %v7452_v11 }
 0x5e0   : > { %6463 = vmatmul.mubr.msk.f32.vlgmr.msra.gmra.mrb[12].mxu1 %vm1338_vm3, %v1663_v16 }
 0x5e1   : > { %6466 = vmatpush3.xpose.msk.msra.mxu1 %vm1338_vm3, %v1743_v24  ;;  %6467 = vmatprep.mubr.msk.f32.mxu1 %vm7453_vm2, %v7452_v11 }
 0x5e2   : > { %6470 = vmatprep.subr.mxu1 %v7452_v11 }
 0x5e4   : > { %6468 = vmatmul.mubr.msk.f32.vlgmr.msra.gmra.mrb[14].mxu1 %vm1338_vm3, %v1741_v25 }
 0x5e5   : > { %6472 = vmatprep.mubr.msk.f32.mxu1 %vm7453_vm2, %v7452_v11 }
 0x6a8   : > { %v1583_v26 = vpop.f32.mrb[8].mxu1 }
 0x6a9   : > { %1660 = vst.msk [vmem:[#allocation3] sm:$0xff] %vm1338_vm3, %v1583_v26  ;;  %v6454_v27 = vpop.f32.mrb[9].mxu1 }
 0x6ac   : > { %v1656_v28 = vpop.f32.mrb[10].mxu1 }
 0x6ad   : > { %1661 = vst.msk [vmem:[#allocation3 + $0x8] sm:$0xff] %vm1338_vm3, %v1656_v28  ;;  %v6459_v29 = vpop.f32.mrb[11].mxu1 }
 0x6b3   : > { %v1736_v30 = vpop.f32.mrb[12].mxu1 }
 0x6b4   : > { %v6464_v31 = vpop.f32.mrb[13].mxu1  ;;  %v1818_v32 = vsel %vm1491_vm4, %v1736_v30, -inf }
 0x6b5   : > { %1819 = vmax.xlane.f32.xlu0 %v1818_v32 }
 0x6b7   : > { %v1814_v33 = vpop.f32.mrb[14].mxu1 }
 0x6b8   : > { %v6469_v34 = vpop.f32.mrb[15].mxu1  ;;  %v1821_v35 = vsel %vm1491_vm4, %v1814_v33, -inf }
 0x6b9   : > { %1822 = vmax.xlane.f32.xlu1 %v1821_v35 }
 0x6ca   : > { %1918 = vrot.lane.b32.xlu1 %v8191_v60, %s7454_s22 }
 0x6ce   : > { %2007 = vrot.lane.b32.xlu1 %v8161_v47, %s7455_s29 }
 0x6d2   : > { %2085 = vrot.lane.b32.xlu1 %v8173_v53, %s7455_s29 }
 0x6d6   : > { %2083 = vrot.lane.b32.xlu1 %v8182_v55, %s7455_s29 }
 0x742   : > { %v1820_v36 = vpop.xlane.xlu0 %1819 }
 0x743   : > { %v1824_v37 = vsub.f32 %v1736_v30, %v1820_v36 }
 0x745   : > { %v1826_v40 = vmul.f32 1.442695, %v1824_v37 }
 0x746   : > { %v1823_v42 = vpop.xlane.xlu1 %1822 }
 0x747   : > { %6868 = vpow2.f32 %v1826_v40  ;;  %v1825_v48 = vsub.f32 %v1814_v33, %v1823_v42 }
 0x749   : > { %v1828_v50 = vmul.f32 1.442695, %v1825_v48 }
 0x74a   : > { %v1919_v43 = vpop.permute.xlu1 %1918 }
 0x74b   : > { %6870 = vpow2.f32 %v1828_v50 }
 0x74e   : > { %v2008_v44 = vpop.permute.xlu1 %2007 }
 0x74f   : > { %6481 = vmatpush3.xpose.msk.msra.mxu0 %vm1338_vm3, %v2008_v44 }
 0x750   : > { %6490 = vmatprep.subr.mxu0 %v7452_v11 }
 0x751   : > { %v6869_v45 = vpop.eup %6868 }
 0x752   : > { %v1830_v46 = vsel %vm1491_vm4, %v6869_v45, 0.0  ;;  %v2086_v1 = vpop.permute.xlu1 %2085 }
 0x753   : > { %1831 = vadd.xlane.f32.xlu0 %v1830_v46 }
 0x755   : > { %v6871_v52 = vpop.eup %6870 }
 0x756   : > { %v1833_v54 = vsel %vm1491_vm4, %v6871_v52, 0.0  ;;  %v2084_v3 = vpop.permute.xlu1 %2083 }
 0x769   : > { %1841 = vrot.lane.b32.xlu0 %v8187_v57, %s7454_s22 }
 0x788   : > { %1834 = vadd.xlane.f32.xlu0 %v1833_v54 }
 0x79e   : > { %2005 = vrot.lane.b32.xlu0 %v8163_v49, %s7455_s29 }
 0x7e0   : > { %v1832_v56 = vpop.xlane.xlu0 %1831 }
 0x7e1   : > { %6872 = vrcp.f32 %v1832_v56 }
 0x7e4   : > { %v1842_v58 = vpop.permute.xlu0 %1841 }
 0x7e5   : > { %6471 = vmatpush3.msra.mxu1 %v1842_v58 }
 0x7e6   : > { %6475 = vmatprep.subr.mxu1 %v7452_v11 }
 0x7eb   : > { %v6873_v59 = vpop.eup %6872 }
 0x7ec   : > { %v1838_v61 = vmul.f32 %v6873_v59, %v6869_v45 }
 0x7ee   : > { %6473 = vmatmul.mubr.msk.f32.vlgmr.msra.gmra.mrb[16].mxu1 %vm1491_vm4, %v1838_v61 }
 0x7ef   : > { %6476 = vmatpush3.msra.mxu1 %v1919_v43  ;;  %6477 = vmatprep.mubr.msk.f32.mxu1 %vm7453_vm2, %v7452_v11 }
 0x7f0   : > { %6485 = vmatprep.subr.mxu1 %v7452_v11 }
 0x815   : > { %v1835_v62 = vpop.xlane.xlu0 %1834 }
 0x816   : > { %6874 = vrcp.f32 %v1835_v62 }
 0x819   : > { %v2006_v63 = vpop.permute.xlu0 %2005 }
 0x81a   : > { %6483 = vmatmul.mubr.msk.f32.vlgmr.msra.gmra.mrb[4].mxu0 %vm1338_vm3, %v2006_v63 }
 0x81b   : > { %6492 = vmatprep.mubr.msk.f32.mxu0 %vm7453_vm2, %v7452_v11 }
 0x820   : > { %v6875_v0 = vpop.eup %6874 }
 0x821   : > { %v1839_v2 = vmul.f32 %v6875_v0, %v6871_v52 }
 0x823   : > { %6478 = vmatmul.mubr.msk.f32.vlgmr.msra.gmra.mrb[18].mxu1 %vm1491_vm4, %v1839_v2 }
 0x824   : > { %6486 = vmatpush3.xpose.msk.msra.mxu1 %vm1338_vm3, %v2086_v1  ;;  %6487 = vmatprep.mubr.msk.f32.mxu1 %vm7453_vm2, %v7452_v11 }
 0x825   : > { %6495 = vmatprep.subr.mxu1 %v7452_v11 }
 0x827   : > { %6488 = vmatmul.mubr.msk.f32.vlgmr.msra.gmra.mrb[20].mxu1 %vm1338_vm3, %v2084_v3 }
 0x828   : > { %6497 = vmatprep.mubr.msk.f32.mxu1 %vm7453_vm2, %v7452_v11 }
 0x8c1   : > { %v8259_v4 = vpop.f32.mrb[16].mxu1 }
 0x8c2   : > { %v6474_v5 = vpop.f32.mrb[17].mxu1 }
 0x8ed   : > { %v2079_v6 = vpop.f32.mrb[4].mxu0 }
 0x8ee   : > { %v6484_v7 = vpop.f32.mrb[5].mxu0  ;;  %v2161_v8 = vsel %vm1491_vm4, %v2079_v6, -inf }
 0x8ef   : > { %2162 = vmax.xlane.f32.xlu0 %v2161_v8 }
 0x8f6   : > { %v8262_v9 = vpop.f32.mrb[18].mxu1 }
 0x8f7   : > { %v6479_v12 = vpop.f32.mrb[19].mxu1 }
 0x8f8   : > { %v6724_v12 = vld [vmem:[%s8079_s23] sm:$0xff]  }
 0x8fa   : > { %v2157_v13 = vpop.f32.mrb[20].mxu1 }
 0x8fb   : > { %v6489_v14 = vpop.f32.mrb[21].mxu1  ;;  %v2164_v15 = vsel %vm1491_vm4, %v2157_v13, -inf }
 0x8fc   : > { %2165 = vmax.xlane.f32.xlu1 %v2164_v15  ;;  %v6726_v14 = vld [vmem:[%s8079_s23 + $0x10] sm:$0xff]   ;;  %v6727_v15 = vld [vmem:[%s8079_s23 + $0x18] sm:$0xff]  }
 0x90d   : > { %2259 = vrot.lane.b32.xlu1 %v8191_v60, %s7455_s29 }
 0x911   : > { %2348 = vrot.lane.b32.xlu1 %v8161_v47, %s7456_s3 }
 0x915   : > { %2426 = vrot.lane.b32.xlu1 %v8173_v53, %s7456_s3 }
 0x919   : > { %2424 = vrot.lane.b32.xlu1 %v8182_v55, %s7456_s3 }
 0x97c   : > { %v2163_v16 = vpop.xlane.xlu0 %2162 }
 0x97d   : > { %v2167_v17 = vsub.f32 %v2079_v6, %v2163_v16  ;;  %v6728_v16 = vld [vmem:[%s8079_s23 + $0x20] sm:$0xff]  }
 0x97f   : > { %v2169_v18 = vmul.f32 1.442695, %v2167_v17  ;;  %v6729_v17 = vld [vmem:[%s8079_s23 + $0x28] sm:$0xff]  }
 0x981   : > { %6876 = vpow2.f32 %v2169_v18  ;;  %v6730_v18 = vld [vmem:[%s8079_s23 + $0x30] sm:$0xff]  }
 0x989   : > { %v2166_v19 = vpop.xlane.xlu1 %2165 }
 0x98a   : > { %v2168_v47 = vsub.f32 %v2157_v13, %v2166_v19  ;;  %v6725_v13 = vld [vmem:[%s8079_s23 + $0x8] sm:$0xff]   ;;  %v6731_v19 = vld [vmem:[%s8079_s23 + $0x38] sm:$0xff]   ;;  %s8830_s23 = scalar_lea.vmem [#allocation19], %s8064_s16 }
 0x98b   : > { %v6877_v20 = vpop.eup %6876 }
 0x98c   : > { %v2173_v21 = vsel %vm1491_vm4, %v6877_v20, 0.0  ;;  %v2171_v53 = vmul.f32 1.442695, %v2168_v47 }
 0x98d   : > { %2174 = vadd.xlane.f32.xlu0 %v2173_v21  ;;  %v2260_v22 = vpop.permute.xlu1 %2259 }
 0x98e   : > { %6496 = vmatpush3.msra.mxu1 %v2260_v22  ;;  %6878 = vpow2.f32 %v2171_v53 }
 0x98f   : > { %6505 = vmatprep.subr.mxu1 %v7452_v11 }
 0x991   : > { %v2349_v28 = vpop.permute.xlu1 %2348 }
 0x995   : > { %v2427_v31 = vpop.permute.xlu1 %2426 }
 0x998   : > { %v6879_v55 = vpop.eup %6878 }
 0x999   : > { %v2176_v23 = vsel %vm1491_vm4, %v6879_v55, 0.0  ;;  %v2425_v33 = vpop.permute.xlu1 %2424 }
 0x9a3   : > { %2183 = vrot.lane.b32.xlu0 %v8187_v57, %s7455_s29 }
 0x9c2   : > { %2177 = vadd.xlane.f32.xlu0 %v2176_v23 }
 0x9d8   : > { %2346 = vrot.lane.b32.xlu0 %v8163_v49, %s7456_s3 }
 0xa1a   : > { %v2175_v24 = vpop.xlane.xlu0 %2174 }
 0xa1b   : > { %6880 = vrcp.f32 %v2175_v24 }
 0xa1e   : > { %v2184_v25 = vpop.permute.xlu0 %2183 }
 0xa1f   : > { %6491 = vmatpush3.msra.mxu0 %v2184_v25 }
 0xa20   : > { %6500 = vmatprep.subr.mxu0 %v7452_v11 }
 0xa25   : > { %v6881_v26 = vpop.eup %6880 }
 0xa26   : > { %v2181_v27 = vmul.f32 %v6881_v26, %v6877_v20 }
 0xa28   : > { %6493 = vmatmul.mubr.msk.f32.vlgmr.msra.gmra.mrb[6].mxu0 %vm1491_vm4, %v2181_v27 }
 0xa29   : > { %6501 = vmatpush3.xpose.msk.msra.mxu0 %vm1338_vm3, %v2349_v28  ;;  %6502 = vmatprep.mubr.msk.f32.mxu0 %vm7453_vm2, %v7452_v11 }
 0xa2a   : > { %6510 = vmatprep.subr.mxu0 %v7452_v11 }
 0xa4f   : > { %v2178_v29 = vpop.xlane.xlu0 %2177 }
 0xa50   : > { %6882 = vrcp.f32 %v2178_v29 }
 0xa53   : > { %v2347_v49 = vpop.permute.xlu0 %2346 }
 0xa54   : > { %6503 = vmatmul.mubr.msk.f32.vlgmr.msra.gmra.mrb[8].mxu0 %vm1338_vm3, %v2347_v49 }
 0xa55   : > { %6512 = vmatprep.mubr.msk.f32.mxu0 %vm7453_vm2, %v7452_v11 }
 0xa5a   : > { %v6883_v30 = vpop.eup %6882 }
 0xa5b   : > { %v2182_v32 = vmul.f32 %v6883_v30, %v6879_v55 }
 0xa5d   : > { %6498 = vmatmul.mubr.msk.f32.vlgmr.msra.gmra.mrb[22].mxu1 %vm1491_vm4, %v2182_v32 }
 0xa5e   : > { %6506 = vmatpush3.xpose.msk.msra.mxu1 %vm1338_vm3, %v2427_v31  ;;  %6507 = vmatprep.mubr.msk.f32.mxu1 %vm7453_vm2, %v7452_v11  ;;  %v6900_v31 = vld [vmem:[#allocation2] sm:$0xff] }
 0xa5f   : > { %6515 = vmatprep.subr.mxu1 %v7452_v11 }
 0xa61   : > { %6508 = vmatmul.mubr.msk.f32.vlgmr.msra.gmra.mrb[24].mxu1 %vm1338_vm3, %v2425_v33  ;;  %v6901_v33 = vld [vmem:[#allocation2 + $0x8] sm:$0xff] }
 0xa62   : > { %6517 = vmatprep.mubr.msk.f32.mxu1 %vm7453_vm2, %v7452_v11 }
 0xafb   : > { %v2255_v34 = vpop.f32.mrb[6].mxu0 }
 0xafc   : > { %v6494_v35 = vpop.f32.mrb[7].mxu0 }
 0xafd   : > { %v2845_v35 = vld [vmem:[%s8084_s26] sm:$0xff] }
 0xb27   : > { %v2420_v36 = vpop.f32.mrb[8].mxu0 }
 0xb28   : > { %v6504_v37 = vpop.f32.mrb[9].mxu0  ;;  %v2502_v40 = vsel %vm1491_vm4, %v2420_v36, -inf }
 0xb29   : > { %2503 = vmax.xlane.f32.xlu0 %v2502_v40  ;;  %v2846_v37 = vld [vmem:[%s8084_s26 + $0x8] sm:$0xff] }
 0xb30   : > { %v2331_v42 = vpop.f32.mrb[22].mxu1 }
 0xb31   : > { %v6499_v43 = vpop.f32.mrb[23].mxu1 }
 0xb32   : > { %v2854_v43 = vld [vmem:[%s8084_s26 + $0x48] sm:$0xff] }
 0xb34   : > { %v2498_v44 = vpop.f32.mrb[24].mxu1 }
 0xb35   : > { %v6509_v45 = vpop.f32.mrb[25].mxu1  ;;  %v2505_v46 = vsel %vm1491_vm4, %v2498_v44, -inf }
 0xb36   : > { %2506 = vmax.xlane.f32.xlu1 %v2505_v46  ;;  %v2869_v45 = vld [vmem:[%s8084_s26 + $0xc0] sm:$0xff]  ;;  %v5920_v46 = vcombine.low %v2846_v37, %v2854_v43 }
 0xb47   : > { %2600 = vrot.lane.b32.xlu1 %v8191_v60, %s7456_s3 }
 0xb4b   : > { %1996 = vrot.lane.b32.xlu1 %v8259_v4, %s7456_s3 }
 0xb4f   : > { %1998 = vrot.lane.b32.xlu1 %v8262_v9, %s7456_s3 }
 0xb53   : > { %2339 = vrot.lane.b32.xlu1 %v2331_v42, %s7455_s29 }
 0xbb6   : > { %v2504_v48 = vpop.xlane.xlu0 %2503 }
 0xbb7   : > { %v2508_v50 = vsub.f32 %v2420_v36, %v2504_v48  ;;  %v2853_v36 = vld [vmem:[%s8084_s26 + $0x40] sm:$0xff]  ;;  %v5921_v48 = vcombine.high %v2846_v37, %v2854_v43 }
 0xbb8   : > { %v5918_v40 = vcombine.low %v2845_v35, %v2853_v36  ;;  %v5919_v42 = vcombine.high %v2845_v35, %v2853_v36  ;;  %v2950_v36 = vld [vmem:[%s8084_s26 + $0x348] sm:$0xff]  ;;  %v2957_v43 = vld [vmem:[%s8084_s26 + $0x380] sm:$0xff] }
 0xbb9   : > { %v2510_v52 = vmul.f32 1.442695, %v2508_v50 }
 0xbbb   : > { %6884 = vpow2.f32 %v2510_v52  ;;  %v2862_v52 = vld [vmem:[%s8084_s26 + $0x88] sm:$0xff] }
 0xbc3   : > { %v2507_v54 = vpop.xlane.xlu1 %2506 }
 0xbc4   : > { %v2509_v56 = vsub.f32 %v2498_v44, %v2507_v54  ;;  %v2861_v44 = vld [vmem:[%s8084_s26 + $0x80] sm:$0xff]  ;;  %v2870_v54 = vld [vmem:[%s8084_s26 + $0xc8] sm:$0xff] }
 0xbc5   : > { %v6885_v58 = vpop.eup %6884  ;;  %v5935_v50 = vcombine.high %v2861_v44, %v2869_v45 }
 0xbc6   : > { %v2512_v59 = vmul.f32 1.442695, %v2509_v56  ;;  %v2514_v61 = vsel %vm1491_vm4, %v6885_v58, 0.0  ;;  %v5937_v56 = vcombine.high %v2862_v52, %v2870_v54 }
 0xbc7   : > { %2515 = vadd.xlane.f32.xlu0 %v2514_v61  ;;  %v2601_v60 = vpop.permute.xlu1 %2600 }
 0xbc8   : > { %6886 = vpow2.f32 %v2512_v59  ;;  %6516 = vmatpush3.msra.mxu1 %v2601_v60  ;;  %v5936_v59 = vcombine.low %v2862_v52, %v2870_v54 }
 0xbc9   : > { %3698 = vmatprep.subr.bf16.mxu1 %v5919_v42 }
 0xbcb   : > { %v1997_v62 = vpop.permute.xlu1 %1996 }
 0xbcc   : > { %2003 = vst.msk [vmem:[#allocation3] sm:$0xff] %vm2002_vm5, %v1997_v62 }
 0xbcf   : > { %v1999_v63 = vpop.permute.xlu1 %1998 }
 0xbd0   : > { %2004 = vst.msk [vmem:[#allocation3 + $0x8] sm:$0xff] %vm2002_vm5, %v1999_v63 }
 0xbd2   : > { %v6887_v0 = vpop.eup %6886 }
 0xbd3   : > { %v2340_v1 = vpop.permute.xlu1 %2339  ;;  %v2517_v2 = vsel %vm1491_vm4, %v6887_v0, 0.0 }
 0xbd4   : > { %2345 = vst.msk [vmem:[#allocation3 + $0x8] sm:$0xff] %vm2343_vm6, %v2340_v1  ;;  %2518 = vadd.xlane.f32.xlu0 %v2517_v2 }
 0xbea   : > { %2524 = vrot.lane.b32.xlu0 %v8187_v57, %s7456_s3 }
 0xbee   : > { %2337 = vrot.lane.b32.xlu0 %v2255_v34, %s7455_s29 }
 0xc54   : > { %v2516_v3 = vpop.xlane.xlu0 %2515 }
 0xc55   : > { %6888 = vrcp.f32 %v2516_v3 }
 0xc5f   : > { %v6889_v5 = vpop.eup %6888 }
 0xc60   : > { %v2522_v6 = vmul.f32 %v6889_v5, %v6885_v58  ;;  %v5934_v58 = vcombine.low %v2861_v44, %v2869_v45  ;;  %v2885_v5 = vld [vmem:[%s8084_s26 + $0x140] sm:$0xff]  ;;  %v2958_v45 = vld [vmem:[%s8084_s26 + $0x388] sm:$0xff] }
 0xc61   : > { %v2519_v4 = vpop.xlane.xlu0 %2518  ;;  %v2965_v44 = vld [vmem:[%s8084_s26 + $0x3c0] sm:$0xff] }
 0xc62   : > { %6890 = vrcp.f32 %v2519_v4  ;;  %v2877_v4 = vld [vmem:[%s8084_s26 + $0x100] sm:$0xff] }
 0xc65   : > { %v2525_v7 = vpop.permute.xlu0 %2524 }
 0xc66   : > { %6511 = vmatpush3.msra.mxu0 %v2525_v7  ;;  %v5951_v7 = vcombine.high %v2877_v4, %v2885_v5 }
 0xc67   : > { %6513 = vmatmul.mubr.msk.f32.vlgmr.msra.gmra.mrb[10].mxu0 %vm1491_vm4, %v2522_v6  ;;  %6520 = vmatprep.subr.bf16.mxu0 %v7452_v11  ;;  %v2878_v6 = vld [vmem:[%s8084_s26 + $0x108] sm:$0xff] }
 0xc68   : > { %6536 = vmatprep.mubr.msk.bf16.mxu0 %vm7453_vm2, %v7452_v11  ;;  %6521 = vmatpush3.bf16.msra.mxu0 %v6724_v12 }
 0xc69   : > { %v2338_v57 = vpop.permute.xlu0 %2337  ;;  %6522 = vmatprep.subr.bf16.mxu0 %v7452_v11 }
 0xc6a   : > { %2344 = vst.msk [vmem:[#allocation3] sm:$0xff] %vm2343_vm6, %v2338_v57  ;;  %v2886_v57 = vld [vmem:[%s8084_s26 + $0x148] sm:$0xff] }
 0xc6b   : > { %v5953_v12 = vcombine.high %v2878_v6, %v2886_v57 }
 0xc6c   : > { %v6891_v8 = vpop.eup %6890  ;;  %6523 = vmatpush3.bf16.msra.mxu0 %v6725_v13  ;;  %v2893_v13 = vld [vmem:[%s8084_s26 + $0x180] sm:$0xff] }
 0xc6d   : > { %v2523_v9 = vmul.f32 %v6891_v8, %v6887_v0  ;;  %6524 = vmatprep.subr.bf16.mxu0 %v7452_v11  ;;  %v5950_v8 = vcombine.low %v2877_v4, %v2885_v5 }
 0xc6f   : > { %6518 = vmatmul.mubr.msk.f32.vlgmr.msra.gmra.mrb[26].mxu1 %vm1491_vm4, %v2523_v9  ;;  %v5952_v9 = vcombine.low %v2878_v6, %v2886_v57 }
 0xc70   : > { %3730 = vmatprep.mubr.bf16.mxu1 %v7451_v10  ;;  %6525 = vmatpush3.bf16.msra.mxu0 %v6726_v14  ;;  %v2901_v14 = vld [vmem:[%s8084_s26 + $0x1c0] sm:$0xff] }
 0xc71   : > { %6526 = vmatprep.subr.bf16.mxu0 %v7452_v11  ;;  %3699 = vmatpush1.bf16.msra.mxu1 %v5918_v40 }
 0xc72   : > { %3700 = vmatprep.subr.bf16.mxu1 %v5935_v50  ;;  %v6030_v50 = vcombine.low %v2957_v43, %v2965_v44 }
 0xc74   : > { %6527 = vmatpush3.bf16.msra.mxu0 %v6727_v15  ;;  %v2894_v15 = vld [vmem:[%s8084_s26 + $0x188] sm:$0xff] }
 0xc75   : > { %6528 = vmatprep.subr.bf16.mxu0 %v7452_v11  ;;  %3701 = vmatpush1.bf16.msra.mxu1 %v5934_v58  ;;  %v2855_v58 = vld [vmem:[%s8084_s26 + $0x50] sm:$0xff] }
 0xc76   : > { %3702 = vmatprep.subr.bf16.mxu1 %v5951_v7 }
 0xc78   : > { %6529 = vmatpush3.bf16.msra.mxu0 %v6728_v16  ;;  %v5967_v16 = vcombine.high %v2893_v13, %v2901_v14 }
 0xc79   : > { %6530 = vmatprep.subr.bf16.mxu0 %v7452_v11  ;;  %3703 = vmatpush1.bf16.msra.mxu1 %v5950_v8 }
 0xc7a   : > { %3704 = vmatprep.subr.bf16.mxu1 %v5967_v16  ;;  %v5917_v16 = vld [vmem:[%s815_s15] ss:$0 sm:$0xff] }
 0xc7c   : > { %6531 = vmatpush3.bf16.msra.mxu0 %v6729_v17  ;;  %v2902_v17 = vld [vmem:[%s8084_s26 + $0x1c8] sm:$0xff] }
 0xc7d   : > { %6532 = vmatprep.subr.bf16.mxu0 %v7452_v11 }
 0xc80   : > { %6533 = vmatpush3.bf16.msra.mxu0 %v6730_v18  ;;  %v5966_v18 = vcombine.low %v2893_v13, %v2901_v14 }
 0xc81   : > { %6534 = vmatprep.subr.bf16.mxu0 %v7452_v11  ;;  %v5907_v11 = vld [vmem:[%s799_s0] ss:$0 sm:$0xff]  ;;  %s8831_s0 = sld [smem:[#allocation30_spill]] }
 0xc82   : > { %3705 = vmatpush1.bf16.msra.mxu1 %v5966_v18  ;;  %v2863_v18 = vld [vmem:[%s8084_s26 + $0x90] sm:$0xff] }
 0xc84   : > { %6535 = vmatpush3.bf16.msra.mxu0 %v6731_v19  ;;  %v5968_v19 = vcombine.low %v2894_v15, %v2902_v17 }
 0xc85   : > { %3741 = vmatprep.subr.bf16.mxu0 %v5921_v48  ;;  %v2966_v48 = vld [vmem:[%s8084_s26 + $0x3c8] sm:$0xff] }
 0xc86   : > { %v6032_v52 = vcombine.low %v2958_v45, %v2966_v48  ;;  %v6033_v54 = vcombine.high %v2958_v45, %v2966_v48  ;;  %v2927_v48 = vld [vmem:[%s8084_s26 + $0x290] sm:$0xff] }
 0xc87   : > { %p6177_p2 = scmp.ne.s32.totalorder %s8831_s0, 3 }
 0xc88   : > { %s8832_s15 = sld [smem:[#allocation44_spill]] (!%p6177_p2) }
 0xd3a   : > { %v2596_v20 = vpop.f32.mrb[10].mxu0 }
 0xd3b   : > { %2678 = vrot.lane.b32.xlu0 %v2596_v20, %s7454_s22  ;;  %v6514_v21 = vpop.f32.mrb[11].mxu0  ;;  %v5969_v20 = vcombine.high %v2894_v15, %v2902_v17 }
 0xd3c   : > { %v2909_v21 = vld [vmem:[%s8084_s26 + $0x200] sm:$0xff] }
 0xd42   : > { %v2672_v22 = vpop.f32.mrb[26].mxu1 }
 0xd43   : > { %2680 = vrot.lane.b32.xlu1 %v2672_v22, %s7454_s22  ;;  %v6519_v47 = vpop.f32.mrb[27].mxu1  ;;  %v2917_v22 = vld [vmem:[%s8084_s26 + $0x240] sm:$0xff] }
 0xd44   : > { %v2910_v47 = vld [vmem:[%s8084_s26 + $0x208] sm:$0xff] }
 0xdad   : > { %v2679_v53 = vpop.permute.xlu0 %2678 }
 0xdae   : > { %2685 = vst.msk [vmem:[#allocation3] sm:$0xff] %vm2684_vm7, %v2679_v53  ;;  %v5983_v53 = vcombine.high %v2909_v21, %v2917_v22 }
 0xdb0   : > { %3706 = vmatprep.subr.bf16.mxu1 %v5983_v53 }
 0xdb5   : > { %v2681_v55 = vpop.permute.xlu1 %2680  ;;  %v2687_v23 = vld [vmem:[#allocation3] sm:$0xff] }
 0xdb6   : > { %2686 = vst.msk [vmem:[#allocation3 + $0x8] sm:$0xff] %vm2684_vm7, %v2681_v55  ;;  %v2918_v55 = vld [vmem:[%s8084_s26 + $0x248] sm:$0xff] }
 0xdbd   : > { %v2688_v24 = vld [vmem:[#allocation3 + $0x8] sm:$0xff] }
 0xdbe   : > { %v2706_v25 = vpack.c.bf16 %v2688_v24, %v2687_v23  ;;  %v5982_v23 = vcombine.low %v2909_v21, %v2917_v22  ;;  %v5984_v24 = vcombine.low %v2910_v47, %v2918_v55  ;;  %v2872_v21 = vld [vmem:[%s8084_s26 + $0xd8] sm:$0xff] }
 0xdc0   : > { %6537 = vmatmul.mubr.bf16.vlgmr.msra.gmra.mrb[12].mxu0 %v2706_v25  ;;  %v5985_v25 = vcombine.high %v2910_v47, %v2918_v55  ;;  %3707 = vmatpush1.bf16.msra.mxu1 %v5982_v23  ;;  %v2887_v23 = vld [vmem:[%s8084_s26 + $0x150] sm:$0xff] }
 0xdc1   : > { %3773 = vmatprep.mubr.bf16.mxu0 %v7451_v10  ;;  %3742 = vmatpush1.bf16.msra.mxu0 %v5920_v46  ;;  %v6031_v46 = vcombine.high %v2957_v43, %v2965_v44 }
 0xdc2   : > { %3743 = vmatprep.subr.bf16.mxu0 %v5937_v56  ;;  %v2847_v56 = vld [vmem:[%s8084_s26 + $0x10] sm:$0xff] }
 0xdc5   : > { %3744 = vmatpush1.bf16.msra.mxu0 %v5936_v59  ;;  %v2848_v59 = vld [vmem:[%s8084_s26 + $0x18] sm:$0xff] }
 0xdc6   : > { %3745 = vmatprep.subr.bf16.mxu0 %v5953_v12  ;;  %v5916_v12 = vld [vmem:[%s807_s25] ss:$0 sm:$0xff] }
 0xdc9   : > { %3746 = vmatpush1.bf16.msra.mxu0 %v5952_v9 }
 0xdca   : > { %3747 = vmatprep.subr.bf16.mxu0 %v5969_v20  ;;  %v2864_v20 = vld [vmem:[%s8084_s26 + $0x98] sm:$0xff] }
 0xdcb   : > { %v5941_v55 = vcombine.high %v2864_v20, %v2872_v21 }
 0xdcd   : > { %3748 = vmatpush1.bf16.msra.mxu0 %v5968_v19  ;;  %v2871_v19 = vld [vmem:[%s8084_s26 + $0xd0] sm:$0xff] }
 0xdce   : > { %3749 = vmatprep.subr.bf16.mxu0 %v5985_v25  ;;  %v5939_v53 = vcombine.high %v2863_v18, %v2871_v19  ;;  %v2888_v25 = vld [vmem:[%s8084_s26 + $0x158] sm:$0xff] }
 0xdd1   : > { %3750 = vmatpush1.bf16.msra.mxu0 %v5984_v24  ;;  %v2880_v24 = vld [vmem:[%s8084_s26 + $0x118] sm:$0xff] }
 0xe93   : > { %v2795_v26 = vpop.f32.mrb[12].mxu0 }
 0xe94   : > { %v2796_v27 = vadd.f32 %v5907_v11, %v2795_v26  ;;  %v6538_v28 = vpop.f32.mrb[13].mxu0  ;;  %v2933_v26 = vld [vmem:[%s8084_s26 + $0x2c0] sm:$0xff] }
 0xe95   : > { %v2798_v29 = vpop.f32.mrb[14].mxu0 }
 0xe96   : > { %v2799_v49 = vadd.f32 %v5907_v11, %v2798_v29  ;;  %v6539_v30 = vpop.f32.mrb[15].mxu0  ;;  %v2802_v32 = vadd.f32 %v6900_v31, %v2796_v27  ;;  %v2925_v11 = vld [vmem:[%s8084_s26 + $0x280] sm:$0xff]  ;;  %v2926_v27 = vld [vmem:[%s8084_s26 + $0x288] sm:$0xff] }
 0xe97   : > { %v5999_v28 = vcombine.high %v2925_v11, %v2933_v26  ;;  %v2934_v29 = vld [vmem:[%s8084_s26 + $0x2c8] sm:$0xff] }
 0xe98   : > { %2806 = vadd.xlane.f32.xlu0 %v2802_v32  ;;  %v2803_v34 = vadd.f32 %v6901_v33, %v2799_v49  ;;  %v5998_v49 = vcombine.low %v2925_v11, %v2933_v26  ;;  %v6000_v30 = vcombine.low %v2926_v27, %v2934_v29  ;;  %v6001_v31 = vcombine.high %v2926_v27, %v2934_v29  ;;  %v2949_v33 = vld [vmem:[%s8084_s26 + $0x340] sm:$0xff]  ;;  %v2895_v29 = vld [vmem:[%s8084_s26 + $0x190] sm:$0xff] }
 0xe99   : > { %3708 = vmatprep.subr.bf16.mxu1 %v5999_v28  ;;  %v5938_v11 = vcombine.low %v2863_v18, %v2871_v19  ;;  %v5940_v26 = vcombine.low %v2864_v20, %v2872_v21  ;;  %v5957_v28 = vcombine.high %v2880_v24, %v2888_v25  ;;  %v2850_v18 = vld [vmem:[%s8084_s26 + $0x28] sm:$0xff] }
 0xe9a   : > { %2808 = vadd.xlane.f32.xlu1 %v2803_v34  ;;  %3751 = vmatprep.subr.bf16.mxu0 %v6001_v31  ;;  %v2904_v31 = vld [vmem:[%s8084_s26 + $0x1d8] sm:$0xff]  ;;  %v2858_v19 = vld [vmem:[%s8084_s26 + $0x68] sm:$0xff] }
 0xe9b   : > { %3709 = vmatpush1.bf16.msra.mxu1 %v5998_v49  ;;  %3752 = vmatpush1.bf16.msra.mxu0 %v6000_v30  ;;  %v2903_v49 = vld [vmem:[%s8084_s26 + $0x1d0] sm:$0xff]  ;;  %v2896_v30 = vld [vmem:[%s8084_s26 + $0x198] sm:$0xff] }
 0xe9c   : > { %v5970_v43 = vcombine.low %v2895_v29, %v2903_v49  ;;  %v5972_v44 = vcombine.low %v2896_v30, %v2904_v31 }
 0xf25   : > { %v2807_v61 = vpop.xlane.xlu0 %2806 }
 0xf26   : > { %v2811_v60 = vmul.f32 0.0078125, %v2807_v61  ;;  %v5922_v61 = vcombine.low %v2847_v56, %v2855_v58 }
 0xf27   : > { %v2809_v62 = vpop.xlane.xlu1 %2808 }
 0xf28   : > { %v8347_v63 = vsub.f32 %v2802_v32, %v2811_v60  ;;  %v2812_v0 = vmul.f32 0.0078125, %v2809_v62  ;;  %v2941_v32 = vld [vmem:[%s8084_s26 + $0x300] sm:$0xff]  ;;  %v5923_v60 = vcombine.high %v2847_v56, %v2855_v58  ;;  %v2856_v62 = vld [vmem:[%s8084_s26 + $0x58] sm:$0xff] }
 0xf29   : > { %v6015_v35 = vcombine.high %v2941_v32, %v2949_v33  ;;  %v6014_v37 = vcombine.low %v2941_v32, %v2949_v33  ;;  %v5956_v33 = vcombine.low %v2880_v24, %v2888_v25  ;;  %v2866_v24 = vld [vmem:[%s8084_s26 + $0xa8] sm:$0xff] }
 0xf2a   : > { %v8349_v1 = vsub.f32 %v2803_v34, %v2812_v0  ;;  %v2815_v2 = vmul.f32 %v8347_v63, %v8347_v63  ;;  %v2942_v34 = vld [vmem:[%s8084_s26 + $0x308] sm:$0xff]  ;;  %v5924_v0 = vcombine.low %v2848_v59, %v2856_v62 }
 0xf2b   : > { %v6016_v40 = vcombine.low %v2942_v34, %v2950_v36  ;;  %v6017_v42 = vcombine.high %v2942_v34, %v2950_v36  ;;  %3710 = vmatprep.subr.bf16.mxu1 %v6015_v35  ;;  %v5971_v34 = vcombine.high %v2895_v29, %v2903_v49  ;;  %v5973_v35 = vcombine.high %v2896_v30, %v2904_v31  ;;  %v2911_v36 = vld [vmem:[%s8084_s26 + $0x210] sm:$0xff]  ;;  %v2874_v25 = vld [vmem:[%s8084_s26 + $0xe8] sm:$0xff]  ;;  %v2881_v29 = vld [vmem:[%s8084_s26 + $0x120] sm:$0xff] }
 0xf2c   : > { %2817 = vadd.xlane.f32.xlu0 %v2815_v2  ;;  %v2816_v3 = vmul.f32 %v8349_v1, %v8349_v1  ;;  %3711 = vmatpush1.bf16.msra.mxu1 %v6014_v37  ;;  %v5925_v2 = vcombine.high %v2848_v59, %v2856_v62  ;;  %v2919_v37 = vld [vmem:[%s8084_s26 + $0x250] sm:$0xff]  ;;  %v2889_v49 = vld [vmem:[%s8084_s26 + $0x160] sm:$0xff]  ;;  %v2882_v30 = vld [vmem:[%s8084_s26 + $0x128] sm:$0xff] }
 0xf2d   : > { %3753 = vmatprep.subr.bf16.mxu0 %v6017_v42  ;;  %3712 = vmatprep.subr.bf16.mxu1 %v6031_v46  ;;  %v2920_v42 = vld [vmem:[%s8084_s26 + $0x258] sm:$0xff]  ;;  %v5987_v45 = vcombine.high %v2911_v36, %v2919_v37  ;;  %v5986_v56 = vcombine.low %v2911_v36, %v2919_v37  ;;  %v2951_v62 = vld [vmem:[%s8084_s26 + $0x350] sm:$0xff]  ;;  %v2890_v31 = vld [vmem:[%s8084_s26 + $0x168] sm:$0xff] }
 0xf2e   : > { %3754 = vmatpush1.bf16.msra.mxu0 %v6016_v40  ;;  %v2912_v40 = vld [vmem:[%s8084_s26 + $0x218] sm:$0xff]  ;;  %v2897_v36 = vld [vmem:[%s8084_s26 + $0x1a0] sm:$0xff] }
 0xf2f   : > { %3755 = vmatprep.subr.bf16.mxu0 %v6033_v54  ;;  %v5989_v46 = vcombine.high %v2912_v40, %v2920_v42  ;;  %v2936_v54 = vld [vmem:[%s8084_s26 + $0x2d8] sm:$0xff]  ;;  %v5988_v58 = vcombine.low %v2912_v40, %v2920_v42  ;;  %v2905_v37 = vld [vmem:[%s8084_s26 + $0x1e0] sm:$0xff]  ;;  %v2898_v40 = vld [vmem:[%s8084_s26 + $0x1a8] sm:$0xff] }
 0xf30   : > { %2819 = vadd.xlane.f32.xlu0 %v2816_v3  ;;  %3713 = vmatpush1.bf16.msra.mxu1 %v6030_v50  ;;  %v2935_v50 = vld [vmem:[%s8084_s26 + $0x2d0] sm:$0xff]  ;;  %v2906_v42 = vld [vmem:[%s8084_s26 + $0x1e8] sm:$0xff] }
 0xf31   : > { %3784 = vmatprep.subr.bf16.mxu1 %v5923_v60  ;;  %v6003_v59 = vcombine.high %v2927_v48, %v2935_v50  ;;  %v2943_v60 = vld [vmem:[%s8084_s26 + $0x310] sm:$0xff] }
 0xf32   : > { %3756 = vmatpush1.bf16.msra.mxu0 %v6032_v52  ;;  %v2928_v52 = vld [vmem:[%s8084_s26 + $0x298] sm:$0xff] }
 0xf33   : > { %3827 = vmatprep.subr.bf16.mxu0 %v5925_v2  ;;  %v2952_v2 = vld [vmem:[%s8084_s26 + $0x358] sm:$0xff] }
 0xfb9   : > { %v2818_v3 = vpop.xlane.xlu0 %2817 }
 0xfba   : > { %v2821_v4 = vmul.f32 0.0078125, %v2818_v3  ;;  %v6002_v3 = vcombine.low %v2927_v48, %v2935_v50  ;;  %v2913_v48 = vld [vmem:[%s8084_s26 + $0x220] sm:$0xff] }
 0xfbb   : > { %v2921_v50 = vld [vmem:[%s8084_s26 + $0x260] sm:$0xff] }
 0xfbc   : > { %v2823_v5 = vadd.f32 1e-05, %v2821_v4  ;;  %v6004_v4 = vcombine.low %v2928_v52, %v2936_v54 }
 0xfbd   : > { %v2820_v6 = vpop.xlane.xlu0 %2819 }
 0xfbe   : > { %6892 = vrsqrt.f32 %v2823_v5  ;;  %v2822_v7 = vmul.f32 0.0078125, %v2820_v6  ;;  %v6019_v5 = vcombine.high %v2943_v60, %v2951_v62 }
 0xfc0   : > { %v2824_v57 = vadd.f32 1e-05, %v2822_v7  ;;  %v2959_v7 = vld [vmem:[%s8084_s26 + $0x390] sm:$0xff] }
 0xfc2   : > { %6894 = vrsqrt.f32 %v2824_v57  ;;  %v2967_v57 = vld [vmem:[%s8084_s26 + $0x3d0] sm:$0xff] }
 0xfc3   : > { %v6034_v20 = vcombine.low %v2959_v7, %v2967_v57 }
 0xfc8   : > { %v6893_v8 = vpop.eup %6892 }
 0xfc9   : > { %v2827_v9 = vmul.f32 %v6893_v8, %v8347_v63  ;;  %v2960_v8 = vld [vmem:[%s8084_s26 + $0x398] sm:$0xff] }
 0xfcb   : > { %v2835_v14 = vmul.f32 %v5916_v12, %v2827_v9  ;;  %v2968_v9 = vld [vmem:[%s8084_s26 + $0x3d8] sm:$0xff] }
 0xfcc   : > { %v6895_v13 = vpop.eup %6894  ;;  %v6036_v21 = vcombine.low %v2960_v8, %v2968_v9 }
 0xfcd   : > { %v2828_v15 = vmul.f32 %v6895_v13, %v8349_v1  ;;  %v8393_v22 = vadd.f32 %v5917_v16, %v2835_v14  ;;  %v2879_v1 = vld [vmem:[%s8084_s26 + $0x110] sm:$0xff]  ;;  %v6035_v14 = vcombine.high %v2959_v7, %v2967_v57  ;;  %v2945_v7 = vld [vmem:[%s8084_s26 + $0x320] sm:$0xff] }
 0xfce   : > { %v5955_v27 = vcombine.high %v2879_v1, %v2887_v23  ;;  %v5954_v32 = vcombine.low %v2879_v1, %v2887_v23  ;;  %v2865_v1 = vld [vmem:[%s8084_s26 + $0xa0] sm:$0xff] }
 0xfcf   : > { %v2836_v17 = vmul.f32 %v5916_v12, %v2828_v15  ;;  %v6018_v12 = vcombine.low %v2943_v60, %v2951_v62  ;;  %v6037_v15 = vcombine.high %v2960_v8, %v2968_v9  ;;  %v2873_v23 = vld [vmem:[%s8084_s26 + $0xe0] sm:$0xff]  ;;  %v2946_v8 = vld [vmem:[%s8084_s26 + $0x328] sm:$0xff] }
 0xfd0   : > { %v2929_v60 = vld [vmem:[%s8084_s26 + $0x2a0] sm:$0xff]  ;;  %v2954_v9 = vld [vmem:[%s8084_s26 + $0x368] sm:$0xff] }
 0xfd1   : > { %v8395_v63 = vadd.f32 %v5917_v16, %v2836_v17  ;;  %v2849_v16 = vld [vmem:[%s8084_s26 + $0x20] sm:$0xff] }
 0xfd2   : > { %v2857_v17 = vld [vmem:[%s8084_s26 + $0x60] sm:$0xff] }
 0xfd3   : > { %v8399_v47 = vpack.c.bf16 %v8395_v63, %v8393_v22  ;;  %v2937_v62 = vld [vmem:[%s8084_s26 + $0x2e0] sm:$0xff] }
 0xfd4   : > { %v2953_v57 = vld [vmem:[%s8084_s26 + $0x360] sm:$0xff] }
 0xfd5   : > { %3731 = vmatmul.mubr.bf16.vlgmr.msra.gmra.mrb[28].mxu1 %v8399_v47  ;;  %3774 = vmatmul.mubr.bf16.vlgmr.msra.gmra.mrb[16].mxu0 %v8399_v47 }
 0xfd6   : > { %3785 = vmatpush1.bf16.msra.mxu1 %v5922_v61  ;;  %3828 = vmatpush1.bf16.msra.mxu0 %v5924_v0  ;;  %v6005_v61 = vcombine.high %v2928_v52, %v2936_v54  ;;  %v2944_v0 = vld [vmem:[%s8084_s26 + $0x318] sm:$0xff]  ;;  %v2914_v52 = vld [vmem:[%s8084_s26 + $0x228] sm:$0xff] }
 0xfd7   : > { %3786 = vmatprep.subr.bf16.mxu1 %v5939_v53  ;;  %3829 = vmatprep.subr.bf16.mxu0 %v5941_v55  ;;  %v6021_v6 = vcombine.high %v2944_v0, %v2952_v2  ;;  %v6020_v13 = vcombine.low %v2944_v0, %v2952_v2  ;;  %v5927_v53 = vcombine.high %v2849_v16, %v2857_v17  ;;  %v2922_v54 = vld [vmem:[%s8084_s26 + $0x268] sm:$0xff] }
 0xfd8   : > { %3816 = vmatprep.mubr.bf16.mxu1 %v7451_v10  ;;  %3859 = vmatprep.mubr.bf16.mxu0 %v7451_v10  ;;  %v5929_v55 = vcombine.high %v2850_v18, %v2858_v19  ;;  %v2930_v0 = vld [vmem:[%s8084_s26 + $0x2a8] sm:$0xff] }
 0xfd9   : > { %v2938_v2 = vld [vmem:[%s8084_s26 + $0x2e8] sm:$0xff] }
 0xfda   : > { %3787 = vmatpush1.bf16.msra.mxu1 %v5938_v11  ;;  %3830 = vmatpush1.bf16.msra.mxu0 %v5940_v26  ;;  %v5926_v11 = vcombine.low %v2849_v16, %v2857_v17  ;;  %v5928_v26 = vcombine.low %v2850_v18, %v2858_v19  ;;  %v2961_v16 = vld [vmem:[%s8084_s26 + $0x3a0] sm:$0xff]  ;;  %v2962_v18 = vld [vmem:[%s8084_s26 + $0x3a8] sm:$0xff] }
 0xfdb   : > { %3788 = vmatprep.subr.bf16.mxu1 %v5955_v27  ;;  %3831 = vmatprep.subr.bf16.mxu0 %v5957_v28  ;;  %v5943_v27 = vcombine.high %v2865_v1, %v2873_v23  ;;  %v5945_v28 = vcombine.high %v2866_v24, %v2874_v25  ;;  %v2969_v17 = vld [vmem:[%s8084_s26 + $0x3e0] sm:$0xff]  ;;  %v2970_v19 = vld [vmem:[%s8084_s26 + $0x3e8] sm:$0xff] }
 0xfde   : > { %3789 = vmatpush1.bf16.msra.mxu1 %v5954_v32  ;;  %3832 = vmatpush1.bf16.msra.mxu0 %v5956_v33  ;;  %v5942_v32 = vcombine.low %v2865_v1, %v2873_v23  ;;  %v5944_v33 = vcombine.low %v2866_v24, %v2874_v25  ;;  %v2851_v1 = vld [vmem:[%s8084_s26 + $0x30] sm:$0xff]  ;;  %v2852_v24 = vld [vmem:[%s8084_s26 + $0x38] sm:$0xff] }
 0xfdf   : > { %3790 = vmatprep.subr.bf16.mxu1 %v5971_v34  ;;  %3833 = vmatprep.subr.bf16.mxu0 %v5973_v35  ;;  %v5959_v34 = vcombine.high %v2881_v29, %v2889_v49  ;;  %v5961_v35 = vcombine.high %v2882_v30, %v2890_v31  ;;  %v2859_v23 = vld [vmem:[%s8084_s26 + $0x70] sm:$0xff]  ;;  %v2860_v25 = vld [vmem:[%s8084_s26 + $0x78] sm:$0xff] }
 0xfe2   : > { %3791 = vmatpush1.bf16.msra.mxu1 %v5970_v43  ;;  %3834 = vmatpush1.bf16.msra.mxu0 %v5972_v44  ;;  %v5958_v43 = vcombine.low %v2881_v29, %v2889_v49  ;;  %v5960_v44 = vcombine.low %v2882_v30, %v2890_v31  ;;  %v2867_v29 = vld [vmem:[%s8084_s26 + $0xb0] sm:$0xff]  ;;  %v2868_v30 = vld [vmem:[%s8084_s26 + $0xb8] sm:$0xff] }
 0xfe3   : > { %3792 = vmatprep.subr.bf16.mxu1 %v5987_v45  ;;  %3835 = vmatprep.subr.bf16.mxu0 %v5989_v46  ;;  %v5975_v45 = vcombine.high %v2897_v36, %v2905_v37  ;;  %v5977_v46 = vcombine.high %v2898_v40, %v2906_v42  ;;  %v2875_v49 = vld [vmem:[%s8084_s26 + $0xf0] sm:$0xff]  ;;  %v2876_v31 = vld [vmem:[%s8084_s26 + $0xf8] sm:$0xff] }
 0xfe6   : > { %3793 = vmatpush1.bf16.msra.mxu1 %v5986_v56  ;;  %3836 = vmatpush1.bf16.msra.mxu0 %v5988_v58  ;;  %v5974_v56 = vcombine.low %v2897_v36, %v2905_v37  ;;  %v5976_v58 = vcombine.low %v2898_v40, %v2906_v42  ;;  %v2883_v36 = vld [vmem:[%s8084_s26 + $0x130] sm:$0xff]  ;;  %v2884_v40 = vld [vmem:[%s8084_s26 + $0x138] sm:$0xff] }
 0xfe7   : > { %3794 = vmatprep.subr.bf16.mxu1 %v6003_v59  ;;  %3837 = vmatprep.subr.bf16.mxu0 %v6005_v61  ;;  %v5991_v59 = vcombine.high %v2913_v48, %v2921_v50  ;;  %v5993_v61 = vcombine.high %v2914_v52, %v2922_v54  ;;  %v2891_v37 = vld [vmem:[%s8084_s26 + $0x170] sm:$0xff]  ;;  %v2892_v42 = vld [vmem:[%s8084_s26 + $0x178] sm:$0xff] }
 0xfea   : > { %3795 = vmatpush1.bf16.msra.mxu1 %v6002_v3  ;;  %3838 = vmatpush1.bf16.msra.mxu0 %v6004_v4  ;;  %v5990_v3 = vcombine.low %v2913_v48, %v2921_v50  ;;  %v5992_v4 = vcombine.low %v2914_v52, %v2922_v54  ;;  %v2899_v48 = vld [vmem:[%s8084_s26 + $0x1b0] sm:$0xff]  ;;  %v2900_v52 = vld [vmem:[%s8084_s26 + $0x1b8] sm:$0xff] }
 0xfeb   : > { %3796 = vmatprep.subr.bf16.mxu1 %v6019_v5  ;;  %3839 = vmatprep.subr.bf16.mxu0 %v6021_v6  ;;  %v6007_v5 = vcombine.high %v2929_v60, %v2937_v62  ;;  %v6009_v6 = vcombine.high %v2930_v0, %v2938_v2  ;;  %v2907_v50 = vld [vmem:[%s8084_s26 + $0x1f0] sm:$0xff]  ;;  %v2908_v54 = vld [vmem:[%s8084_s26 + $0x1f8] sm:$0xff] }
 0xfee   : > { %3797 = vmatpush1.bf16.msra.mxu1 %v6018_v12  ;;  %3840 = vmatpush1.bf16.msra.mxu0 %v6020_v13  ;;  %v6006_v12 = vcombine.low %v2929_v60, %v2937_v62  ;;  %v6008_v13 = vcombine.low %v2930_v0, %v2938_v2  ;;  %v2915_v60 = vld [vmem:[%s8084_s26 + $0x230] sm:$0xff]  ;;  %v2916_v0 = vld [vmem:[%s8084_s26 + $0x238] sm:$0xff] }
 0xfef   : > { %3798 = vmatprep.subr.bf16.mxu1 %v6035_v14  ;;  %3841 = vmatprep.subr.bf16.mxu0 %v6037_v15  ;;  %v6023_v14 = vcombine.high %v2945_v7, %v2953_v57  ;;  %v6025_v15 = vcombine.high %v2946_v8, %v2954_v9  ;;  %v2923_v62 = vld [vmem:[%s8084_s26 + $0x270] sm:$0xff]  ;;  %v2924_v2 = vld [vmem:[%s8084_s26 + $0x278] sm:$0xff] }
 0xff2   : > { %3799 = vmatpush1.bf16.msra.mxu1 %v6034_v20  ;;  %3842 = vmatpush1.bf16.msra.mxu0 %v6036_v21  ;;  %v6022_v20 = vcombine.low %v2945_v7, %v2953_v57  ;;  %v6024_v21 = vcombine.low %v2946_v8, %v2954_v9  ;;  %v2939_v7 = vld [vmem:[%s8084_s26 + $0x2f0] sm:$0xff]  ;;  %v2932_v57 = vld [vmem:[%s8084_s26 + $0x2b8] sm:$0xff]  ;;  %v5994_v9 = vcombine.low %v2915_v60, %v2923_v62 }
 0xff3   : > { %3870 = vmatprep.subr.bf16.mxu1 %v5927_v53  ;;  %3913 = vmatprep.subr.bf16.mxu0 %v5929_v55  ;;  %v6039_v53 = vcombine.high %v2961_v16, %v2969_v17  ;;  %v6041_v55 = vcombine.high %v2962_v18, %v2970_v19  ;;  %v2940_v8 = vld [vmem:[%s8084_s26 + $0x2f8] sm:$0xff] }
 0xff5   : > { %3817 = vmatmul.mubr.bf16.vlgmr.msra.gmra.mrb[32].mxu1 %v8399_v47  ;;  %3860 = vmatmul.mubr.bf16.vlgmr.msra.gmra.mrb[20].mxu0 %v8399_v47 }
 0xff6   : > { %3871 = vmatpush1.bf16.msra.mxu1 %v5926_v11  ;;  %3914 = vmatpush1.bf16.msra.mxu0 %v5928_v26  ;;  %v6038_v11 = vcombine.low %v2961_v16, %v2969_v17  ;;  %v6040_v26 = vcombine.low %v2962_v18, %v2970_v19  ;;  %v2955_v16 = vld [vmem:[%s8084_s26 + $0x370] sm:$0xff]  ;;  %v2948_v17 = vld [vmem:[%s8084_s26 + $0x338] sm:$0xff] }
 0xff7   : > { %3872 = vmatprep.subr.bf16.mxu1 %v5943_v27  ;;  %3915 = vmatprep.subr.bf16.mxu0 %v5945_v28  ;;  %v5931_v27 = vcombine.high %v2851_v1, %v2859_v23  ;;  %v5933_v28 = vcombine.high %v2852_v24, %v2860_v25  ;;  %v2956_v18 = vld [vmem:[%s8084_s26 + $0x378] sm:$0xff] }
 0xff8   : > { %3902 = vmatprep.mubr.bf16.mxu1 %v7451_v10  ;;  %3945 = vmatprep.mubr.bf16.mxu0 %v7451_v10 }
 0xffa   : > { %3873 = vmatpush1.bf16.msra.mxu1 %v5942_v32  ;;  %3916 = vmatpush1.bf16.msra.mxu0 %v5944_v33  ;;  %v5930_v32 = vcombine.low %v2851_v1, %v2859_v23  ;;  %v5932_v33 = vcombine.low %v2852_v24, %v2860_v25  ;;  %v2971_v1 = vld [vmem:[%s8084_s26 + $0x3f0] sm:$0xff]  ;;  %v2964_v23 = vld [vmem:[%s8084_s26 + $0x3b8] sm:$0xff] }
 0xffb   : > { %3874 = vmatprep.subr.bf16.mxu1 %v5959_v34  ;;  %3917 = vmatprep.subr.bf16.mxu0 %v5961_v35  ;;  %v5947_v34 = vcombine.high %v2867_v29, %v2875_v49  ;;  %v5949_v35 = vcombine.high %v2868_v30, %v2876_v31  ;;  %v2972_v24 = vld [vmem:[%s8084_s26 + $0x3f8] sm:$0xff] }
 0xffe   : > { %3875 = vmatpush1.bf16.msra.mxu1 %v5958_v43  ;;  %3918 = vmatpush1.bf16.msra.mxu0 %v5960_v44  ;;  %v5946_v43 = vcombine.low %v2867_v29, %v2875_v49  ;;  %v5948_v44 = vcombine.low %v2868_v30, %v2876_v31  ;;  %v6044_v29 = vcombine.low %v2964_v23, %v2972_v24  ;;  %v6732_v49 = vld [vmem:[%s8088_s27 + $0x40] sm:$0xff]  }
 0xfff   : > { %3876 = vmatprep.subr.bf16.mxu1 %v5975_v45  ;;  %3919 = vmatprep.subr.bf16.mxu0 %v5977_v46  ;;  %v5963_v45 = vcombine.high %v2883_v36, %v2891_v37  ;;  %v5965_v46 = vcombine.high %v2884_v40, %v2892_v42  ;;  %v6733_v30 = vld [vmem:[%s8088_s27 + $0xc0] sm:$0xff]  }
0x1000   : > { %v6734_v31 = vld [vmem:[%s8088_s27] sm:$0xff]  }
0x1002   : > { %3877 = vmatpush1.bf16.msra.mxu1 %v5974_v56  ;;  %3920 = vmatpush1.bf16.msra.mxu0 %v5976_v58  ;;  %v5962_v56 = vcombine.low %v2883_v36, %v2891_v37  ;;  %v5964_v58 = vcombine.low %v2884_v40, %v2892_v42  ;;  %v6739_v36 = vld [vmem:[%s8088_s27 + $0x88] sm:$0xff]   ;;  %v6740_v37 = vld [vmem:[%s8088_s27 + $0x50] sm:$0xff]  }
0x1003   : > { %3878 = vmatprep.subr.bf16.mxu1 %v5991_v59  ;;  %3921 = vmatprep.subr.bf16.mxu0 %v5993_v61  ;;  %v5979_v59 = vcombine.high %v2899_v48, %v2907_v50  ;;  %v5981_v61 = vcombine.high %v2900_v52, %v2908_v54  ;;  %v6741_v40 = vld [vmem:[%s8088_s27 + $0xd0] sm:$0xff]  }
0x1004   : > { %v6742_v42 = vld [vmem:[%s8088_s27 + $0x10] sm:$0xff]  }
0x1006   : > { %3879 = vmatpush1.bf16.msra.mxu1 %v5990_v3  ;;  %3922 = vmatpush1.bf16.msra.mxu0 %v5992_v4  ;;  %v5978_v3 = vcombine.low %v2899_v48, %v2907_v50  ;;  %v5995_v4 = vcombine.high %v2915_v60, %v2923_v62  ;;  %v6748_v48 = vld [vmem:[%s8088_s27 + $0x60] sm:$0xff]   ;;  %v6756_v60 = vld [vmem:[%s8088_s27 + $0x70] sm:$0xff]  }
0x1007   : > { %3880 = vmatprep.subr.bf16.mxu1 %v6007_v5  ;;  %3923 = vmatprep.subr.bf16.mxu0 %v6009_v6  ;;  %v5997_v5 = vcombine.high %v2916_v0, %v2924_v2  ;;  %v2931_v6 = vld [vmem:[%s8084_s26 + $0x2b0] sm:$0xff]  ;;  %v6749_v50 = vld [vmem:[%s8088_s27 + $0xe0] sm:$0xff]  }
0x1008   : > { %v6010_v19 = vcombine.low %v2931_v6, %v2939_v7  ;;  %v6757_v62 = vld [vmem:[%s8088_s27 + $0xf0] sm:$0xff]  }
0x100a   : > { %3881 = vmatpush1.bf16.msra.mxu1 %v6006_v12  ;;  %3924 = vmatpush1.bf16.msra.mxu0 %v6008_v13  ;;  %v5996_v12 = vcombine.low %v2916_v0, %v2924_v2  ;;  %v6011_v13 = vcombine.high %v2931_v6, %v2939_v7  ;;  %v6758_v0 = vld [vmem:[%s8088_s27 + $0x30] sm:$0xff]   ;;  %v6764_v6 = vld [vmem:[%s8088_s27 + $0x140] sm:$0xff]  }
0x100b   : > { %3882 = vmatprep.subr.bf16.mxu1 %v6023_v14  ;;  %3925 = vmatprep.subr.bf16.mxu0 %v6025_v15  ;;  %v6013_v14 = vcombine.high %v2932_v57, %v2940_v8  ;;  %v2947_v15 = vld [vmem:[%s8084_s26 + $0x330] sm:$0xff]  ;;  %v6765_v7 = vld [vmem:[%s8088_s27 + $0x1c0] sm:$0xff]  }
0x100c   : > { %v6026_v25 = vcombine.low %v2947_v15, %v2955_v16  ;;  %v6759_v2 = vld [vmem:[%s8088_s27 + $0xb0] sm:$0xff]  }
0x100e   : > { %3883 = vmatpush1.bf16.msra.mxu1 %v6022_v20  ;;  %3926 = vmatpush1.bf16.msra.mxu0 %v6024_v21  ;;  %v6012_v20 = vcombine.low %v2932_v57, %v2940_v8  ;;  %v6027_v21 = vcombine.high %v2947_v15, %v2955_v16  ;;  %v8538_v57 = vld [vmem:[%s8086_s30] sm:$0xff]  ;;  %v2992_v8 = vsub.s32 3, %v8150_v38 }
0x100f   : > { %3884 = vmatprep.subr.bf16.mxu1 %v6039_v53  ;;  %3927 = vmatprep.subr.bf16.mxu0 %v6041_v55  ;;  %v6029_v53 = vcombine.high %v2948_v17, %v2956_v18  ;;  %v2963_v55 = vld [vmem:[%s8084_s26 + $0x3b0] sm:$0xff] }
0x1012   : > { %3885 = vmatpush1.bf16.msra.mxu1 %v6038_v11  ;;  %3928 = vmatpush1.bf16.msra.mxu0 %v6040_v26  ;;  %v6028_v11 = vcombine.low %v2948_v17, %v2956_v18  ;;  %v6043_v26 = vcombine.high %v2963_v55, %v2971_v1 }
0x1013   : > { %3956 = vmatprep.subr.bf16.mxu1 %v5931_v27  ;;  %3999 = vmatprep.subr.bf16.mxu0 %v5933_v28  ;;  %v6045_v27 = vcombine.high %v2964_v23, %v2972_v24  ;;  %v6042_v28 = vcombine.low %v2963_v55, %v2971_v1 }
0x1015   : > { %3903 = vmatmul.mubr.bf16.vlgmr.msra.gmra.mrb[36].mxu1 %v8399_v47  ;;  %3946 = vmatmul.mubr.bf16.vlgmr.msra.gmra.mrb[24].mxu0 %v8399_v47 }
0x1016   : > { %3957 = vmatpush1.bf16.msra.mxu1 %v5930_v32  ;;  %4000 = vmatpush1.bf16.msra.mxu0 %v5932_v33  ;;  %v6735_v32 = vld [vmem:[%s8088_s27 + $0x80] sm:$0xff]   ;;  %v6736_v33 = vld [vmem:[%s8088_s27 + $0x48] sm:$0xff]  }
0x1017   : > { %3958 = vmatprep.subr.bf16.mxu1 %v5947_v34  ;;  %4001 = vmatprep.subr.bf16.mxu0 %v5949_v35  ;;  %v6737_v34 = vld [vmem:[%s8088_s27 + $0xc8] sm:$0xff]  }
0x1018   : > { %3988 = vmatprep.mubr.bf16.mxu1 %v7451_v10  ;;  %4031 = vmatprep.mubr.bf16.mxu0 %v7451_v10  ;;  %v5980_v10 = vcombine.low %v2900_v52, %v2908_v54  ;;  %v6738_v35 = vld [vmem:[%s8088_s27 + $0x8] sm:$0xff]   ;;  %v6750_v52 = vld [vmem:[%s8088_s27 + $0x20] sm:$0xff]  }
0x1019   : > { %v6751_v54 = vld [vmem:[%s8088_s27 + $0xa0] sm:$0xff]  }
0x101a   : > { %3959 = vmatpush1.bf16.msra.mxu1 %v5946_v43  ;;  %4002 = vmatpush1.bf16.msra.mxu0 %v5948_v44  ;;  %v6743_v43 = vld [vmem:[%s8088_s27 + $0x90] sm:$0xff]   ;;  %v6745_v44 = vld [vmem:[%s8088_s27 + $0xd8] sm:$0xff]  }
0x101b   : > { %3960 = vmatprep.subr.bf16.mxu1 %v5963_v45  ;;  %4003 = vmatprep.subr.bf16.mxu0 %v5965_v46  ;;  %v6746_v45 = vld [vmem:[%s8088_s27 + $0x18] sm:$0xff]  }
0x101c   : > { %v6747_v46 = vld [vmem:[%s8088_s27 + $0x98] sm:$0xff]  }
0x101e   : > { %3961 = vmatpush1.bf16.msra.mxu1 %v5962_v56  ;;  %4004 = vmatpush1.bf16.msra.mxu0 %v5964_v58  ;;  %v6752_v56 = vld [vmem:[%s8088_s27 + $0x68] sm:$0xff]  }
0x101f   : > { %3962 = vmatprep.subr.bf16.mxu1 %v5979_v59  ;;  %4005 = vmatprep.subr.bf16.mxu0 %v5981_v61  ;;  %v6753_v58 = vld [vmem:[%s8088_s27 + $0xe8] sm:$0xff]  }
0x1020   : > { %v6754_v59 = vld [vmem:[%s8088_s27 + $0x28] sm:$0xff]  }
0x1021   : > { %v6755_v61 = vld [vmem:[%s8088_s27 + $0xa8] sm:$0xff]  }
0x1022   : > { %3963 = vmatpush1.bf16.msra.mxu1 %v5978_v3  ;;  %4006 = vmatpush1.bf16.msra.mxu0 %v5980_v10  ;;  %v6760_v3 = vld [vmem:[%s8088_s27 + $0x78] sm:$0xff]  }
0x1023   : > { %3964 = vmatprep.subr.bf16.mxu1 %v5995_v4  ;;  %4007 = vmatprep.subr.bf16.mxu0 %v5997_v5  ;;  %v6761_v10 = vld [vmem:[%s8088_s27 + $0xf8] sm:$0xff]  }
0x1024   : > { %v6762_v4 = vld [vmem:[%s8088_s27 + $0x38] sm:$0xff]  }
0x1025   : > { %v6763_v5 = vld [vmem:[%s8088_s27 + $0xb8] sm:$0xff]  }
0x1026   : > { %3965 = vmatpush1.bf16.msra.mxu1 %v5994_v9  ;;  %4008 = vmatpush1.bf16.msra.mxu0 %v5996_v12  ;;  %v2981_v9 = vrot.slane %v8538_v57, %v8153_v39  ;;  %v2989_v12 = vrot.slane %v8538_v57, %v8168_v51 }
0x1027   : > { %3966 = vmatprep.subr.bf16.mxu1 %v6011_v13  ;;  %4009 = vmatprep.subr.bf16.mxu0 %v6013_v14  ;;  %v2985_v13 = vrot.slane %v8538_v57, %v8157_v41  ;;  %v2993_v14 = vrot.slane %v8538_v57, %v2992_v8 }
0x102a   : > { %3967 = vmatpush1.bf16.msra.mxu1 %v6010_v19  ;;  %4010 = vmatpush1.bf16.msra.mxu0 %v6012_v20 }
0x102b   : > { %3968 = vmatprep.subr.bf16.mxu1 %v6027_v21  ;;  %4011 = vmatprep.subr.bf16.mxu0 %v6029_v53 }
0x102e   : > { %3969 = vmatpush1.bf16.msra.mxu1 %v6026_v25  ;;  %4012 = vmatpush1.bf16.msra.mxu0 %v6028_v11 }
0x102f   : > { %3970 = vmatprep.subr.bf16.mxu1 %v6043_v26  ;;  %4013 = vmatprep.subr.bf16.mxu0 %v6045_v27 }
0x1032   : > { %3971 = vmatpush1.bf16.msra.mxu1 %v6042_v28  ;;  %4014 = vmatpush1.bf16.msra.mxu0 %v6044_v29 }
0x1033   : > { %6239 = vmatprep.subr.bf16.mxu1 %v6732_v49  ;;  %6261 = vmatprep.subr.bf16.mxu0 %v6733_v30 }
0x1035   : > { %3989 = vmatmul.mubr.bf16.vlgmr.msra.gmra.mrb[40].mxu1 %v8399_v47  ;;  %4032 = vmatmul.mubr.bf16.vlgmr.msra.gmra.mrb[28].mxu0 %v8399_v47  ;;  %v6744_v47 = vld [vmem:[%s8088_s27 + $0x58] sm:$0xff]  }
0x1036   : > { %6240 = vmatpush3.bf16.msra.mxu1 %v6734_v31  ;;  %6262 = vmatpush3.bf16.msra.mxu0 %v6735_v32 }
0x1037   : > { %6241 = vmatprep.subr.bf16.mxu1 %v6736_v33  ;;  %6263 = vmatprep.subr.bf16.mxu0 %v6737_v34 }
0x103a   : > { %6242 = vmatpush3.bf16.msra.mxu1 %v6738_v35  ;;  %6264 = vmatpush3.bf16.msra.mxu0 %v6739_v36 }
0x103b   : > { %6243 = vmatprep.subr.bf16.mxu1 %v6740_v37  ;;  %6265 = vmatprep.subr.bf16.mxu0 %v6741_v40 }
0x103e   : > { %6244 = vmatpush3.bf16.msra.mxu1 %v6742_v42  ;;  %6266 = vmatpush3.bf16.msra.mxu0 %v6743_v43  ;;  %v6766_v42 = vld [vmem:[%s8088_s27 + $0x100] sm:$0xff]  }
0x103f   : > { %6245 = vmatprep.subr.bf16.mxu1 %v6744_v47  ;;  %6267 = vmatprep.subr.bf16.mxu0 %v6745_v44  ;;  %v6767_v43 = vld [vmem:[%s8088_s27 + $0x180] sm:$0xff]   ;;  %v6768_v47 = vld [vmem:[%s8088_s27 + $0x148] sm:$0xff]  }
0x1040   : > { %v6769_v44 = vld [vmem:[%s8088_s27 + $0x1c8] sm:$0xff]  }
0x1042   : > { %6246 = vmatpush3.bf16.msra.mxu1 %v6746_v45  ;;  %6268 = vmatpush3.bf16.msra.mxu0 %v6747_v46  ;;  %v6770_v45 = vld [vmem:[%s8088_s27 + $0x108] sm:$0xff]  }
0x1043   : > { %6247 = vmatprep.subr.bf16.mxu1 %v6748_v48  ;;  %6269 = vmatprep.subr.bf16.mxu0 %v6749_v50  ;;  %v6771_v46 = vld [vmem:[%s8088_s27 + $0x188] sm:$0xff]   ;;  %v6772_v48 = vld [vmem:[%s8088_s27 + $0x150] sm:$0xff]  }
0x1044   : > { %v6773_v50 = vld [vmem:[%s8088_s27 + $0x1d0] sm:$0xff]  }
0x1046   : > { %6248 = vmatpush3.bf16.msra.mxu1 %v6750_v52  ;;  %6270 = vmatpush3.bf16.msra.mxu0 %v6751_v54  ;;  %v6774_v52 = vld [vmem:[%s8088_s27 + $0x110] sm:$0xff]  }
0x1047   : > { %6249 = vmatprep.subr.bf16.mxu1 %v6752_v56  ;;  %6271 = vmatprep.subr.bf16.mxu0 %v6753_v58  ;;  %v6775_v54 = vld [vmem:[%s8088_s27 + $0x190] sm:$0xff]   ;;  %v6776_v56 = vld [vmem:[%s8088_s27 + $0x158] sm:$0xff]  }
0x1048   : > { %v6777_v58 = vld [vmem:[%s8088_s27 + $0x1d8] sm:$0xff]  }
0x104a   : > { %6250 = vmatpush3.bf16.msra.mxu1 %v6754_v59  ;;  %6272 = vmatpush3.bf16.msra.mxu0 %v6755_v61  ;;  %v6778_v59 = vld [vmem:[%s8088_s27 + $0x118] sm:$0xff]  }
0x104b   : > { %6251 = vmatprep.subr.bf16.mxu1 %v6756_v60  ;;  %6273 = vmatprep.subr.bf16.mxu0 %v6757_v62  ;;  %v6779_v61 = vld [vmem:[%s8088_s27 + $0x198] sm:$0xff]   ;;  %v6780_v60 = vld [vmem:[%s8088_s27 + $0x160] sm:$0xff]  }
0x104c   : > { %v6781_v62 = vld [vmem:[%s8088_s27 + $0x1e0] sm:$0xff]  }
0x104e   : > { %6252 = vmatpush3.bf16.msra.mxu1 %v6758_v0  ;;  %6274 = vmatpush3.bf16.msra.mxu0 %v6759_v2  ;;  %v6782_v0 = vld [vmem:[%s8088_s27 + $0x120] sm:$0xff]  }
0x104f   : > { %6253 = vmatprep.subr.bf16.mxu1 %v6760_v3  ;;  %6275 = vmatprep.subr.bf16.mxu0 %v6761_v10  ;;  %v6783_v2 = vld [vmem:[%s8088_s27 + $0x1a0] sm:$0xff]   ;;  %v6784_v3 = vld [vmem:[%s8088_s27 + $0x168] sm:$0xff]  }
0x1050   : > { %v6785_v10 = vld [vmem:[%s8088_s27 + $0x1e8] sm:$0xff]  }
0x1052   : > { %6254 = vmatpush3.bf16.msra.mxu1 %v6762_v4  ;;  %6276 = vmatpush3.bf16.msra.mxu0 %v6763_v5  ;;  %v2996_v4 = vsub.s32 4, %v8150_v38  ;;  %v3004_v5 = vsub.s32 6, %v8150_v38 }
0x1053   : > { %6283 = vmatprep.subr.bf16.mxu1 %v6764_v6  ;;  %6305 = vmatprep.subr.bf16.mxu0 %v6765_v7  ;;  %v3000_v6 = vsub.s32 5, %v8150_v38  ;;  %v3008_v7 = vsub.s32 7, %v8150_v38 }
0x10a8   : > { %v3732_v15 = vpop.f32.mrb[28].mxu1  ;;  %v3775_v16 = vpop.f32.mrb[16].mxu0 }
0x10a9   : > { %v3733_v17 = vadd.f32 %v3732_v15, %v2981_v9  ;;  %v3776_v18 = vadd.f32 %v3775_v16, %v2989_v12  ;;  %v3734_v19 = vpop.f32.mrb[29].mxu1  ;;  %v3777_v20 = vpop.f32.mrb[17].mxu0  ;;  %v6788_v15 = vld [vmem:[%s8088_s27 + $0x170] sm:$0xff]  }
0x10aa   : > { %v3735_v21 = vadd.f32 %v3734_v19, %v2985_v13  ;;  %v3778_v53 = vadd.f32 %v3777_v20, %v2993_v14  ;;  %v3736_v55 = vpop.f32.mrb[30].mxu1  ;;  %v3779_v1 = vpop.f32.mrb[18].mxu0  ;;  %v6789_v16 = vld [vmem:[%s8088_s27 + $0x1f0] sm:$0xff]  }
0x10ab   : > { %v3737_v23 = vadd.f32 %v3736_v55, %v2981_v9  ;;  %v3780_v24 = vadd.f32 %v3779_v1, %v2989_v12  ;;  %v3738_v25 = vpop.f32.mrb[31].mxu1  ;;  %v3781_v11 = vpop.f32.mrb[19].mxu0  ;;  %v4042_v28 = vmax.f32 %v3733_v17, 0.0  ;;  %v4044_v29 = vmax.f32 %v3776_v18, 0.0  ;;  %v6786_v9 = vld [vmem:[%s8088_s27 + $0x128] sm:$0xff]  }
0x10ac   : > { %v3739_v26 = vadd.f32 %v3738_v25, %v2985_v13  ;;  %v3782_v27 = vadd.f32 %v3781_v11, %v2993_v14  ;;  %v4043_v31 = vmax.f32 %v3735_v21, 0.0  ;;  %v4045_v32 = vmax.f32 %v3778_v53, 0.0  ;;  %v6787_v12 = vld [vmem:[%s8088_s27 + $0x1a8] sm:$0xff]   ;;  %v6790_v21 = vld [vmem:[%s8088_s27 + $0x130] sm:$0xff]   ;;  %v6792_v25 = vld [vmem:[%s8088_s27 + $0x178] sm:$0xff]  }
0x10ad   : > { %v4058_v49 = vmax.f32 %v3737_v23, 0.0  ;;  %v4060_v30 = vmax.f32 %v3780_v24, 0.0  ;;  %v2997_v13 = vrot.slane %v8538_v57, %v2996_v4  ;;  %v3005_v14 = vrot.slane %v8538_v57, %v3004_v5  ;;  %v6791_v53 = vld [vmem:[%s8088_s27 + $0x1b0] sm:$0xff]   ;;  %v6793_v11 = vld [vmem:[%s8088_s27 + $0x1f8] sm:$0xff]  }
0x10ae   : > { %v4059_v33 = vmax.f32 %v3739_v26, 0.0  ;;  %v4061_v34 = vmax.f32 %v3782_v27, 0.0  ;;  %v3001_v17 = vrot.slane %v8538_v57, %v3000_v6  ;;  %v3009_v18 = vrot.slane %v8538_v57, %v3008_v7 }
0x10af   : > { %v4331_v35 = vpack.c.bf16 %v4058_v49, %v4042_v28  ;;  %v4333_v36 = vpack.c.bf16 %v4060_v30, %v4044_v29 }
0x10b0   : > { %v4332_v37 = vpack.c.bf16 %v4059_v33, %v4043_v31  ;;  %v4334_v40 = vpack.c.bf16 %v4061_v34, %v4045_v32  ;;  %v6794_v34 = vld [vmem:[%s8088_s27 + $0x138] sm:$0xff]  }
0x10b2   : > { %5153 = vmatprep.mubr.bf16.mxu1 %v4332_v37  ;;  %5194 = vmatprep.mubr.bf16.mxu0 %v4334_v40 }
0x10b3   : > { %5154 = vmatmul.mubr.bf16.vlgmr.msra.gmra.mrb[44].mxu1 %v4331_v35  ;;  %5195 = vmatmul.mubr.bf16.vlgmr.msra.gmra.mrb[32].mxu0 %v4333_v36  ;;  %v6795_v35 = vld [vmem:[%s8088_s27 + $0x1b8] sm:$0xff]  }
0x10b4   : > { %6284 = vmatpush3.bf16.msra.mxu1 %v6766_v42  ;;  %6306 = vmatpush3.bf16.msra.mxu0 %v6767_v43  ;;  %v6796_v43 = vld [vmem:[%s8088_s27 + $0x240] sm:$0xff]  }
0x10b5   : > { %6285 = vmatprep.subr.bf16.mxu1 %v6768_v47  ;;  %6307 = vmatprep.subr.bf16.mxu0 %v6769_v44  ;;  %v6797_v47 = vld [vmem:[%s8088_s27 + $0x2c0] sm:$0xff]  }
0x10b8   : > { %6286 = vmatpush3.bf16.msra.mxu1 %v6770_v45  ;;  %6308 = vmatpush3.bf16.msra.mxu0 %v6771_v46 }
0x10b9   : > { %6287 = vmatprep.subr.bf16.mxu1 %v6772_v48  ;;  %6309 = vmatprep.subr.bf16.mxu0 %v6773_v50 }
0x10bc   : > { %6288 = vmatpush3.bf16.msra.mxu1 %v6774_v52  ;;  %6310 = vmatpush3.bf16.msra.mxu0 %v6775_v54 }
0x10bd   : > { %6289 = vmatprep.subr.bf16.mxu1 %v6776_v56  ;;  %6311 = vmatprep.subr.bf16.mxu0 %v6777_v58  ;;  %v6798_v58 = vld [vmem:[%s8088_s27 + $0x200] sm:$0xff]  }
0x10c0   : > { %6290 = vmatpush3.bf16.msra.mxu1 %v6778_v59  ;;  %6312 = vmatpush3.bf16.msra.mxu0 %v6779_v61  ;;  %v6799_v59 = vld [vmem:[%s8088_s27 + $0x280] sm:$0xff]   ;;  %v6800_v61 = vld [vmem:[%s8088_s27 + $0x248] sm:$0xff]  }
0x10c1   : > { %6291 = vmatprep.subr.bf16.mxu1 %v6780_v60  ;;  %6313 = vmatprep.subr.bf16.mxu0 %v6781_v62  ;;  %v6801_v60 = vld [vmem:[%s8088_s27 + $0x2c8] sm:$0xff]  }
0x10c2   : > { %v6802_v62 = vld [vmem:[%s8088_s27 + $0x208] sm:$0xff]  }
0x10c4   : > { %6292 = vmatpush3.bf16.msra.mxu1 %v6782_v0  ;;  %6314 = vmatpush3.bf16.msra.mxu0 %v6783_v2  ;;  %v6803_v0 = vld [vmem:[%s8088_s27 + $0x288] sm:$0xff]   ;;  %v6804_v2 = vld [vmem:[%s8088_s27 + $0x250] sm:$0xff]  }
0x10c5   : > { %6293 = vmatprep.subr.bf16.mxu1 %v6784_v3  ;;  %6315 = vmatprep.subr.bf16.mxu0 %v6785_v10  ;;  %v6805_v3 = vld [vmem:[%s8088_s27 + $0x2d0] sm:$0xff]  }
0x10c6   : > { %v6806_v10 = vld [vmem:[%s8088_s27 + $0x210] sm:$0xff]  }
0x10c8   : > { %v3818_v19 = vpop.f32.mrb[32].mxu1  ;;  %v3861_v20 = vpop.f32.mrb[20].mxu0  ;;  %6294 = vmatpush3.bf16.msra.mxu1 %v6786_v9  ;;  %6316 = vmatpush3.bf16.msra.mxu0 %v6787_v12  ;;  %v6807_v9 = vld [vmem:[%s8088_s27 + $0x290] sm:$0xff]   ;;  %v6808_v12 = vld [vmem:[%s8088_s27 + $0x258] sm:$0xff]  }
0x10c9   : > { %v3819_v55 = vadd.f32 %v3818_v19, %v2997_v13  ;;  %v3862_v1 = vadd.f32 %v3861_v20, %v3005_v14  ;;  %v3820_v23 = vpop.f32.mrb[33].mxu1  ;;  %v3863_v24 = vpop.f32.mrb[21].mxu0  ;;  %6295 = vmatprep.subr.bf16.mxu1 %v6788_v15  ;;  %6317 = vmatprep.subr.bf16.mxu0 %v6789_v16  ;;  %v6811_v15 = vld [vmem:[%s8088_s27 + $0x298] sm:$0xff]   ;;  %v6812_v16 = vld [vmem:[%s8088_s27 + $0x260] sm:$0xff]   ;;  %v6816_v20 = vld [vmem:[%s8088_s27 + $0x268] sm:$0xff]  }
0x10ca   : > { %v3821_v26 = vadd.f32 %v3820_v23, %v3001_v17  ;;  %v3864_v27 = vadd.f32 %v3863_v24, %v3009_v18  ;;  %v3822_v28 = vpop.f32.mrb[34].mxu1  ;;  %v3865_v57 = vpop.f32.mrb[22].mxu0  ;;  %v6815_v19 = vld [vmem:[%s8088_s27 + $0x2a0] sm:$0xff]  }
0x10cb   : > { %v3823_v29 = vadd.f32 %v3822_v28, %v2997_v13  ;;  %v3866_v49 = vadd.f32 %v3865_v57, %v3005_v14  ;;  %v3824_v30 = vpop.f32.mrb[35].mxu1  ;;  %v3867_v31 = vpop.f32.mrb[23].mxu0  ;;  %v4046_v36 = vmax.f32 %v3819_v55, 0.0  ;;  %v4048_v37 = vmax.f32 %v3862_v1, 0.0  ;;  %v6809_v13 = vld [vmem:[%s8088_s27 + $0x2d8] sm:$0xff]   ;;  %v6818_v55 = vld [vmem:[%s8088_s27 + $0x228] sm:$0xff]  }
0x10cc   : > { %v3825_v32 = vadd.f32 %v3824_v30, %v3001_v17  ;;  %v3868_v33 = vadd.f32 %v3867_v31, %v3009_v18  ;;  %6296 = vmatpush3.bf16.msra.mxu1 %v6790_v21  ;;  %6318 = vmatpush3.bf16.msra.mxu0 %v6791_v53  ;;  %v4047_v44 = vmax.f32 %v3821_v26, 0.0  ;;  %v4049_v45 = vmax.f32 %v3864_v27, 0.0  ;;  %v6810_v14 = vld [vmem:[%s8088_s27 + $0x218] sm:$0xff]   ;;  %v6813_v17 = vld [vmem:[%s8088_s27 + $0x2e0] sm:$0xff]   ;;  %v6817_v21 = vld [vmem:[%s8088_s27 + $0x2e8] sm:$0xff]  }
0x10cd   : > { %v4062_v40 = vmax.f32 %v3823_v29, 0.0  ;;  %v4064_v42 = vmax.f32 %v3866_v49, 0.0  ;;  %6297 = vmatprep.subr.bf16.mxu1 %v6792_v25  ;;  %6319 = vmatprep.subr.bf16.mxu0 %v6793_v11  ;;  %v6814_v18 = vld [vmem:[%s8088_s27 + $0x220] sm:$0xff]   ;;  %v8619_v53 = vld [vmem:[%s8086_s30 + $0x8] sm:$0xff]  ;;  %v6820_v25 = vld [vmem:[%s8088_s27 + $0x270] sm:$0xff]  }
0x10ce   : > { %v4063_v46 = vmax.f32 %v3825_v32, 0.0  ;;  %v4065_v48 = vmax.f32 %v3868_v33, 0.0  ;;  %v6819_v1 = vld [vmem:[%s8088_s27 + $0x2a8] sm:$0xff]   ;;  %v3013_v23 = vrot.slane %v8619_v53, %v8153_v39  ;;  %v3021_v24 = vrot.slane %v8619_v53, %v8168_v51  ;;  %v6821_v11 = vld [vmem:[%s8088_s27 + $0x2f0] sm:$0xff]   ;;  %v6824_v32 = vld [vmem:[%s8088_s27 + $0x278] sm:$0xff]  }
0x10cf   : > { %v4335_v50 = vpack.c.bf16 %v4062_v40, %v4046_v36  ;;  %v4337_v52 = vpack.c.bf16 %v4064_v42, %v4048_v37  ;;  %v3017_v26 = vrot.slane %v8619_v53, %v8157_v41  ;;  %v3025_v27 = vrot.slane %v8619_v53, %v2992_v8  ;;  %v6822_v29 = vld [vmem:[%s8088_s27 + $0x230] sm:$0xff]   ;;  %v6825_v41 = vld [vmem:[%s8088_s27 + $0x2f8] sm:$0xff]  }
0x10d0   : > { %v4336_v54 = vpack.c.bf16 %v4063_v46, %v4047_v44  ;;  %v4338_v56 = vpack.c.bf16 %v4065_v48, %v4049_v45  ;;  %6298 = vmatpush3.bf16.msra.mxu1 %v6794_v34  ;;  %6320 = vmatpush3.bf16.msra.mxu0 %v6795_v35  ;;  %v6823_v39 = vld [vmem:[%s8088_s27 + $0x2b0] sm:$0xff]   ;;  %v6826_v44 = vld [vmem:[%s8088_s27 + $0x238] sm:$0xff]  }
0x10d1   : > { %6327 = vmatprep.subr.bf16.mxu1 %v6796_v43  ;;  %6349 = vmatprep.subr.bf16.mxu0 %v6797_v47  ;;  %v6827_v45 = vld [vmem:[%s8088_s27 + $0x2b8] sm:$0xff]  }
0x10d2   : > { %5235 = vmatprep.mubr.bf16.mxu1 %v4336_v54  ;;  %5276 = vmatprep.mubr.bf16.mxu0 %v4338_v56  ;;  %v6828_v54 = vld [vmem:[%s8088_s27 + $0x340] sm:$0xff]  }
0x10d3   : > { %5236 = vmatmul.mubr.bf16.vlgmr.msra.gmra.mrb[48].mxu1 %v4335_v50  ;;  %5277 = vmatmul.mubr.bf16.vlgmr.msra.gmra.mrb[36].mxu0 %v4337_v52  ;;  %v6829_v56 = vld [vmem:[%s8088_s27 + $0x3c0] sm:$0xff]  }
0x10d4   : > { %6328 = vmatpush3.bf16.msra.mxu1 %v6798_v58  ;;  %6350 = vmatpush3.bf16.msra.mxu0 %v6799_v59 }
0x10d5   : > { %6329 = vmatprep.subr.bf16.mxu1 %v6800_v61  ;;  %6351 = vmatprep.subr.bf16.mxu0 %v6801_v60 }
0x10d8   : > { %6330 = vmatpush3.bf16.msra.mxu1 %v6802_v62  ;;  %6352 = vmatpush3.bf16.msra.mxu0 %v6803_v0 }
0x10d9   : > { %6331 = vmatprep.subr.bf16.mxu1 %v6804_v2  ;;  %6353 = vmatprep.subr.bf16.mxu0 %v6805_v3 }
0x10dc   : > { %6332 = vmatpush3.bf16.msra.mxu1 %v6806_v10  ;;  %6354 = vmatpush3.bf16.msra.mxu0 %v6807_v9  ;;  %v6830_v10 = vld [vmem:[%s8088_s27 + $0x300] sm:$0xff]  }
0x10dd   : > { %6333 = vmatprep.subr.bf16.mxu1 %v6808_v12  ;;  %6355 = vmatprep.subr.bf16.mxu0 %v6809_v13  ;;  %v6831_v9 = vld [vmem:[%s8088_s27 + $0x380] sm:$0xff]   ;;  %v6832_v12 = vld [vmem:[%s8088_s27 + $0x348] sm:$0xff]  }
0x10de   : > { %v6833_v13 = vld [vmem:[%s8088_s27 + $0x3c8] sm:$0xff]  }
0x10e0   : > { %6334 = vmatpush3.bf16.msra.mxu1 %v6810_v14  ;;  %6356 = vmatpush3.bf16.msra.mxu0 %v6811_v15  ;;  %v6834_v14 = vld [vmem:[%s8088_s27 + $0x308] sm:$0xff]  }
0x10e1   : > { %6335 = vmatprep.subr.bf16.mxu1 %v6812_v16  ;;  %6357 = vmatprep.subr.bf16.mxu0 %v6813_v17  ;;  %v6835_v15 = vld [vmem:[%s8088_s27 + $0x388] sm:$0xff]   ;;  %v6836_v16 = vld [vmem:[%s8088_s27 + $0x350] sm:$0xff]  }
0x10e2   : > { %v6837_v17 = vld [vmem:[%s8088_s27 + $0x3d0] sm:$0xff]  }
0x10e4   : > { %6336 = vmatpush3.bf16.msra.mxu1 %v6814_v18  ;;  %6358 = vmatpush3.bf16.msra.mxu0 %v6815_v19  ;;  %v6838_v18 = vld [vmem:[%s8088_s27 + $0x310] sm:$0xff]  }
0x10e5   : > { %6337 = vmatprep.subr.bf16.mxu1 %v6816_v20  ;;  %6359 = vmatprep.subr.bf16.mxu0 %v6817_v21  ;;  %v6839_v19 = vld [vmem:[%s8088_s27 + $0x390] sm:$0xff]   ;;  %v6840_v20 = vld [vmem:[%s8088_s27 + $0x358] sm:$0xff]  }
0x10e6   : > { %v6841_v21 = vld [vmem:[%s8088_s27 + $0x3d8] sm:$0xff]  }
0x10e8   : > { %v3904_v28 = vpop.f32.mrb[36].mxu1  ;;  %v3947_v57 = vpop.f32.mrb[24].mxu0  ;;  %6338 = vmatpush3.bf16.msra.mxu1 %v6818_v55  ;;  %6360 = vmatpush3.bf16.msra.mxu0 %v6819_v1  ;;  %v6842_v55 = vld [vmem:[%s8088_s27 + $0x318] sm:$0xff]  }
0x10e9   : > { %v3905_v49 = vadd.f32 %v3904_v28, %v3013_v23  ;;  %v3948_v30 = vadd.f32 %v3947_v57, %v3021_v24  ;;  %v3906_v51 = vpop.f32.mrb[37].mxu1  ;;  %v3949_v31 = vpop.f32.mrb[25].mxu0  ;;  %6339 = vmatprep.subr.bf16.mxu1 %v6820_v25  ;;  %6361 = vmatprep.subr.bf16.mxu0 %v6821_v11  ;;  %v6843_v1 = vld [vmem:[%s8088_s27 + $0x398] sm:$0xff]   ;;  %v6846_v25 = vld [vmem:[%s8088_s27 + $0x320] sm:$0xff]   ;;  %v6850_v28 = vld [vmem:[%s8088_s27 + $0x328] sm:$0xff]  }
0x10ea   : > { %v3907_v33 = vadd.f32 %v3906_v51, %v3017_v26  ;;  %v3950_v34 = vadd.f32 %v3949_v31, %v3025_v27  ;;  %v3908_v35 = vpop.f32.mrb[38].mxu1  ;;  %v3951_v8 = vpop.f32.mrb[26].mxu0  ;;  %v6847_v11 = vld [vmem:[%s8088_s27 + $0x3a0] sm:$0xff]   ;;  %v6851_v57 = vld [vmem:[%s8088_s27 + $0x3a8] sm:$0xff]   ;;  %v3033_v51 = vrot.slane %v8619_v53, %v3000_v6  ;;  %v3041_v31 = vrot.slane %v8619_v53, %v3008_v7  ;;  %v6857_v6 = vld [vmem:[%s8088_s27 + $0x3f8] sm:$0xff]  }
0x10eb   : > { %v3909_v36 = vadd.f32 %v3908_v35, %v3013_v23  ;;  %v3952_v37 = vadd.f32 %v3951_v8, %v3021_v24  ;;  %v3910_v40 = vpop.f32.mrb[39].mxu1  ;;  %v3953_v42 = vpop.f32.mrb[27].mxu0  ;;  %v4050_v46 = vmax.f32 %v3905_v49, 0.0  ;;  %v4052_v48 = vmax.f32 %v3948_v30, 0.0  ;;  %v6844_v23 = vld [vmem:[%s8088_s27 + $0x360] sm:$0xff]   ;;  %v6852_v49 = vld [vmem:[%s8088_s27 + $0x370] sm:$0xff]  }
0x10ec   : > { %v3911_v43 = vadd.f32 %v3910_v40, %v3017_v26  ;;  %v3954_v47 = vadd.f32 %v3953_v42, %v3025_v27  ;;  %6340 = vmatpush3.bf16.msra.mxu1 %v6822_v29  ;;  %6362 = vmatpush3.bf16.msra.mxu0 %v6823_v39  ;;  %v4051_v58 = vmax.f32 %v3907_v33, 0.0  ;;  %v4053_v59 = vmax.f32 %v3950_v34, 0.0  ;;  %v6845_v24 = vld [vmem:[%s8088_s27 + $0x3e0] sm:$0xff]   ;;  %v6848_v26 = vld [vmem:[%s8088_s27 + $0x368] sm:$0xff]   ;;  %v6853_v30 = vld [vmem:[%s8088_s27 + $0x3f0] sm:$0xff]  }
0x10ed   : > { %v4066_v50 = vmax.f32 %v3909_v36, 0.0  ;;  %v4068_v52 = vmax.f32 %v3952_v37, 0.0  ;;  %6341 = vmatprep.subr.bf16.mxu1 %v6824_v32  ;;  %6363 = vmatprep.subr.bf16.mxu0 %v6825_v41  ;;  %v6849_v27 = vld [vmem:[%s8088_s27 + $0x3e8] sm:$0xff]   ;;  %v3029_v29 = vrot.slane %v8619_v53, %v2996_v4  ;;  %v3037_v39 = vrot.slane %v8619_v53, %v3004_v5  ;;  %v6854_v4 = vld [vmem:[%s8088_s27 + $0x330] sm:$0xff]   ;;  %v6856_v36 = vld [vmem:[%s8088_s27 + $0x378] sm:$0xff]  }
0x10ee   : > { %v4067_v61 = vmax.f32 %v3911_v43, 0.0  ;;  %v4069_v60 = vmax.f32 %v3954_v47, 0.0  ;;  %v6855_v33 = vld [vmem:[%s8088_s27 + $0x3b0] sm:$0xff]  }
0x10ef   : > { %v4339_v62 = vpack.c.bf16 %v4066_v50, %v4050_v46  ;;  %v4341_v0 = vpack.c.bf16 %v4068_v52, %v4052_v48  ;;  %v6858_v46 = vld [vmem:[%s8088_s27 + $0x338] sm:$0xff]  }
0x10f0   : > { %v4340_v2 = vpack.c.bf16 %v4067_v61, %v4051_v58  ;;  %v4342_v3 = vpack.c.bf16 %v4069_v60, %v4053_v59  ;;  %6342 = vmatpush3.bf16.msra.mxu1 %v6826_v44  ;;  %6364 = vmatpush3.bf16.msra.mxu0 %v6827_v45  ;;  %v6859_v48 = vld [vmem:[%s8088_s27 + $0x3b8] sm:$0xff]  }
0x10f1   : > { %6371 = vmatprep.subr.bf16.mxu1 %v6828_v54  ;;  %6393 = vmatprep.subr.bf16.mxu0 %v6829_v56 }
0x10f2   : > { %5317 = vmatprep.mubr.bf16.mxu1 %v4340_v2  ;;  %5358 = vmatprep.mubr.bf16.mxu0 %v4342_v3 }
0x10f3   : > { %5318 = vmatmul.mubr.bf16.vlgmr.msra.gmra.mrb[52].mxu1 %v4339_v62  ;;  %5359 = vmatmul.mubr.bf16.vlgmr.msra.gmra.mrb[40].mxu0 %v4341_v0 }
0x10f4   : > { %6372 = vmatpush3.bf16.msra.mxu1 %v6830_v10  ;;  %6394 = vmatpush3.bf16.msra.mxu0 %v6831_v9 }
0x10f5   : > { %6373 = vmatprep.subr.bf16.mxu1 %v6832_v12  ;;  %6395 = vmatprep.subr.bf16.mxu0 %v6833_v13  ;;  %v6046_v12 = vld [vmem:[%s850_s19] ss:$0 sm:$0xff] }
0x10f8   : > { %6374 = vmatpush3.bf16.msra.mxu1 %v6834_v14  ;;  %6396 = vmatpush3.bf16.msra.mxu0 %v6835_v15 }
0x10f9   : > { %6375 = vmatprep.subr.bf16.mxu1 %v6836_v16  ;;  %6397 = vmatprep.subr.bf16.mxu0 %v6837_v17 }
0x10fc   : > { %6376 = vmatpush3.bf16.msra.mxu1 %v6838_v18  ;;  %6398 = vmatpush3.bf16.msra.mxu0 %v6839_v19 }
0x10fd   : > { %6377 = vmatprep.subr.bf16.mxu1 %v6840_v20  ;;  %6399 = vmatprep.subr.bf16.mxu0 %v6841_v21 }
0x1100   : > { %6378 = vmatpush3.bf16.msra.mxu1 %v6842_v55  ;;  %6400 = vmatpush3.bf16.msra.mxu0 %v6843_v1 }
0x1101   : > { %6379 = vmatprep.subr.bf16.mxu1 %v6844_v23  ;;  %6401 = vmatprep.subr.bf16.mxu0 %v6845_v24 }
0x1104   : > { %6380 = vmatpush3.bf16.msra.mxu1 %v6846_v25  ;;  %6402 = vmatpush3.bf16.msra.mxu0 %v6847_v11 }
0x1105   : > { %6381 = vmatprep.subr.bf16.mxu1 %v6848_v26  ;;  %6403 = vmatprep.subr.bf16.mxu0 %v6849_v27 }
0x1108   : > { %v3990_v32 = vpop.f32.mrb[40].mxu1  ;;  %v4033_v41 = vpop.f32.mrb[28].mxu0  ;;  %6382 = vmatpush3.bf16.msra.mxu1 %v6850_v28  ;;  %6404 = vmatpush3.bf16.msra.mxu0 %v6851_v57 }
0x1109   : > { %v3991_v34 = vadd.f32 %v3990_v32, %v3029_v29  ;;  %v4034_v5 = vadd.f32 %v4033_v41, %v3037_v39  ;;  %v3992_v35 = vpop.f32.mrb[41].mxu1  ;;  %v4035_v8 = vpop.f32.mrb[29].mxu0  ;;  %6383 = vmatprep.subr.bf16.mxu1 %v6852_v49  ;;  %6405 = vmatprep.subr.bf16.mxu0 %v6853_v30 }
0x110a   : > { %v3993_v37 = vadd.f32 %v3992_v35, %v3033_v51  ;;  %v4036_v38 = vadd.f32 %v4035_v8, %v3041_v31  ;;  %v3994_v40 = vpop.f32.mrb[42].mxu1  ;;  %v4037_v7 = vpop.f32.mrb[30].mxu0 }
0x110b   : > { %v3995_v53 = vadd.f32 %v3994_v40, %v3029_v29  ;;  %v4038_v42 = vadd.f32 %v4037_v7, %v3037_v39  ;;  %v3996_v43 = vpop.f32.mrb[43].mxu1  ;;  %v4039_v47 = vpop.f32.mrb[31].mxu0  ;;  %v4054_v50 = vmax.f32 %v3991_v34, 0.0  ;;  %v4056_v52 = vmax.f32 %v4034_v5, 0.0 }
0x110c   : > { %v3997_v44 = vadd.f32 %v3996_v43, %v3033_v51  ;;  %v4040_v45 = vadd.f32 %v4039_v47, %v3041_v31  ;;  %6384 = vmatpush3.bf16.msra.mxu1 %v6854_v4  ;;  %6406 = vmatpush3.bf16.msra.mxu0 %v6855_v33  ;;  %v4055_v58 = vmax.f32 %v3993_v37, 0.0  ;;  %v4057_v59 = vmax.f32 %v4036_v38, 0.0 }
0x110d   : > { %v4070_v54 = vmax.f32 %v3995_v53, 0.0  ;;  %v4072_v56 = vmax.f32 %v4038_v42, 0.0  ;;  %6385 = vmatprep.subr.bf16.mxu1 %v6856_v36  ;;  %6407 = vmatprep.subr.bf16.mxu0 %v6857_v6 }
0x110e   : > { %v4071_v61 = vmax.f32 %v3997_v44, 0.0  ;;  %v4073_v60 = vmax.f32 %v4040_v45, 0.0 }
0x110f   : > { %v4343_v62 = vpack.c.bf16 %v4070_v54, %v4054_v50  ;;  %v4345_v0 = vpack.c.bf16 %v4072_v56, %v4056_v52 }
0x1110   : > { %v4344_v2 = vpack.c.bf16 %v4071_v61, %v4055_v58  ;;  %v4346_v3 = vpack.c.bf16 %v4073_v60, %v4057_v59  ;;  %6386 = vmatpush3.bf16.msra.mxu1 %v6858_v46  ;;  %6408 = vmatpush3.bf16.msra.mxu0 %v6859_v48 }
0x1112   : > { %5399 = vmatprep.mubr.bf16.mxu1 %v4344_v2  ;;  %5440 = vmatprep.mubr.bf16.mxu0 %v4346_v3 }
0x1113   : > { %5400 = vmatmul.mubr.bf16.vlgmr.msra.gmra.mrb[56].mxu1 %v4343_v62  ;;  %5441 = vmatmul.mubr.bf16.vlgmr.msra.gmra.mrb[44].mxu0 %v4345_v0 }
0x1186   : > { %v6255_v10 = vpop.f32.mrb[44].mxu1  ;;  %v6277_v9 = vpop.f32.mrb[32].mxu0 }
0x1187   : > { %v6256_v13 = vpop.f32.mrb[45].mxu1  ;;  %v6278_v14 = vpop.f32.mrb[33].mxu0 }
0x1188   : > { %v6257_v15 = vadd.f32 %v6256_v13, %v6255_v10  ;;  %v6279_v16 = vadd.f32 %v6278_v14, %v6277_v9  ;;  %v6258_v17 = vpop.f32.mrb[46].mxu1  ;;  %v6280_v18 = vpop.f32.mrb[34].mxu0 }
0x1189   : > { %v6259_v19 = vpop.f32.mrb[47].mxu1  ;;  %v6281_v20 = vpop.f32.mrb[35].mxu0 }
0x118a   : > { %v5156_v21 = vadd.f32 %v6257_v15, %v6046_v12  ;;  %v6260_v55 = vadd.f32 %v6259_v19, %v6258_v17  ;;  %v6282_v1 = vadd.f32 %v6281_v20, %v6280_v18 }
0x118c   : > { %v5197_v23 = vadd.f32 %v6279_v16, %v5156_v21  ;;  %v5159_v24 = vadd.f32 %v6260_v55, %v6046_v12 }
0x118e   : > { %v5200_v25 = vadd.f32 %v6282_v1, %v5159_v24 }
0x11a6   : > { %v6299_v11 = vpop.f32.mrb[48].mxu1  ;;  %v6321_v26 = vpop.f32.mrb[36].mxu0 }
0x11a7   : > { %v6300_v27 = vpop.f32.mrb[49].mxu1  ;;  %v6322_v28 = vpop.f32.mrb[37].mxu0 }
0x11a8   : > { %v6301_v57 = vadd.f32 %v6300_v27, %v6299_v11  ;;  %v6323_v29 = vadd.f32 %v6322_v28, %v6321_v26  ;;  %v6302_v39 = vpop.f32.mrb[50].mxu1  ;;  %v6324_v49 = vpop.f32.mrb[38].mxu0  ;;  %v6175_v26 = vld [vmem:[%s858_s4] ss:$0 sm:$0xff] }
0x11a9   : > { %v6303_v30 = vpop.f32.mrb[51].mxu1  ;;  %v6325_v51 = vpop.f32.mrb[39].mxu0 }
0x11aa   : > { %v5238_v31 = vadd.f32 %v6301_v57, %v5197_v23  ;;  %v6304_v32 = vadd.f32 %v6303_v30, %v6302_v39  ;;  %v6326_v41 = vadd.f32 %v6325_v51, %v6324_v49  ;;  %v6176_v57 = vld [vmem:[%s8830_s23] ss:$0 sm:$0xff] }
0x11ac   : > { %v5279_v4 = vadd.f32 %v6323_v29, %v5238_v31  ;;  %v5241_v33 = vadd.f32 %v6304_v32, %v5200_v25 }
0x11ae   : > { %v5282_v34 = vadd.f32 %v6326_v41, %v5241_v33 }
0x11c6   : > { %v6343_v5 = vpop.f32.mrb[52].mxu1  ;;  %v6365_v35 = vpop.f32.mrb[40].mxu0 }
0x11c7   : > { %v6344_v8 = vpop.f32.mrb[53].mxu1  ;;  %v6366_v36 = vpop.f32.mrb[41].mxu0 }
0x11c8   : > { %v6345_v6 = vadd.f32 %v6344_v8, %v6343_v5  ;;  %v6367_v37 = vadd.f32 %v6366_v36, %v6365_v35  ;;  %v6346_v38 = vpop.f32.mrb[54].mxu1  ;;  %v6368_v40 = vpop.f32.mrb[42].mxu0 }
0x11c9   : > { %v6347_v7 = vpop.f32.mrb[55].mxu1  ;;  %v6369_v53 = vpop.f32.mrb[43].mxu0 }
0x11ca   : > { %v5320_v42 = vadd.f32 %v6345_v6, %v5279_v4  ;;  %v6348_v43 = vadd.f32 %v6347_v7, %v6346_v38  ;;  %v6370_v47 = vadd.f32 %v6369_v53, %v6368_v40  ;;  %v6178_v53 = vld [vmem:[#allocation20] ss:$0 sm:$0xff] (!%p6177_p2) }
0x11cc   : > { %v5361_v44 = vadd.f32 %v6367_v37, %v5320_v42  ;;  %v5323_v45 = vadd.f32 %v6348_v43, %v5282_v34  ;;  %v6179_v43 = vld [vmem:[#allocation21] ss:$0 sm:$0xff] (!%p6177_p2) }
0x11ce   : > { %v5364_v46 = vadd.f32 %v6370_v47, %v5323_v45 }
0x11e6   : > { %v6387_v48 = vpop.f32.mrb[56].mxu1  ;;  %v6409_v50 = vpop.f32.mrb[44].mxu0 }
0x11e7   : > { %v6388_v52 = vpop.f32.mrb[57].mxu1  ;;  %v6410_v54 = vpop.f32.mrb[45].mxu0 }
0x11e8   : > { %v6389_v56 = vadd.f32 %v6388_v52, %v6387_v48  ;;  %v6411_v58 = vadd.f32 %v6410_v54, %v6409_v50  ;;  %v6390_v59 = vpop.f32.mrb[58].mxu1  ;;  %v6412_v61 = vpop.f32.mrb[46].mxu0 }
0x11e9   : > { %v6391_v60 = vpop.f32.mrb[59].mxu1  ;;  %v6413_v62 = vpop.f32.mrb[47].mxu0 }
0x11ea   : > { %v5402_v0 = vadd.f32 %v6389_v56, %v5361_v44  ;;  %v6392_v2 = vadd.f32 %v6391_v60, %v6390_v59  ;;  %v6414_v3 = vadd.f32 %v6413_v62, %v6412_v61 }
0x11ec   : > { %v5443_v10 = vadd.f32 %v6411_v58, %v5402_v0  ;;  %v5405_v9 = vadd.f32 %v6392_v2, %v5364_v46 }
0x11ee   : > { %v5446_v12 = vadd.f32 %v6414_v3, %v5405_v9  ;;  %v5449_v13 = vadd.f32 %v5443_v10, %v8393_v22 }
0x11f0   : > { %5453 = vadd.xlane.f32.xlu0 %v5449_v13  ;;  %v5450_v14 = vadd.f32 %v5446_v12, %v8395_v63 }
0x11f2   : > { %5455 = vadd.xlane.f32.xlu1 %v5450_v14 }
0x127d   : > { %v5454_v15 = vpop.xlane.xlu0 %5453 }
0x127e   : > { %v5457_v16 = vmul.f32 0.0078125, %v5454_v15 }
0x127f   : > { %v5456_v17 = vpop.xlane.xlu1 %5455 }
0x1280   : > { %v5459_v18 = vsub.f32 %v5449_v13, %v5457_v16  ;;  %v5458_v19 = vmul.f32 0.0078125, %v5456_v17 }
0x1282   : > { %v5460_v20 = vsub.f32 %v5450_v14, %v5458_v19  ;;  %v5461_v21 = vmul.f32 %v5459_v18, %v5459_v18 }
0x1284   : > { %5463 = vadd.xlane.f32.xlu0 %v5461_v21  ;;  %v5462_v55 = vmul.f32 %v5460_v20, %v5460_v20 }
0x1286   : > { %5465 = vadd.xlane.f32.xlu1 %v5462_v55 }
0x1311   : > { %v5464_v1 = vpop.xlane.xlu0 %5463 }
0x1312   : > { %v5467_v23 = vmul.f32 0.0078125, %v5464_v1 }
0x1313   : > { %v5466_v24 = vpop.xlane.xlu1 %5465 }
0x1314   : > { %v5469_v22 = vadd.f32 1e-05, %v5467_v23  ;;  %v5468_v25 = vmul.f32 0.0078125, %v5466_v24 }
0x1316   : > { %6896 = vrsqrt.f32 %v5469_v22  ;;  %v5470_v63 = vadd.f32 1e-05, %v5468_v25 }
0x1318   : > { %6898 = vrsqrt.f32 %v5470_v63 }
0x1320   : > { %v6897_v11 = vpop.eup %6896 }
0x1321   : > { %v5473_v27 = vmul.f32 %v6897_v11, %v5459_v18 }
0x1322   : > { %v6899_v28 = vpop.eup %6898 }
0x1323   : > { %v5481_v29 = vmul.f32 %v6175_v26, %v5473_v27  ;;  %v5474_v39 = vmul.f32 %v6899_v28, %v5460_v20  ;;  %5496 = sbr.rel (%p6177_p2) target bundleno = 5219 (0x1463), region = 160 }
0x1325   : > { %v5489_v49 = vadd.f32 %v6176_v57, %v5481_v29  ;;  %v5482_v30 = vmul.f32 %v6175_v26, %v5474_v39 }
0x1327   : > { %5491 = vst [vmem:[#allocation2] sm:$0xff] %v5489_v49  ;;  %v5490_v51 = vadd.f32 %v6176_v57, %v5482_v30  ;;  %5499 = vadd.xlane.f32.xlu0 (!%p6177_p2), %v5489_v49 }
0x1329   : > { %5492 = vst [vmem:[#allocation2 + $0x8] sm:$0xff] %v5490_v51 }
0x132b   : > { %5501 = vadd.xlane.f32.xlu0 %v5490_v51 }
0x13b4   : > { %v5500_v31 = vpop.xlane.xlu0 %5499 }
0x13b5   : > { %v5503_v32 = vmul.f32 0.0078125, %v5500_v31 }
0x13b7   : > { %v5505_v41 = vsub.f32 %v5489_v49, %v5503_v32 }
0x13b8   : > { %v5502_v4 = vpop.xlane.xlu0 %5501 }
0x13b9   : > { %v5504_v33 = vmul.f32 0.0078125, %v5502_v4  ;;  %v5507_v34 = vmul.f32 %v5505_v41, %v5505_v41 }
0x13bb   : > { %v5506_v5 = vsub.f32 %v5490_v51, %v5504_v33  ;;  %5509 = vadd.xlane.f32.xlu1 %v5507_v34 }
0x13bd   : > { %v5508_v35 = vmul.f32 %v5506_v5, %v5506_v5 }
0x13bf   : > { %5511 = vadd.xlane.f32.xlu1 %v5508_v35 }
0x1448   : > { %v5510_v8 = vpop.xlane.xlu1 %5509 }
0x1449   : > { %v5513_v36 = vmul.f32 0.0078125, %v5510_v8 }
0x144b   : > { %v5515_v6 = vadd.f32 1e-05, %v5513_v36 }
0x144c   : > { %v5512_v37 = vpop.xlane.xlu1 %5511 }
0x144d   : > { %6902 = vrsqrt.f32 %v5515_v6  ;;  %v5514_v38 = vmul.f32 0.0078125, %v5512_v37 }
0x144f   : > { %v5516_v40 = vadd.f32 1e-05, %v5514_v38 }
0x1451   : > { %6904 = vrsqrt.f32 %v5516_v40 }
0x1457   : > { %v6903_v7 = vpop.eup %6902 }
0x1458   : > { %v5519_v42 = vmul.f32 %v6903_v7, %v5505_v41 }
0x145a   : > { %v5527_v47 = vmul.f32 %v6178_v53, %v5519_v42 }
0x145b   : > { %v6905_v44 = vpop.eup %6904 }
0x145c   : > { %v5535_v45 = vadd.f32 %v6179_v43, %v5527_v47  ;;  %v5520_v46 = vmul.f32 %v6905_v44, %v5506_v5 }
0x145e   : > { %5537 = vst [vmem:[%s8832_s15] sm:$0xff] %v5535_v45  ;;  %v5528_v48 = vmul.f32 %v6178_v53, %v5520_v46 }
0x1460   : > { %v5536_v50 = vadd.f32 %v6179_v43, %v5528_v48 }
0x1462   : > { %5538 = vst [vmem:[%s8832_s15 + $0x8] sm:$0xff] %v5536_v50 }
0x1463 PF: > { %s8833_s27 = sld [smem:[#allocation31_spill]]  ;;  %s8834_s24 = sld [smem:[#allocation28_spill]] }
0x1464   : > { %s8835_s25 = sld [smem:[#allocation29_spill]]  ;;  %s8836_s26 = sld [smem:[#allocation32_spill]] }
0x1469   : > { %p27_p8 = scmp.ge.s32.totalorder %s8833_s27, 6  }
0x146b   :  { %29 = sbr.rel (!%p27_p8) target bundleno = 14 (0xe), region = 268 }
0x1472   :  { %5550 = vsyncpa [#allocation5], 1 }
0x1473   :  { %5552 = vsyncpa [#allocation5 + $0x1], 1 }
0x1474   :  { %5553 = vsyncpa [#allocation7], 1 }
0x1475   :  { %5554 = vsyncpa [#allocation22], 1 }

</bundles_post_ra>
